<compile_context>
chip_gen: v5e
topology: v5e:2x2
jax: 0.10.0
libtpu: 0.0.40
codegen_flags: <defaults>
</compile_context>

<pallas_src>
import math

import jax
import jax.numpy as jnp
import numpy as np
from jax.experimental import pallas as pl
from jax.experimental.pallas import tpu as pltpu

# Model dimensions (defaults of NerFACEModel)
D_XYZ = 3 + 2 * 3 * 6      # 39
D_DIR = 3 + 2 * 3 * 4      # 27
D_IN = D_XYZ + D_DIR       # 66  (xyz ++ dirs per row)
D_EXPR = 76
D_LAT = 32
D_C = D_EXPR + D_LAT       # 108 (expr/3 ++ latent, identical for every row)
PIN = 128                  # padded merged-input width (xyz lanes 0..38, dirs 39..65)
H = 256                    # xyz-branch hidden size
HD = 128                   # dir-branch hidden size
DOUT0 = HD + 4             # dir layer-0 output lanes: 0..127 dir branch, 131 alpha
TN_MAX = 2048              # max rows per grid step
MIN_BLOCKS = 4             # keep >= 4 grid blocks so the v7x megacore has work


def _nerface_kernel(in_ref,
                    w0, b0, w1, b1, w2, b2,
                    w3x, w3h, b3, w4, b4, w5, b5,
                    wf, bfeat,
                    wd0fa, wd0d, bd0, wd1, bd1, wd2, bd2,
                    wrgb, bout,
                    out_ref):
    f32 = jnp.float32
    bf16 = jnp.bfloat16
    xin = in_ref[...]                    # [TN, 128] bf16 (xyz ++ dirs, zero-padded)

    def mm(a, w):
        return jnp.dot(a, w[...], preferred_element_type=f32)

    def bias_relu(acc, b):
        # bf16 epilogue: cast the f32 MXU accumulator once, then bias + ReLU in bf16.
        return jnp.maximum(acc.astype(bf16) + b[...], 0)

    # layer 0: Linear(cat(xyz, expr/3, latent)) -> 256, relu  (c folded into b0)
    h = bias_relu(mm(xin, w0), b0)
    # layers 1, 2
    h = bias_relu(mm(h, w1), b1)
    h = bias_relu(mm(h, w2), b2)
    # layer 3: skip connection Linear(cat(initial, h)) -> 256 (c folded into b3)
    h = bias_relu(mm(xin, w3x) + mm(h, w3h), b3)
    # layers 4, 5
    h = bias_relu(mm(h, w4), b4)
    h = bias_relu(mm(h, w5), b5)
    # feature head (no relu in the reference)
    feat = mm(h, wf).astype(bf16) + bfeat[...]
    # dir layer 0 with fc_alpha folded into the same matmul (lane 131 of wd0fa)
    acc0 = mm(feat, wd0fa) + mm(xin, wd0d)            # [TN, 132] f32
    alpha = acc0[:, HD:DOUT0]                         # [TN, 4], no bias / no ReLU
    d = jnp.maximum(acc0[:, :HD].astype(bf16) + bd0[...], 0)
    # dir layers 1, 2
    d = bias_relu(mm(d, wd1), bd1)
    d = bias_relu(mm(d, wd2), bd2)
    # output = cat(rgb, alpha): wrgb col 3 is zero; alpha rides in lane 3 of `alpha`
    out_ref[...] = mm(d, wrgb) + alpha + bout[...]


def _pick_tn(n):
    """Rows per grid step: big enough to amortize per-step overhead, but keep
    >= MIN_BLOCKS grid blocks so the row axis can shard across TensorCores."""
    if n <= 256:
        return max(16, -(-n // 16) * 16)          # single block, 16-row aligned
    tn = -(-n // MIN_BLOCKS)                      # cdiv
    tn = -(-tn // 256) * 256                      # round up to a multiple of 256
    return min(TN_MAX, tn)


@jax.jit
def nerface_forward(x, expr, latent, params):
    """x: [N, 66] f32 (xyz ++ dirs), expr: [76] f32, latent: [32] f32 -> [N, 4] f32."""
    N = x.shape[0]
    stream, fold = params['stream'], params['fold']

    # Fold the constant conditioning vector into the layer-0 / layer-3 biases.
    c = jnp.concatenate([expr / 3.0, latent]).astype(jnp.float32)            # [108]
    b0p = (c @ fold['w0c'] + fold['b0']).reshape(1, H).astype(jnp.bfloat16)
    b3p = (c @ fold['w3c'] + fold['b3']).reshape(1, H).astype(jnp.bfloat16)

    # Single cheap bf16 cast+pad (fuses to one HBM pass); NO row padding — the
    # ragged last grid block is handled by Pallas and rows are independent.
    in_p = jnp.pad(x.astype(jnp.bfloat16), ((0, 0), (0, PIN - D_IN)))

    tn = _pick_tn(N)
    num_blocks = pl.cdiv(N, tn)

    ordered = [
        in_p,
        stream['w0'], b0p,
        stream['w1'], stream['b1'],
        stream['w2'], stream['b2'],
        stream['w3x'], stream['w3h'], b3p,
        stream['w4'], stream['b4'],
        stream['w5'], stream['b5'],
        stream['wf'], stream['bfeat'],
        stream['wd0fa'], stream['wd0d'], stream['bd0'],
        stream['wd1'], stream['bd1'],
        stream['wd2'], stream['bd2'],
        stream['wrgb'], stream['bout'],
    ]

    row_spec = pl.BlockSpec((tn, PIN), lambda i: (i, 0))

    def const2d(a):
        # NOTE: pipeline_mode=pl.Buffered(1) would single-buffer these constant
        # blocks (they always map to block (0,0)); left at the default for
        # maximally portable lowering.
        return pl.BlockSpec(a.shape, lambda i: (0, 0))

    in_specs = [row_spec] + [const2d(a) for a in ordered[1:]]
    out_spec = pl.BlockSpec((tn, 4), lambda i: (i, 0))

    return pl.pallas_call(
        _nerface_kernel,
        out_shape=jax.ShapeDtypeStruct((N, 4), jnp.float32),
        grid_spec=pltpu.PrefetchScalarGridSpec(
            num_scalar_prefetch=0,
            grid=(num_blocks,),
            in_specs=in_specs,
            out_specs=out_spec,
        ),
        compiler_params=pltpu.CompilerParams(
            dimension_semantics=("parallel",),
            vmem_limit_bytes=32 * 1024 * 1024),
    )(*ordered)


# ---------------- parameter init (deterministic, PyTorch-Linear-like) ----------------

def init_params(key):
    keys = iter(jax.random.split(key, 64))

    def linear(fan_in, fan_out):
        k_w, k_b = next(keys), next(keys)
        bound = 1.0 / math.sqrt(fan_in)
        W = jax.random.uniform(k_w, (fan_in, fan_out), jnp.float32, -bound, bound)
        b = jax.random.uniform(k_b, (fan_out,), jnp.float32, -bound, bound)
        return W, b

    raw = {}
    raw['l0'] = linear(D_XYZ + D_EXPR + D_LAT, H)          # 147 -> 256
    raw['l1'] = linear(H, H)
    raw['l2'] = linear(H, H)
    raw['l3'] = linear(D_XYZ + D_EXPR + D_LAT + H, H)      # 403 -> 256 (skip layer)
    raw['l4'] = linear(H, H)
    raw['l5'] = linear(H, H)
    raw['feat'] = linear(H, H)
    raw['alpha'] = linear(H, 1)
    raw['d0'] = linear(H + D_DIR, HD)                      # 283 -> 128
    raw['d1'] = linear(HD, HD)
    raw['d2'] = linear(HD, HD)
    raw['d3'] = linear(HD, HD)   # declared in torch __init__ but never used in forward
    raw['rgb'] = linear(HD, 3)
    return raw


def pack_kernel_params(raw):
    """Split / pad / cast weights for the kernel.

    Returns {'stream': bf16 weights + bf16 biases streamed into the kernel,
             'fold':   f32 pieces used to fold the conditioning vector into the
                       layer-0 / layer-3 biases at call time}.
    """
    f32, bf16 = jnp.float32, jnp.bfloat16
    rb = lambda b: b.reshape(1, -1).astype(bf16)    # per-layer biases stream as bf16

    W0, b0 = raw['l0']                              # [147,256], [256]
    w0m = jnp.zeros((PIN, H), f32).at[:D_XYZ].set(W0[:D_XYZ]).astype(bf16)
    w0c = W0[D_XYZ:].astype(f32)                    # [108,256], folded at call time

    W3, b3 = raw['l3']                              # [403,256]
    w3xm = jnp.zeros((PIN, H), f32).at[:D_XYZ].set(W3[:D_XYZ]).astype(bf16)
    w3c = W3[D_XYZ:D_XYZ + D_C].astype(f32)         # [108,256]
    w3h = W3[D_XYZ + D_C:].astype(bf16)             # [256,256]

    Wd0, bd0 = raw['d0']                            # [283,128]
    Wa, ba = raw['alpha']                           # [256,1]
    # dir-layer-0 weight with fc_alpha folded into output lane 131 (no ReLU there)
    wd0fa = (jnp.zeros((H, DOUT0), f32)
             .at[:, :HD].set(Wd0[:H])
             .at[:, DOUT0 - 1:].set(Wa)).astype(bf16)            # [256,132]
    # dir rows of Wd0 placed at lanes 39..65 of the merged input; alpha lanes zero
    wd0d = (jnp.zeros((PIN, DOUT0), f32)
            .at[D_XYZ:D_XYZ + D_DIR, :HD].set(Wd0[H:])).astype(bf16)   # [128,132]

    Wrgb, brgb = raw['rgb']
    wrgb = jnp.zeros((HD, 4), f32).at[:, :3].set(Wrgb).astype(bf16)
    bout = jnp.concatenate([brgb, ba]).reshape(1, 4).astype(f32)

    stream = dict(
        w0=w0m,
        w1=raw['l1'][0].astype(bf16), b1=rb(raw['l1'][1]),
        w2=raw['l2'][0].astype(bf16), b2=rb(raw['l2'][1]),
        w3x=w3xm, w3h=w3h,
        w4=raw['l4'][0].astype(bf16), b4=rb(raw['l4'][1]),
        w5=raw['l5'][0].astype(bf16), b5=rb(raw['l5'][1]),
        wf=raw['feat'][0].astype(bf16), bfeat=rb(raw['feat'][1]),
        wd0fa=wd0fa, wd0d=wd0d, bd0=rb(bd0),
        wd1=raw['d1'][0].astype(bf16), bd1=rb(raw['d1'][1]),
        wd2=raw['d2'][0].astype(bf16), bd2=rb(raw['d2'][1]),
        wrgb=wrgb, bout=bout,
    )
    fold = dict(w0c=w0c, b0=raw['l0'][1].astype(f32),
                w3c=w3c, b3=raw['l3'][1].astype(f32))
    # TODO(synk): layers_dir[3] (raw['d3']) is unused in the reference forward; not lowered.
    return dict(stream=stream, fold=fold)


# ---------------- pure-JAX f32 reference (mirrors the PyTorch forward) ----------------

def reference_forward(x, expr, latent, raw):
    N = x.shape[0]
    xyz = x[:, :D_XYZ]
    dirs = x[:, D_XYZ:D_XYZ + D_DIR]
    expr_enc = jnp.broadcast_to(expr / 3.0, (N, D_EXPR))
    lat = jnp.broadcast_to(latent, (N, D_LAT))
    initial = jnp.concatenate([xyz, expr_enc, lat], axis=1)

    def lin(name, v):
        W, b = raw[name]
        return v @ W + b

    h = initial
    for i in range(6):
        if i == 3:
            h = lin('l3', jnp.concatenate([initial, h], axis=-1))
        else:
            h = lin(f'l{i}', h)
        h = jax.nn.relu(h)
    feat = lin('feat', h)
    alpha = lin('alpha', feat)
    d = jax.nn.relu(lin('d0', jnp.concatenate([feat, dirs], axis=-1)))
    d = jax.nn.relu(lin('d1', d))
    d = jax.nn.relu(lin('d2', d))
    rgb = lin('rgb', d)
    return jnp.concatenate([rgb, alpha], axis=-1)


if __name__ == "__main__":
    key = jax.random.PRNGKey(0)
    kp, kx, ke, kl = jax.random.split(key, 4)

    raw = init_params(kp)
    params = pack_kernel_params(raw)

    expr = jax.random.normal(ke, (D_EXPR,), jnp.float32)         # [76]
    latent = jax.random.normal(kl, (D_LAT,), jnp.float32)        # [32]

    # Two sizes, both deliberately NOT multiples of the tile, to exercise the
    # ragged last grid block at two different TN choices (256 and 768).
    for n in (1000, 2500):
        x = jax.random.normal(jax.random.fold_in(kx, n), (n, D_IN), jnp.float32)
        out = jax.block_until_ready(nerface_forward(x, expr, latent, params))
        ref = reference_forward(x, expr, latent, raw)
        # Tolerance accounts for bf16 weights/biases/activations (f32 MXU accumulation)
        # versus the f32 reference.
        np.testing.assert_allclose(np.asarray(out), np.asarray(ref), rtol=5e-2, atol=5e-2)

    print("KERNEL_OK")
</pallas_src>

<mosaic_0001>
module attributes {stable_mosaic.version = 11 : i64} {
  func.func @_nerface_kernel(%arg0: i32, %arg1: memref<256x128xbf16, #tpu.memory_space<vmem>>, %arg2: memref<128x256xbf16, #tpu.memory_space<vmem>>, %arg3: memref<1x256xbf16, #tpu.memory_space<vmem>>, %arg4: memref<256x256xbf16, #tpu.memory_space<vmem>>, %arg5: memref<1x256xbf16, #tpu.memory_space<vmem>>, %arg6: memref<256x256xbf16, #tpu.memory_space<vmem>>, %arg7: memref<1x256xbf16, #tpu.memory_space<vmem>>, %arg8: memref<128x256xbf16, #tpu.memory_space<vmem>>, %arg9: memref<256x256xbf16, #tpu.memory_space<vmem>>, %arg10: memref<1x256xbf16, #tpu.memory_space<vmem>>, %arg11: memref<256x256xbf16, #tpu.memory_space<vmem>>, %arg12: memref<1x256xbf16, #tpu.memory_space<vmem>>, %arg13: memref<256x256xbf16, #tpu.memory_space<vmem>>, %arg14: memref<1x256xbf16, #tpu.memory_space<vmem>>, %arg15: memref<256x256xbf16, #tpu.memory_space<vmem>>, %arg16: memref<1x256xbf16, #tpu.memory_space<vmem>>, %arg17: memref<256x132xbf16, #tpu.memory_space<vmem>>, %arg18: memref<128x132xbf16, #tpu.memory_space<vmem>>, %arg19: memref<1x128xbf16, #tpu.memory_space<vmem>>, %arg20: memref<128x128xbf16, #tpu.memory_space<vmem>>, %arg21: memref<1x128xbf16, #tpu.memory_space<vmem>>, %arg22: memref<128x128xbf16, #tpu.memory_space<vmem>>, %arg23: memref<1x128xbf16, #tpu.memory_space<vmem>>, %arg24: memref<128x4xbf16, #tpu.memory_space<vmem>>, %arg25: memref<1x4xf32, #tpu.memory_space<vmem>>, %arg26: memref<256x4xf32, #tpu.memory_space<vmem>>) attributes {dimension_semantics = [#tpu.dimension_semantics<parallel>], iteration_bounds = array<i64: 4>, scalar_prefetch = 0 : i64, scratch_operands = 0 : i64, tpu.core_type = #tpu.core_type<tc>, window_params = [{transform_indices = @transform_0, window_bounds = array<i64: 256, 128>}, {pipeline_mode = #tpu.pipeline_mode<synchronous>, transform_indices = @transform_1, window_bounds = array<i64: 128, 256>}, {pipeline_mode = #tpu.pipeline_mode<synchronous>, transform_indices = @transform_2, window_bounds = array<i64: 1, 256>}, {pipeline_mode = #tpu.pipeline_mode<synchronous>, transform_indices = @transform_3, window_bounds = array<i64: 256, 256>}, {pipeline_mode = #tpu.pipeline_mode<synchronous>, transform_indices = @transform_4, window_bounds = array<i64: 1, 256>}, {pipeline_mode = #tpu.pipeline_mode<synchronous>, transform_indices = @transform_5, window_bounds = array<i64: 256, 256>}, {pipeline_mode = #tpu.pipeline_mode<synchronous>, transform_indices = @transform_6, window_bounds = array<i64: 1, 256>}, {pipeline_mode = #tpu.pipeline_mode<synchronous>, transform_indices = @transform_7, window_bounds = array<i64: 128, 256>}, {pipeline_mode = #tpu.pipeline_mode<synchronous>, transform_indices = @transform_8, window_bounds = array<i64: 256, 256>}, {pipeline_mode = #tpu.pipeline_mode<synchronous>, transform_indices = @transform_9, window_bounds = array<i64: 1, 256>}, {pipeline_mode = #tpu.pipeline_mode<synchronous>, transform_indices = @transform_10, window_bounds = array<i64: 256, 256>}, {pipeline_mode = #tpu.pipeline_mode<synchronous>, transform_indices = @transform_11, window_bounds = array<i64: 1, 256>}, {pipeline_mode = #tpu.pipeline_mode<synchronous>, transform_indices = @transform_12, window_bounds = array<i64: 256, 256>}, {pipeline_mode = #tpu.pipeline_mode<synchronous>, transform_indices = @transform_13, window_bounds = array<i64: 1, 256>}, {pipeline_mode = #tpu.pipeline_mode<synchronous>, transform_indices = @transform_14, window_bounds = array<i64: 256, 256>}, {pipeline_mode = #tpu.pipeline_mode<synchronous>, transform_indices = @transform_15, window_bounds = array<i64: 1, 256>}, {pipeline_mode = #tpu.pipeline_mode<synchronous>, transform_indices = @transform_16, window_bounds = array<i64: 256, 132>}, {pipeline_mode = #tpu.pipeline_mode<synchronous>, transform_indices = @transform_17, window_bounds = array<i64: 128, 132>}, {pipeline_mode = #tpu.pipeline_mode<synchronous>, transform_indices = @transform_18, window_bounds = array<i64: 1, 128>}, {pipeline_mode = #tpu.pipeline_mode<synchronous>, transform_indices = @transform_19, window_bounds = array<i64: 128, 128>}, {pipeline_mode = #tpu.pipeline_mode<synchronous>, transform_indices = @transform_20, window_bounds = array<i64: 1, 128>}, {pipeline_mode = #tpu.pipeline_mode<synchronous>, transform_indices = @transform_21, window_bounds = array<i64: 128, 128>}, {pipeline_mode = #tpu.pipeline_mode<synchronous>, transform_indices = @transform_22, window_bounds = array<i64: 1, 128>}, {pipeline_mode = #tpu.pipeline_mode<synchronous>, transform_indices = @transform_23, window_bounds = array<i64: 128, 4>}, {pipeline_mode = #tpu.pipeline_mode<synchronous>, transform_indices = @transform_24, window_bounds = array<i64: 1, 4>}, {transform_indices = @transform_25, window_bounds = array<i64: 256, 4>}]} {
    %c0 = arith.constant 0 : index
    %c0_0 = arith.constant 0 : index
    %0 = vector.load %arg1[%c0, %c0_0] : memref<256x128xbf16, #tpu.memory_space<vmem>>, vector<256x128xbf16>
    %c0_1 = arith.constant 0 : index
    %c0_2 = arith.constant 0 : index
    %1 = vector.load %arg2[%c0_1, %c0_2] : memref<128x256xbf16, #tpu.memory_space<vmem>>, vector<128x256xbf16>
    %cst = arith.constant dense<0.000000e+00> : vector<256x256xf32>
    %2 = tpu.matmul %0, %1, %cst {dimension_numbers = #tpu.dot_dimension_numbers<[1], [0], [0], [1], [0, 0, 1, 1], [], []>} : vector<256x128xbf16>, vector<128x256xbf16>, vector<256x256xf32> -> vector<256x256xf32>
    %3 = arith.truncf %2 : vector<256x256xf32> to vector<256x256xbf16>
    %c0_3 = arith.constant 0 : index
    %c0_4 = arith.constant 0 : index
    %4 = vector.load %arg3[%c0_3, %c0_4] : memref<1x256xbf16, #tpu.memory_space<vmem>>, vector<1x256xbf16>
    %5 = vector.broadcast %4 : vector<1x256xbf16> to vector<256x256xbf16>
    %6 = arith.addf %3, %5 : vector<256x256xbf16>
    %cst_5 = arith.constant 0.000000e+00 : bf16
    %7 = vector.broadcast %cst_5 : bf16 to vector<256x256xbf16>
    %8 = arith.maximumf %6, %7 : vector<256x256xbf16>
    %c0_6 = arith.constant 0 : index
    %c0_7 = arith.constant 0 : index
    %9 = vector.load %arg4[%c0_6, %c0_7] : memref<256x256xbf16, #tpu.memory_space<vmem>>, vector<256x256xbf16>
    %cst_8 = arith.constant dense<0.000000e+00> : vector<256x256xf32>
    %10 = tpu.matmul %8, %9, %cst_8 {dimension_numbers = #tpu.dot_dimension_numbers<[1], [0], [0], [1], [0, 0, 1, 1], [], []>} : vector<256x256xbf16>, vector<256x256xbf16>, vector<256x256xf32> -> vector<256x256xf32>
    %11 = arith.truncf %10 : vector<256x256xf32> to vector<256x256xbf16>
    %c0_9 = arith.constant 0 : index
    %c0_10 = arith.constant 0 : index
    %12 = vector.load %arg5[%c0_9, %c0_10] : memref<1x256xbf16, #tpu.memory_space<vmem>>, vector<1x256xbf16>
    %13 = vector.broadcast %12 : vector<1x256xbf16> to vector<256x256xbf16>
    %14 = arith.addf %11, %13 : vector<256x256xbf16>
    %cst_11 = arith.constant 0.000000e+00 : bf16
    %15 = vector.broadcast %cst_11 : bf16 to vector<256x256xbf16>
    %16 = arith.maximumf %14, %15 : vector<256x256xbf16>
    %c0_12 = arith.constant 0 : index
    %c0_13 = arith.constant 0 : index
    %17 = vector.load %arg6[%c0_12, %c0_13] : memref<256x256xbf16, #tpu.memory_space<vmem>>, vector<256x256xbf16>
    %cst_14 = arith.constant dense<0.000000e+00> : vector<256x256xf32>
    %18 = tpu.matmul %16, %17, %cst_14 {dimension_numbers = #tpu.dot_dimension_numbers<[1], [0], [0], [1], [0, 0, 1, 1], [], []>} : vector<256x256xbf16>, vector<256x256xbf16>, vector<256x256xf32> -> vector<256x256xf32>
    %19 = arith.truncf %18 : vector<256x256xf32> to vector<256x256xbf16>
    %c0_15 = arith.constant 0 : index
    %c0_16 = arith.constant 0 : index
    %20 = vector.load %arg7[%c0_15, %c0_16] : memref<1x256xbf16, #tpu.memory_space<vmem>>, vector<1x256xbf16>
    %21 = vector.broadcast %20 : vector<1x256xbf16> to vector<256x256xbf16>
    %22 = arith.addf %19, %21 : vector<256x256xbf16>
    %cst_17 = arith.constant 0.000000e+00 : bf16
    %23 = vector.broadcast %cst_17 : bf16 to vector<256x256xbf16>
    %24 = arith.maximumf %22, %23 : vector<256x256xbf16>
    %c0_18 = arith.constant 0 : index
    %c0_19 = arith.constant 0 : index
    %25 = vector.load %arg8[%c0_18, %c0_19] : memref<128x256xbf16, #tpu.memory_space<vmem>>, vector<128x256xbf16>
    %cst_20 = arith.constant dense<0.000000e+00> : vector<256x256xf32>
    %26 = tpu.matmul %0, %25, %cst_20 {dimension_numbers = #tpu.dot_dimension_numbers<[1], [0], [0], [1], [0, 0, 1, 1], [], []>} : vector<256x128xbf16>, vector<128x256xbf16>, vector<256x256xf32> -> vector<256x256xf32>
    %c0_21 = arith.constant 0 : index
    %c0_22 = arith.constant 0 : index
    %27 = vector.load %arg9[%c0_21, %c0_22] : memref<256x256xbf16, #tpu.memory_space<vmem>>, vector<256x256xbf16>
    %cst_23 = arith.constant dense<0.000000e+00> : vector<256x256xf32>
    %28 = tpu.matmul %24, %27, %cst_23 {dimension_numbers = #tpu.dot_dimension_numbers<[1], [0], [0], [1], [0, 0, 1, 1], [], []>} : vector<256x256xbf16>, vector<256x256xbf16>, vector<256x256xf32> -> vector<256x256xf32>
    %29 = arith.addf %26, %28 : vector<256x256xf32>
    %30 = arith.truncf %29 : vector<256x256xf32> to vector<256x256xbf16>
    %c0_24 = arith.constant 0 : index
    %c0_25 = arith.constant 0 : index
    %31 = vector.load %arg10[%c0_24, %c0_25] : memref<1x256xbf16, #tpu.memory_space<vmem>>, vector<1x256xbf16>
    %32 = vector.broadcast %31 : vector<1x256xbf16> to vector<256x256xbf16>
    %33 = arith.addf %30, %32 : vector<256x256xbf16>
    %cst_26 = arith.constant 0.000000e+00 : bf16
    %34 = vector.broadcast %cst_26 : bf16 to vector<256x256xbf16>
    %35 = arith.maximumf %33, %34 : vector<256x256xbf16>
    %c0_27 = arith.constant 0 : index
    %c0_28 = arith.constant 0 : index
    %36 = vector.load %arg11[%c0_27, %c0_28] : memref<256x256xbf16, #tpu.memory_space<vmem>>, vector<256x256xbf16>
    %cst_29 = arith.constant dense<0.000000e+00> : vector<256x256xf32>
    %37 = tpu.matmul %35, %36, %cst_29 {dimension_numbers = #tpu.dot_dimension_numbers<[1], [0], [0], [1], [0, 0, 1, 1], [], []>} : vector<256x256xbf16>, vector<256x256xbf16>, vector<256x256xf32> -> vector<256x256xf32>
    %38 = arith.truncf %37 : vector<256x256xf32> to vector<256x256xbf16>
    %c0_30 = arith.constant 0 : index
    %c0_31 = arith.constant 0 : index
    %39 = vector.load %arg12[%c0_30, %c0_31] : memref<1x256xbf16, #tpu.memory_space<vmem>>, vector<1x256xbf16>
    %40 = vector.broadcast %39 : vector<1x256xbf16> to vector<256x256xbf16>
    %41 = arith.addf %38, %40 : vector<256x256xbf16>
    %cst_32 = arith.constant 0.000000e+00 : bf16
    %42 = vector.broadcast %cst_32 : bf16 to vector<256x256xbf16>
    %43 = arith.maximumf %41, %42 : vector<256x256xbf16>
    %c0_33 = arith.constant 0 : index
    %c0_34 = arith.constant 0 : index
    %44 = vector.load %arg13[%c0_33, %c0_34] : memref<256x256xbf16, #tpu.memory_space<vmem>>, vector<256x256xbf16>
    %cst_35 = arith.constant dense<0.000000e+00> : vector<256x256xf32>
    %45 = tpu.matmul %43, %44, %cst_35 {dimension_numbers = #tpu.dot_dimension_numbers<[1], [0], [0], [1], [0, 0, 1, 1], [], []>} : vector<256x256xbf16>, vector<256x256xbf16>, vector<256x256xf32> -> vector<256x256xf32>
    %46 = arith.truncf %45 : vector<256x256xf32> to vector<256x256xbf16>
    %c0_36 = arith.constant 0 : index
    %c0_37 = arith.constant 0 : index
    %47 = vector.load %arg14[%c0_36, %c0_37] : memref<1x256xbf16, #tpu.memory_space<vmem>>, vector<1x256xbf16>
    %48 = vector.broadcast %47 : vector<1x256xbf16> to vector<256x256xbf16>
    %49 = arith.addf %46, %48 : vector<256x256xbf16>
    %cst_38 = arith.constant 0.000000e+00 : bf16
    %50 = vector.broadcast %cst_38 : bf16 to vector<256x256xbf16>
    %51 = arith.maximumf %49, %50 : vector<256x256xbf16>
    %c0_39 = arith.constant 0 : index
    %c0_40 = arith.constant 0 : index
    %52 = vector.load %arg15[%c0_39, %c0_40] : memref<256x256xbf16, #tpu.memory_space<vmem>>, vector<256x256xbf16>
    %cst_41 = arith.constant dense<0.000000e+00> : vector<256x256xf32>
    %53 = tpu.matmul %51, %52, %cst_41 {dimension_numbers = #tpu.dot_dimension_numbers<[1], [0], [0], [1], [0, 0, 1, 1], [], []>} : vector<256x256xbf16>, vector<256x256xbf16>, vector<256x256xf32> -> vector<256x256xf32>
    %54 = arith.truncf %53 : vector<256x256xf32> to vector<256x256xbf16>
    %c0_42 = arith.constant 0 : index
    %c0_43 = arith.constant 0 : index
    %55 = vector.load %arg16[%c0_42, %c0_43] : memref<1x256xbf16, #tpu.memory_space<vmem>>, vector<1x256xbf16>
    %56 = vector.broadcast %55 : vector<1x256xbf16> to vector<256x256xbf16>
    %57 = arith.addf %54, %56 : vector<256x256xbf16>
    %c0_44 = arith.constant 0 : index
    %c0_45 = arith.constant 0 : index
    %58 = vector.load %arg17[%c0_44, %c0_45] : memref<256x132xbf16, #tpu.memory_space<vmem>>, vector<256x132xbf16>
    %cst_46 = arith.constant dense<0.000000e+00> : vector<256x132xf32>
    %59 = tpu.matmul %57, %58, %cst_46 {dimension_numbers = #tpu.dot_dimension_numbers<[1], [0], [0], [1], [0, 0, 1, 1], [], []>} : vector<256x256xbf16>, vector<256x132xbf16>, vector<256x132xf32> -> vector<256x132xf32>
    %c0_47 = arith.constant 0 : index
    %c0_48 = arith.constant 0 : index
    %60 = vector.load %arg18[%c0_47, %c0_48] : memref<128x132xbf16, #tpu.memory_space<vmem>>, vector<128x132xbf16>
    %cst_49 = arith.constant dense<0.000000e+00> : vector<256x132xf32>
    %61 = tpu.matmul %0, %60, %cst_49 {dimension_numbers = #tpu.dot_dimension_numbers<[1], [0], [0], [1], [0, 0, 1, 1], [], []>} : vector<256x128xbf16>, vector<128x132xbf16>, vector<256x132xf32> -> vector<256x132xf32>
    %62 = arith.addf %59, %61 : vector<256x132xf32>
    %63 = vector.extract_strided_slice %62 {offsets = [0, 128], sizes = [256, 4], strides = [1, 1]} : vector<256x132xf32> to vector<256x4xf32>
    %64 = vector.extract_strided_slice %62 {offsets = [0, 0], sizes = [256, 128], strides = [1, 1]} : vector<256x132xf32> to vector<256x128xf32>
    %65 = arith.truncf %64 : vector<256x128xf32> to vector<256x128xbf16>
    %c0_50 = arith.constant 0 : index
    %c0_51 = arith.constant 0 : index
    %66 = vector.load %arg19[%c0_50, %c0_51] : memref<1x128xbf16, #tpu.memory_space<vmem>>, vector<1x128xbf16>
    %67 = vector.broadcast %66 : vector<1x128xbf16> to vector<256x128xbf16>
    %68 = arith.addf %65, %67 : vector<256x128xbf16>
    %cst_52 = arith.constant 0.000000e+00 : bf16
    %69 = vector.broadcast %cst_52 : bf16 to vector<256x128xbf16>
    %70 = arith.maximumf %68, %69 : vector<256x128xbf16>
    %c0_53 = arith.constant 0 : index
    %c0_54 = arith.constant 0 : index
    %71 = vector.load %arg20[%c0_53, %c0_54] : memref<128x128xbf16, #tpu.memory_space<vmem>>, vector<128x128xbf16>
    %cst_55 = arith.constant dense<0.000000e+00> : vector<256x128xf32>
    %72 = tpu.matmul %70, %71, %cst_55 {dimension_numbers = #tpu.dot_dimension_numbers<[1], [0], [0], [1], [0, 0, 1, 1], [], []>} : vector<256x128xbf16>, vector<128x128xbf16>, vector<256x128xf32> -> vector<256x128xf32>
    %73 = arith.truncf %72 : vector<256x128xf32> to vector<256x128xbf16>
    %c0_56 = arith.constant 0 : index
    %c0_57 = arith.constant 0 : index
    %74 = vector.load %arg21[%c0_56, %c0_57] : memref<1x128xbf16, #tpu.memory_space<vmem>>, vector<1x128xbf16>
    %75 = vector.broadcast %74 : vector<1x128xbf16> to vector<256x128xbf16>
    %76 = arith.addf %73, %75 : vector<256x128xbf16>
    %cst_58 = arith.constant 0.000000e+00 : bf16
    %77 = vector.broadcast %cst_58 : bf16 to vector<256x128xbf16>
    %78 = arith.maximumf %76, %77 : vector<256x128xbf16>
    %c0_59 = arith.constant 0 : index
    %c0_60 = arith.constant 0 : index
    %79 = vector.load %arg22[%c0_59, %c0_60] : memref<128x128xbf16, #tpu.memory_space<vmem>>, vector<128x128xbf16>
    %cst_61 = arith.constant dense<0.000000e+00> : vector<256x128xf32>
    %80 = tpu.matmul %78, %79, %cst_61 {dimension_numbers = #tpu.dot_dimension_numbers<[1], [0], [0], [1], [0, 0, 1, 1], [], []>} : vector<256x128xbf16>, vector<128x128xbf16>, vector<256x128xf32> -> vector<256x128xf32>
    %81 = arith.truncf %80 : vector<256x128xf32> to vector<256x128xbf16>
    %c0_62 = arith.constant 0 : index
    %c0_63 = arith.constant 0 : index
    %82 = vector.load %arg23[%c0_62, %c0_63] : memref<1x128xbf16, #tpu.memory_space<vmem>>, vector<1x128xbf16>
    %83 = vector.broadcast %82 : vector<1x128xbf16> to vector<256x128xbf16>
    %84 = arith.addf %81, %83 : vector<256x128xbf16>
    %cst_64 = arith.constant 0.000000e+00 : bf16
    %85 = vector.broadcast %cst_64 : bf16 to vector<256x128xbf16>
    %86 = arith.maximumf %84, %85 : vector<256x128xbf16>
    %c0_65 = arith.constant 0 : index
    %c0_66 = arith.constant 0 : index
    %87 = vector.load %arg24[%c0_65, %c0_66] : memref<128x4xbf16, #tpu.memory_space<vmem>>, vector<128x4xbf16>
    %cst_67 = arith.constant dense<0.000000e+00> : vector<256x4xf32>
    %88 = tpu.matmul %86, %87, %cst_67 {dimension_numbers = #tpu.dot_dimension_numbers<[1], [0], [0], [1], [0, 0, 1, 1], [], []>} : vector<256x128xbf16>, vector<128x4xbf16>, vector<256x4xf32> -> vector<256x4xf32>
    %89 = arith.addf %88, %63 : vector<256x4xf32>
    %c0_68 = arith.constant 0 : index
    %c0_69 = arith.constant 0 : index
    %90 = vector.load %arg25[%c0_68, %c0_69] : memref<1x4xf32, #tpu.memory_space<vmem>>, vector<1x4xf32>
    %91 = vector.broadcast %90 : vector<1x4xf32> to vector<256x4xf32>
    %92 = arith.addf %89, %91 : vector<256x4xf32>
    %c0_70 = arith.constant 0 : index
    %c0_71 = arith.constant 0 : index
    %93 = vector.load %arg26[%c0_70, %c0_71] : memref<256x4xf32, #tpu.memory_space<vmem>>, vector<256x4xf32>
    tpu.vector_store %arg26[%c0_70, %c0_71], %92 {strides = array<i32>} : memref<256x4xf32, #tpu.memory_space<vmem>>, vector<256x4xf32>,
    return
  }
  func.func @transform_0(%arg0: i32) -> (i32, i32) {
    %c0_i32 = arith.constant 0 : i32
    %c0_i32_0 = arith.constant 0 : i32
    return %arg0, %c0_i32 : i32, i32
  }
  func.func @transform_1(%arg0: i32) -> (i32, i32) {
    %c0_i32 = arith.constant 0 : i32
    %c0_i32_0 = arith.constant 0 : i32
    %c0_i32_1 = arith.constant 0 : i32
    return %c0_i32, %c0_i32_0 : i32, i32
  }
  func.func @transform_2(%arg0: i32) -> (i32, i32) {
    %c0_i32 = arith.constant 0 : i32
    %c0_i32_0 = arith.constant 0 : i32
    %c0_i32_1 = arith.constant 0 : i32
    return %c0_i32, %c0_i32_0 : i32, i32
  }
  func.func @transform_3(%arg0: i32) -> (i32, i32) {
    %c0_i32 = arith.constant 0 : i32
    %c0_i32_0 = arith.constant 0 : i32
    %c0_i32_1 = arith.constant 0 : i32
    return %c0_i32, %c0_i32_0 : i32, i32
  }
  func.func @transform_4(%arg0: i32) -> (i32, i32) {
    %c0_i32 = arith.constant 0 : i32
    %c0_i32_0 = arith.constant 0 : i32
    %c0_i32_1 = arith.constant 0 : i32
    return %c0_i32, %c0_i32_0 : i32, i32
  }
  func.func @transform_5(%arg0: i32) -> (i32, i32) {
    %c0_i32 = arith.constant 0 : i32
    %c0_i32_0 = arith.constant 0 : i32
    %c0_i32_1 = arith.constant 0 : i32
    return %c0_i32, %c0_i32_0 : i32, i32
  }
  func.func @transform_6(%arg0: i32) -> (i32, i32) {
    %c0_i32 = arith.constant 0 : i32
    %c0_i32_0 = arith.constant 0 : i32
    %c0_i32_1 = arith.constant 0 : i32
    return %c0_i32, %c0_i32_0 : i32, i32
  }
  func.func @transform_7(%arg0: i32) -> (i32, i32) {
    %c0_i32 = arith.constant 0 : i32
    %c0_i32_0 = arith.constant 0 : i32
    %c0_i32_1 = arith.constant 0 : i32
    return %c0_i32, %c0_i32_0 : i32, i32
  }
  func.func @transform_8(%arg0: i32) -> (i32, i32) {
    %c0_i32 = arith.constant 0 : i32
    %c0_i32_0 = arith.constant 0 : i32
    %c0_i32_1 = arith.constant 0 : i32
    return %c0_i32, %c0_i32_0 : i32, i32
  }
  func.func @transform_9(%arg0: i32) -> (i32, i32) {
    %c0_i32 = arith.constant 0 : i32
    %c0_i32_0 = arith.constant 0 : i32
    %c0_i32_1 = arith.constant 0 : i32
    return %c0_i32, %c0_i32_0 : i32, i32
  }
  func.func @transform_10(%arg0: i32) -> (i32, i32) {
    %c0_i32 = arith.constant 0 : i32
    %c0_i32_0 = arith.constant 0 : i32
    %c0_i32_1 = arith.constant 0 : i32
    return %c0_i32, %c0_i32_0 : i32, i32
  }
  func.func @transform_11(%arg0: i32) -> (i32, i32) {
    %c0_i32 = arith.constant 0 : i32
    %c0_i32_0 = arith.constant 0 : i32
    %c0_i32_1 = arith.constant 0 : i32
    return %c0_i32, %c0_i32_0 : i32, i32
  }
  func.func @transform_12(%arg0: i32) -> (i32, i32) {
    %c0_i32 = arith.constant 0 : i32
    %c0_i32_0 = arith.constant 0 : i32
    %c0_i32_1 = arith.constant 0 : i32
    return %c0_i32, %c0_i32_0 : i32, i32
  }
  func.func @transform_13(%arg0: i32) -> (i32, i32) {
    %c0_i32 = arith.constant 0 : i32
    %c0_i32_0 = arith.constant 0 : i32
    %c0_i32_1 = arith.constant 0 : i32
    return %c0_i32, %c0_i32_0 : i32, i32
  }
  func.func @transform_14(%arg0: i32) -> (i32, i32) {
    %c0_i32 = arith.constant 0 : i32
    %c0_i32_0 = arith.constant 0 : i32
    %c0_i32_1 = arith.constant 0 : i32
    return %c0_i32, %c0_i32_0 : i32, i32
  }
  func.func @transform_15(%arg0: i32) -> (i32, i32) {
    %c0_i32 = arith.constant 0 : i32
    %c0_i32_0 = arith.constant 0 : i32
    %c0_i32_1 = arith.constant 0 : i32
    return %c0_i32, %c0_i32_0 : i32, i32
  }
  func.func @transform_16(%arg0: i32) -> (i32, i32) {
    %c0_i32 = arith.constant 0 : i32
    %c0_i32_0 = arith.constant 0 : i32
    %c0_i32_1 = arith.constant 0 : i32
    return %c0_i32, %c0_i32_0 : i32, i32
  }
  func.func @transform_17(%arg0: i32) -> (i32, i32) {
    %c0_i32 = arith.constant 0 : i32
    %c0_i32_0 = arith.constant 0 : i32
    %c0_i32_1 = arith.constant 0 : i32
    return %c0_i32, %c0_i32_0 : i32, i32
  }
  func.func @transform_18(%arg0: i32) -> (i32, i32) {
    %c0_i32 = arith.constant 0 : i32
    %c0_i32_0 = arith.constant 0 : i32
    %c0_i32_1 = arith.constant 0 : i32
    return %c0_i32, %c0_i32_0 : i32, i32
  }
  func.func @transform_19(%arg0: i32) -> (i32, i32) {
    %c0_i32 = arith.constant 0 : i32
    %c0_i32_0 = arith.constant 0 : i32
    %c0_i32_1 = arith.constant 0 : i32
    return %c0_i32, %c0_i32_0 : i32, i32
  }
  func.func @transform_20(%arg0: i32) -> (i32, i32) {
    %c0_i32 = arith.constant 0 : i32
    %c0_i32_0 = arith.constant 0 : i32
    %c0_i32_1 = arith.constant 0 : i32
    return %c0_i32, %c0_i32_0 : i32, i32
  }
  func.func @transform_21(%arg0: i32) -> (i32, i32) {
    %c0_i32 = arith.constant 0 : i32
    %c0_i32_0 = arith.constant 0 : i32
    %c0_i32_1 = arith.constant 0 : i32
    return %c0_i32, %c0_i32_0 : i32, i32
  }
  func.func @transform_22(%arg0: i32) -> (i32, i32) {
    %c0_i32 = arith.constant 0 : i32
    %c0_i32_0 = arith.constant 0 : i32
    %c0_i32_1 = arith.constant 0 : i32
    return %c0_i32, %c0_i32_0 : i32, i32
  }
  func.func @transform_23(%arg0: i32) -> (i32, i32) {
    %c0_i32 = arith.constant 0 : i32
    %c0_i32_0 = arith.constant 0 : i32
    %c0_i32_1 = arith.constant 0 : i32
    return %c0_i32, %c0_i32_0 : i32, i32
  }
  func.func @transform_24(%arg0: i32) -> (i32, i32) {
    %c0_i32 = arith.constant 0 : i32
    %c0_i32_0 = arith.constant 0 : i32
    %c0_i32_1 = arith.constant 0 : i32
    return %c0_i32, %c0_i32_0 : i32, i32
  }
  func.func @transform_25(%arg0: i32) -> (i32, i32) {
    %c0_i32 = arith.constant 0 : i32
    %c0_i32_0 = arith.constant 0 : i32
    return %arg0, %c0_i32 : i32, i32
  }
}

</mosaic_0001>

<bundles_post_ra>
// kernel: nerface_forward.1
= control target key start
LH: loop header
LB: loop body
LE: loop exit
PB: predicated region body
PF: predicated region fallthrough
CT: control target
= control target key end

     0   :  { %s16399_s0 = inlined_call_operand.vmem [shape: bf16[1000,128], index: 0, kind: input, shape index: {}]   ;;  %s16400_s1 = inlined_call_operand.vmem [shape: bf16[128,256], index: 1, kind: input, shape index: {}]   ;;  %s16401_s2 = inlined_call_operand.vmem [shape: bf16[1,256], index: 2, kind: input, shape index: {}]   ;;  %s16402_s3 = inlined_call_operand.vmem [shape: bf16[256,256], index: 3, kind: input, shape index: {}]   ;;  %s16403_s4 = inlined_call_operand.vmem [shape: bf16[1,256], index: 4, kind: input, shape index: {}]   ;;  %s16404_s5 = inlined_call_operand.vmem [shape: bf16[256,256], index: 5, kind: input, shape index: {}]   ;;  %s16405_s6 = inlined_call_operand.vmem [shape: bf16[1,256], index: 6, kind: input, shape index: {}]   ;;  %s16406_s7 = inlined_call_operand.vmem [shape: bf16[128,256], index: 7, kind: input, shape index: {}]   ;;  %s16407_s8 = inlined_call_operand.vmem [shape: bf16[256,256], index: 8, kind: input, shape index: {}]   ;;  %s16408_s9 = inlined_call_operand.vmem [shape: bf16[1,256], index: 9, kind: input, shape index: {}]   ;;  %s16409_s10 = inlined_call_operand.vmem [shape: bf16[256,256], index: 10, kind: input, shape index: {}]   ;;  %s16410_s11 = inlined_call_operand.vmem [shape: bf16[1,256], index: 11, kind: input, shape index: {}]   ;;  %s16411_s12 = inlined_call_operand.vmem [shape: bf16[256,256], index: 12, kind: input, shape index: {}]   ;;  %s16412_s13 = inlined_call_operand.vmem [shape: bf16[1,256], index: 13, kind: input, shape index: {}]   ;;  %s16413_s14 = inlined_call_operand.vmem [shape: bf16[256,256], index: 14, kind: input, shape index: {}]   ;;  %s16414_s15 = inlined_call_operand.vmem [shape: bf16[1,256], index: 15, kind: input, shape index: {}]   ;;  %s16415_s16 = inlined_call_operand.vmem [shape: bf16[256,132], index: 16, kind: input, shape index: {}]   ;;  %s16416_s17 = inlined_call_operand.vmem [shape: bf16[128,132], index: 17, kind: input, shape index: {}]   ;;  %s16417_s18 = inlined_call_operand.vmem [shape: bf16[1,128], index: 18, kind: input, shape index: {}]   ;;  %s16418_s19 = inlined_call_operand.vmem [shape: bf16[128,128], index: 19, kind: input, shape index: {}]   ;;  %s16419_s20 = inlined_call_operand.vmem [shape: bf16[1,128], index: 20, kind: input, shape index: {}]   ;;  %s16420_s21 = inlined_call_operand.vmem [shape: bf16[128,128], index: 21, kind: input, shape index: {}]   ;;  %s16421_s22 = inlined_call_operand.vmem [shape: bf16[1,128], index: 22, kind: input, shape index: {}]   ;;  %s16422_s23 = inlined_call_operand.vmem [shape: bf16[128,4], index: 23, kind: input, shape index: {}]   ;;  %s16423_s24 = inlined_call_operand.vmem [shape: f32[1,4], index: 24, kind: input, shape index: {}]   ;;  %s16424_s25 = inlined_call_operand.vmem [shape: f32[1000,4], index: 25, kind: output, shape index: {}]  }
   0x1   :  { %16437 = sst [smem:[#allocation29_spill]] %s16399_s0 }
   0x2   :  { %16438 = sst [smem:[#allocation30_spill]] %s16400_s1 }
   0x3   :  { %16439 = sst [smem:[#allocation31_spill]] %s16401_s2 }
   0x4   :  { %16440 = sst [smem:[#allocation32_spill]] %s16402_s3 }
   0x5   :  { %16441 = sst [smem:[#allocation33_spill]] %s16403_s4 }
   0x6   :  { %16442 = sst [smem:[#allocation34_spill]] %s16404_s5 }
   0x7   :  { %16443 = sst [smem:[#allocation35_spill]] %s16405_s6 }
   0x8   :  { %16444 = sst [smem:[#allocation36_spill]] %s16406_s7 }
   0x9   :  { %16445 = sst [smem:[#allocation37_spill]] %s16407_s8 }
   0xa   :  { %16446 = sst [smem:[#allocation38_spill]] %s16408_s9 }
   0xb   :  { %16447 = sst [smem:[#allocation39_spill]] %s16409_s10 }
   0xc   :  { %16448 = sst [smem:[#allocation40_spill]] %s16410_s11 }
   0xd   :  { %16449 = sst [smem:[#allocation41_spill]] %s16424_s25 }
   0xe   :  { %s11427_s29 = smov 0   ;;  %s11429_s2 = smov 0  }
   0xf   :  { %s11431_s6 = smov 0  }
  0x10 LB: > { %16450 = sst [smem:[#allocation3_spill]] %s11259_s2  ;;  %s11440_s30 = sadd.s32 4294967295, %s11263_s6   ;;  %s11263_s6 = sphi %s11431_s6, %s16563_s6   ;;  %s11259_s2 = sphi %s11429_s2, %s16565_s2   ;;  %s11255_s29 = sphi %s11427_s29, %s16564_s29  }
  0x11   : > { %16451 = sst [smem:[#allocation4_spill]] %s11440_s30  ;;  %s11442_s7 = sadd.s32 1, %s11263_s6  }
  0x12   : > { %16452 = sst [smem:[#allocation5_spill]] %s11442_s7  ;;  %s569_s3 = ssub.s32 %s11263_s6, %s11442_s7 }
  0x13   : > { %s572_s26 = sadd.s32 1, %s11259_s2  ;;  %p570_p0 = scmp.eq.s32.totalorder %s569_s3, 0 }
  0x14   : > { %p582_p1 = scmp.ne.s32.totalorder %s11259_s2, %s11255_s29  ;;  %p583_p2 = scmp.eq.s32.totalorder %s11440_s30, 3 }
  0x15   : > { %p9480_p3 = scmp.ge.s32.totalorder %s11263_s6, 1  ;;  %p696_p5 = scmp.lt.s32.totalorder %s11263_s6, 5 }
  0x16   : > { %s11450_s1 = scalar_select %p570_p0, %s11259_s2, %s572_s26  }
  0x17   : > { %p11452_p4 = por %p583_p2, %p582_p1  ;;  %p697_p6 = pnand %p9480_p3, %p696_p5 }
  0x18   : > { %16453 = sst [smem:[#allocation6_spill]] %s11450_s1 }
  0x19   : > { %700 = sbr.rel (%p697_p6) target bundleno = 3071 (0xbff), region = 120 }
  0x1e   : > { %s16455_s28 = sld [smem:[#allocation30_spill]]  ;;  %s11487_s27 = sshll.u32 %s11440_s30, 5  ;;  %vm9104_vm0 = vcmask 31744  }
  0x1f   : > { %p772_p7 = scmp.lt.s32.totalorder %s11487_s27, 124  ;;  %s16456_s9 = sld [smem:[#allocation29_spill]] }
  0x20   : > { %s16457_s26 = sld [smem:[#allocation32_spill]]  ;;  %s9145_s4 = ssub.s32 (%p11452_p4), 125, %s11487_s27 }
  0x21   : > { %s773_s6 = scalar_select %p772_p7, %s11487_s27, 124 }
  0x22   : > { %s16460_s2 = sld [smem:[#allocation34_spill]]  ;;  %p9146_p8 = scmp.lt.s32.totalorder (%p11452_p4), %s9145_s4, 32 }
  0x23   : > { %s9483_s0 = sshll.u32 %s773_s6, 2  ;;  %s16459_s6 = sld [smem:[#allocation33_spill]] }
  0x24   : > { %v9606_v0 = vld [vmem:[%s16455_s28 + $0x70] sm:$0xf]  ;;  %v10780_v1 = vld [vmem:[%s16455_s28 + $0x74] sm:$0xf0]  ;;  %v9598_v2 = vld [vmem:[%s16455_s28 + $0x60] sm:$0xf] }
  0x25   : > { %v9607_v3 = vor.u32 %v10780_v1, %v9606_v0  ;;  %v10778_v4 = vld [vmem:[%s16455_s28 + $0x64] sm:$0xf0]  ;;  %v9590_v6 = vld [vmem:[%s16455_s28 + $0x50] sm:$0xf]  ;;  %v10776_v7 = vld [vmem:[%s16455_s28 + $0x54] sm:$0xf0]  ;;  %s11518_s30 = scalar_lea.vmem %s16456_s9, %s9483_s0 }
  0x26   : > { %v9599_v5 = vor.u32 %v10778_v4, %v9598_v2  ;;  %v9591_v8 = vor.u32 %v10776_v7, %v9590_v6  ;;  %v9582_v9 = vld [vmem:[%s16455_s28 + $0x40] sm:$0xf]  ;;  %v10774_v10 = vld [vmem:[%s16455_s28 + $0x44] sm:$0xf0]  ;;  %v9574_v12 = vld [vmem:[%s16455_s28 + $0x30] sm:$0xf] }
  0x27   : > { %11064 = vmatpush.bf16.msra.mxu1 %v9607_v3  ;;  %1010 = vmatpush.bf16.msra.mxu0 %v9607_v3  ;;  %v9583_v11 = vor.u32 %v10774_v10, %v9582_v9  ;;  %v10772_v13 = vld [vmem:[%s16455_s28 + $0x34] sm:$0xf0]  ;;  %v9566_v15 = vld [vmem:[%s16455_s28 + $0x20] sm:$0xf]  ;;  %v10770_v16 = vld [vmem:[%s16455_s28 + $0x24] sm:$0xf0] }
  0x28   : > { %11065 = vmatpush.bf16.msra.mxu2 %v9607_v3  ;;  %11066 = vmatpush.bf16.msra.mxu3 %v9607_v3  ;;  %v9575_v14 = vor.u32 %v10772_v13, %v9574_v12  ;;  %v9567_v17 = vor.u32 %v10770_v16, %v9566_v15  ;;  %v9558_v18 = vld [vmem:[%s16455_s28 + $0x10] sm:$0xf]  ;;  %v10768_v19 = vld [vmem:[%s16455_s28 + $0x14] sm:$0xf0]  ;;  %v9550_v21 = vld [vmem:[%s16455_s28] sm:$0xf]  ;;  %s16461_s25 = smov %s16460_s2 }
  0x29   : > { %v9559_v20 = vor.u32 %v10768_v19, %v9558_v18  ;;  %v10766_v22 = vld [vmem:[%s16455_s28 + $0x4] sm:$0xf0]  ;;  %v10779_v23 = vld [vmem:[%s16455_s28 + $0x74] sm:$0xf]  ;;  %v9608_v24 = vld [vmem:[%s16455_s28 + $0x78] sm:$0xf0] }
  0x2a   : > { %v9551_v25 = vor.u32 %v10766_v22, %v9550_v21  ;;  %v9611_v26 = vor.u32 %v10779_v23, %v9608_v24  ;;  %v10777_v27 = vld [vmem:[%s16455_s28 + $0x64] sm:$0xf]  ;;  %v9600_v28 = vld [vmem:[%s16455_s28 + $0x68] sm:$0xf0]  ;;  %v10775_v31 = vld [vmem:[%s16455_s28 + $0x54] sm:$0xf] }
  0x2b   : > { %11067 = vmatpush.bf16.msra.mxu1 %v9599_v5  ;;  %1011 = vmatpush.bf16.msra.mxu0 %v9599_v5  ;;  %v11527_v29 = vld [vmem:[%s11518_s30 + $0x20] sm:$0xff]  ;;  %v9603_v30 = vor.u32 %v10777_v27, %v9600_v28  ;;  %v9592_v32 = vld [vmem:[%s16455_s28 + $0x58] sm:$0xf0]  ;;  %v9584_v35 = vld [vmem:[%s16455_s28 + $0x48] sm:$0xf0]  ;;  %s16462_s5 = sld [smem:[#allocation35_spill]] }
  0x2c   : > { %11068 = vmatpush.bf16.msra.mxu2 %v9599_v5  ;;  %11069 = vmatpush.bf16.msra.mxu3 %v9599_v5  ;;  %v9595_v33 = vor.u32 %v10775_v31, %v9592_v32  ;;  %v10773_v34 = vld [vmem:[%s16455_s28 + $0x44] sm:$0xf]  ;;  %v10771_v37 = vld [vmem:[%s16455_s28 + $0x34] sm:$0xf]  ;;  %v9576_v38 = vld [vmem:[%s16455_s28 + $0x38] sm:$0xf0] }
  0x2d   : > { %v9587_v36 = vor.u32 %v10773_v34, %v9584_v35  ;;  %v9579_v39 = vor.u32 %v10771_v37, %v9576_v38  ;;  %v10769_v40 = vld [vmem:[%s16455_s28 + $0x24] sm:$0xf]  ;;  %v9568_v41 = vld [vmem:[%s16455_s28 + $0x28] sm:$0xf0]  ;;  %v10767_v44 = vld [vmem:[%s16455_s28 + $0x14] sm:$0xf] }
  0x2e   : > { %v11555_v42 = vld [vmem:[%s11518_s30 + $0x28] sm:$0xff]  ;;  %v9571_v43 = vor.u32 %v10769_v40, %v9568_v41  ;;  %v9560_v45 = vld [vmem:[%s16455_s28 + $0x18] sm:$0xf0]  ;;  %v10749_v46 = vld [vmem:[%s11518_s30] sm:$0xff]  ;;  %s16464_s0 = sld [smem:[#allocation38_spill]] }
  0x2f   : > { %11070 = vmatpush.bf16.msra.mxu1 %v9591_v8  ;;  %1012 = vmatpush.bf16.msra.mxu0 %v9591_v8  ;;  %v9563_v47 = vor.u32 %v10767_v44, %v9560_v45  ;;  %v10765_v48 = vld [vmem:[%s16455_s28 + $0x4] sm:$0xf]  ;;  %v9552_v49 = vld [vmem:[%s16455_s28 + $0x8] sm:$0xf0]  ;;  %v11572_v51 = vld [vmem:[%s11518_s30 + $0x30] sm:$0xff]  ;;  %s16458_s28 = sld [smem:[#allocation31_spill]] }
  0x30   : > { %11071 = vmatpush.bf16.msra.mxu2 %v9591_v8  ;;  %11072 = vmatpush.bf16.msra.mxu3 %v9591_v8  ;;  %v9555_v50 = vor.u32 %v10765_v48, %v9552_v49  ;;  %v10811_v52 = vld [vmem:[%s16457_s26 + $0xf4] sm:$0xf]  ;;  %v9736_v53 = vld [vmem:[%s16457_s26 + $0xf8] sm:$0xf0]  ;;  %v10750_v54 = vld [vmem:[%s11518_s30 + $0x8] sm:$0xff]  ;;  %s16465_s9 = sld [smem:[#allocation36_spill]] }
  0x31   : > { %v9739_v55 = vor.u32 %v10811_v52, %v9736_v53  ;;  %v11583_v56 = vld [vmem:[%s11518_s30 + $0x38] sm:$0xff]  ;;  %v10751_v57 = vld [vmem:[%s11518_s30 + $0x10] sm:$0xff]  ;;  %v10809_v58 = vld [vmem:[%s16457_s26 + $0xe4] sm:$0xf]  ;;  %s16466_s10 = sld [smem:[#allocation39_spill]] }
  0x32   : > { %v9728_v59 = vld [vmem:[%s16457_s26 + $0xe8] sm:$0xf0]  ;;  %v10752_v60 = vld [vmem:[%s11518_s30 + $0x18] sm:$0xff]  ;;  %v10807_v62 = vld [vmem:[%s16457_s26 + $0xd4] sm:$0xf]  ;;  %s16485_s11 = sld [smem:[#allocation40_spill]] }
  0x33   : > { %11073 = vmatpush.bf16.msra.mxu1 %v9583_v11  ;;  %1013 = vmatpush.bf16.msra.mxu0 %v9583_v11  ;;  %v9731_v61 = vor.u32 %v10809_v58, %v9728_v59  ;;  %v9720_v63 = vld [vmem:[%s16457_s26 + $0xd8] sm:$0xf0]  ;;  %v11601_v1 = vld [vmem:[%s11518_s30 + $0x40] sm:$0xff]  ;;  %v9670_v3 = vld [vmem:[%s16457_s26 + $0x70] sm:$0xf] }
  0x34   : > { %11074 = vmatpush.bf16.msra.mxu2 %v9583_v11  ;;  %11075 = vmatpush.bf16.msra.mxu3 %v9583_v11  ;;  %v9723_v0 = vor.u32 %v10807_v62, %v9720_v63  ;;  %v11605_v2 = vld [vmem:[%s11518_s30 + $0x60] sm:$0xff]  ;;  %v10796_v4 = vld [vmem:[%s16457_s26 + $0x74] sm:$0xf0]  ;;  %v11615_v6 = vld [vmem:[%s11518_s30 + $0x48] sm:$0xff] }
  0x35   : > { %v9671_v5 = vor.u32 %v10796_v4, %v9670_v3  ;;  %v9662_v7 = vld [vmem:[%s16457_s26 + $0x60] sm:$0xf]  ;;  %v10794_v8 = vld [vmem:[%s16457_s26 + $0x64] sm:$0xf0]  ;;  %v10805_v12 = vld [vmem:[%s16457_s26 + $0xc4] sm:$0xf] }
  0x36   : > { %v9663_v9 = vor.u32 %v10794_v8, %v9662_v7  ;;  %v11627_v11 = vld [vmem:[%s11518_s30 + $0x68] sm:$0xff]  ;;  %v10792_v16 = vld [vmem:[%s16457_s26 + $0x54] sm:$0xf0]  ;;  %v11646_v19 = vld [vmem:[%s11518_s30 + $0x50] sm:$0xff] }
  0x37   : > { %11076 = vmatpush.bf16.msra.mxu1 %v9575_v14  ;;  %1014 = vmatpush.bf16.msra.mxu0 %v9575_v14  ;;  %v9712_v13 = vld [vmem:[%s16457_s26 + $0xc8] sm:$0xf0]  ;;  %v10790_v21 = vld [vmem:[%s16457_s26 + $0x44] sm:$0xf0]  ;;  %v11658_v24 = vld [vmem:[%s11518_s30 + $0x70] sm:$0xff] }
  0x38   : > { %11077 = vmatpush.bf16.msra.mxu2 %v9575_v14  ;;  %11078 = vmatpush.bf16.msra.mxu3 %v9575_v14  ;;  %v9654_v14 = vld [vmem:[%s16457_s26 + $0x50] sm:$0xf]  ;;  %v9715_v15 = vor.u32 %v10805_v12, %v9712_v13  ;;  %v10795_v27 = vld [vmem:[%s16457_s26 + $0x74] sm:$0xf]  ;;  %v10788_v32 = vld [vmem:[%s16457_s26 + $0x34] sm:$0xf0] }
  0x39   : > { %v9638_v31 = vld [vmem:[%s16457_s26 + $0x30] sm:$0xf]  ;;  %v9726_v34 = vld [vmem:[%s16457_s26 + $0xe0] sm:$0xf]  ;;  %v10810_v35 = vld [vmem:[%s16457_s26 + $0xe4] sm:$0xf0] }
  0x3a   : > { %v9727_v37 = vor.u32 %v10810_v35, %v9726_v34  ;;  %v9664_v38 = vld [vmem:[%s16457_s26 + $0x68] sm:$0xf0]  ;;  %v10791_v44 = vld [vmem:[%s16457_s26 + $0x54] sm:$0xf]  ;;  %v9630_v48 = vld [vmem:[%s16457_s26 + $0x20] sm:$0xf] }
  0x3b   : > { %11079 = vmatpush.bf16.msra.mxu1 %v9567_v17  ;;  %1015 = vmatpush.bf16.msra.mxu0 %v9567_v17  ;;  %v9710_v53 = vld [vmem:[%s16457_s26 + $0xc0] sm:$0xf]  ;;  %v9648_v58 = vld [vmem:[%s16457_s26 + $0x48] sm:$0xf0]  ;;  %v9702_v62 = vld [vmem:[%s16457_s26 + $0xb0] sm:$0xf] }
  0x3c   : > { %11080 = vmatpush.bf16.msra.mxu2 %v9567_v17  ;;  %11081 = vmatpush.bf16.msra.mxu3 %v9567_v17  ;;  %v9655_v17 = vor.u32 %v10792_v16, %v9654_v14  ;;  %v10804_v63 = vld [vmem:[%s16457_s26 + $0xb4] sm:$0xf0]  ;;  %v9640_v3 = vld [vmem:[%s16457_s26 + $0x38] sm:$0xf0]  ;;  %v9694_v7 = vld [vmem:[%s16457_s26 + $0xa0] sm:$0xf] }
  0x3d   : > { %v9703_v4 = vor.u32 %v10804_v63, %v9702_v62  ;;  %v10802_v8 = vld [vmem:[%s16457_s26 + $0xa4] sm:$0xf0]  ;;  %v10803_v13 = vld [vmem:[%s16457_s26 + $0xb4] sm:$0xf]  ;;  %v9704_v14 = vld [vmem:[%s16457_s26 + $0xb8] sm:$0xf0] }
  0x3e   : > { %v9695_v12 = vor.u32 %v10802_v8, %v9694_v7  ;;  %v10798_v35 = vld [vmem:[%s16457_s26 + $0x84] sm:$0xf0]  ;;  %v9696_v62 = vld [vmem:[%s16457_s26 + $0xa8] sm:$0xf0] }
  0x3f   : > { %11082 = vmatpush.bf16.msra.mxu1 %v9559_v20  ;;  %1016 = vmatpush.bf16.msra.mxu0 %v9559_v20 }
  0x40   : > { %11083 = vmatpush.bf16.msra.mxu2 %v9559_v20  ;;  %11084 = vmatpush.bf16.msra.mxu3 %v9559_v20  ;;  %v9646_v20 = vld [vmem:[%s16457_s26 + $0x40] sm:$0xf] }
  0x41   : > { %v9647_v22 = vor.u32 %v10790_v21, %v9646_v20  ;;  %v9707_v20 = vor.u32 %v10803_v13, %v9704_v14  ;;  %v10784_v21 = vld [vmem:[%s16457_s26 + $0x14] sm:$0xf0] }
  0x43   : > { %11085 = vmatpush.bf16.msra.mxu1 %v9551_v25  ;;  %1017 = vmatpush.bf16.msra.mxu0 %v9551_v25 }
  0x44   : > { %11086 = vmatpush.bf16.msra.mxu2 %v9551_v25  ;;  %11087 = vmatpush.bf16.msra.mxu3 %v9551_v25  ;;  %v9734_v25 = vld [vmem:[%s16457_s26 + $0xf0] sm:$0xf] }
  0x46   : > { %1038 = vmatmul.bf16.vlgmr.msra.gmra.mxu1 %v11527_v29  ;;  %1018 = vmatmul.bf16.vlgmr.msra.gmra.mxu0 %v10749_v46 }
  0x47   : > { %1099 = vmatpush.bf16.msrb.mxu1 %v9611_v26  ;;  %1058 = vmatmul.bf16.vlgmr.msra.gmra.mxu2 %v11601_v1  ;;  %v10812_v26 = vld [vmem:[%s16457_s26 + $0xf4] sm:$0xf0] }
  0x48   : > { %1078 = vmatmul.bf16.vlgmr.msra.gmra.mxu3 %v11605_v2  ;;  %1745 = vmatpush.bf16.msrb.mxu2 %v9671_v5  ;;  %v9735_v28 = vor.u32 %v10812_v26, %v9734_v25  ;;  %v9686_v25 = vld [vmem:[%s16457_s26 + $0x90] sm:$0xf]  ;;  %v10800_v26 = vld [vmem:[%s16457_s26 + $0x94] sm:$0xf0] }
  0x4a   : > { %1834 = vmatpush.bf16.msrb.mxu3 %v9735_v28  ;;  %v9687_v28 = vor.u32 %v10800_v26, %v9686_v25 }
  0x4b   : > { %1100 = vmatpush.bf16.msrb.mxu1 %v9603_v30 }
  0x4c   : > { %1746 = vmatpush.bf16.msrb.mxu2 %v9663_v9  ;;  %v10785_v9 = vld [vmem:[%s16457_s26 + $0x24] sm:$0xf] }
  0x4e   : > { %1835 = vmatpush.bf16.msrb.mxu3 %v9727_v37  ;;  %v9616_v37 = vld [vmem:[%s16457_s26 + $0x8] sm:$0xf0] }
  0x4f   : > { %1101 = vmatpush.bf16.msrb.mxu1 %v9595_v33  ;;  %v9639_v33 = vor.u32 %v10788_v32, %v9638_v31  ;;  %v9614_v31 = vld [vmem:[%s16457_s26] sm:$0xf]  ;;  %v10782_v32 = vld [vmem:[%s16457_s26 + $0x4] sm:$0xf0] }
  0x50   : > { %1747 = vmatpush.bf16.msrb.mxu2 %v9655_v17  ;;  %v9615_v34 = vor.u32 %v10782_v32, %v9614_v31  ;;  %v10826_v31 = vld [vmem:[%s16461_s25 + $0x64] sm:$0xf0] }
  0x53   : > { %1102 = vmatpush.bf16.msrb.mxu1 %v9587_v36  ;;  %v10793_v36 = vld [vmem:[%s16457_s26 + $0x64] sm:$0xf] }
  0x54   : > { %1748 = vmatpush.bf16.msrb.mxu2 %v9647_v22  ;;  %v9667_v40 = vor.u32 %v10793_v36, %v9664_v38  ;;  %v10781_v36 = vld [vmem:[%s16457_s26 + $0x4] sm:$0xf] }
  0x56   : > { %1043 = vmatmul.bf16.gmra.mxu1 %v11555_v42  ;;  %1023 = vmatmul.bf16.gmra.mxu0 %v10750_v54 }
  0x57   : > { %1103 = vmatpush.bf16.msrb.mxu1 %v9579_v39  ;;  %1063 = vmatmul.bf16.gmra.mxu2 %v11615_v6  ;;  %v1220_v39 = vld [vmem:[%s16458_s28] sm:$0x3]  ;;  %s16463_s28 = sld [smem:[#allocation37_spill]] }
  0x58   : > { %1083 = vmatmul.bf16.gmra.mxu3 %v11627_v11  ;;  %1749 = vmatpush.bf16.msrb.mxu2 %v9639_v33  ;;  %1222 = vst [vmem:[#allocation1] ss:$9 sm:$0xff] %v1220_v39  ;;  %v9678_v33 = vld [vmem:[%s16457_s26 + $0x80] sm:$0xf]  ;;  %v9619_v39 = vor.u32 %v10781_v36, %v9616_v37 }
  0x59   : > { %v9679_v38 = vor.u32 %v10798_v35, %v9678_v33 }
  0x5b   : > { %1104 = vmatpush.bf16.msrb.mxu1 %v9571_v43  ;;  %v10808_v43 = vld [vmem:[%s16457_s26 + $0xd4] sm:$0xf0] }
  0x5f   : > { %1105 = vmatpush.bf16.msrb.mxu1 %v9563_v47  ;;  %v11710_v47 = vld [vmem:[%s11518_s30 + $0x58] sm:$0xff] }
  0x63   : > { %1106 = vmatpush.bf16.msrb.mxu1 %v9555_v50  ;;  %v10786_v50 = vld [vmem:[%s16457_s26 + $0x24] sm:$0xf0] }
  0x64   : > { %v9631_v52 = vor.u32 %v10786_v50, %v9630_v48  ;;  %v10828_v48 = vld [vmem:[%s16461_s25 + $0x74] sm:$0xf0] }
  0x66   : > { %1048 = vmatmul.bf16.gmra.mxu1 %v11572_v51  ;;  %1028 = vmatmul.bf16.gmra.mxu0 %v10751_v57 }
  0x67   : > { %2012 = vmatpush.bf16.msra.mxu1 %v9739_v55  ;;  %1068 = vmatmul.bf16.gmra.mxu2 %v11646_v19  ;;  %v10789_v55 = vld [vmem:[%s16457_s26 + $0x44] sm:$0xf] }
  0x68   : > { %1088 = vmatmul.bf16.gmra.mxu3 %v11658_v24  ;;  %1750 = vmatpush.bf16.msrb.mxu2 %v9631_v52  ;;  %v9651_v59 = vor.u32 %v10789_v55, %v9648_v58 }
  0x6b   : > { %2013 = vmatpush.bf16.msra.mxu1 %v9731_v61  ;;  %v11734_v61 = vld [vmem:[%s11518_s30 + $0x78] sm:$0xff] }
  0x6f   : > { %2014 = vmatpush.bf16.msra.mxu1 %v9723_v0  ;;  %v10787_v0 = vld [vmem:[%s16457_s26 + $0x34] sm:$0xf] }
  0x70   : > { %v9643_v5 = vor.u32 %v10787_v0, %v9640_v3 }
  0x73   : > { %2015 = vmatpush.bf16.msra.mxu1 %v9715_v15  ;;  %v9622_v15 = vld [vmem:[%s16457_s26 + $0x10] sm:$0xf] }
  0x74   : > { %v9623_v22 = vor.u32 %v10784_v21, %v9622_v15 }
  0x76   : > { %1053 = vmatmul.bf16.gmra.mxu1 %v11583_v56  ;;  %1033 = vmatmul.bf16.gmra.mxu0 %v10752_v60 }
  0x77   : > { %1073 = vmatmul.bf16.gmra.mxu2 %v11710_v47  ;;  %2016 = vmatpush.bf16.msra.mxu1 %v9707_v20 }
  0x78   : > { %1093 = vmatmul.bf16.gmra.mxu3 %v11734_v61  ;;  %1751 = vmatpush.bf16.msrb.mxu2 %v9623_v22 }
  0x7c   : > { %1752 = vmatpush.bf16.msrb.mxu2 %v9615_v34 }
  0x86   : > { %1107 = vmatmul.bf16.vlgmr.msrb.gmra.mxu1 %v10749_v46  ;;  %v9656_v46 = vld [vmem:[%s16457_s26 + $0x58] sm:$0xf0] }
  0x87   : > { %v9659_v49 = vor.u32 %v10791_v44, %v9656_v46  ;;  %v1224_v44 = vld [vmem:[#allocation1 + $0x9] sm:$0xff] }
  0x88   : > { %v9798_v46 = vld [vmem:[%s16460_s2 + $0x70] sm:$0xf] }
  0x96   : > { %1112 = vmatmul.bf16.gmra.mxu1 %v10750_v54  ;;  %v10806_v54 = vld [vmem:[%s16457_s26 + $0xc4] sm:$0xf0] }
  0xa6   : > { %1117 = vmatmul.bf16.gmra.mxu1 %v10751_v57  ;;  %v9711_v57 = vor.u32 %v10806_v54, %v9710_v53  ;;  %v1228_v53 = vpack.i.b16 %v1224_v44, %v1224_v44 }
  0xa8   : > { %v1230_v58 = vperm.slane %v1228_v53, 0 }
  0xaa   : > { %v11829_v7 = vunpack.c.l.bf16 %v1230_v58  ;;  %v9688_v58 = vld [vmem:[%s16457_s26 + $0x98] sm:$0xf0] }
  0xb6   : > { %1122 = vmatmul.bf16.gmra.mxu1 %v10752_v60 }
  0xc3   : > { %v11624_v10 = vpop.f32.mrf.mxu1 }
  0xc6   : > { %1127 = vmatmul.bf16.gmra.mxu1 %v11527_v29  ;;  %v9672_v29 = vld [vmem:[%s16457_s26 + $0x78] sm:$0xf0] }
  0xc7   : > { %v9675_v30 = vor.u32 %v10795_v27, %v9672_v29  ;;  %v10783_v27 = vld [vmem:[%s16457_s26 + $0x14] sm:$0xf]  ;;  %v9624_v29 = vld [vmem:[%s16457_s26 + $0x18] sm:$0xf0] }
  0xc9   : > { %1923 = vmatpush.bf16.msrb.mxu0 %v9675_v30  ;;  %v9627_v30 = vor.u32 %v10783_v27, %v9624_v29 }
  0xcb   : > { %v11643_v18 = vpop.f32.mrf.mxu1 }
  0xcd   : > { %1924 = vmatpush.bf16.msrb.mxu0 %v9667_v40 }
  0xd1   : > { %1925 = vmatpush.bf16.msrb.mxu0 %v9659_v49  ;;  %v9799_v49 = vor.u32 %v10828_v48, %v9798_v46 }
  0xd3   : > { %v11655_v23 = vpop.f32.mrf.mxu1  ;;  %2658 = vmatpush.bf16.msra.mxu2 %v9799_v49 }
  0xd5   : > { %1926 = vmatpush.bf16.msrb.mxu0 %v9651_v59  ;;  %v10801_v59 = vld [vmem:[%s16457_s26 + $0xa4] sm:$0xf] }
  0xd6   : > { %1132 = vmatmul.bf16.gmra.mxu1 %v11555_v42  ;;  %v9718_v42 = vld [vmem:[%s16457_s26 + $0xd0] sm:$0xf]  ;;  %v9699_v63 = vor.u32 %v10801_v59, %v9696_v62 }
  0xd7   : > { %v9719_v45 = vor.u32 %v10808_v43, %v9718_v42  ;;  %v1019_v42 = vpop.f32.mrf.mxu0  ;;  %v1223_v43 = vld [vmem:[#allocation1] sm:$0xff] }
  0xd8   : > { %v1225_v52 = vpack.i.b16 %v1223_v43, %v1223_v43  ;;  %2017 = vmatpush.bf16.msra.mxu1 %v9699_v63 }
  0xd9   : > { %1836 = vmatpush.bf16.msrb.mxu3 %v9719_v45  ;;  %1927 = vmatpush.bf16.msrb.mxu0 %v9643_v5  ;;  %v2133_v45 = vld [vmem:[%s16459_s6] sm:$0x3] }
  0xda   : > { %2135 = vst [vmem:[#allocation1] ss:$9 sm:$0xff] %v2133_v45 }
  0xdb   : > { %v11695_v41 = vpop.f32.mrf.mxu1 }
  0xdd   : > { %1837 = vmatpush.bf16.msrb.mxu3 %v9711_v57  ;;  %v1227_v57 = vperm.slane %v1225_v52, 0 }
  0xdf   : > { %v11827_v5 = vunpack.c.l.bf16 %v1227_v57  ;;  %v10799_v57 = vld [vmem:[%s16457_s26 + $0x94] sm:$0xf] }
  0xe0   : > { %v9691_v59 = vor.u32 %v10799_v57, %v9688_v58  ;;  %v11888_v58 = vpop.f32.mrf.mxu3 }
  0xe1   : > { %1838 = vmatpush.bf16.msrb.mxu3 %v9703_v4 }
  0xe2   : > { %2018 = vmatpush.bf16.msra.mxu1 %v9691_v59 }
  0xe3   : > { %v11731_v60 = vpop.f32.mrf.mxu1 }
  0xe5   : > { %1839 = vmatpush.bf16.msrb.mxu3 %v9695_v12 }
  0xe6   : > { %1137 = vmatmul.bf16.gmra.mxu1 %v11572_v51  ;;  %v9632_v51 = vld [vmem:[%s16457_s26 + $0x28] sm:$0xf0] }
  0xe7   : > { %v9635_v16 = vor.u32 %v10785_v9, %v9632_v51 }
  0xe9   : > { %1928 = vmatpush.bf16.msrb.mxu0 %v9635_v16  ;;  %1840 = vmatpush.bf16.msrb.mxu3 %v9687_v28 }
  0xeb   : > { %v11771_v17 = vpop.f32.mrf.mxu1 }
  0xed   : > { %1929 = vmatpush.bf16.msrb.mxu0 %v9627_v30  ;;  %1841 = vmatpush.bf16.msrb.mxu3 %v9679_v38  ;;  %v9790_v30 = vld [vmem:[%s16461_s25 + $0x60] sm:$0xf] }
  0xee   : > { %v9791_v32 = vor.u32 %v10826_v31, %v9790_v30 }
  0xf0   : > { %2659 = vmatpush.bf16.msra.mxu2 %v9791_v32 }
  0xf1   : > { %1930 = vmatpush.bf16.msrb.mxu0 %v9619_v39 }
  0xf3   : > { %v11806_v40 = vpop.f32.mrf.mxu1 }
  0xf6   : > { %1142 = vmatmul.bf16.gmra.mxu1 %v11583_v56  ;;  %v1021_v56 = vpop.f32.mrf.mxu0 }
  0xfb   : > { %v11818_v50 = vpop.f32.mrf.mxu1 }
  0xfe   : > { %v1024_v0 = vpop.f32.mrf.mxu0 }
 0x103   : > { %v1108_v54 = vpop.f32.mrf.mxu1 }
 0x104   : > { %v1188_v55 = vpack.c.bf16 %v1108_v54, %v1019_v42 }
 0x106   : > { %1147 = vmatmul.bf16.gmra.mxu1 %v11601_v1  ;;  %v1231_v3 = vunpack.c.l.bf16 %v1188_v55  ;;  %v1232_v4 = vunpack.c.h.bf16 %v1188_v55  ;;  %v1026_v26 = vpop.f32.mrf.mxu0 }
 0x108   : > { %v1297_v1 = vadd.f32 %v11827_v5, %v1231_v3  ;;  %v1298_v12 = vadd.f32 %v11829_v7, %v1232_v4 }
 0x10a   : > { %v1457_v16 = vmax.f32 %v1297_v1, 0.0  ;;  %v1458_v20 = vmax.f32 %v1298_v12, 0.0 }
 0x10b   : > { %v1110_v8 = vpop.f32.mrf.mxu1 }
 0x10c   : > { %v1189_v9 = vpack.c.bf16 %v1110_v8, %v1021_v56 }
 0x10e   : > { %v1233_v51 = vunpack.c.l.bf16 %v1189_v9  ;;  %v1234_v13 = vunpack.c.h.bf16 %v1189_v9  ;;  %v1029_v37 = vpop.f32.mrf.mxu0 }
 0x110   : > { %v1299_v14 = vadd.f32 %v11827_v5, %v1233_v51  ;;  %v1300_v15 = vadd.f32 %v11829_v7, %v1234_v13 }
 0x112   : > { %v1459_v21 = vmax.f32 %v1299_v14, 0.0  ;;  %v1460_v22 = vmax.f32 %v1300_v15, 0.0 }
 0x113   : > { %v1113_v25 = vpop.f32.mrf.mxu1 }
 0x114   : > { %v1521_v27 = vpack.c.bf16 %v1459_v21, %v1457_v16  ;;  %v11835_v28 = vpack.c.bf16 %v1460_v22, %v1458_v20  ;;  %v1190_v29 = vpack.c.bf16 %v1113_v25, %v1024_v0 }
 0x116   : > { %1152 = vmatmul.bf16.gmra.mxu1 %v11615_v6  ;;  %1753 = vmatmul.bf16.vlgmr.msrb.gmra.mxu2 %v1521_v27  ;;  %v1235_v33 = vunpack.c.l.bf16 %v1190_v29  ;;  %v1236_v34 = vunpack.c.h.bf16 %v1190_v29  ;;  %v1031_v55 = vpop.f32.mrf.mxu0 }
 0x117   : > { %1842 = vmatmul.bf16.vlgmr.msrb.gmra.mxu3 %v11835_v28  ;;  %1931 = vmatmul.bf16.vlgmr.msrb.gmra.mxu0 %v1521_v27  ;;  %v10824_v27 = vld [vmem:[%s16461_s25 + $0x54] sm:$0xf0] }
 0x118   : > { %v1301_v39 = vadd.f32 %v11827_v5, %v1235_v33  ;;  %v1302_v42 = vadd.f32 %v11829_v7, %v1236_v34 }
 0x11a   : > { %v1461_v45 = vmax.f32 %v1301_v39, 0.0  ;;  %v1462_v48 = vmax.f32 %v1302_v42, 0.0 }
 0x11b   : > { %v1115_v35 = vpop.f32.mrf.mxu1 }
 0x11c   : > { %v1191_v36 = vpack.c.bf16 %v1115_v35, %v1026_v26  ;;  %v9782_v26 = vld [vmem:[%s16461_s25 + $0x50] sm:$0xf] }
 0x11d   : > { %v9783_v29 = vor.u32 %v10824_v27, %v9782_v26 }
 0x11e   : > { %v1237_v6 = vunpack.c.l.bf16 %v1191_v36  ;;  %v1238_v38 = vunpack.c.h.bf16 %v1191_v36  ;;  %v1034_v51 = vpop.f32.mrf.mxu0 }
 0x11f   : > { %2660 = vmatpush.bf16.msra.mxu2 %v9783_v29 }
 0x120   : > { %v1303_v43 = vadd.f32 %v11827_v5, %v1237_v6  ;;  %v1304_v44 = vadd.f32 %v11829_v7, %v1238_v38 }
 0x122   : > { %v1463_v46 = vmax.f32 %v1303_v43, 0.0  ;;  %v1464_v49 = vmax.f32 %v1304_v44, 0.0 }
 0x123   : > { %v1118_v56 = vpop.f32.mrf.mxu1 }
 0x124   : > { %v1523_v52 = vpack.c.bf16 %v1463_v46, %v1461_v45  ;;  %v11849_v53 = vpack.c.bf16 %v1464_v49, %v1462_v48  ;;  %v1192_v54 = vpack.c.bf16 %v1118_v56, %v1029_v37  ;;  %v10797_v56 = vld [vmem:[%s16457_s26 + $0x84] sm:$0xf] }
 0x126   : > { %1157 = vmatmul.bf16.gmra.mxu1 %v11646_v19  ;;  %1758 = vmatmul.bf16.gmra.mxu2 %v1523_v52  ;;  %v1239_v62 = vunpack.c.l.bf16 %v1192_v54  ;;  %v1240_v63 = vunpack.c.h.bf16 %v1192_v54  ;;  %v1036_v32 = vpop.f32.mrf.mxu0 }
 0x127   : > { %1847 = vmatmul.bf16.gmra.mxu3 %v11849_v53  ;;  %1936 = vmatmul.bf16.gmra.mxu0 %v1523_v52  ;;  %v9680_v52 = vld [vmem:[%s16457_s26 + $0x88] sm:$0xf0] }
 0x128   : > { %v1305_v8 = vadd.f32 %v11827_v5, %v1239_v62  ;;  %v1306_v9 = vadd.f32 %v11829_v7, %v1240_v63  ;;  %v9683_v54 = vor.u32 %v10797_v56, %v9680_v52 }
 0x12a   : > { %v1465_v13 = vmax.f32 %v1305_v8, 0.0  ;;  %v1466_v15 = vmax.f32 %v1306_v9, 0.0  ;;  %2019 = vmatpush.bf16.msra.mxu1 %v9683_v54 }
 0x12b   : > { %v1120_v0 = vpop.f32.mrf.mxu1 }
 0x12c   : > { %v1193_v3 = vpack.c.bf16 %v1120_v0, %v1031_v55 }
 0x12e   : > { %v1241_v19 = vunpack.c.l.bf16 %v1193_v3  ;;  %v1242_v4 = vunpack.c.h.bf16 %v1193_v3 }
 0x130   : > { %v1307_v1 = vadd.f32 %v11827_v5, %v1241_v19  ;;  %v1308_v12 = vadd.f32 %v11829_v7, %v1242_v4 }
 0x132   : > { %v1467_v14 = vmax.f32 %v1307_v1, 0.0  ;;  %v1468_v16 = vmax.f32 %v1308_v12, 0.0 }
 0x133   : > { %v1123_v20 = vpop.f32.mrf.mxu1 }
 0x134   : > { %v1525_v21 = vpack.c.bf16 %v1467_v14, %v1465_v13  ;;  %v11863_v22 = vpack.c.bf16 %v1468_v16, %v1466_v15  ;;  %v1194_v25 = vpack.c.bf16 %v1123_v20, %v1034_v51  ;;  %v11899_v15 = vpop.f32.mrf.mxu3  ;;  %v9774_v20 = vld [vmem:[%s16461_s25 + $0x40] sm:$0xf] }
 0x136   : > { %1162 = vmatmul.bf16.gmra.mxu1 %v11710_v47  ;;  %1763 = vmatmul.bf16.gmra.mxu2 %v1525_v21  ;;  %v1243_v30 = vunpack.c.l.bf16 %v1194_v25  ;;  %v1244_v31 = vunpack.c.h.bf16 %v1194_v25 }
 0x137   : > { %1852 = vmatmul.bf16.gmra.mxu3 %v11863_v22  ;;  %1941 = vmatmul.bf16.gmra.mxu0 %v1525_v21  ;;  %v10822_v21 = vld [vmem:[%s16461_s25 + $0x44] sm:$0xf0] }
 0x138   : > { %v1309_v36 = vadd.f32 %v11827_v5, %v1243_v30  ;;  %v1310_v37 = vadd.f32 %v11829_v7, %v1244_v31  ;;  %v9775_v25 = vor.u32 %v10822_v21, %v9774_v20 }
 0x13a   : > { %v1469_v39 = vmax.f32 %v1309_v36, 0.0  ;;  %v1470_v43 = vmax.f32 %v1310_v37, 0.0  ;;  %2661 = vmatpush.bf16.msra.mxu2 %v9775_v25 }
 0x13b   : > { %v1125_v33 = vpop.f32.mrf.mxu1 }
 0x13c   : > { %v1195_v34 = vpack.c.bf16 %v1125_v33, %v1036_v32  ;;  %v11915_v33 = vpop.f32.mrf.mxu3 }
 0x13e   : > { %v1245_v47 = vunpack.c.l.bf16 %v1195_v34  ;;  %v1246_v35 = vunpack.c.h.bf16 %v1195_v34  ;;  %v9862_v34 = vld [vmem:[%s16461_s25 + $0xf0] sm:$0xf] }
 0x140   : > { %v1311_v6 = vadd.f32 %v11827_v5, %v1245_v47  ;;  %v1312_v38 = vadd.f32 %v11829_v7, %v1246_v35  ;;  %v10844_v47 = vld [vmem:[%s16461_s25 + $0xf4] sm:$0xf0] }
 0x141   : > { %v9863_v36 = vor.u32 %v10844_v47, %v9862_v34 }
 0x142   : > { %v1471_v42 = vmax.f32 %v1311_v6, 0.0  ;;  %v1472_v44 = vmax.f32 %v1312_v38, 0.0 }
 0x143   : > { %v1128_v45 = vpop.f32.mrf.mxu1  ;;  %2747 = vmatpush.bf16.msra.mxu3 %v9863_v36 }
 0x144   : > { %v1527_v46 = vpack.c.bf16 %v1471_v42, %v1469_v39  ;;  %v11877_v48 = vpack.c.bf16 %v1472_v44, %v1470_v43  ;;  %v1196_v49 = vpack.c.bf16 %v1128_v45, %v11624_v10 }
 0x146   : > { %1167 = vmatmul.bf16.gmra.mxu1 %v11605_v2  ;;  %1768 = vmatmul.bf16.gmra.mxu2 %v1527_v46  ;;  %v1247_v55 = vunpack.c.l.bf16 %v1196_v49  ;;  %v1248_v57 = vunpack.c.h.bf16 %v1196_v49  ;;  %v11890_v2 = vpop.f32.mrf.mxu2  ;;  %v11932_v49 = vpop.f32.mrf.mxu3 }
 0x147   : > { %1857 = vmatmul.bf16.gmra.mxu3 %v11877_v48  ;;  %1946 = vmatmul.bf16.gmra.mxu0 %v1527_v46 }
 0x148   : > { %v1313_v0 = vadd.f32 %v11827_v5, %v1247_v55  ;;  %v1314_v3 = vadd.f32 %v11829_v7, %v1248_v57  ;;  %v10827_v55 = vld [vmem:[%s16461_s25 + $0x74] sm:$0xf] }
 0x14a   : > { %v1473_v8 = vmax.f32 %v1313_v0, 0.0  ;;  %v1474_v1 = vmax.f32 %v1314_v3, 0.0 }
 0x14b   : > { %v1130_v10 = vpop.f32.mrf.mxu1 }
 0x14c   : > { %v1197_v59 = vpack.c.bf16 %v1130_v10, %v11643_v18  ;;  %v10843_v10 = vld [vmem:[%s16461_s25 + $0xf4] sm:$0xf] }
 0x14e   : > { %v1249_v62 = vunpack.c.l.bf16 %v1197_v59  ;;  %v1250_v63 = vunpack.c.h.bf16 %v1197_v59  ;;  %v11901_v18 = vpop.f32.mrf.mxu2  ;;  %v9864_v59 = vld [vmem:[%s16461_s25 + $0xf8] sm:$0xf0] }
 0x150   : > { %v1315_v19 = vadd.f32 %v11827_v5, %v1249_v62  ;;  %v1316_v4 = vadd.f32 %v11829_v7, %v1250_v63  ;;  %v9867_v63 = vor.u32 %v10843_v10, %v9864_v59 }
 0x152   : > { %v1475_v9 = vmax.f32 %v1315_v19, 0.0  ;;  %v1476_v12 = vmax.f32 %v1316_v4, 0.0  ;;  %2925 = vmatpush.bf16.msrb.mxu1 %v9867_v63 }
 0x153   : > { %v1133_v51 = vpop.f32.mrf.mxu1 }
 0x154   : > { %v1529_v13 = vpack.c.bf16 %v1475_v9, %v1473_v8  ;;  %v11897_v14 = vpack.c.bf16 %v1476_v12, %v1474_v1  ;;  %v1198_v16 = vpack.c.bf16 %v1133_v51, %v11655_v23 }
 0x156   : > { %1172 = vmatmul.bf16.gmra.mxu1 %v11627_v11  ;;  %1773 = vmatmul.bf16.gmra.mxu2 %v1529_v13  ;;  %v1251_v26 = vunpack.c.l.bf16 %v1198_v16  ;;  %v1252_v27 = vunpack.c.h.bf16 %v1198_v16  ;;  %v11923_v35 = vpop.f32.mrf.mxu2  ;;  %v11953_v16 = vpop.f32.mrf.mxu3 }
 0x157   : > { %1862 = vmatmul.bf16.gmra.mxu3 %v11897_v14  ;;  %1951 = vmatmul.bf16.gmra.mxu0 %v1529_v13 }
 0x158   : > { %v1317_v31 = vadd.f32 %v11827_v5, %v1251_v26  ;;  %v1318_v32 = vadd.f32 %v11829_v7, %v1252_v27 }
 0x15a   : > { %v1477_v6 = vmax.f32 %v1317_v31, 0.0  ;;  %v1478_v39 = vmax.f32 %v1318_v32, 0.0 }
 0x15b   : > { %v1135_v29 = vpop.f32.mrf.mxu1 }
 0x15c   : > { %v1199_v23 = vpack.c.bf16 %v1135_v29, %v11695_v41 }
 0x15e   : > { %v1253_v11 = vunpack.c.l.bf16 %v1199_v23  ;;  %v1254_v30 = vunpack.c.h.bf16 %v1199_v23  ;;  %v11934_v56 = vpop.f32.mrf.mxu2  ;;  %v9766_v23 = vld [vmem:[%s16461_s25 + $0x30] sm:$0xf]  ;;  %v11969_v32 = vpop.f32.mrf.mxu3 }
 0x160   : > { %v1319_v41 = vadd.f32 %v11827_v5, %v1253_v11  ;;  %v1320_v37 = vadd.f32 %v11829_v7, %v1254_v30  ;;  %v10820_v11 = vld [vmem:[%s16461_s25 + $0x34] sm:$0xf0] }
 0x161   : > { %v9767_v31 = vor.u32 %v10820_v11, %v9766_v23 }
 0x162   : > { %v1479_v38 = vmax.f32 %v1319_v41, 0.0  ;;  %v1480_v42 = vmax.f32 %v1320_v37, 0.0 }
 0x163   : > { %v1138_v43 = vpop.f32.mrf.mxu1  ;;  %2662 = vmatpush.bf16.msra.mxu2 %v9767_v31 }
 0x164   : > { %v1531_v44 = vpack.c.bf16 %v1479_v38, %v1477_v6  ;;  %v11927_v45 = vpack.c.bf16 %v1480_v42, %v1478_v39  ;;  %v1200_v46 = vpack.c.bf16 %v1138_v43, %v11731_v60  ;;  %v9800_v60 = vld [vmem:[%s16461_s25 + $0x78] sm:$0xf0]  ;;  %v9854_v38 = vld [vmem:[%s16461_s25 + $0xe0] sm:$0xf] }
 0x166   : > { %1177 = vmatmul.bf16.gmra.mxu1 %v11658_v24  ;;  %1778 = vmatmul.bf16.gmra.mxu2 %v1531_v44  ;;  %v1255_v52 = vunpack.c.l.bf16 %v1200_v46  ;;  %v1256_v54 = vunpack.c.h.bf16 %v1200_v46  ;;  %v9803_v24 = vor.u32 %v10827_v55, %v9800_v60 }
 0x167   : > { %1867 = vmatmul.bf16.gmra.mxu3 %v11927_v45  ;;  %1956 = vmatmul.bf16.gmra.mxu0 %v1531_v44 }
 0x168   : > { %2836 = vmatpush.bf16.msra.mxu0 %v9803_v24  ;;  %v1321_v19 = vadd.f32 %v11827_v5, %v1255_v52  ;;  %v1322_v4 = vadd.f32 %v11829_v7, %v1256_v54 }
 0x16a   : > { %v1481_v1 = vmax.f32 %v1321_v19, 0.0  ;;  %v1482_v51 = vmax.f32 %v1322_v4, 0.0 }
 0x16b   : > { %v1140_v57 = vpop.f32.mrf.mxu1 }
 0x16c   : > { %v1201_v62 = vpack.c.bf16 %v1140_v57, %v11771_v17  ;;  %v11955_v17 = vpop.f32.mrf.mxu2  ;;  %v11987_v57 = vpop.f32.mrf.mxu3 }
 0x16e   : > { %v1257_v0 = vunpack.c.l.bf16 %v1201_v62  ;;  %v1258_v3 = vunpack.c.h.bf16 %v1201_v62  ;;  %v10825_v62 = vld [vmem:[%s16461_s25 + $0x64] sm:$0xf] }
 0x170   : > { %v1323_v8 = vadd.f32 %v11827_v5, %v1257_v0  ;;  %v1324_v9 = vadd.f32 %v11829_v7, %v1258_v3  ;;  %v9856_v3 = vld [vmem:[%s16461_s25 + $0xe8] sm:$0xf0] }
 0x172   : > { %v1483_v12 = vmax.f32 %v1323_v8, 0.0  ;;  %v1484_v13 = vmax.f32 %v1324_v9, 0.0 }
 0x173   : > { %v1143_v20 = vpop.f32.mrf.mxu1 }
 0x174   : > { %v1533_v21 = vpack.c.bf16 %v1483_v12, %v1481_v1  ;;  %v11957_v25 = vpack.c.bf16 %v1484_v13, %v1482_v51  ;;  %v1202_v26 = vpack.c.bf16 %v1143_v20, %v11806_v40  ;;  %v12009_v20 = vpop.f32.mrf.mxu3 }
 0x176   : > { %1182 = vmatmul.bf16.gmra.mxu1 %v11734_v61  ;;  %1783 = vmatmul.bf16.gmra.mxu2 %v1533_v21  ;;  %v1259_v27 = vunpack.c.l.bf16 %v1202_v26  ;;  %v1260_v29 = vunpack.c.h.bf16 %v1202_v26  ;;  %v11971_v61 = vpop.f32.mrf.mxu2 }
 0x177   : > { %1872 = vmatmul.bf16.gmra.mxu3 %v11957_v25  ;;  %1961 = vmatmul.bf16.gmra.mxu0 %v1533_v21 }
 0x178   : > { %v1325_v36 = vadd.f32 %v11827_v5, %v1259_v27  ;;  %v1326_v41 = vadd.f32 %v11829_v7, %v1260_v29 }
 0x17a   : > { %v1485_v42 = vmax.f32 %v1325_v36, 0.0  ;;  %v1486_v44 = vmax.f32 %v1326_v41, 0.0 }
 0x17b   : > { %v1145_v30 = vpop.f32.mrf.mxu1 }
 0x17c   : > { %v1203_v40 = vpack.c.bf16 %v1145_v30, %v11818_v50  ;;  %v10842_v50 = vld [vmem:[%s16461_s25 + $0xe4] sm:$0xf0] }
 0x17d   : > { %v9855_v39 = vor.u32 %v10842_v50, %v9854_v38 }
 0x17e   : > { %v1261_v34 = vunpack.c.l.bf16 %v1203_v40  ;;  %v1262_v47 = vunpack.c.h.bf16 %v1203_v40  ;;  %v11989_v24 = vpop.f32.mrf.mxu2 }
 0x17f   : > { %2748 = vmatpush.bf16.msra.mxu3 %v9855_v39 }
 0x180   : > { %v1327_v37 = vadd.f32 %v11827_v5, %v1261_v34  ;;  %v1328_v6 = vadd.f32 %v11829_v7, %v1262_v47 }
 0x182   : > { %v1487_v43 = vmax.f32 %v1327_v37, 0.0  ;;  %v1488_v46 = vmax.f32 %v1328_v6, 0.0  ;;  %v9758_v37 = vld [vmem:[%s16461_s25 + $0x20] sm:$0xf]  ;;  %v10818_v6 = vld [vmem:[%s16461_s25 + $0x24] sm:$0xf0] }
 0x183   : > { %v1148_v52 = vpop.f32.mrf.mxu1  ;;  %v9759_v50 = vor.u32 %v10818_v6, %v9758_v37 }
 0x184   : > { %v1535_v54 = vpack.c.bf16 %v1487_v43, %v1485_v42  ;;  %v11983_v55 = vpack.c.bf16 %v1488_v46, %v1486_v44  ;;  %v1204_v60 = vpack.c.bf16 %v1148_v52, %v11890_v2  ;;  %v9792_v2 = vld [vmem:[%s16461_s25 + $0x68] sm:$0xf0] }
 0x185   : > { %v9795_v0 = vor.u32 %v10825_v62, %v9792_v2  ;;  %2663 = vmatpush.bf16.msra.mxu2 %v9759_v50 }
 0x186   : > { %1788 = vmatmul.bf16.gmra.mxu2 %v1535_v54  ;;  %2020 = vmatmul.bf16.vlgmr.msra.gmra.mxu1 %v11835_v28  ;;  %v1263_v10 = vunpack.c.l.bf16 %v1204_v60  ;;  %v1264_v59 = vunpack.c.h.bf16 %v1204_v60  ;;  %v10841_v28 = vld [vmem:[%s16461_s25 + $0xe4] sm:$0xf]  ;;  %v12011_v21 = vpop.f32.mrf.mxu2  ;;  %v9846_v60 = vld [vmem:[%s16461_s25 + $0xd0] sm:$0xf] }
 0x187   : > { %1877 = vmatmul.bf16.gmra.mxu3 %v11983_v55  ;;  %1966 = vmatmul.bf16.gmra.mxu0 %v1535_v54  ;;  %v9859_v4 = vor.u32 %v10841_v28, %v9856_v3 }
 0x188   : > { %2837 = vmatpush.bf16.msra.mxu0 %v9795_v0  ;;  %v1329_v8 = vadd.f32 %v11827_v5, %v1263_v10  ;;  %v1330_v9 = vadd.f32 %v11829_v7, %v1264_v59 }
 0x189   : > { %2926 = vmatpush.bf16.msrb.mxu1 %v9859_v4 }
 0x18a   : > { %v1489_v26 = vmax.f32 %v1329_v8, 0.0  ;;  %v1490_v27 = vmax.f32 %v1330_v9, 0.0 }
 0x18b   : > { %v1150_v63 = vpop.f32.mrf.mxu1 }
 0x18c   : > { %v1205_v19 = vpack.c.bf16 %v1150_v63, %v11901_v18 }
 0x18e   : > { %v1265_v1 = vunpack.c.l.bf16 %v1205_v19  ;;  %v1266_v12 = vunpack.c.h.bf16 %v1205_v19 }
 0x190   : > { %v1331_v51 = vadd.f32 %v11827_v5, %v1265_v1  ;;  %v1332_v13 = vadd.f32 %v11829_v7, %v1266_v12 }
 0x192   : > { %v1491_v18 = vmax.f32 %v1331_v51, 0.0  ;;  %v1492_v29 = vmax.f32 %v1332_v13, 0.0 }
 0x193   : > { %v1153_v23 = vpop.f32.mrf.mxu1 }
 0x194   : > { %v12013_v11 = vpop.f32.mrf.mxu0  ;;  %v1537_v30 = vpack.c.bf16 %v1491_v18, %v1489_v26  ;;  %v12015_v31 = vpack.c.bf16 %v1492_v29, %v1490_v27  ;;  %v1206_v40 = vpack.c.bf16 %v1153_v23, %v11923_v35  ;;  %v10823_v27 = vld [vmem:[%s16461_s25 + $0x54] sm:$0xf]  ;;  %v9784_v18 = vld [vmem:[%s16461_s25 + $0x58] sm:$0xf0] }
 0x195   : > { %v9787_v23 = vor.u32 %v10823_v27, %v9784_v18 }
 0x196   : > { %1793 = vmatmul.bf16.gmra.mxu2 %v1537_v30  ;;  %2025 = vmatmul.bf16.gmra.mxu1 %v11849_v53  ;;  %v1267_v47 = vunpack.c.l.bf16 %v1206_v40  ;;  %v1268_v36 = vunpack.c.h.bf16 %v1206_v40 }
 0x197   : > { %1882 = vmatmul.bf16.gmra.mxu3 %v12015_v31  ;;  %1971 = vmatmul.bf16.gmra.mxu0 %v1537_v30  ;;  %v9848_v30 = vld [vmem:[%s16461_s25 + $0xd8] sm:$0xf0] }
 0x198   : > { %v1333_v42 = vadd.f32 %v11827_v5, %v1267_v47  ;;  %v1334_v43 = vadd.f32 %v11829_v7, %v1268_v36  ;;  %2838 = vmatpush.bf16.msra.mxu0 %v9787_v23  ;;  %v9838_v23 = vld [vmem:[%s16461_s25 + $0xc0] sm:$0xf] }
 0x199   : > { %v1754_v34 = vpop.f32.mrf.mxu2 }
 0x19a   : > { %v1843_v41 = vpop.f32.mrf.mxu3  ;;  %v1493_v62 = vmax.f32 %v1333_v42, 0.0  ;;  %v1494_v2 = vmax.f32 %v1334_v43, 0.0 }
 0x19b   : > { %v12026_v38 = vadd.f32 %v1843_v41, %v1754_v34  ;;  %v1155_v35 = vpop.f32.mrf.mxu1 }
 0x19c   : > { %v1207_v53 = vpack.c.bf16 %v1155_v35, %v11934_v56  ;;  %v12029_v39 = vpop.f32.mrf.mxu0  ;;  %v10840_v56 = vld [vmem:[%s16461_s25 + $0xd4] sm:$0xf0] }
 0x19d   : > { %v9847_v59 = vor.u32 %v10840_v56, %v9846_v60 }
 0x19e   : > { %v1269_v44 = vunpack.c.l.bf16 %v1207_v53  ;;  %v1270_v46 = vunpack.c.h.bf16 %v1207_v53 }
 0x19f   : > { %2749 = vmatpush.bf16.msra.mxu3 %v9847_v59 }
 0x1a0   : > { %v1335_v52 = vadd.f32 %v11827_v5, %v1269_v44  ;;  %v1336_v54 = vadd.f32 %v11829_v7, %v1270_v46 }
 0x1a1   : > { %v1756_v10 = vpop.f32.mrf.mxu2 }
 0x1a2   : > { %v1845_v63 = vpop.f32.mrf.mxu3  ;;  %v1495_v0 = vmax.f32 %v1335_v52, 0.0  ;;  %v1496_v28 = vmax.f32 %v1336_v54, 0.0 }
 0x1a3   : > { %v12041_v3 = vadd.f32 %v1845_v63, %v1756_v10  ;;  %v1158_v19 = vpop.f32.mrf.mxu1 }
 0x1a4   : > { %v12043_v4 = vpop.f32.mrf.mxu0  ;;  %v1539_v8 = vpack.c.bf16 %v1495_v0, %v1493_v62  ;;  %v12045_v9 = vpack.c.bf16 %v1496_v28, %v1494_v2  ;;  %v1208_v1 = vpack.c.bf16 %v1158_v19, %v11955_v17  ;;  %v9750_v28 = vld [vmem:[%s16461_s25 + $0x10] sm:$0xf]  ;;  %v10816_v19 = vld [vmem:[%s16461_s25 + $0x14] sm:$0xf0] }
 0x1a6   : > { %1798 = vmatmul.bf16.gmra.mxu2 %v1539_v8  ;;  %2030 = vmatmul.bf16.gmra.mxu1 %v11863_v22  ;;  %v1271_v51 = vunpack.c.l.bf16 %v1208_v1  ;;  %v1272_v13 = vunpack.c.h.bf16 %v1208_v1  ;;  %v10839_v22 = vld [vmem:[%s16461_s25 + $0xd4] sm:$0xf]  ;;  %v9751_v1 = vor.u32 %v10816_v19, %v9750_v28 }
 0x1a7   : > { %1887 = vmatmul.bf16.gmra.mxu3 %v12045_v9  ;;  %1976 = vmatmul.bf16.gmra.mxu0 %v1539_v8  ;;  %v9851_v47 = vor.u32 %v10839_v22, %v9848_v30 }
 0x1a8   : > { %v1337_v36 = vadd.f32 %v11827_v5, %v1271_v51  ;;  %v1338_v41 = vadd.f32 %v11829_v7, %v1272_v13  ;;  %2664 = vmatpush.bf16.msra.mxu2 %v9751_v1 }
 0x1a9   : > { %v1759_v12 = vpop.f32.mrf.mxu2  ;;  %2927 = vmatpush.bf16.msrb.mxu1 %v9851_v47 }
 0x1aa   : > { %v1848_v26 = vpop.f32.mrf.mxu3  ;;  %v1497_v42 = vmax.f32 %v1337_v36, 0.0  ;;  %v1498_v43 = vmax.f32 %v1338_v41, 0.0 }
 0x1ab   : > { %v12056_v29 = vadd.f32 %v1848_v26, %v1759_v12  ;;  %v1160_v17 = vpop.f32.mrf.mxu1 }
 0x1ac   : > { %v1209_v40 = vpack.c.bf16 %v1160_v17, %v11971_v61  ;;  %v12065_v34 = vpop.f32.mrf.mxu0 }
 0x1ae   : > { %v1273_v37 = vunpack.c.l.bf16 %v1209_v40  ;;  %v1274_v6 = vunpack.c.h.bf16 %v1209_v40 }
 0x1b0   : > { %v1339_v35 = vadd.f32 %v11827_v5, %v1273_v37  ;;  %v1340_v50 = vadd.f32 %v11829_v7, %v1274_v6 }
 0x1b1   : > { %v1761_v53 = vpop.f32.mrf.mxu2 }
 0x1b2   : > { %v1850_v44 = vpop.f32.mrf.mxu3  ;;  %v1499_v61 = vmax.f32 %v1339_v35, 0.0  ;;  %v1500_v46 = vmax.f32 %v1340_v50, 0.0 }
 0x1b3   : > { %v12071_v52 = vadd.f32 %v1850_v44, %v1761_v53  ;;  %v1163_v54 = vpop.f32.mrf.mxu1 }
 0x1b4   : > { %v12073_v60 = vpop.f32.mrf.mxu0  ;;  %v1541_v56 = vpack.c.bf16 %v1499_v61, %v1497_v42  ;;  %v12075_v10 = vpack.c.bf16 %v1500_v46, %v1498_v43  ;;  %v1210_v59 = vpack.c.bf16 %v1163_v54, %v11989_v24 }
 0x1b6   : > { %1803 = vmatmul.bf16.gmra.mxu2 %v1541_v56  ;;  %2035 = vmatmul.bf16.gmra.mxu1 %v11877_v48  ;;  %v1275_v2 = vunpack.c.l.bf16 %v1210_v59  ;;  %v1276_v63 = vunpack.c.h.bf16 %v1210_v59  ;;  %v9776_v59 = vld [vmem:[%s16461_s25 + $0x48] sm:$0xf0] }
 0x1b7   : > { %1892 = vmatmul.bf16.gmra.mxu3 %v12075_v10  ;;  %1981 = vmatmul.bf16.gmra.mxu0 %v1541_v56  ;;  %v10821_v56 = vld [vmem:[%s16461_s25 + $0x44] sm:$0xf] }
 0x1b8   : > { %v1341_v51 = vadd.f32 %v11827_v5, %v1275_v2  ;;  %v1342_v13 = vadd.f32 %v11829_v7, %v1276_v63  ;;  %v9779_v2 = vor.u32 %v10821_v56, %v9776_v59  ;;  %v9840_v63 = vld [vmem:[%s16461_s25 + $0xc8] sm:$0xf0] }
 0x1b9   : > { %v1764_v62 = vpop.f32.mrf.mxu2 }
 0x1ba   : > { %v1853_v0 = vpop.f32.mrf.mxu3  ;;  %v1501_v40 = vmax.f32 %v1341_v51, 0.0  ;;  %v1502_v47 = vmax.f32 %v1342_v13, 0.0  ;;  %2839 = vmatpush.bf16.msra.mxu0 %v9779_v2 }
 0x1bb   : > { %v12086_v8 = vadd.f32 %v1853_v0, %v1764_v62  ;;  %v1165_v24 = vpop.f32.mrf.mxu1 }
 0x1bc   : > { %v1211_v48 = vpack.c.bf16 %v1165_v24, %v12011_v21  ;;  %v12089_v12 = vpop.f32.mrf.mxu0  ;;  %v10838_v21 = vld [vmem:[%s16461_s25 + $0xc4] sm:$0xf0] }
 0x1bd   : > { %v9839_v30 = vor.u32 %v10838_v21, %v9838_v23 }
 0x1be   : > { %v1277_v26 = vunpack.c.l.bf16 %v1211_v48  ;;  %v1278_v27 = vunpack.c.h.bf16 %v1211_v48 }
 0x1bf   : > { %2750 = vmatpush.bf16.msra.mxu3 %v9839_v30 }
 0x1c0   : > { %v1343_v18 = vadd.f32 %v11827_v5, %v1277_v26  ;;  %v1344_v17 = vadd.f32 %v11829_v7, %v1278_v27 }
 0x1c1   : > { %v1766_v22 = vpop.f32.mrf.mxu2 }
 0x1c2   : > { %v1855_v36 = vpop.f32.mrf.mxu3  ;;  %v1503_v41 = vmax.f32 %v1343_v18, 0.0  ;;  %v1504_v37 = vmax.f32 %v1344_v17, 0.0 }
 0x1c3   : > { %v12101_v6 = vadd.f32 %v1855_v36, %v1766_v22  ;;  %v1168_v35 = vpop.f32.mrf.mxu1 }
 0x1c4   : > { %v12103_v50 = vpop.f32.mrf.mxu0  ;;  %v1543_v53 = vpack.c.bf16 %v1503_v41, %v1501_v40  ;;  %v12105_v42 = vpack.c.bf16 %v1504_v37, %v1502_v47  ;;  %v1212_v43 = vpack.c.bf16 %v1168_v35, %v11888_v58 }
 0x1c6   : > { %1808 = vmatmul.bf16.gmra.mxu2 %v1543_v53  ;;  %2040 = vmatmul.bf16.gmra.mxu1 %v11897_v14  ;;  %v1279_v61 = vunpack.c.l.bf16 %v1212_v43  ;;  %v1280_v46 = vunpack.c.h.bf16 %v1212_v43  ;;  %v10837_v14 = vld [vmem:[%s16461_s25 + $0xc4] sm:$0xf] }
 0x1c7   : > { %1897 = vmatmul.bf16.gmra.mxu3 %v12105_v42  ;;  %1986 = vmatmul.bf16.gmra.mxu0 %v1543_v53  ;;  %v9843_v19 = vor.u32 %v10837_v14, %v9840_v63 }
 0x1c8   : > { %v1345_v24 = vadd.f32 %v11827_v5, %v1279_v61  ;;  %v1346_v1 = vadd.f32 %v11829_v7, %v1280_v46  ;;  %v10814_v61 = vld [vmem:[%s16461_s25 + $0x4] sm:$0xf0] }
 0x1c9   : > { %v1769_v44 = vpop.f32.mrf.mxu2  ;;  %2928 = vmatpush.bf16.msrb.mxu1 %v9843_v19  ;;  %v9830_v19 = vld [vmem:[%s16461_s25 + $0xb0] sm:$0xf] }
 0x1ca   : > { %v1858_v54 = vpop.f32.mrf.mxu3  ;;  %v1505_v18 = vmax.f32 %v1345_v24, 0.0  ;;  %v1506_v17 = vmax.f32 %v1346_v1, 0.0 }
 0x1cb   : > { %v12116_v62 = vadd.f32 %v1858_v54, %v1769_v44  ;;  %v1170_v58 = vpop.f32.mrf.mxu1  ;;  %v9742_v44 = vld [vmem:[%s16461_s25] sm:$0xf] }
 0x1cc   : > { %v1213_v0 = vpack.c.bf16 %v1170_v58, %v11899_v15  ;;  %v12125_v28 = vpop.f32.mrf.mxu0  ;;  %v9743_v54 = vor.u32 %v10814_v61, %v9742_v44  ;;  %v9822_v61 = vld [vmem:[%s16461_s25 + $0xa0] sm:$0xf] }
 0x1ce   : > { %v1281_v48 = vunpack.c.l.bf16 %v1213_v0  ;;  %v1282_v51 = vunpack.c.h.bf16 %v1213_v0  ;;  %2665 = vmatpush.bf16.msra.mxu2 %v9743_v54  ;;  %v10817_v54 = vld [vmem:[%s16461_s25 + $0x24] sm:$0xf] }
 0x1d0   : > { %v1347_v13 = vadd.f32 %v11827_v5, %v1281_v48  ;;  %v1348_v26 = vadd.f32 %v11829_v7, %v1282_v51 }
 0x1d1   : > { %v1771_v27 = vpop.f32.mrf.mxu2 }
 0x1d2   : > { %v1860_v23 = vpop.f32.mrf.mxu3  ;;  %v1507_v15 = vmax.f32 %v1347_v13, 0.0  ;;  %v1508_v21 = vmax.f32 %v1348_v26, 0.0 }
 0x1d3   : > { %v12131_v22 = vadd.f32 %v1860_v23, %v1771_v27  ;;  %v1173_v30 = vpop.f32.mrf.mxu1 }
 0x1d4   : > { %v12133_v40 = vpop.f32.mrf.mxu0  ;;  %v1545_v47 = vpack.c.bf16 %v1507_v15, %v1505_v18  ;;  %v12135_v36 = vpack.c.bf16 %v1508_v21, %v1506_v17  ;;  %v1214_v41 = vpack.c.bf16 %v1173_v30, %v11915_v33 }
 0x1d6   : > { %1813 = vmatmul.bf16.gmra.mxu2 %v1545_v47  ;;  %2045 = vmatmul.bf16.gmra.mxu1 %v11927_v45  ;;  %v1283_v35 = vunpack.c.l.bf16 %v1214_v41  ;;  %v1284_v53 = vunpack.c.h.bf16 %v1214_v41  ;;  %v9768_v41 = vld [vmem:[%s16461_s25 + $0x38] sm:$0xf0] }
 0x1d7   : > { %1902 = vmatmul.bf16.gmra.mxu3 %v12135_v36  ;;  %1991 = vmatmul.bf16.gmra.mxu0 %v1545_v47  ;;  %v10819_v47 = vld [vmem:[%s16461_s25 + $0x34] sm:$0xf] }
 0x1d8   : > { %v1349_v59 = vadd.f32 %v11827_v5, %v1283_v35  ;;  %v1350_v58 = vadd.f32 %v11829_v7, %v1284_v53 }
 0x1d9   : > { %v1774_v37 = vpop.f32.mrf.mxu2 }
 0x1da   : > { %v1863_v43 = vpop.f32.mrf.mxu3  ;;  %v1509_v48 = vmax.f32 %v1349_v59, 0.0  ;;  %v1510_v51 = vmax.f32 %v1350_v58, 0.0  ;;  %v10835_v58 = vld [vmem:[%s16461_s25 + $0xb4] sm:$0xf] }
 0x1db   : > { %v12146_v46 = vadd.f32 %v1863_v43, %v1774_v37  ;;  %v1175_v33 = vpop.f32.mrf.mxu1  ;;  %v9771_v37 = vor.u32 %v10819_v47, %v9768_v41 }
 0x1dc   : > { %v1215_v45 = vpack.c.bf16 %v1175_v33, %v11932_v49  ;;  %v12149_v56 = vpop.f32.mrf.mxu0  ;;  %v10836_v49 = vld [vmem:[%s16461_s25 + $0xb4] sm:$0xf0]  ;;  %v10834_v33 = vld [vmem:[%s16461_s25 + $0xa4] sm:$0xf0] }
 0x1dd   : > { %v9831_v1 = vor.u32 %v10836_v49, %v9830_v19  ;;  %2840 = vmatpush.bf16.msra.mxu0 %v9771_v37 }
 0x1de   : > { %v1285_v2 = vunpack.c.l.bf16 %v1215_v45  ;;  %v1286_v14 = vunpack.c.h.bf16 %v1215_v45 }
 0x1df   : > { %2751 = vmatpush.bf16.msra.mxu3 %v9831_v1 }
 0x1e0   : > { %v1351_v63 = vadd.f32 %v11827_v5, %v1285_v2  ;;  %v1352_v0 = vadd.f32 %v11829_v7, %v1286_v14  ;;  %v9832_v2 = vld [vmem:[%s16461_s25 + $0xb8] sm:$0xf0]  ;;  %v9823_v14 = vor.u32 %v10834_v33, %v9822_v61  ;;  %v9806_v61 = vld [vmem:[%s16461_s25 + $0x80] sm:$0xf]  ;;  %v10830_v33 = vld [vmem:[%s16461_s25 + $0x84] sm:$0xf0] }
 0x1e1   : > { %v1776_v24 = vpop.f32.mrf.mxu2 }
 0x1e2   : > { %v1865_v13 = vpop.f32.mrf.mxu3  ;;  %v1511_v26 = vmax.f32 %v1351_v63, 0.0  ;;  %v1512_v27 = vmax.f32 %v1352_v0, 0.0  ;;  %v9760_v63 = vld [vmem:[%s16461_s25 + $0x28] sm:$0xf0]  ;;  %v9835_v0 = vor.u32 %v10835_v58, %v9832_v2 }
 0x1e3   : > { %v12161_v18 = vadd.f32 %v1865_v13, %v1776_v24  ;;  %v1178_v17 = vpop.f32.mrf.mxu1  ;;  %v9763_v19 = vor.u32 %v10817_v54, %v9760_v63  ;;  %2752 = vmatpush.bf16.msra.mxu3 %v9823_v14  ;;  %v10815_v13 = vld [vmem:[%s16461_s25 + $0x14] sm:$0xf]  ;;  %v10813_v54 = vld [vmem:[%s16461_s25 + $0x4] sm:$0xf]  ;;  %v9807_v14 = vor.u32 %v10830_v33, %v9806_v61  ;;  %v9744_v63 = vld [vmem:[%s16461_s25 + $0x8] sm:$0xf0] }
 0x1e4   : > { %v12163_v23 = vpop.f32.mrf.mxu0  ;;  %v1547_v15 = vpack.c.bf16 %v1511_v26, %v1509_v48  ;;  %v12165_v21 = vpack.c.bf16 %v1512_v27, %v1510_v51  ;;  %v1216_v30 = vpack.c.bf16 %v1178_v17, %v11953_v16  ;;  %2929 = vmatpush.bf16.msrb.mxu1 %v9835_v0  ;;  %v9814_v48 = vld [vmem:[%s16461_s25 + $0x90] sm:$0xf]  ;;  %v10832_v51 = vld [vmem:[%s16461_s25 + $0x94] sm:$0xf0]  ;;  %v9747_v0 = vor.u32 %v10813_v54, %v9744_v63 }
 0x1e5   : > { %2841 = vmatpush.bf16.msra.mxu0 %v9763_v19  ;;  %v9815_v17 = vor.u32 %v10832_v51, %v9814_v48 }
 0x1e6   : > { %1818 = vmatmul.bf16.gmra.mxu2 %v1547_v15  ;;  %2050 = vmatmul.bf16.gmra.mxu1 %v11957_v25  ;;  %v1287_v53 = vunpack.c.l.bf16 %v1216_v30  ;;  %v1288_v43 = vunpack.c.h.bf16 %v1216_v30 }
 0x1e7   : > { %1907 = vmatmul.bf16.gmra.mxu3 %v12165_v21  ;;  %1996 = vmatmul.bf16.gmra.mxu0 %v1547_v15  ;;  %v9752_v15 = vld [vmem:[%s16461_s25 + $0x18] sm:$0xf0] }
 0x1e8   : > { %v1353_v49 = vadd.f32 %v11827_v5, %v1287_v53  ;;  %v9755_v47 = vor.u32 %v10815_v13, %v9752_v15  ;;  %2753 = vmatpush.bf16.msra.mxu3 %v9815_v17 }
 0x1e9   : > { %v1779_v35 = vpop.f32.mrf.mxu2 }
 0x1ea   : > { %v1868_v44 = vpop.f32.mrf.mxu3  ;;  %v1513_v41 = vmax.f32 %v1353_v49, 0.0  ;;  %2842 = vmatpush.bf16.msra.mxu0 %v9755_v47  ;;  %v2136_v49 = vld [vmem:[#allocation1] sm:$0xff] }
 0x1eb   : > { %v12176_v16 = vadd.f32 %v1868_v44, %v1779_v35  ;;  %v1180_v25 = vpop.f32.mrf.mxu1 }
 0x1ec   : > { %v1217_v45 = vpack.c.bf16 %v1180_v25, %v11969_v32  ;;  %v12188_v59 = vpop.f32.mrf.mxu0  ;;  %v1354_v32 = vadd.f32 %v11829_v7, %v1288_v43  ;;  %2754 = vmatpush.bf16.msra.mxu3 %v9807_v14 }
 0x1ee   : > { %v1289_v24 = vunpack.c.l.bf16 %v1217_v45  ;;  %v1290_v1 = vunpack.c.h.bf16 %v1217_v45  ;;  %v1514_v37 = vmax.f32 %v1354_v32, 0.0  ;;  %v2137_v32 = vld [vmem:[#allocation1 + $0x9] sm:$0xff]  ;;  %2843 = vmatpush.bf16.msra.mxu0 %v9747_v0  ;;  %v2138_v0 = vpack.i.b16 %v2136_v49, %v2136_v49  ;;  %v10833_v49 = vld [vmem:[%s16461_s25 + $0xa4] sm:$0xf] }
 0x1f0   : > { %v1355_v26 = vadd.f32 %v11827_v5, %v1289_v24  ;;  %v1356_v27 = vadd.f32 %v11829_v7, %v1290_v1  ;;  %v3046_v24 = vld [vmem:[%s16462_s5] sm:$0x3]  ;;  %s16557_s5 = sld [smem:[#allocation41_spill]] (%p11452_p4) }
 0x1f1   : > { %v1781_v30 = vpop.f32.mrf.mxu2  ;;  %3048 = vst [vmem:[#allocation1] ss:$9 sm:$0xff] %v3046_v24 }
 0x1f2   : > { %v1870_v35 = vpop.f32.mrf.mxu3  ;;  %v1515_v53 = vmax.f32 %v1355_v26, 0.0  ;;  %v1516_v43 = vmax.f32 %v1356_v27, 0.0 }
 0x1f3   : > { %v12215_v44 = vadd.f32 %v1870_v35, %v1781_v30  ;;  %v1183_v25 = vpop.f32.mrf.mxu1 }
 0x1f4   : > { %v12226_v45 = vpop.f32.mrf.mxu0  ;;  %v1549_v58 = vpack.c.bf16 %v1515_v53, %v1513_v41  ;;  %v12228_v2 = vpack.c.bf16 %v1516_v43, %v1514_v37  ;;  %v1218_v19 = vpack.c.bf16 %v1183_v25, %v11987_v57  ;;  %v9926_v57 = vld [vmem:[%s16463_s28 + $0x70] sm:$0xf] }
 0x1f6   : > { %1823 = vmatmul.bf16.gmra.mxu2 %v1549_v58  ;;  %2055 = vmatmul.bf16.gmra.mxu1 %v11983_v55  ;;  %v10876_v55 = vld [vmem:[%s16463_s28 + $0x74] sm:$0xf0]  ;;  %v1291_v48 = vunpack.c.l.bf16 %v1218_v19  ;;  %v1292_v51 = vunpack.c.h.bf16 %v1218_v19 }
 0x1f7   : > { %1912 = vmatmul.bf16.gmra.mxu3 %v12228_v2  ;;  %2001 = vmatmul.bf16.gmra.mxu0 %v1549_v58  ;;  %v9927_v26 = vor.u32 %v10876_v55, %v9926_v57 }
 0x1f8   : > { %v1357_v47 = vadd.f32 %v11827_v5, %v1291_v48  ;;  %v1358_v41 = vadd.f32 %v11829_v7, %v1292_v51 }
 0x1f9   : > { %v1784_v1 = vpop.f32.mrf.mxu2  ;;  %3587 = vmatpush.bf16.msrb.mxu2 %v9927_v26 }
 0x1fa   : > { %v1873_v13 = vpop.f32.mrf.mxu3  ;;  %v1517_v61 = vmax.f32 %v1357_v47, 0.0  ;;  %v1518_v33 = vmax.f32 %v1358_v41, 0.0 }
 0x1fb   : > { %v12245_v27 = vadd.f32 %v1873_v13, %v1784_v1  ;;  %v1185_v17 = vpop.f32.mrf.mxu1  ;;  %v2141_v1 = vpack.i.b16 %v2137_v32, %v2137_v32 }
 0x1fc   : > { %v1219_v15 = vpack.c.bf16 %v1185_v17, %v12009_v20  ;;  %v12248_v30 = vpop.f32.mrf.mxu0 }
 0x1fd   : > { %v2143_v48 = vperm.slane %v2141_v1, 0 }
 0x1fe   : > { %v1293_v37 = vunpack.c.l.bf16 %v1219_v15  ;;  %v1294_v35 = vunpack.c.h.bf16 %v1219_v15 }
 0x1ff   : > { %v12274_v47 = vunpack.c.l.bf16 %v2143_v48 }
 0x200   : > { %v1359_v53 = vadd.f32 %v11827_v5, %v1293_v37  ;;  %v1360_v43 = vadd.f32 %v11829_v7, %v1294_v35  ;;  %v2140_v7 = vperm.slane %v2138_v0, 0 }
 0x201   : > { %v1786_v25 = vpop.f32.mrf.mxu2 }
 0x202   : > { %v1875_v54 = vpop.f32.mrf.mxu3  ;;  %v1519_v58 = vmax.f32 %v1359_v53, 0.0  ;;  %v1520_v14 = vmax.f32 %v1360_v43, 0.0 }
 0x203   : > { %v12254_v20 = vadd.f32 %v1875_v54, %v1786_v25  ;;  %v2021_v63 = vpop.f32.mrf.mxu1 }
 0x204   : > { %v12256_v19 = vpop.f32.mrf.mxu0  ;;  %v2022_v24 = vadd.f32 %v2021_v63, %v12013_v11  ;;  %v1551_v57 = vpack.c.bf16 %v1519_v58, %v1517_v61  ;;  %v12259_v55 = vpack.c.bf16 %v1520_v14, %v1518_v33  ;;  %v9824_v11 = vld [vmem:[%s16461_s25 + $0xa8] sm:$0xf0] }
 0x205   : > { %v9827_v51 = vor.u32 %v10833_v49, %v9824_v11 }
 0x206   : > { %1828 = vmatmul.bf16.gmra.mxu2 %v1551_v57  ;;  %2060 = vmatmul.bf16.gmra.mxu1 %v12015_v31  ;;  %v2101_v5 = vpack.c.bf16 %v2022_v24, %v12026_v38  ;;  %v12270_v31 = vunpack.c.l.bf16 %v2140_v7 }
 0x207   : > { %1917 = vmatmul.bf16.gmra.mxu3 %v12259_v55  ;;  %2006 = vmatmul.bf16.gmra.mxu0 %v1551_v57 }
 0x208   : > { %v2144_v26 = vunpack.c.l.bf16 %v2101_v5  ;;  %2930 = vmatpush.bf16.msrb.mxu1 %v9827_v51  ;;  %v2145_v15 = vunpack.c.h.bf16 %v2101_v5 }
 0x209   : > { %v1789_v32 = vpop.f32.mrf.mxu2 }
 0x20a   : > { %v1878_v13 = vpop.f32.mrf.mxu3  ;;  %v2210_v53 = vadd.f32 %v12270_v31, %v2144_v26  ;;  %v2211_v43 = vadd.f32 %v12274_v47, %v2145_v15 }
 0x20b   : > { %v12272_v38 = vadd.f32 %v1878_v13, %v1789_v32  ;;  %v2023_v17 = vpop.f32.mrf.mxu1  ;;  %v9918_v32 = vld [vmem:[%s16463_s28 + $0x60] sm:$0xf] }
 0x20c   : > { %v12276_v41 = vpop.f32.mrf.mxu0  ;;  %v2024_v37 = vadd.f32 %v2023_v17, %v12029_v39  ;;  %v2370_v63 = vmax.f32 %v2210_v53, 0.0  ;;  %v2371_v1 = vmax.f32 %v2211_v43, 0.0 }
 0x20e   : > { %v2102_v35 = vpack.c.bf16 %v2024_v37, %v12041_v3 }
 0x210   : > { %v2146_v25 = vunpack.c.l.bf16 %v2102_v35  ;;  %v2147_v61 = vunpack.c.h.bf16 %v2102_v35 }
 0x211   : > { %v1791_v33 = vpop.f32.mrf.mxu2 }
 0x212   : > { %v2212_v54 = vadd.f32 %v12270_v31, %v2146_v25  ;;  %v2213_v58 = vadd.f32 %v12274_v47, %v2147_v61  ;;  %v1880_v14 = vpop.f32.mrf.mxu3 }
 0x213   : > { %v12284_v0 = vadd.f32 %v1880_v14, %v1791_v33  ;;  %v2026_v24 = vpop.f32.mrf.mxu1 }
 0x214   : > { %v2372_v39 = vmax.f32 %v2212_v54, 0.0  ;;  %v2373_v57 = vmax.f32 %v2213_v58, 0.0  ;;  %v12286_v3 = vpop.f32.mrf.mxu0  ;;  %v2027_v5 = vadd.f32 %v2026_v24, %v12043_v4  ;;  %v10874_v4 = vld [vmem:[%s16463_s28 + $0x64] sm:$0xf0] }
 0x215   : > { %v9919_v13 = vor.u32 %v10874_v4, %v9918_v32  ;;  %v10831_v32 = vld [vmem:[%s16461_s25 + $0x94] sm:$0xf] }
 0x216   : > { %v2434_v7 = vpack.c.bf16 %v2372_v39, %v2370_v63  ;;  %v12289_v48 = vpack.c.bf16 %v2373_v57, %v2371_v1  ;;  %2065 = vmatmul.bf16.gmra.mxu1 %v12045_v9  ;;  %v2103_v49 = vpack.c.bf16 %v2027_v5, %v12056_v29 }
 0x217   : > { %3588 = vmatpush.bf16.msrb.mxu2 %v9919_v13 }
 0x218   : > { %2666 = vmatmul.bf16.vlgmr.msra.gmra.mxu2 %v2434_v7  ;;  %2755 = vmatmul.bf16.vlgmr.msra.gmra.mxu3 %v12289_v48  ;;  %v2148_v26 = vunpack.c.l.bf16 %v2103_v49  ;;  %v2149_v29 = vunpack.c.h.bf16 %v2103_v49 }
 0x219   : > { %2844 = vmatmul.bf16.vlgmr.msra.gmra.mxu0 %v2434_v7  ;;  %v1794_v11 = vpop.f32.mrf.mxu2 }
 0x21a   : > { %v1883_v51 = vpop.f32.mrf.mxu3  ;;  %v2214_v53 = vadd.f32 %v12270_v31, %v2148_v26  ;;  %v2215_v61 = vadd.f32 %v12274_v47, %v2149_v29 }
 0x21b   : > { %v12300_v17 = vadd.f32 %v1883_v51, %v1794_v11  ;;  %v2028_v9 = vpop.f32.mrf.mxu1 }
 0x21c   : > { %v12302_v15 = vpop.f32.mrf.mxu0  ;;  %v2029_v37 = vadd.f32 %v2028_v9, %v12065_v34  ;;  %v2374_v1 = vmax.f32 %v2214_v53, 0.0  ;;  %v2375_v57 = vmax.f32 %v2215_v61, 0.0 }
 0x21e   : > { %v2104_v35 = vpack.c.bf16 %v2029_v37, %v12071_v52 }
 0x220   : > { %v2150_v43 = vunpack.c.l.bf16 %v2104_v35  ;;  %v2151_v25 = vunpack.c.h.bf16 %v2104_v35 }
 0x221   : > { %v1796_v33 = vpop.f32.mrf.mxu2 }
 0x222   : > { %v1885_v54 = vpop.f32.mrf.mxu3  ;;  %v2216_v58 = vadd.f32 %v12270_v31, %v2150_v43  ;;  %v2217_v14 = vadd.f32 %v12274_v47, %v2151_v25 }
 0x223   : > { %v12310_v63 = vadd.f32 %v1885_v54, %v1796_v33  ;;  %v2031_v24 = vpop.f32.mrf.mxu1 }
 0x224   : > { %v12312_v34 = vpop.f32.mrf.mxu0  ;;  %v2032_v52 = vadd.f32 %v2031_v24, %v12073_v60  ;;  %v2376_v39 = vmax.f32 %v2216_v58, 0.0  ;;  %v2377_v5 = vmax.f32 %v2217_v14, 0.0  ;;  %v9816_v60 = vld [vmem:[%s16461_s25 + $0x98] sm:$0xf0] }
 0x225   : > { %v9819_v51 = vor.u32 %v10831_v32, %v9816_v60 }
 0x226   : > { %2070 = vmatmul.bf16.gmra.mxu1 %v12075_v10  ;;  %v2436_v7 = vpack.c.bf16 %v2376_v39, %v2374_v1  ;;  %v12316_v49 = vpack.c.bf16 %v2377_v5, %v2375_v57  ;;  %v2105_v11 = vpack.c.bf16 %v2032_v52, %v12086_v8 }
 0x227   : > { %2931 = vmatpush.bf16.msrb.mxu1 %v9819_v51 }
 0x228   : > { %2671 = vmatmul.bf16.gmra.mxu2 %v2436_v7  ;;  %2760 = vmatmul.bf16.gmra.mxu3 %v12316_v49  ;;  %v2152_v13 = vunpack.c.l.bf16 %v2105_v11  ;;  %v2153_v8 = vunpack.c.h.bf16 %v2105_v11 }
 0x229   : > { %2849 = vmatmul.bf16.gmra.mxu0 %v2436_v7  ;;  %v1799_v4 = vpop.f32.mrf.mxu2 }
 0x22a   : > { %v1888_v10 = vpop.f32.mrf.mxu3  ;;  %v2218_v53 = vadd.f32 %v12270_v31, %v2152_v13  ;;  %v2219_v61 = vadd.f32 %v12274_v47, %v2153_v8 }
 0x22b   : > { %v12326_v26 = vadd.f32 %v1888_v10, %v1799_v4  ;;  %v2033_v9 = vpop.f32.mrf.mxu1  ;;  %v9910_v4 = vld [vmem:[%s16463_s28 + $0x50] sm:$0xf] }
 0x22c   : > { %v12328_v29 = vpop.f32.mrf.mxu0  ;;  %v2034_v37 = vadd.f32 %v2033_v9, %v12089_v12  ;;  %v2378_v52 = vmax.f32 %v2218_v53, 0.0  ;;  %v2379_v57 = vmax.f32 %v2219_v61, 0.0 }
 0x22e   : > { %v2106_v35 = vpack.c.bf16 %v2034_v37, %v12101_v6 }
 0x230   : > { %v2154_v43 = vunpack.c.l.bf16 %v2106_v35  ;;  %v2155_v25 = vunpack.c.h.bf16 %v2106_v35 }
 0x231   : > { %v1801_v33 = vpop.f32.mrf.mxu2 }
 0x232   : > { %v1890_v54 = vpop.f32.mrf.mxu3  ;;  %v2220_v58 = vadd.f32 %v12270_v31, %v2154_v43  ;;  %v2221_v14 = vadd.f32 %v12274_v47, %v2155_v25 }
 0x233   : > { %v12336_v24 = vadd.f32 %v1890_v54, %v1801_v33  ;;  %v2036_v1 = vpop.f32.mrf.mxu1 }
 0x234   : > { %v12338_v39 = vpop.f32.mrf.mxu0  ;;  %v2037_v12 = vadd.f32 %v2036_v1, %v12103_v50  ;;  %v2380_v6 = vmax.f32 %v2220_v58, 0.0  ;;  %v2381_v5 = vmax.f32 %v2221_v14, 0.0  ;;  %v10872_v50 = vld [vmem:[%s16463_s28 + $0x54] sm:$0xf0] }
 0x236   : > { %2075 = vmatmul.bf16.gmra.mxu1 %v12105_v42  ;;  %v2438_v7 = vpack.c.bf16 %v2380_v6, %v2378_v52  ;;  %v12342_v11 = vpack.c.bf16 %v2381_v5, %v2379_v57  ;;  %v2107_v32 = vpack.c.bf16 %v2037_v12, %v12116_v62  ;;  %v9911_v42 = vor.u32 %v10872_v50, %v9910_v4  ;;  %v10829_v4 = vld [vmem:[%s16461_s25 + $0x84] sm:$0xf] }
 0x238   : > { %2676 = vmatmul.bf16.gmra.mxu2 %v2438_v7  ;;  %2765 = vmatmul.bf16.gmra.mxu3 %v12342_v11  ;;  %v2156_v10 = vunpack.c.l.bf16 %v2107_v32  ;;  %v2157_v62 = vunpack.c.h.bf16 %v2107_v32 }
 0x239   : > { %2854 = vmatmul.bf16.gmra.mxu0 %v2438_v7  ;;  %v1804_v60 = vpop.f32.mrf.mxu2  ;;  %3589 = vmatpush.bf16.msrb.mxu2 %v9911_v42 }
 0x23a   : > { %v1893_v51 = vpop.f32.mrf.mxu3  ;;  %v2222_v53 = vadd.f32 %v12270_v31, %v2156_v10  ;;  %v2223_v61 = vadd.f32 %v12274_v47, %v2157_v62 }
 0x23b   : > { %v12352_v13 = vadd.f32 %v1893_v51, %v1804_v60  ;;  %v2038_v9 = vpop.f32.mrf.mxu1 }
 0x23c   : > { %v12354_v8 = vpop.f32.mrf.mxu0  ;;  %v2039_v37 = vadd.f32 %v2038_v9, %v12125_v28  ;;  %v2382_v12 = vmax.f32 %v2222_v53, 0.0  ;;  %v2383_v57 = vmax.f32 %v2223_v61, 0.0 }
 0x23e   : > { %v2108_v35 = vpack.c.bf16 %v2039_v37, %v12131_v22 }
 0x240   : > { %v2158_v43 = vunpack.c.l.bf16 %v2108_v35  ;;  %v2159_v25 = vunpack.c.h.bf16 %v2108_v35 }
 0x241   : > { %v1806_v33 = vpop.f32.mrf.mxu2 }
 0x242   : > { %v1895_v54 = vpop.f32.mrf.mxu3  ;;  %v2224_v58 = vadd.f32 %v12270_v31, %v2158_v43  ;;  %v2225_v14 = vadd.f32 %v12274_v47, %v2159_v25 }
 0x243   : > { %v12362_v1 = vadd.f32 %v1895_v54, %v1806_v33  ;;  %v2041_v52 = vpop.f32.mrf.mxu1 }
 0x244   : > { %v12364_v28 = vpop.f32.mrf.mxu0  ;;  %v2042_v22 = vadd.f32 %v2041_v52, %v12133_v40  ;;  %v2384_v6 = vmax.f32 %v2224_v58, 0.0  ;;  %v2385_v5 = vmax.f32 %v2225_v14, 0.0  ;;  %v9808_v40 = vld [vmem:[%s16461_s25 + $0x88] sm:$0xf0]  ;;  %s16556_s25 = sld [smem:[#allocation4_spill]] (%p11452_p4) }
 0x245   : > { %v9811_v51 = vor.u32 %v10829_v4, %v9808_v40 }
 0x246   : > { %2080 = vmatmul.bf16.gmra.mxu1 %v12135_v36  ;;  %v2440_v7 = vpack.c.bf16 %v2384_v6, %v2382_v12  ;;  %v12368_v32 = vpack.c.bf16 %v2385_v5, %v2383_v57  ;;  %v2109_v60 = vpack.c.bf16 %v2042_v22, %v12146_v46 }
 0x247   : > { %2932 = vmatpush.bf16.msrb.mxu1 %v9811_v51 }
 0x248   : > { %2681 = vmatmul.bf16.gmra.mxu2 %v2440_v7  ;;  %2770 = vmatmul.bf16.gmra.mxu3 %v12368_v32  ;;  %v2160_v42 = vunpack.c.l.bf16 %v2109_v60  ;;  %v2161_v46 = vunpack.c.h.bf16 %v2109_v60 }
 0x249   : > { %2859 = vmatmul.bf16.gmra.mxu0 %v2440_v7  ;;  %v1809_v50 = vpop.f32.mrf.mxu2 }
 0x24a   : > { %v1898_v36 = vpop.f32.mrf.mxu3  ;;  %v2226_v53 = vadd.f32 %v12270_v31, %v2160_v42  ;;  %v2227_v61 = vadd.f32 %v12274_v47, %v2161_v46 }
 0x24b   : > { %v12378_v10 = vadd.f32 %v1898_v36, %v1809_v50  ;;  %v2043_v9 = vpop.f32.mrf.mxu1  ;;  %v9902_v50 = vld [vmem:[%s16463_s28 + $0x40] sm:$0xf] }
 0x24c   : > { %v12380_v62 = vpop.f32.mrf.mxu0  ;;  %v2044_v37 = vadd.f32 %v2043_v9, %v12149_v56  ;;  %v2386_v22 = vmax.f32 %v2226_v53, 0.0  ;;  %v2387_v57 = vmax.f32 %v2227_v61, 0.0 }
 0x24e   : > { %v2110_v35 = vpack.c.bf16 %v2044_v37, %v12161_v18 }
 0x250   : > { %v2162_v43 = vunpack.c.l.bf16 %v2110_v35  ;;  %v2163_v25 = vunpack.c.h.bf16 %v2110_v35 }
 0x251   : > { %v1811_v33 = vpop.f32.mrf.mxu2 }
 0x252   : > { %v1900_v54 = vpop.f32.mrf.mxu3  ;;  %v2228_v58 = vadd.f32 %v12270_v31, %v2162_v43  ;;  %v2229_v14 = vadd.f32 %v12274_v47, %v2163_v25 }
 0x253   : > { %v12388_v52 = vadd.f32 %v1900_v54, %v1811_v33  ;;  %v2046_v12 = vpop.f32.mrf.mxu1  ;;  %v9990_v33 = vld [vmem:[%s16463_s28 + $0xf0] sm:$0xf]  ;;  %v10892_v54 = vld [vmem:[%s16463_s28 + $0xf4] sm:$0xf0] }
 0x254   : > { %v12390_v6 = vpop.f32.mrf.mxu0  ;;  %v2047_v56 = vadd.f32 %v2046_v12, %v12163_v23  ;;  %v2388_v18 = vmax.f32 %v2228_v58, 0.0  ;;  %v2389_v5 = vmax.f32 %v2229_v14, 0.0  ;;  %v10870_v23 = vld [vmem:[%s16463_s28 + $0x44] sm:$0xf0]  ;;  %v9991_v14 = vor.u32 %v10892_v54, %v9990_v33 }
 0x256   : > { %2085 = vmatmul.bf16.gmra.mxu1 %v12165_v21  ;;  %v2442_v7 = vpack.c.bf16 %v2388_v18, %v2386_v22  ;;  %v12394_v60 = vpack.c.bf16 %v2389_v5, %v2387_v57  ;;  %v2111_v4 = vpack.c.bf16 %v2047_v56, %v12176_v16  ;;  %v9903_v21 = vor.u32 %v10870_v23, %v9902_v50 }
 0x257   : > { %3676 = vmatpush.bf16.msrb.mxu3 %v9991_v14 }
 0x258   : > { %2686 = vmatmul.bf16.gmra.mxu2 %v2442_v7  ;;  %2775 = vmatmul.bf16.gmra.mxu3 %v12394_v60  ;;  %v2164_v36 = vunpack.c.l.bf16 %v2111_v4  ;;  %v2165_v16 = vunpack.c.h.bf16 %v2111_v4 }
 0x259   : > { %2864 = vmatmul.bf16.gmra.mxu0 %v2442_v7  ;;  %v1814_v40 = vpop.f32.mrf.mxu2  ;;  %3590 = vmatpush.bf16.msrb.mxu2 %v9903_v21 }
 0x25a   : > { %v1903_v51 = vpop.f32.mrf.mxu3  ;;  %v2230_v53 = vadd.f32 %v12270_v31, %v2164_v36  ;;  %v2231_v61 = vadd.f32 %v12274_v47, %v2165_v16 }
 0x25b   : > { %v12404_v42 = vadd.f32 %v1903_v51, %v1814_v40  ;;  %v2048_v9 = vpop.f32.mrf.mxu1 }
 0x25c   : > { %v12406_v46 = vpop.f32.mrf.mxu0  ;;  %v2049_v37 = vadd.f32 %v2048_v9, %v12188_v59  ;;  %v2390_v18 = vmax.f32 %v2230_v53, 0.0  ;;  %v2391_v4 = vmax.f32 %v2231_v61, 0.0 }
 0x25e   : > { %v2112_v35 = vpack.c.bf16 %v2049_v37, %v12215_v44 }
 0x260   : > { %v2166_v43 = vunpack.c.l.bf16 %v2112_v35  ;;  %v2167_v25 = vunpack.c.h.bf16 %v2112_v35 }
 0x261   : > { %v1816_v58 = vpop.f32.mrf.mxu2 }
 0x262   : > { %v1905_v59 = vpop.f32.mrf.mxu3  ;;  %v2232_v12 = vadd.f32 %v12270_v31, %v2166_v43  ;;  %v2233_v44 = vadd.f32 %v12274_v47, %v2167_v25 }
 0x263   : > { %v12420_v22 = vadd.f32 %v1905_v59, %v1816_v58  ;;  %v2051_v56 = vpop.f32.mrf.mxu1 }
 0x264   : > { %v12422_v57 = vpop.f32.mrf.mxu0  ;;  %v2052_v5 = vadd.f32 %v2051_v56, %v12226_v45  ;;  %v2392_v7 = vmax.f32 %v2232_v12, 0.0  ;;  %v2393_v40 = vmax.f32 %v2233_v44, 0.0 }
 0x266   : > { %2090 = vmatmul.bf16.gmra.mxu1 %v12228_v2  ;;  %v2444_v50 = vpack.c.bf16 %v2392_v7, %v2390_v18  ;;  %v12426_v23 = vpack.c.bf16 %v2393_v40, %v2391_v4  ;;  %v2113_v51 = vpack.c.bf16 %v2052_v5, %v12245_v27 }
 0x268   : > { %2691 = vmatmul.bf16.gmra.mxu2 %v2444_v50  ;;  %2780 = vmatmul.bf16.gmra.mxu3 %v12426_v23  ;;  %v2168_v9 = vunpack.c.l.bf16 %v2113_v51  ;;  %v2169_v37 = vunpack.c.h.bf16 %v2113_v51  ;;  %v9894_v51 = vld [vmem:[%s16463_s28 + $0x30] sm:$0xf] }
 0x269   : > { %2869 = vmatmul.bf16.gmra.mxu0 %v2444_v50  ;;  %v1819_v21 = vpop.f32.mrf.mxu2 }
 0x26a   : > { %v1908_v36 = vpop.f32.mrf.mxu3  ;;  %v2234_v43 = vadd.f32 %v12270_v31, %v2168_v9  ;;  %v2235_v61 = vadd.f32 %v12274_v47, %v2169_v37 }
 0x26b   : > { %v12430_v16 = vadd.f32 %v1908_v36, %v1819_v21  ;;  %v2053_v45 = vpop.f32.mrf.mxu1 }
 0x26c   : > { %v12432_v35 = vpop.f32.mrf.mxu0  ;;  %v2054_v2 = vadd.f32 %v2053_v45, %v12248_v30  ;;  %v2394_v44 = vmax.f32 %v2234_v43, 0.0  ;;  %v2395_v18 = vmax.f32 %v2235_v61, 0.0 }
 0x26e   : > { %v2114_v53 = vpack.c.bf16 %v2054_v2, %v12254_v20 }
 0x270   : > { %v2170_v27 = vunpack.c.l.bf16 %v2114_v53  ;;  %v2171_v25 = vunpack.c.h.bf16 %v2114_v53 }
 0x271   : > { %v1821_v33 = vpop.f32.mrf.mxu2 }
 0x272   : > { %v1910_v54 = vpop.f32.mrf.mxu3  ;;  %v2236_v58 = vadd.f32 %v12270_v31, %v2170_v27  ;;  %v2237_v14 = vadd.f32 %v12274_v47, %v2171_v25 }
 0x273   : > { %v12440_v59 = vadd.f32 %v1910_v54, %v1821_v33  ;;  %v2056_v12 = vpop.f32.mrf.mxu1  ;;  %v9982_v33 = vld [vmem:[%s16463_s28 + $0xe0] sm:$0xf]  ;;  %v10890_v54 = vld [vmem:[%s16463_s28 + $0xe4] sm:$0xf0] }
 0x274   : > { %v12442_v56 = vpop.f32.mrf.mxu0  ;;  %v2057_v30 = vadd.f32 %v2056_v12, %v12256_v19  ;;  %v2396_v20 = vmax.f32 %v2236_v58, 0.0  ;;  %v2397_v5 = vmax.f32 %v2237_v14, 0.0  ;;  %v10868_v19 = vld [vmem:[%s16463_s28 + $0x34] sm:$0xf0]  ;;  %v9983_v14 = vor.u32 %v10890_v54, %v9982_v33 }
 0x276   : > { %2095 = vmatmul.bf16.gmra.mxu1 %v12259_v55  ;;  %v2446_v7 = vpack.c.bf16 %v2396_v20, %v2394_v44  ;;  %v12446_v4 = vpack.c.bf16 %v2397_v5, %v2395_v18  ;;  %v2115_v40 = vpack.c.bf16 %v2057_v30, %v12272_v38  ;;  %v9895_v55 = vor.u32 %v10868_v19, %v9894_v51 }
 0x277   : > { %3677 = vmatpush.bf16.msrb.mxu3 %v9983_v14 }
 0x278   : > { %2696 = vmatmul.bf16.gmra.mxu2 %v2446_v7  ;;  %2785 = vmatmul.bf16.gmra.mxu3 %v12446_v4  ;;  %v2172_v36 = vunpack.c.l.bf16 %v2115_v40  ;;  %v2173_v38 = vunpack.c.h.bf16 %v2115_v40 }
 0x279   : > { %2874 = vmatmul.bf16.gmra.mxu0 %v2446_v7  ;;  %v1824_v50 = vpop.f32.mrf.mxu2  ;;  %3591 = vmatpush.bf16.msrb.mxu2 %v9895_v55 }
 0x27a   : > { %v1913_v21 = vpop.f32.mrf.mxu3  ;;  %v2238_v43 = vadd.f32 %v12270_v31, %v2172_v36  ;;  %v2239_v61 = vadd.f32 %v12274_v47, %v2173_v38 }
 0x27b   : > { %v12456_v9 = vadd.f32 %v1913_v21, %v1824_v50  ;;  %v2058_v45 = vpop.f32.mrf.mxu1 }
 0x27c   : > { %v12458_v37 = vpop.f32.mrf.mxu0  ;;  %v2059_v2 = vadd.f32 %v2058_v45, %v12276_v41  ;;  %v2398_v20 = vmax.f32 %v2238_v43, 0.0  ;;  %v2399_v40 = vmax.f32 %v2239_v61, 0.0 }
 0x27e   : > { %v2116_v53 = vpack.c.bf16 %v2059_v2, %v12284_v0 }
 0x280   : > { %v2174_v27 = vunpack.c.l.bf16 %v2116_v53  ;;  %v2175_v25 = vunpack.c.h.bf16 %v2116_v53 }
 0x281   : > { %v1826_v58 = vpop.f32.mrf.mxu2 }
 0x282   : > { %v1915_v41 = vpop.f32.mrf.mxu3  ;;  %v2240_v12 = vadd.f32 %v12270_v31, %v2174_v27  ;;  %v2241_v0 = vadd.f32 %v12274_v47, %v2175_v25 }
 0x283   : > { %v12472_v44 = vadd.f32 %v1915_v41, %v1826_v58  ;;  %v2061_v30 = vpop.f32.mrf.mxu1 }
 0x284   : > { %v12474_v18 = vpop.f32.mrf.mxu0  ;;  %v2062_v5 = vadd.f32 %v2061_v30, %v12286_v3  ;;  %v2400_v7 = vmax.f32 %v2240_v12, 0.0  ;;  %v2401_v50 = vmax.f32 %v2241_v0, 0.0 }
 0x286   : > { %2933 = vmatmul.bf16.vlgmr.msrb.gmra.mxu1 %v12289_v48  ;;  %v2448_v51 = vpack.c.bf16 %v2400_v7, %v2398_v20  ;;  %v12478_v19 = vpack.c.bf16 %v2401_v50, %v2399_v40  ;;  %v2117_v21 = vpack.c.bf16 %v2062_v5, %v12300_v17 }
 0x288   : > { %2701 = vmatmul.bf16.gmra.mxu2 %v2448_v51  ;;  %2790 = vmatmul.bf16.gmra.mxu3 %v12478_v19  ;;  %v2176_v45 = vunpack.c.l.bf16 %v2117_v21  ;;  %v2177_v2 = vunpack.c.h.bf16 %v2117_v21 }
 0x289   : > { %2879 = vmatmul.bf16.gmra.mxu0 %v2448_v51  ;;  %v1829_v55 = vpop.f32.mrf.mxu2  ;;  %v10866_v51 = vld [vmem:[%s16463_s28 + $0x24] sm:$0xf0] }
 0x28a   : > { %v1918_v36 = vpop.f32.mrf.mxu3  ;;  %v2242_v27 = vadd.f32 %v12270_v31, %v2176_v45  ;;  %v2243_v61 = vadd.f32 %v12274_v47, %v2177_v2 }
 0x28b   : > { %v12482_v38 = vadd.f32 %v1918_v36, %v1829_v55  ;;  %v2063_v3 = vpop.f32.mrf.mxu1 }
 0x28c   : > { %v2064_v53 = vadd.f32 %v2063_v3, %v12302_v15  ;;  %v12485_v43 = vpop.f32.mrf.mxu0  ;;  %v2402_v15 = vmax.f32 %v2242_v27, 0.0 }
 0x28e   : > { %v2118_v48 = vpack.c.bf16 %v2064_v53, %v12310_v63  ;;  %v2403_v63 = vmax.f32 %v2243_v61, 0.0 }
 0x290   : > { %v2178_v17 = vunpack.c.l.bf16 %v2118_v48  ;;  %v2179_v25 = vunpack.c.h.bf16 %v2118_v48 }
 0x291   : > { %v1831_v33 = vpop.f32.mrf.mxu2 }
 0x292   : > { %v1920_v54 = vpop.f32.mrf.mxu3  ;;  %v2244_v58 = vadd.f32 %v12270_v31, %v2178_v17  ;;  %v2245_v14 = vadd.f32 %v12274_v47, %v2179_v25 }
 0x293   : > { %v12492_v41 = vadd.f32 %v1920_v54, %v1831_v33  ;;  %v2066_v12 = vpop.f32.mrf.mxu1  ;;  %v9974_v33 = vld [vmem:[%s16463_s28 + $0xd0] sm:$0xf] }
 0x294   : > { %v2067_v0 = vadd.f32 %v2066_v12, %v12312_v34  ;;  %v2404_v30 = vmax.f32 %v2244_v58, 0.0  ;;  %v2405_v20 = vmax.f32 %v2245_v14, 0.0  ;;  %v9886_v34 = vld [vmem:[%s16463_s28 + $0x20] sm:$0xf] }
 0x295   : > { %v9887_v21 = vor.u32 %v10866_v51, %v9886_v34 }
 0x296   : > { %v12495_v5 = vpop.f32.mrf.mxu0  ;;  %2938 = vmatmul.bf16.gmra.mxu1 %v12316_v49  ;;  %v2450_v7 = vpack.c.bf16 %v2404_v30, %v2402_v15  ;;  %v12498_v40 = vpack.c.bf16 %v2405_v20, %v2403_v63  ;;  %v2119_v50 = vpack.c.bf16 %v2067_v0, %v12326_v26 }
 0x297   : > { %3592 = vmatpush.bf16.msrb.mxu2 %v9887_v21 }
 0x298   : > { %2706 = vmatmul.bf16.gmra.mxu2 %v2450_v7  ;;  %2795 = vmatmul.bf16.gmra.mxu3 %v12498_v40  ;;  %v2180_v55 = vunpack.c.l.bf16 %v2119_v50  ;;  %v2181_v45 = vunpack.c.h.bf16 %v2119_v50 }
 0x299   : > { %2884 = vmatmul.bf16.gmra.mxu0 %v2450_v7 }
 0x29a   : > { %v2246_v27 = vadd.f32 %v12270_v31, %v2180_v55  ;;  %v2247_v61 = vadd.f32 %v12274_v47, %v2181_v45 }
 0x29b   : > { %v2068_v49 = vpop.f32.mrf.mxu1  ;;  %v2667_v36 = vpop.f32.mrf.mxu2 }
 0x29c   : > { %v2069_v3 = vadd.f32 %v2068_v49, %v12328_v29  ;;  %v2756_v26 = vpop.f32.mrf.mxu3  ;;  %v10888_v29 = vld [vmem:[%s16463_s28 + $0xd4] sm:$0xf0]  ;;  %v2406_v15 = vmax.f32 %v2246_v27, 0.0  ;;  %v2407_v20 = vmax.f32 %v2247_v61, 0.0 }
 0x29d   : > { %v12509_v2 = vadd.f32 %v2756_v26, %v2667_v36  ;;  %v9975_v54 = vor.u32 %v10888_v29, %v9974_v33 }
 0x29e   : > { %v2120_v53 = vpack.c.bf16 %v2069_v3, %v12336_v24  ;;  %v12512_v48 = vpop.f32.mrf.mxu0 }
 0x29f   : > { %3678 = vmatpush.bf16.msrb.mxu3 %v9975_v54 }
 0x2a0   : > { %v2182_v17 = vunpack.c.l.bf16 %v2120_v53  ;;  %v2183_v25 = vunpack.c.h.bf16 %v2120_v53 }
 0x2a2   : > { %v2248_v58 = vadd.f32 %v12270_v31, %v2182_v17  ;;  %v2249_v24 = vadd.f32 %v12274_v47, %v2183_v25 }
 0x2a3   : > { %v2071_v14 = vpop.f32.mrf.mxu1  ;;  %v2669_v12 = vpop.f32.mrf.mxu2 }
 0x2a4   : > { %v2072_v0 = vadd.f32 %v2071_v14, %v12338_v39  ;;  %v2758_v30 = vpop.f32.mrf.mxu3  ;;  %v2408_v63 = vmax.f32 %v2248_v58, 0.0  ;;  %v2409_v7 = vmax.f32 %v2249_v24, 0.0 }
 0x2a5   : > { %v12525_v50 = vadd.f32 %v2758_v30, %v2669_v12 }
 0x2a6   : > { %v12527_v34 = vpop.f32.mrf.mxu0  ;;  %2943 = vmatmul.bf16.gmra.mxu1 %v12342_v11  ;;  %v2452_v51 = vpack.c.bf16 %v2408_v63, %v2406_v15  ;;  %v12530_v21 = vpack.c.bf16 %v2409_v7, %v2407_v20  ;;  %v2121_v55 = vpack.c.bf16 %v2072_v0, %v12352_v13 }
 0x2a8   : > { %2711 = vmatmul.bf16.gmra.mxu2 %v2452_v51  ;;  %2800 = vmatmul.bf16.gmra.mxu3 %v12530_v21  ;;  %v2184_v39 = vunpack.c.l.bf16 %v2121_v55  ;;  %v2185_v45 = vunpack.c.h.bf16 %v2121_v55 }
 0x2a9   : > { %2889 = vmatmul.bf16.gmra.mxu0 %v2452_v51  ;;  %v10864_v51 = vld [vmem:[%s16463_s28 + $0x14] sm:$0xf0] }
 0x2aa   : > { %v2250_v17 = vadd.f32 %v12270_v31, %v2184_v39  ;;  %v2251_v61 = vadd.f32 %v12274_v47, %v2185_v45 }
 0x2ab   : > { %v2073_v49 = vpop.f32.mrf.mxu1  ;;  %v2672_v36 = vpop.f32.mrf.mxu2 }
 0x2ac   : > { %v2074_v3 = vadd.f32 %v2073_v49, %v12354_v8  ;;  %v2761_v26 = vpop.f32.mrf.mxu3  ;;  %v2410_v8 = vmax.f32 %v2250_v17, 0.0 }
 0x2ad   : > { %v12535_v53 = vadd.f32 %v2761_v26, %v2672_v36 }
 0x2ae   : > { %v2122_v11 = vpack.c.bf16 %v2074_v3, %v12362_v1  ;;  %v12538_v27 = vpop.f32.mrf.mxu0  ;;  %v2411_v1 = vmax.f32 %v2251_v61, 0.0 }
 0x2b0   : > { %v2186_v13 = vunpack.c.l.bf16 %v2122_v11  ;;  %v2187_v25 = vunpack.c.h.bf16 %v2122_v11 }
 0x2b2   : > { %v2252_v33 = vadd.f32 %v12270_v31, %v2186_v13  ;;  %v2253_v29 = vadd.f32 %v12274_v47, %v2187_v25 }
 0x2b3   : > { %v2076_v54 = vpop.f32.mrf.mxu1  ;;  %v2674_v58 = vpop.f32.mrf.mxu2 }
 0x2b4   : > { %v2077_v24 = vadd.f32 %v2076_v54, %v12364_v28  ;;  %v2763_v14 = vpop.f32.mrf.mxu3  ;;  %v2412_v12 = vmax.f32 %v2252_v33, 0.0  ;;  %v2413_v15 = vmax.f32 %v2253_v29, 0.0  ;;  %v9878_v28 = vld [vmem:[%s16463_s28 + $0x10] sm:$0xf]  ;;  %v9966_v33 = vld [vmem:[%s16463_s28 + $0xc0] sm:$0xf] }
 0x2b5   : > { %v12545_v0 = vadd.f32 %v2763_v14, %v2674_v58  ;;  %v9879_v55 = vor.u32 %v10864_v51, %v9878_v28 }
 0x2b6   : > { %v12547_v30 = vpop.f32.mrf.mxu0  ;;  %2948 = vmatmul.bf16.gmra.mxu1 %v12368_v32  ;;  %v2454_v63 = vpack.c.bf16 %v2412_v12, %v2410_v8  ;;  %v12550_v20 = vpack.c.bf16 %v2413_v15, %v2411_v1  ;;  %v2123_v7 = vpack.c.bf16 %v2077_v24, %v12378_v10 }
 0x2b7   : > { %3593 = vmatpush.bf16.msrb.mxu2 %v9879_v55 }
 0x2b8   : > { %2716 = vmatmul.bf16.gmra.mxu2 %v2454_v63  ;;  %2805 = vmatmul.bf16.gmra.mxu3 %v12550_v20  ;;  %v2188_v39 = vunpack.c.l.bf16 %v2123_v7  ;;  %v2189_v36 = vunpack.c.h.bf16 %v2123_v7 }
 0x2b9   : > { %2894 = vmatmul.bf16.gmra.mxu0 %v2454_v63 }
 0x2ba   : > { %v2254_v17 = vadd.f32 %v12270_v31, %v2188_v39  ;;  %v2255_v61 = vadd.f32 %v12274_v47, %v2189_v36 }
 0x2bb   : > { %v2078_v32 = vpop.f32.mrf.mxu1  ;;  %v2677_v49 = vpop.f32.mrf.mxu2 }
 0x2bc   : > { %v2079_v45 = vadd.f32 %v2078_v32, %v12380_v62  ;;  %v2766_v10 = vpop.f32.mrf.mxu3  ;;  %v10886_v62 = vld [vmem:[%s16463_s28 + $0xc4] sm:$0xf0]  ;;  %v2414_v24 = vmax.f32 %v2254_v17, 0.0  ;;  %v2415_v15 = vmax.f32 %v2255_v61, 0.0 }
 0x2bd   : > { %v12561_v3 = vadd.f32 %v2766_v10, %v2677_v49  ;;  %v9967_v29 = vor.u32 %v10886_v62, %v9966_v33 }
 0x2be   : > { %v2124_v26 = vpack.c.bf16 %v2079_v45, %v12388_v52  ;;  %v12564_v11 = vpop.f32.mrf.mxu0 }
 0x2bf   : > { %3679 = vmatpush.bf16.msrb.mxu3 %v9967_v29 }
 0x2c0   : > { %v2190_v13 = vunpack.c.l.bf16 %v2124_v26  ;;  %v2191_v25 = vunpack.c.h.bf16 %v2124_v26 }
 0x2c2   : > { %v2256_v54 = vadd.f32 %v12270_v31, %v2190_v13  ;;  %v2257_v52 = vadd.f32 %v12274_v47, %v2191_v25 }
 0x2c3   : > { %v2081_v58 = vpop.f32.mrf.mxu1  ;;  %v2679_v8 = vpop.f32.mrf.mxu2 }
 0x2c4   : > { %v2082_v14 = vadd.f32 %v2081_v58, %v12390_v6  ;;  %v2768_v12 = vpop.f32.mrf.mxu3  ;;  %v2416_v1 = vmax.f32 %v2256_v54, 0.0  ;;  %v2417_v63 = vmax.f32 %v2257_v52, 0.0 }
 0x2c5   : > { %v12577_v7 = vadd.f32 %v2768_v12, %v2679_v8 }
 0x2c6   : > { %v12579_v28 = vpop.f32.mrf.mxu0  ;;  %2953 = vmatmul.bf16.gmra.mxu1 %v12394_v60  ;;  %v2456_v51 = vpack.c.bf16 %v2416_v1, %v2414_v24  ;;  %v12582_v55 = vpack.c.bf16 %v2417_v63, %v2415_v15  ;;  %v2125_v39 = vpack.c.bf16 %v2082_v14, %v12404_v42 }
 0x2c8   : > { %2721 = vmatmul.bf16.gmra.mxu2 %v2456_v51  ;;  %2810 = vmatmul.bf16.gmra.mxu3 %v12582_v55  ;;  %v2192_v6 = vunpack.c.l.bf16 %v2125_v39  ;;  %v2193_v36 = vunpack.c.h.bf16 %v2125_v39 }
 0x2c9   : > { %2899 = vmatmul.bf16.gmra.mxu0 %v2456_v51  ;;  %v10875_v51 = vld [vmem:[%s16463_s28 + $0x74] sm:$0xf] }
 0x2ca   : > { %v2258_v13 = vadd.f32 %v12270_v31, %v2192_v6  ;;  %v2259_v61 = vadd.f32 %v12274_v47, %v2193_v36 }
 0x2cb   : > { %v2083_v32 = vpop.f32.mrf.mxu1  ;;  %v2682_v49 = vpop.f32.mrf.mxu2 }
 0x2cc   : > { %v2084_v45 = vadd.f32 %v2083_v32, %v12406_v46  ;;  %v2771_v10 = vpop.f32.mrf.mxu3  ;;  %v2418_v46 = vmax.f32 %v2258_v13, 0.0 }
 0x2cd   : > { %v12587_v26 = vadd.f32 %v2771_v10, %v2682_v49  ;;  %v10873_v10 = vld [vmem:[%s16463_s28 + $0x64] sm:$0xf] }
 0x2ce   : > { %v2126_v60 = vpack.c.bf16 %v2084_v45, %v12420_v22  ;;  %v12590_v17 = vpop.f32.mrf.mxu0  ;;  %v2419_v22 = vmax.f32 %v2259_v61, 0.0 }
 0x2d0   : > { %v2194_v42 = vunpack.c.l.bf16 %v2126_v60  ;;  %v2195_v25 = vunpack.c.h.bf16 %v2126_v60  ;;  %v9920_v60 = vld [vmem:[%s16463_s28 + $0x68] sm:$0xf0] }
 0x2d2   : > { %v2260_v33 = vadd.f32 %v12270_v31, %v2194_v42  ;;  %v2261_v62 = vadd.f32 %v12274_v47, %v2195_v25  ;;  %v9923_v25 = vor.u32 %v10873_v10, %v9920_v60 }
 0x2d3   : > { %v2086_v29 = vpop.f32.mrf.mxu1  ;;  %v2684_v54 = vpop.f32.mrf.mxu2 }
 0x2d4   : > { %v2087_v52 = vadd.f32 %v2086_v29, %v12422_v57  ;;  %v2773_v58 = vpop.f32.mrf.mxu3  ;;  %v2420_v8 = vmax.f32 %v2260_v33, 0.0  ;;  %v2421_v24 = vmax.f32 %v2261_v62, 0.0  ;;  %v9928_v57 = vld [vmem:[%s16463_s28 + $0x78] sm:$0xf0] }
 0x2d5   : > { %v12597_v14 = vadd.f32 %v2773_v58, %v2684_v54  ;;  %v9931_v39 = vor.u32 %v10875_v51, %v9928_v57 }
 0x2d6   : > { %v12599_v12 = vpop.f32.mrf.mxu0  ;;  %2958 = vmatmul.bf16.gmra.mxu1 %v12426_v23  ;;  %v2458_v1 = vpack.c.bf16 %v2420_v8, %v2418_v46  ;;  %v12602_v15 = vpack.c.bf16 %v2421_v24, %v2419_v22  ;;  %v2127_v63 = vpack.c.bf16 %v2087_v52, %v12430_v16  ;;  %v9870_v23 = vld [vmem:[%s16463_s28] sm:$0xf]  ;;  %v10862_v16 = vld [vmem:[%s16463_s28 + $0x4] sm:$0xf0]  ;;  %v10871_v46 = vld [vmem:[%s16463_s28 + $0x54] sm:$0xf] }
 0x2d7   : > { %v9871_v6 = vor.u32 %v10862_v16, %v9870_v23  ;;  %3765 = vmatpush.bf16.msrb.mxu0 %v9931_v39  ;;  %v10884_v8 = vld [vmem:[%s16463_s28 + $0xb4] sm:$0xf0]  ;;  %v10869_v16 = vld [vmem:[%s16463_s28 + $0x44] sm:$0xf] }
 0x2d8   : > { %2726 = vmatmul.bf16.gmra.mxu2 %v2458_v1  ;;  %2815 = vmatmul.bf16.gmra.mxu3 %v12602_v15  ;;  %v2196_v32 = vunpack.c.l.bf16 %v2127_v63  ;;  %v2197_v49 = vunpack.c.h.bf16 %v2127_v63 }
 0x2d9   : > { %2904 = vmatmul.bf16.gmra.mxu0 %v2458_v1  ;;  %3594 = vmatpush.bf16.msrb.mxu2 %v9871_v6  ;;  %v9904_v6 = vld [vmem:[%s16463_s28 + $0x48] sm:$0xf0] }
 0x2da   : > { %v2262_v29 = vadd.f32 %v12270_v31, %v2196_v32  ;;  %v2263_v54 = vadd.f32 %v12274_v47, %v2197_v49  ;;  %v9907_v10 = vor.u32 %v10869_v16, %v9904_v6  ;;  %v10880_v16 = vld [vmem:[%s16463_s28 + $0x94] sm:$0xf0]  ;;  %v10863_v6 = vld [vmem:[%s16463_s28 + $0x14] sm:$0xf] }
 0x2db   : > { %v2088_v36 = vpop.f32.mrf.mxu1  ;;  %v2687_v45 = vpop.f32.mrf.mxu2  ;;  %3766 = vmatpush.bf16.msrb.mxu0 %v9923_v25 }
 0x2dc   : > { %v2089_v13 = vadd.f32 %v2088_v36, %v12432_v35  ;;  %v2776_v42 = vpop.f32.mrf.mxu3  ;;  %v9912_v35 = vld [vmem:[%s16463_s28 + $0x58] sm:$0xf0]  ;;  %v2422_v39 = vmax.f32 %v2262_v29, 0.0  ;;  %v2423_v23 = vmax.f32 %v2263_v54, 0.0 }
 0x2dd   : > { %v12625_v61 = vadd.f32 %v2776_v42, %v2687_v45  ;;  %v9915_v22 = vor.u32 %v10871_v46, %v9912_v35  ;;  %v9896_v29 = vld [vmem:[%s16463_s28 + $0x38] sm:$0xf0] }
 0x2de   : > { %v2128_v33 = vpack.c.bf16 %v2089_v13, %v12440_v59  ;;  %v12628_v62 = vpop.f32.mrf.mxu0  ;;  %v9958_v59 = vld [vmem:[%s16463_s28 + $0xb0] sm:$0xf] }
 0x2df   : > { %v9959_v24 = vor.u32 %v10884_v8, %v9958_v59  ;;  %3767 = vmatpush.bf16.msrb.mxu0 %v9915_v22  ;;  %v10865_v59 = vld [vmem:[%s16463_s28 + $0x24] sm:$0xf] }
 0x2e0   : > { %v2198_v52 = vunpack.c.l.bf16 %v2128_v33  ;;  %v2199_v58 = vunpack.c.h.bf16 %v2128_v33 }
 0x2e1   : > { %3680 = vmatpush.bf16.msrb.mxu3 %v9959_v24 }
 0x2e2   : > { %v2264_v1 = vadd.f32 %v12270_v31, %v2198_v52  ;;  %v2265_v63 = vadd.f32 %v12274_v47, %v2199_v58  ;;  %v9950_v52 = vld [vmem:[%s16463_s28 + $0xa0] sm:$0xf]  ;;  %v10882_v58 = vld [vmem:[%s16463_s28 + $0xa4] sm:$0xf0] }
 0x2e3   : > { %v2091_v51 = vpop.f32.mrf.mxu1  ;;  %v2689_v57 = vpop.f32.mrf.mxu2  ;;  %3768 = vmatpush.bf16.msrb.mxu0 %v9907_v10  ;;  %v9951_v24 = vor.u32 %v10882_v58, %v9950_v52 }
 0x2e4   : > { %v2092_v32 = vadd.f32 %v2091_v51, %v12442_v56  ;;  %v2778_v49 = vpop.f32.mrf.mxu3  ;;  %v2424_v36 = vmax.f32 %v2264_v1, 0.0  ;;  %v2425_v45 = vmax.f32 %v2265_v63, 0.0  ;;  %v10867_v56 = vld [vmem:[%s16463_s28 + $0x34] sm:$0xf]  ;;  %v9888_v1 = vld [vmem:[%s16463_s28 + $0x28] sm:$0xf0] }
 0x2e5   : > { %v12653_v60 = vadd.f32 %v2778_v49, %v2689_v57  ;;  %v9891_v51 = vor.u32 %v10865_v59, %v9888_v1  ;;  %3681 = vmatpush.bf16.msrb.mxu3 %v9951_v24  ;;  %v9872_v24 = vld [vmem:[%s16463_s28 + $0x8] sm:$0xf0] }
 0x2e6   : > { %v2129_v13 = vpack.c.bf16 %v2092_v32, %v12456_v9  ;;  %v12656_v42 = vpop.f32.mrf.mxu0  ;;  %2963 = vmatmul.bf16.gmra.mxu1 %v12446_v4  ;;  %v2460_v25 = vpack.c.bf16 %v2424_v36, %v2422_v39  ;;  %v12659_v33 = vpack.c.bf16 %v2425_v45, %v2423_v23  ;;  %v9899_v9 = vor.u32 %v10867_v56, %v9896_v29  ;;  %v9880_v45 = vld [vmem:[%s16463_s28 + $0x18] sm:$0xf0] }
 0x2e7   : > { %v9883_v10 = vor.u32 %v10863_v6, %v9880_v45 }
 0x2e8   : > { %2731 = vmatmul.bf16.gmra.mxu2 %v2460_v25  ;;  %2820 = vmatmul.bf16.gmra.mxu3 %v12659_v33  ;;  %v2200_v54 = vunpack.c.l.bf16 %v2129_v13  ;;  %v2201_v46 = vunpack.c.h.bf16 %v2129_v13 }
 0x2e9   : > { %2909 = vmatmul.bf16.gmra.mxu0 %v2460_v25 }
 0x2ea   : > { %3769 = vmatpush.bf16.msrb.mxu0 %v9899_v9  ;;  %v2266_v39 = vadd.f32 %v12270_v31, %v2200_v54  ;;  %v2267_v23 = vadd.f32 %v12274_v47, %v2201_v46  ;;  %v9934_v46 = vld [vmem:[%s16463_s28 + $0x80] sm:$0xf] }
 0x2eb   : > { %v2093_v4 = vpop.f32.mrf.mxu1  ;;  %v2692_v35 = vpop.f32.mrf.mxu2 }
 0x2ec   : > { %v2094_v8 = vadd.f32 %v2093_v4, %v12458_v37  ;;  %v2781_v22 = vpop.f32.mrf.mxu3  ;;  %v9942_v37 = vld [vmem:[%s16463_s28 + $0x90] sm:$0xf]  ;;  %v2426_v25 = vmax.f32 %v2266_v39, 0.0  ;;  %v2427_v29 = vmax.f32 %v2267_v23, 0.0  ;;  %v10878_v4 = vld [vmem:[%s16463_s28 + $0x84] sm:$0xf0] }
 0x2ed   : > { %v12681_v63 = vadd.f32 %v2781_v22, %v2692_v35  ;;  %v9943_v36 = vor.u32 %v10880_v16, %v9942_v37  ;;  %v10861_v35 = vld [vmem:[%s16463_s28 + $0x4] sm:$0xf]  ;;  %v9935_v22 = vor.u32 %v10878_v4, %v9934_v46  ;;  %v3050_v37 = vld [vmem:[#allocation1 + $0x9] sm:$0xff]  ;;  %v4233_v16 = vld [vmem:[%s16464_s0] sm:$0x3] }
 0x2ee   : > { %v2130_v57 = vpack.c.bf16 %v2094_v8, %v12472_v44  ;;  %3770 = vmatpush.bf16.msrb.mxu0 %v9891_v51  ;;  %v12695_v49 = vpop.f32.mrf.mxu0  ;;  %v9875_v51 = vor.u32 %v10861_v35, %v9872_v24 }
 0x2ef   : > { %3682 = vmatpush.bf16.msrb.mxu3 %v9943_v36 }
 0x2f0   : > { %v2202_v32 = vunpack.c.l.bf16 %v2130_v57  ;;  %v2203_v44 = vunpack.c.h.bf16 %v2130_v57 }
 0x2f2   : > { %v2268_v13 = vadd.f32 %v12270_v31, %v2202_v32  ;;  %v2269_v56 = vadd.f32 %v12274_v47, %v2203_v44  ;;  %3771 = vmatpush.bf16.msrb.mxu0 %v9883_v10 }
 0x2f3   : > { %v2096_v9 = vpop.f32.mrf.mxu1  ;;  %v2694_v54 = vpop.f32.mrf.mxu2  ;;  %3683 = vmatpush.bf16.msrb.mxu3 %v9935_v22 }
 0x2f4   : > { %v2097_v52 = vadd.f32 %v2096_v9, %v12474_v18  ;;  %v2783_v58 = vpop.f32.mrf.mxu3  ;;  %v2428_v59 = vmax.f32 %v2268_v13, 0.0  ;;  %v2429_v8 = vmax.f32 %v2269_v56, 0.0  ;;  %v3049_v18 = vld [vmem:[#allocation1] sm:$0xff] }
 0x2f5   : > { %v12715_v1 = vadd.f32 %v2783_v58, %v2694_v54  ;;  %4235 = vst [vmem:[#allocation1] ss:$9 sm:$0xff] %v4233_v16 }
 0x2f6   : > { %2968 = vmatmul.bf16.gmra.mxu1 %v12478_v19  ;;  %v2462_v57 = vpack.c.bf16 %v2428_v59, %v2426_v25  ;;  %v12718_v39 = vpack.c.bf16 %v2429_v8, %v2427_v29  ;;  %v2131_v23 = vpack.c.bf16 %v2097_v52, %v12482_v38  ;;  %3772 = vmatpush.bf16.msrb.mxu0 %v9875_v51  ;;  %v10054_v19 = vld [vmem:[%s16465_s9 + $0x70] sm:$0xf]  ;;  %v10860_v38 = vld [vmem:[%s16465_s9 + $0x74] sm:$0xf0]  ;;  %v12731_v6 = vpop.f32.mrf.mxu0 }
 0x2f7   : > { %v10055_v32 = vor.u32 %v10860_v38, %v10054_v19  ;;  %v3051_v8 = vpack.i.b16 %v3049_v18, %v3049_v18 }
 0x2f8   : > { %2736 = vmatmul.bf16.gmra.mxu2 %v2462_v57  ;;  %2825 = vmatmul.bf16.gmra.mxu3 %v12718_v39  ;;  %v2204_v44 = vunpack.c.l.bf16 %v2131_v23  ;;  %v2205_v10 = vunpack.c.h.bf16 %v2131_v23 }
 0x2f9   : > { %2914 = vmatmul.bf16.gmra.mxu0 %v2462_v57  ;;  %4023 = vmatpush.bf16.msra.mxu2 %v10055_v32  ;;  %v3053_v18 = vperm.slane %v3051_v8, 0 }
 0x2fa   : > { %v2270_v9 = vadd.f32 %v12270_v31, %v2204_v44  ;;  %v2271_v4 = vadd.f32 %v12274_v47, %v2205_v10 }
 0x2fb   : > { %v2098_v36 = vpop.f32.mrf.mxu1  ;;  %v2697_v45 = vpop.f32.mrf.mxu2 }
 0x2fc   : > { %v2099_v13 = vadd.f32 %v2098_v36, %v12485_v43  ;;  %v2786_v25 = vpop.f32.mrf.mxu3  ;;  %v3054_v43 = vpack.i.b16 %v3050_v37, %v3050_v37  ;;  %v2430_v22 = vmax.f32 %v2270_v9, 0.0  ;;  %v2431_v23 = vmax.f32 %v2271_v4, 0.0 }
 0x2fd   : > { %v12734_v56 = vadd.f32 %v2786_v25, %v2697_v45 }
 0x2fe   : > { %v2132_v29 = vpack.c.bf16 %v2099_v13, %v12492_v41  ;;  %v12741_v24 = vpop.f32.mrf.mxu0  ;;  %v3056_v37 = vperm.slane %v3054_v43, 0 }
 0x300   : > { %v2206_v54 = vunpack.c.l.bf16 %v2132_v29  ;;  %v2207_v46 = vunpack.c.h.bf16 %v2132_v29  ;;  %v12753_v10 = vunpack.c.l.bf16 %v3056_v37 }
 0x302   : > { %v2272_v35 = vadd.f32 %v12270_v31, %v2206_v54  ;;  %v2273_v52 = vadd.f32 %v12274_v47, %v2207_v46 }
 0x303   : > { %v2699_v58 = vpop.f32.mrf.mxu2  ;;  %v2934_v59 = vpop.f32.mrf.mxu1 }
 0x304   : > { %v2788_v51 = vpop.f32.mrf.mxu3  ;;  %v2935_v41 = vadd.f32 %v2934_v59, %v12495_v5  ;;  %v2432_v57 = vmax.f32 %v2272_v35, 0.0  ;;  %v2433_v16 = vmax.f32 %v2273_v52, 0.0  ;;  %v12751_v5 = vunpack.c.l.bf16 %v3053_v18 }
 0x305   : > { %v12744_v19 = vadd.f32 %v2788_v51, %v2699_v58 }
 0x306   : > { %2973 = vmatmul.bf16.gmra.mxu1 %v12498_v40  ;;  %v2464_v31 = vpack.c.bf16 %v2432_v57, %v2430_v22  ;;  %v12747_v38 = vpack.c.bf16 %v2433_v16, %v2431_v23  ;;  %v3014_v47 = vpack.c.bf16 %v2935_v41, %v12509_v2  ;;  %v12758_v2 = vpop.f32.mrf.mxu0 }
 0x308   : > { %2741 = vmatmul.bf16.gmra.mxu2 %v2464_v31  ;;  %2830 = vmatmul.bf16.gmra.mxu3 %v12747_v38  ;;  %v3057_v32 = vunpack.c.l.bf16 %v3014_v47  ;;  %v3058_v45 = vunpack.c.h.bf16 %v3014_v47  ;;  %v10046_v47 = vld [vmem:[%s16465_s9 + $0x60] sm:$0xf] }
 0x309   : > { %2919 = vmatmul.bf16.gmra.mxu0 %v2464_v31 }
 0x30a   : > { %v3123_v9 = vadd.f32 %v12751_v5, %v3057_v32  ;;  %v3124_v54 = vadd.f32 %v12753_v10, %v3058_v45 }
 0x30b   : > { %v2702_v44 = vpop.f32.mrf.mxu2  ;;  %v2936_v36 = vpop.f32.mrf.mxu1 }
 0x30c   : > { %v2791_v40 = vpop.f32.mrf.mxu3  ;;  %v2937_v13 = vadd.f32 %v2936_v36, %v12512_v48  ;;  %v3283_v58 = vmax.f32 %v3123_v9, 0.0  ;;  %v3284_v48 = vmax.f32 %v3124_v54, 0.0 }
 0x30d   : > { %v12756_v25 = vadd.f32 %v2791_v40, %v2702_v44 }
 0x30e   : > { %v3015_v29 = vpack.c.bf16 %v2937_v13, %v12525_v50  ;;  %v12772_v31 = vpop.f32.mrf.mxu0 }
 0x310   : > { %v3059_v46 = vunpack.c.l.bf16 %v3015_v29  ;;  %v3060_v4 = vunpack.c.h.bf16 %v3015_v29 }
 0x312   : > { %v3125_v35 = vadd.f32 %v12751_v5, %v3059_v46  ;;  %v3126_v52 = vadd.f32 %v12753_v10, %v3060_v4 }
 0x313   : > { %v2704_v59 = vpop.f32.mrf.mxu2  ;;  %v2939_v8 = vpop.f32.mrf.mxu1 }
 0x314   : > { %v3285_v43 = vmax.f32 %v3125_v35, 0.0  ;;  %v3286_v22 = vmax.f32 %v3126_v52, 0.0  ;;  %v2793_v51 = vpop.f32.mrf.mxu3  ;;  %v2940_v41 = vadd.f32 %v2939_v8, %v12527_v34  ;;  %v10858_v34 = vld [vmem:[%s16465_s9 + $0x64] sm:$0xf0] }
 0x315   : > { %v12766_v50 = vadd.f32 %v2793_v51, %v2704_v59  ;;  %v10047_v18 = vor.u32 %v10858_v34, %v10046_v47 }
 0x316   : > { %v3347_v57 = vpack.c.bf16 %v3285_v43, %v3283_v58  ;;  %v12768_v23 = vpack.c.bf16 %v3286_v22, %v3284_v48  ;;  %2978 = vmatmul.bf16.gmra.mxu1 %v12530_v21  ;;  %v3016_v16 = vpack.c.bf16 %v2940_v41, %v12535_v53  ;;  %v12787_v46 = vpop.f32.mrf.mxu0 }
 0x317   : > { %4024 = vmatpush.bf16.msra.mxu2 %v10047_v18 }
 0x318   : > { %3595 = vmatmul.bf16.vlgmr.msrb.gmra.mxu2 %v3347_v57  ;;  %3684 = vmatmul.bf16.vlgmr.msrb.gmra.mxu3 %v12768_v23  ;;  %v3061_v37 = vunpack.c.l.bf16 %v3016_v16  ;;  %v3062_v44 = vunpack.c.h.bf16 %v3016_v16 }
 0x319   : > { %3773 = vmatmul.bf16.vlgmr.msrb.gmra.mxu0 %v3347_v57 }
 0x31a   : > { %v3127_v13 = vadd.f32 %v12751_v5, %v3061_v37  ;;  %v3128_v54 = vadd.f32 %v12753_v10, %v3062_v44 }
 0x31b   : > { %v2707_v32 = vpop.f32.mrf.mxu2  ;;  %v2941_v21 = vpop.f32.mrf.mxu1 }
 0x31c   : > { %v2796_v53 = vpop.f32.mrf.mxu3  ;;  %v2942_v36 = vadd.f32 %v2941_v21, %v12538_v27  ;;  %v3287_v27 = vmax.f32 %v3127_v13, 0.0 }
 0x31d   : > { %v12782_v45 = vadd.f32 %v2796_v53, %v2707_v32 }
 0x31e   : > { %v3017_v40 = vpack.c.bf16 %v2942_v36, %v12545_v0  ;;  %v3288_v0 = vmax.f32 %v3128_v54, 0.0 }
 0x320   : > { %v3063_v29 = vunpack.c.l.bf16 %v3017_v40  ;;  %v3064_v9 = vunpack.c.h.bf16 %v3017_v40 }
 0x322   : > { %v3129_v4 = vadd.f32 %v12751_v5, %v3063_v29  ;;  %v3130_v35 = vadd.f32 %v12753_v10, %v3064_v9 }
 0x323   : > { %v2709_v52 = vpop.f32.mrf.mxu2  ;;  %v2944_v58 = vpop.f32.mrf.mxu1 }
 0x324   : > { %v2798_v59 = vpop.f32.mrf.mxu3  ;;  %v2945_v8 = vadd.f32 %v2944_v58, %v12547_v30  ;;  %v3289_v48 = vmax.f32 %v3129_v4, 0.0  ;;  %v3290_v43 = vmax.f32 %v3130_v35, 0.0  ;;  %v12799_v30 = vpop.f32.mrf.mxu0 }
 0x325   : > { %v12792_v22 = vadd.f32 %v2798_v59, %v2709_v52 }
 0x326   : > { %2983 = vmatmul.bf16.gmra.mxu1 %v12550_v20  ;;  %v3349_v51 = vpack.c.bf16 %v3289_v48, %v3287_v27  ;;  %v12795_v41 = vpack.c.bf16 %v3290_v43, %v3288_v0  ;;  %v3018_v57 = vpack.c.bf16 %v2945_v8, %v12561_v3  ;;  %v10856_v0 = vld [vmem:[%s16465_s9 + $0x54] sm:$0xf0] }
 0x328   : > { %3600 = vmatmul.bf16.gmra.mxu2 %v3349_v51  ;;  %3689 = vmatmul.bf16.gmra.mxu3 %v12795_v41  ;;  %v3065_v16 = vunpack.c.l.bf16 %v3018_v57  ;;  %v3066_v18 = vunpack.c.h.bf16 %v3018_v57 }
 0x329   : > { %3778 = vmatmul.bf16.gmra.mxu0 %v3349_v51 }
 0x32a   : > { %v3131_v44 = vadd.f32 %v12751_v5, %v3065_v16  ;;  %v3132_v36 = vadd.f32 %v12753_v10, %v3066_v18 }
 0x32b   : > { %v2712_v47 = vpop.f32.mrf.mxu2  ;;  %v2946_v34 = vpop.f32.mrf.mxu1 }
 0x32c   : > { %v2801_v37 = vpop.f32.mrf.mxu3  ;;  %v2947_v32 = vadd.f32 %v2946_v34, %v12564_v11  ;;  %v3291_v54 = vmax.f32 %v3131_v44, 0.0  ;;  %v3292_v52 = vmax.f32 %v3132_v36, 0.0  ;;  %v12812_v27 = vpop.f32.mrf.mxu0 }
 0x32d   : > { %v12802_v21 = vadd.f32 %v2801_v37, %v2712_v47 }
 0x32e   : > { %v3019_v20 = vpack.c.bf16 %v2947_v32, %v12577_v7 }
 0x330   : > { %v3067_v3 = vunpack.c.l.bf16 %v3019_v20  ;;  %v3068_v53 = vunpack.c.h.bf16 %v3019_v20 }
 0x332   : > { %v3133_v40 = vadd.f32 %v12751_v5, %v3067_v3  ;;  %v3134_v13 = vadd.f32 %v12753_v10, %v3068_v53 }
 0x333   : > { %v2714_v29 = vpop.f32.mrf.mxu2  ;;  %v2949_v9 = vpop.f32.mrf.mxu1 }
 0x334   : > { %v2803_v4 = vpop.f32.mrf.mxu3  ;;  %v2950_v11 = vadd.f32 %v2949_v9, %v12579_v28  ;;  %v3293_v35 = vmax.f32 %v3133_v40, 0.0  ;;  %v3294_v58 = vmax.f32 %v3134_v13, 0.0  ;;  %v10038_v28 = vld [vmem:[%s16465_s9 + $0x50] sm:$0xf]  ;;  %v12830_v32 = vpop.f32.mrf.mxu0 }
 0x335   : > { %v12810_v7 = vadd.f32 %v2803_v4, %v2714_v29  ;;  %v10039_v43 = vor.u32 %v10856_v0, %v10038_v28  ;;  %v10889_v28 = vld [vmem:[%s16463_s28 + $0xe4] sm:$0xf]  ;;  %v9984_v0 = vld [vmem:[%s16463_s28 + $0xe8] sm:$0xf0] }
 0x336   : > { %2988 = vmatmul.bf16.gmra.mxu1 %v12582_v55  ;;  %v3351_v59 = vpack.c.bf16 %v3293_v35, %v3291_v54  ;;  %v12815_v8 = vpack.c.bf16 %v3294_v58, %v3292_v52  ;;  %v3020_v48 = vpack.c.bf16 %v2950_v11, %v12587_v26  ;;  %v10891_v35 = vld [vmem:[%s16463_s28 + $0xf4] sm:$0xf]  ;;  %v9992_v52 = vld [vmem:[%s16463_s28 + $0xf8] sm:$0xf0] }
 0x337   : > { %4025 = vmatpush.bf16.msra.mxu2 %v10039_v43  ;;  %v9987_v43 = vor.u32 %v10889_v28, %v9984_v0  ;;  %v10883_v0 = vld [vmem:[%s16463_s28 + $0xb4] sm:$0xf] }
 0x338   : > { %3605 = vmatmul.bf16.gmra.mxu2 %v3351_v59  ;;  %3694 = vmatmul.bf16.gmra.mxu3 %v12815_v8  ;;  %v3069_v51 = vunpack.c.l.bf16 %v3020_v48  ;;  %v3070_v16 = vunpack.c.h.bf16 %v3020_v48  ;;  %v9995_v48 = vor.u32 %v10891_v35, %v9992_v52 }
 0x339   : > { %3783 = vmatmul.bf16.gmra.mxu0 %v3351_v59 }
 0x33a   : > { %v3135_v37 = vadd.f32 %v12751_v5, %v3069_v51  ;;  %v3136_v3 = vadd.f32 %v12753_v10, %v3070_v16  ;;  %3854 = vmatpush.bf16.msra.mxu1 %v9995_v48 }
 0x33b   : > { %v2717_v55 = vpop.f32.mrf.mxu2  ;;  %v2951_v57 = vpop.f32.mrf.mxu1 }
 0x33c   : > { %v2806_v47 = vpop.f32.mrf.mxu3  ;;  %v2952_v26 = vadd.f32 %v2951_v57, %v12590_v17  ;;  %v3295_v17 = vmax.f32 %v3135_v37, 0.0  ;;  %v9976_v37 = vld [vmem:[%s16463_s28 + $0xd8] sm:$0xf0] }
 0x33d   : > { %v12826_v34 = vadd.f32 %v2806_v47, %v2717_v55 }
 0x33e   : > { %v3021_v18 = vpack.c.bf16 %v2952_v26, %v12597_v14  ;;  %v3296_v14 = vmax.f32 %v3136_v3, 0.0  ;;  %3855 = vmatpush.bf16.msra.mxu1 %v9987_v43  ;;  %v9960_v43 = vld [vmem:[%s16463_s28 + $0xb8] sm:$0xf0] }
 0x340   : > { %v3071_v20 = vunpack.c.l.bf16 %v3021_v18  ;;  %v3072_v44 = vunpack.c.h.bf16 %v3021_v18  ;;  %v10887_v18 = vld [vmem:[%s16463_s28 + $0xd4] sm:$0xf] }
 0x342   : > { %v3137_v53 = vadd.f32 %v12751_v5, %v3071_v20  ;;  %v3138_v36 = vadd.f32 %v12753_v10, %v3072_v44  ;;  %v9979_v44 = vor.u32 %v10887_v18, %v9976_v37 }
 0x343   : > { %v2719_v40 = vpop.f32.mrf.mxu2  ;;  %v2954_v13 = vpop.f32.mrf.mxu1 }
 0x344   : > { %v2808_v29 = vpop.f32.mrf.mxu3  ;;  %v2955_v9 = vadd.f32 %v2954_v13, %v12599_v12  ;;  %v3297_v54 = vmax.f32 %v3137_v53, 0.0  ;;  %v3298_v4 = vmax.f32 %v3138_v36, 0.0  ;;  %3856 = vmatpush.bf16.msra.mxu1 %v9979_v44  ;;  %v9968_v13 = vld [vmem:[%s16463_s28 + $0xc8] sm:$0xf0] }
 0x345   : > { %v12836_v11 = vadd.f32 %v2808_v29, %v2719_v40  ;;  %v10885_v40 = vld [vmem:[%s16463_s28 + $0xc4] sm:$0xf] }
 0x346   : > { %2993 = vmatmul.bf16.gmra.mxu1 %v12602_v15  ;;  %v3353_v58 = vpack.c.bf16 %v3297_v54, %v3295_v17  ;;  %v12845_v59 = vpack.c.bf16 %v3298_v4, %v3296_v14  ;;  %v3022_v12 = vpack.c.bf16 %v2955_v9, %v12625_v61  ;;  %v12855_v15 = vpop.f32.mrf.mxu0  ;;  %v9971_v29 = vor.u32 %v10885_v40, %v9968_v13  ;;  %v10879_v40 = vld [vmem:[%s16463_s28 + $0x94] sm:$0xf]  ;;  %v9944_v13 = vld [vmem:[%s16463_s28 + $0x98] sm:$0xf0] }
 0x348   : > { %3610 = vmatmul.bf16.gmra.mxu2 %v3353_v58  ;;  %3699 = vmatmul.bf16.gmra.mxu3 %v12845_v59  ;;  %v3073_v51 = vunpack.c.l.bf16 %v3022_v12  ;;  %v3074_v61 = vunpack.c.h.bf16 %v3022_v12 }
 0x349   : > { %3788 = vmatmul.bf16.gmra.mxu0 %v3353_v58  ;;  %3857 = vmatpush.bf16.msra.mxu1 %v9971_v29  ;;  %v9947_v29 = vor.u32 %v10879_v40, %v9944_v13 }
 0x34a   : > { %v3139_v3 = vadd.f32 %v12751_v5, %v3073_v51 }
 0x34b   : > { %v2722_v55 = vpop.f32.mrf.mxu2  ;;  %v2956_v57 = vpop.f32.mrf.mxu1 }
 0x34c   : > { %v2811_v16 = vpop.f32.mrf.mxu3  ;;  %v2957_v47 = vadd.f32 %v2956_v57, %v12628_v62  ;;  %v3140_v62 = vadd.f32 %v12753_v10, %v3074_v61  ;;  %v3299_v14 = vmax.f32 %v3139_v3, 0.0  ;;  %v10030_v61 = vld [vmem:[%s16465_s9 + $0x40] sm:$0xf] }
 0x34d   : > { %v12858_v26 = vadd.f32 %v2811_v16, %v2722_v55  ;;  %v10854_v16 = vld [vmem:[%s16465_s9 + $0x44] sm:$0xf0] }
 0x34e   : > { %v3023_v20 = vpack.c.bf16 %v2957_v47, %v12653_v60  ;;  %v12877_v4 = vpop.f32.mrf.mxu0  ;;  %v3300_v48 = vmax.f32 %v3140_v62, 0.0  ;;  %v10031_v47 = vor.u32 %v10854_v16, %v10030_v61 }
 0x350   : > { %v3075_v53 = vunpack.c.l.bf16 %v3023_v20  ;;  %v3076_v36 = vunpack.c.h.bf16 %v3023_v20  ;;  %4026 = vmatpush.bf16.msra.mxu2 %v10031_v47 }
 0x352   : > { %v3141_v17 = vadd.f32 %v12751_v5, %v3075_v53  ;;  %v3142_v60 = vadd.f32 %v12753_v10, %v3076_v36 }
 0x353   : > { %v2724_v9 = vpop.f32.mrf.mxu2  ;;  %v2959_v54 = vpop.f32.mrf.mxu1 }
 0x354   : > { %v2813_v35 = vpop.f32.mrf.mxu3  ;;  %v2960_v52 = vadd.f32 %v2959_v54, %v12656_v42  ;;  %v3301_v58 = vmax.f32 %v3141_v17, 0.0  ;;  %v3302_v12 = vmax.f32 %v3142_v60, 0.0  ;;  %v9963_v42 = vor.u32 %v10883_v0, %v9960_v43 }
 0x355   : > { %v12880_v28 = vadd.f32 %v2813_v35, %v2724_v9  ;;  %v10859_v35 = vld [vmem:[%s16465_s9 + $0x74] sm:$0xf] }
 0x356   : > { %2998 = vmatmul.bf16.gmra.mxu1 %v12659_v33  ;;  %v3355_v51 = vpack.c.bf16 %v3301_v58, %v3299_v14  ;;  %v12889_v55 = vpack.c.bf16 %v3302_v12, %v3300_v48  ;;  %v3024_v57 = vpack.c.bf16 %v2960_v52, %v12681_v63  ;;  %v10881_v33 = vld [vmem:[%s16463_s28 + $0xa4] sm:$0xf]  ;;  %v9952_v63 = vld [vmem:[%s16463_s28 + $0xa8] sm:$0xf0]  ;;  %v12914_v17 = vpop.f32.mrf.mxu0  ;;  %v10056_v52 = vld [vmem:[%s16465_s9 + $0x78] sm:$0xf0] }
 0x357   : > { %3858 = vmatpush.bf16.msra.mxu1 %v9963_v42  ;;  %v9955_v44 = vor.u32 %v10881_v33, %v9952_v63  ;;  %v10059_v58 = vor.u32 %v10859_v35, %v10056_v52  ;;  %v9936_v48 = vld [vmem:[%s16463_s28 + $0x88] sm:$0xf0] }
 0x358   : > { %3615 = vmatmul.bf16.gmra.mxu2 %v3355_v51  ;;  %3704 = vmatmul.bf16.gmra.mxu3 %v12889_v55  ;;  %v3077_v18 = vunpack.c.l.bf16 %v3024_v57  ;;  %v3078_v3 = vunpack.c.h.bf16 %v3024_v57 }
 0x359   : > { %3793 = vmatmul.bf16.gmra.mxu0 %v3355_v51  ;;  %4112 = vmatpush.bf16.msra.mxu3 %v10059_v58 }
 0x35a   : > { %v3143_v9 = vadd.f32 %v12751_v5, %v3077_v18  ;;  %v3144_v14 = vadd.f32 %v12753_v10, %v3078_v3 }
 0x35b   : > { %v2727_v37 = vpop.f32.mrf.mxu2  ;;  %v2961_v20 = vpop.f32.mrf.mxu1  ;;  %3859 = vmatpush.bf16.msra.mxu1 %v9955_v44 }
 0x35c   : > { %v2816_v53 = vpop.f32.mrf.mxu3  ;;  %v2962_v36 = vadd.f32 %v2961_v20, %v12695_v49  ;;  %v3303_v57 = vmax.f32 %v3143_v9, 0.0  ;;  %v3304_v47 = vmax.f32 %v3144_v14, 0.0 }
 0x35d   : > { %v12906_v62 = vadd.f32 %v2816_v53, %v2727_v37 }
 0x35e   : > { %v3025_v60 = vpack.c.bf16 %v2962_v36, %v12715_v1  ;;  %v10877_v1 = vld [vmem:[%s16463_s28 + $0x84] sm:$0xf]  ;;  %v12940_v3 = vpop.f32.mrf.mxu0 }
 0x35f   : > { %3860 = vmatpush.bf16.msra.mxu1 %v9947_v29  ;;  %v9939_v43 = vor.u32 %v10877_v1, %v9936_v48 }
 0x360   : > { %v3079_v49 = vunpack.c.l.bf16 %v3025_v60  ;;  %v3080_v54 = vunpack.c.h.bf16 %v3025_v60 }
 0x362   : > { %v3145_v12 = vadd.f32 %v12751_v5, %v3079_v49  ;;  %v3146_v0 = vadd.f32 %v12753_v10, %v3080_v54 }
 0x363   : > { %v2729_v51 = vpop.f32.mrf.mxu2  ;;  %v2964_v42 = vpop.f32.mrf.mxu1  ;;  %3861 = vmatpush.bf16.msra.mxu1 %v9939_v43 }
 0x364   : > { %v2818_v61 = vpop.f32.mrf.mxu3  ;;  %v2965_v16 = vadd.f32 %v2964_v42, %v12731_v6  ;;  %v3305_v33 = vmax.f32 %v3145_v12, 0.0  ;;  %v3306_v63 = vmax.f32 %v3146_v0, 0.0 }
 0x365   : > { %v12934_v18 = vadd.f32 %v2818_v61, %v2729_v51 }
 0x366   : > { %3003 = vmatmul.bf16.gmra.mxu1 %v12718_v39  ;;  %v3357_v37 = vpack.c.bf16 %v3305_v33, %v3303_v57  ;;  %v12937_v20 = vpack.c.bf16 %v3306_v63, %v3304_v47  ;;  %v3026_v44 = vpack.c.bf16 %v2965_v16, %v12734_v56  ;;  %v12949_v14 = vpop.f32.mrf.mxu0  ;;  %v10852_v16 = vld [vmem:[%s16465_s9 + $0x34] sm:$0xf0] }
 0x368   : > { %3620 = vmatmul.bf16.gmra.mxu2 %v3357_v37  ;;  %3709 = vmatmul.bf16.gmra.mxu3 %v12937_v20  ;;  %v3081_v6 = vunpack.c.l.bf16 %v3026_v44  ;;  %v3082_v40 = vunpack.c.h.bf16 %v3026_v44 }
 0x369   : > { %3798 = vmatmul.bf16.gmra.mxu0 %v3357_v37 }
 0x36a   : > { %v3147_v9 = vadd.f32 %v12751_v5, %v3081_v6  ;;  %v3148_v54 = vadd.f32 %v12753_v10, %v3082_v40 }
 0x36b   : > { %v2732_v53 = vpop.f32.mrf.mxu2  ;;  %v2966_v36 = vpop.f32.mrf.mxu1 }
 0x36c   : > { %v2821_v13 = vpop.f32.mrf.mxu3  ;;  %v2967_v60 = vadd.f32 %v2966_v36, %v12741_v24  ;;  %v3307_v48 = vmax.f32 %v3147_v9, 0.0  ;;  %v10857_v9 = vld [vmem:[%s16465_s9 + $0x64] sm:$0xf] }
 0x36d   : > { %v12944_v29 = vadd.f32 %v2821_v13, %v2732_v53 }
 0x36e   : > { %v3027_v39 = vpack.c.bf16 %v2967_v60, %v12744_v19  ;;  %v3308_v19 = vmax.f32 %v3148_v54, 0.0  ;;  %v12967_v37 = vpop.f32.mrf.mxu0 }
 0x370   : > { %v3083_v56 = vunpack.c.l.bf16 %v3027_v39  ;;  %v3084_v49 = vunpack.c.h.bf16 %v3027_v39 }
 0x372   : > { %v3149_v35 = vadd.f32 %v12751_v5, %v3083_v56  ;;  %v3150_v52 = vadd.f32 %v12753_v10, %v3084_v49  ;;  %v10048_v56 = vld [vmem:[%s16465_s9 + $0x68] sm:$0xf0] }
 0x373   : > { %v2734_v58 = vpop.f32.mrf.mxu2  ;;  %v2969_v1 = vpop.f32.mrf.mxu1 }
 0x374   : > { %v2823_v24 = vpop.f32.mrf.mxu3  ;;  %v2970_v12 = vadd.f32 %v2969_v1, %v12758_v2  ;;  %v3309_v0 = vmax.f32 %v3149_v35, 0.0  ;;  %v3310_v43 = vmax.f32 %v3150_v52, 0.0  ;;  %v10022_v2 = vld [vmem:[%s16465_s9 + $0x30] sm:$0xf] }
 0x375   : > { %v12954_v51 = vadd.f32 %v2823_v24, %v2734_v58  ;;  %v10023_v33 = vor.u32 %v10852_v16, %v10022_v2 }
 0x376   : > { %3008 = vmatmul.bf16.gmra.mxu1 %v12747_v38  ;;  %v3359_v42 = vpack.c.bf16 %v3309_v0, %v3307_v48  ;;  %v12957_v57 = vpack.c.bf16 %v3310_v43, %v3308_v19  ;;  %v3028_v61 = vpack.c.bf16 %v2970_v12, %v12756_v25  ;;  %v12986_v19 = vpop.f32.mrf.mxu0 }
 0x377   : > { %4027 = vmatpush.bf16.msra.mxu2 %v10023_v33 }
 0x378   : > { %3625 = vmatmul.bf16.gmra.mxu2 %v3359_v42  ;;  %3714 = vmatmul.bf16.gmra.mxu3 %v12957_v57  ;;  %v3085_v47 = vunpack.c.l.bf16 %v3028_v61  ;;  %v3086_v44 = vunpack.c.h.bf16 %v3028_v61 }
 0x379   : > { %3803 = vmatmul.bf16.gmra.mxu0 %v3359_v42 }
 0x37a   : > { %v3151_v40 = vadd.f32 %v12751_v5, %v3085_v47  ;;  %v3152_v39 = vadd.f32 %v12753_v10, %v3086_v44 }
 0x37b   : > { %v2737_v38 = vpop.f32.mrf.mxu2  ;;  %v2971_v63 = vpop.f32.mrf.mxu1 }
 0x37c   : > { %v2826_v25 = vpop.f32.mrf.mxu3  ;;  %v2972_v6 = vadd.f32 %v2971_v63, %v12772_v31  ;;  %v10051_v31 = vor.u32 %v10857_v9, %v10048_v56  ;;  %v3311_v52 = vmax.f32 %v3151_v40, 0.0  ;;  %v3312_v24 = vmax.f32 %v3152_v39, 0.0 }
 0x37d   : > { %v12970_v53 = vadd.f32 %v2826_v25, %v2737_v38 }
 0x37e   : > { %v3029_v36 = vpack.c.bf16 %v2972_v6, %v12766_v50  ;;  %4113 = vmatpush.bf16.msra.mxu3 %v10051_v31  ;;  %v12998_v25 = vpop.f32.mrf.mxu0 }
 0x380   : > { %v3087_v13 = vunpack.c.l.bf16 %v3029_v36  ;;  %v3088_v60 = vunpack.c.h.bf16 %v3029_v36 }
 0x382   : > { %v3153_v49 = vadd.f32 %v12751_v5, %v3087_v13  ;;  %v3154_v54 = vadd.f32 %v12753_v10, %v3088_v60 }
 0x383   : > { %v2739_v50 = vpop.f32.mrf.mxu2  ;;  %v2974_v35 = vpop.f32.mrf.mxu1 }
 0x384   : > { %v2828_v58 = vpop.f32.mrf.mxu3  ;;  %v2975_v1 = vadd.f32 %v2974_v35, %v12787_v46  ;;  %v3313_v48 = vmax.f32 %v3153_v49, 0.0  ;;  %v3314_v12 = vmax.f32 %v3154_v54, 0.0 }
 0x385   : > { %v12984_v0 = vadd.f32 %v2828_v58, %v2739_v50  ;;  %v10850_v58 = vld [vmem:[%s16465_s9 + $0x24] sm:$0xf0] }
 0x386   : > { %3862 = vmatmul.bf16.vlgmr.msra.gmra.mxu1 %v12768_v23  ;;  %v3361_v43 = vpack.c.bf16 %v3313_v48, %v3311_v52  ;;  %v12989_v42 = vpack.c.bf16 %v3314_v12, %v3312_v24  ;;  %v3030_v61 = vpack.c.bf16 %v2975_v1, %v12782_v45  ;;  %v13017_v1 = vpop.f32.mrf.mxu0 }
 0x388   : > { %3630 = vmatmul.bf16.gmra.mxu2 %v3361_v43  ;;  %3719 = vmatmul.bf16.gmra.mxu3 %v12989_v42  ;;  %v3089_v2 = vunpack.c.l.bf16 %v3030_v61  ;;  %v3090_v33 = vunpack.c.h.bf16 %v3030_v61 }
 0x389   : > { %3808 = vmatmul.bf16.gmra.mxu0 %v3361_v43 }
 0x38a   : > { %v3155_v44 = vadd.f32 %v12751_v5, %v3089_v2  ;;  %v3156_v36 = vadd.f32 %v12753_v10, %v3090_v33 }
 0x38b   : > { %v2742_v46 = vpop.f32.mrf.mxu2  ;;  %v2976_v16 = vpop.f32.mrf.mxu1 }
 0x38c   : > { %v2831_v47 = vpop.f32.mrf.mxu3  ;;  %v2977_v38 = vadd.f32 %v2976_v16, %v12799_v30  ;;  %v3315_v9 = vmax.f32 %v3155_v44, 0.0 }
 0x38d   : > { %v12994_v63 = vadd.f32 %v2831_v47, %v2742_v46 }
 0x38e   : > { %v3031_v23 = vpack.c.bf16 %v2977_v38, %v12792_v22  ;;  %v3316_v22 = vmax.f32 %v3156_v36, 0.0 }
 0x390   : > { %v3091_v45 = vunpack.c.l.bf16 %v3031_v23  ;;  %v3092_v6 = vunpack.c.h.bf16 %v3031_v23  ;;  %v10855_v23 = vld [vmem:[%s16465_s9 + $0x54] sm:$0xf] }
 0x392   : > { %v3157_v40 = vadd.f32 %v12751_v5, %v3091_v45  ;;  %v3158_v13 = vadd.f32 %v12753_v10, %v3092_v6 }
 0x393   : > { %v2744_v60 = vpop.f32.mrf.mxu2  ;;  %v2979_v39 = vpop.f32.mrf.mxu1 }
 0x394   : > { %v2833_v30 = vpop.f32.mrf.mxu3  ;;  %v2980_v56 = vadd.f32 %v2979_v39, %v12812_v27  ;;  %v3317_v31 = vmax.f32 %v3157_v40, 0.0  ;;  %v3318_v49 = vmax.f32 %v3158_v13, 0.0  ;;  %v10014_v27 = vld [vmem:[%s16465_s9 + $0x20] sm:$0xf]  ;;  %v13033_v13 = vpop.f32.mrf.mxu0 }
 0x395   : > { %v13004_v54 = vadd.f32 %v2833_v30, %v2744_v60 }
 0x396   : > { %3867 = vmatmul.bf16.gmra.mxu1 %v12795_v41  ;;  %v3363_v50 = vpack.c.bf16 %v3317_v31, %v3315_v9  ;;  %v13007_v35 = vpack.c.bf16 %v3318_v49, %v3316_v22  ;;  %v3032_v52 = vpack.c.bf16 %v2980_v56, %v12802_v21  ;;  %v10015_v41 = vor.u32 %v10850_v58, %v10014_v27 }
 0x398   : > { %3635 = vmatmul.bf16.gmra.mxu2 %v3363_v50  ;;  %3724 = vmatmul.bf16.gmra.mxu3 %v13007_v35  ;;  %v3093_v48 = vunpack.c.l.bf16 %v3032_v52  ;;  %v3094_v43 = vunpack.c.h.bf16 %v3032_v52 }
 0x399   : > { %3813 = vmatmul.bf16.gmra.mxu0 %v3363_v50  ;;  %4028 = vmatpush.bf16.msra.mxu2 %v10015_v41 }
 0x39a   : > { %v3159_v16 = vadd.f32 %v12751_v5, %v3093_v48  ;;  %v3160_v38 = vadd.f32 %v12753_v10, %v3094_v43 }
 0x39b   : > { %v2981_v24 = vpop.f32.mrf.mxu1  ;;  %v3596_v12 = vpop.f32.mrf.mxu2 }
 0x39c   : > { %v2982_v21 = vadd.f32 %v2981_v24, %v12830_v32  ;;  %v3685_v61 = vpop.f32.mrf.mxu3  ;;  %v10040_v32 = vld [vmem:[%s16465_s9 + $0x58] sm:$0xf0]  ;;  %v3319_v40 = vmax.f32 %v3159_v16, 0.0  ;;  %v3320_v30 = vmax.f32 %v3160_v38, 0.0 }
 0x39d   : > { %v13020_v2 = vadd.f32 %v3685_v61, %v3596_v12  ;;  %v10043_v44 = vor.u32 %v10855_v23, %v10040_v32  ;;  %v13046_v12 = vpop.f32.mrf.mxu0 }
 0x39e   : > { %v3033_v46 = vpack.c.bf16 %v2982_v21, %v12810_v7 }
 0x39f   : > { %4114 = vmatpush.bf16.msra.mxu3 %v10043_v44 }
 0x3a0   : > { %v3095_v33 = vunpack.c.l.bf16 %v3033_v46  ;;  %v3096_v47 = vunpack.c.h.bf16 %v3033_v46 }
 0x3a2   : > { %v3161_v45 = vadd.f32 %v12751_v5, %v3095_v33  ;;  %v3162_v6 = vadd.f32 %v12753_v10, %v3096_v47 }
 0x3a3   : > { %v2984_v7 = vpop.f32.mrf.mxu1  ;;  %v3598_v36 = vpop.f32.mrf.mxu2 }
 0x3a4   : > { %v2985_v60 = vadd.f32 %v2984_v7, %v12855_v15  ;;  %v3687_v39 = vpop.f32.mrf.mxu3  ;;  %v3321_v9 = vmax.f32 %v3161_v45, 0.0  ;;  %v3322_v56 = vmax.f32 %v3162_v6, 0.0 }
 0x3a5   : > { %v13036_v31 = vadd.f32 %v3687_v39, %v3598_v36 }
 0x3a6   : > { %3872 = vmatmul.bf16.gmra.mxu1 %v12815_v8  ;;  %v3365_v22 = vpack.c.bf16 %v3321_v9, %v3319_v40  ;;  %v13039_v49 = vpack.c.bf16 %v3322_v56, %v3320_v30  ;;  %v3034_v50 = vpack.c.bf16 %v2985_v60, %v12826_v34  ;;  %v13060_v40 = vpop.f32.mrf.mxu0  ;;  %v10848_v60 = vld [vmem:[%s16465_s9 + $0x14] sm:$0xf0] }
 0x3a8   : > { %3640 = vmatmul.bf16.gmra.mxu2 %v3365_v22  ;;  %3729 = vmatmul.bf16.gmra.mxu3 %v13039_v49  ;;  %v3097_v52 = vunpack.c.l.bf16 %v3034_v50  ;;  %v3098_v58 = vunpack.c.h.bf16 %v3034_v50 }
 0x3a9   : > { %3818 = vmatmul.bf16.gmra.mxu0 %v3365_v22 }
 0x3aa   : > { %v3163_v43 = vadd.f32 %v12751_v5, %v3097_v52  ;;  %v3164_v61 = vadd.f32 %v12753_v10, %v3098_v58 }
 0x3ab   : > { %v2986_v27 = vpop.f32.mrf.mxu1  ;;  %v3601_v15 = vpop.f32.mrf.mxu2 }
 0x3ac   : > { %v2987_v41 = vadd.f32 %v2986_v27, %v12877_v4  ;;  %v3690_v48 = vpop.f32.mrf.mxu3  ;;  %v3323_v4 = vmax.f32 %v3163_v43, 0.0  ;;  %v3324_v44 = vmax.f32 %v3164_v61, 0.0 }
 0x3ad   : > { %v13044_v24 = vadd.f32 %v3690_v48, %v3601_v15  ;;  %v10853_v48 = vld [vmem:[%s16465_s9 + $0x44] sm:$0xf] }
 0x3ae   : > { %v3035_v8 = vpack.c.bf16 %v2987_v41, %v12836_v11  ;;  %v13081_v43 = vpop.f32.mrf.mxu0 }
 0x3b0   : > { %v3099_v34 = vunpack.c.l.bf16 %v3035_v8  ;;  %v3100_v21 = vunpack.c.h.bf16 %v3035_v8 }
 0x3b2   : > { %v3165_v46 = vadd.f32 %v12751_v5, %v3099_v34  ;;  %v3166_v16 = vadd.f32 %v12753_v10, %v3100_v21 }
 0x3b3   : > { %v2989_v33 = vpop.f32.mrf.mxu1  ;;  %v3603_v47 = vpop.f32.mrf.mxu2 }
 0x3b4   : > { %v2990_v38 = vadd.f32 %v2989_v33, %v12914_v17  ;;  %v3692_v23 = vpop.f32.mrf.mxu3  ;;  %v3325_v32 = vmax.f32 %v3165_v46, 0.0  ;;  %v3326_v45 = vmax.f32 %v3166_v16, 0.0  ;;  %v10006_v17 = vld [vmem:[%s16465_s9 + $0x10] sm:$0xf] }
 0x3b5   : > { %v13054_v11 = vadd.f32 %v3692_v23, %v3603_v47 }
 0x3b6   : > { %3877 = vmatmul.bf16.gmra.mxu1 %v12845_v59  ;;  %v3367_v6 = vpack.c.bf16 %v3325_v32, %v3323_v4  ;;  %v13057_v7 = vpack.c.bf16 %v3326_v45, %v3324_v44  ;;  %v3036_v36 = vpack.c.bf16 %v2990_v38, %v12858_v26  ;;  %v10007_v59 = vor.u32 %v10848_v60, %v10006_v17  ;;  %v13093_v17 = vpop.f32.mrf.mxu0 }
 0x3b8   : > { %3645 = vmatmul.bf16.gmra.mxu2 %v3367_v6  ;;  %3734 = vmatmul.bf16.gmra.mxu3 %v13057_v7  ;;  %v3101_v39 = vunpack.c.l.bf16 %v3036_v36  ;;  %v3102_v56 = vunpack.c.h.bf16 %v3036_v36 }
 0x3b9   : > { %3823 = vmatmul.bf16.gmra.mxu0 %v3367_v6  ;;  %4029 = vmatpush.bf16.msra.mxu2 %v10007_v59 }
 0x3ba   : > { %v3167_v27 = vadd.f32 %v12751_v5, %v3101_v39  ;;  %v3168_v41 = vadd.f32 %v12753_v10, %v3102_v56 }
 0x3bb   : > { %v2991_v9 = vpop.f32.mrf.mxu1  ;;  %v3606_v30 = vpop.f32.mrf.mxu2 }
 0x3bc   : > { %v2992_v26 = vadd.f32 %v2991_v9, %v12940_v3  ;;  %v3695_v22 = vpop.f32.mrf.mxu3  ;;  %v10032_v3 = vld [vmem:[%s16465_s9 + $0x48] sm:$0xf0]  ;;  %v3327_v46 = vmax.f32 %v3167_v27, 0.0  ;;  %v3328_v4 = vmax.f32 %v3168_v41, 0.0 }
 0x3bd   : > { %v13070_v50 = vadd.f32 %v3695_v22, %v3606_v30  ;;  %v10035_v8 = vor.u32 %v10853_v48, %v10032_v3 }
 0x3be   : > { %v3037_v52 = vpack.c.bf16 %v2992_v26, %v12880_v28 }
 0x3bf   : > { %4115 = vmatpush.bf16.msra.mxu3 %v10035_v8 }
 0x3c0   : > { %v3103_v15 = vunpack.c.l.bf16 %v3037_v52  ;;  %v3104_v58 = vunpack.c.h.bf16 %v3037_v52 }
 0x3c2   : > { %v3169_v34 = vadd.f32 %v12751_v5, %v3103_v15  ;;  %v3170_v28 = vadd.f32 %v12753_v10, %v3104_v58 }
 0x3c3   : > { %v2994_v21 = vpop.f32.mrf.mxu1  ;;  %v3608_v61 = vpop.f32.mrf.mxu2 }
 0x3c4   : > { %v2995_v16 = vadd.f32 %v2994_v21, %v12949_v14  ;;  %v3697_v33 = vpop.f32.mrf.mxu3  ;;  %v3329_v47 = vmax.f32 %v3169_v34, 0.0  ;;  %v3330_v38 = vmax.f32 %v3170_v28, 0.0  ;;  %v13106_v34 = vpop.f32.mrf.mxu0 }
 0x3c5   : > { %v13086_v23 = vadd.f32 %v3697_v33, %v3608_v61 }
 0x3c6   : > { %3882 = vmatmul.bf16.gmra.mxu1 %v12889_v55  ;;  %v3369_v32 = vpack.c.bf16 %v3329_v47, %v3327_v46  ;;  %v13089_v44 = vpack.c.bf16 %v3330_v38, %v3328_v4  ;;  %v3038_v45 = vpack.c.bf16 %v2995_v16, %v12906_v62  ;;  %v10846_v46 = vld [vmem:[%s16465_s9 + $0x4] sm:$0xf0] }
 0x3c8   : > { %3650 = vmatmul.bf16.gmra.mxu2 %v3369_v32  ;;  %3739 = vmatmul.bf16.gmra.mxu3 %v13089_v44  ;;  %v3105_v6 = vunpack.c.l.bf16 %v3038_v45  ;;  %v3106_v60 = vunpack.c.h.bf16 %v3038_v45 }
 0x3c9   : > { %3828 = vmatmul.bf16.gmra.mxu0 %v3369_v32 }
 0x3ca   : > { %v3171_v30 = vadd.f32 %v12751_v5, %v3105_v6  ;;  %v3172_v26 = vadd.f32 %v12753_v10, %v3106_v60 }
 0x3cb   : > { %v2996_v36 = vpop.f32.mrf.mxu1  ;;  %v3611_v14 = vpop.f32.mrf.mxu2 }
 0x3cc   : > { %v2997_v59 = vadd.f32 %v2996_v36, %v12967_v37  ;;  %v3700_v39 = vpop.f32.mrf.mxu3  ;;  %v3331_v58 = vmax.f32 %v3171_v30, 0.0  ;;  %v3332_v3 = vmax.f32 %v3172_v26, 0.0  ;;  %v13124_v36 = vpop.f32.mrf.mxu0 }
 0x3cd   : > { %v13096_v9 = vadd.f32 %v3700_v39, %v3611_v14  ;;  %v10851_v39 = vld [vmem:[%s16465_s9 + $0x34] sm:$0xf] }
 0x3ce   : > { %v3039_v55 = vpack.c.bf16 %v2997_v59, %v12934_v18 }
 0x3d0   : > { %v3107_v62 = vunpack.c.l.bf16 %v3039_v55  ;;  %v3108_v56 = vunpack.c.h.bf16 %v3039_v55 }
 0x3d2   : > { %v3173_v22 = vadd.f32 %v12751_v5, %v3107_v62  ;;  %v3174_v52 = vadd.f32 %v12753_v10, %v3108_v56 }
 0x3d3   : > { %v2999_v27 = vpop.f32.mrf.mxu1  ;;  %v3613_v15 = vpop.f32.mrf.mxu2 }
 0x3d4   : > { %v3000_v37 = vadd.f32 %v2999_v27, %v12986_v19  ;;  %v3702_v41 = vpop.f32.mrf.mxu3  ;;  %v3333_v48 = vmax.f32 %v3173_v22, 0.0  ;;  %v3334_v8 = vmax.f32 %v3174_v52, 0.0  ;;  %v9998_v19 = vld [vmem:[%s16465_s9] sm:$0xf] }
 0x3d5   : > { %v13104_v18 = vadd.f32 %v3702_v41, %v3613_v15  ;;  %v9999_v16 = vor.u32 %v10846_v46, %v9998_v19  ;;  %v10849_v46 = vld [vmem:[%s16465_s9 + $0x24] sm:$0xf] }
 0x3d6   : > { %3887 = vmatmul.bf16.gmra.mxu1 %v12937_v20  ;;  %v3371_v28 = vpack.c.bf16 %v3333_v48, %v3331_v58  ;;  %v13109_v21 = vpack.c.bf16 %v3334_v8, %v3332_v3  ;;  %v3040_v61 = vpack.c.bf16 %v3000_v37, %v12944_v29  ;;  %v13143_v8 = vpop.f32.mrf.mxu0 }
 0x3d7   : > { %4030 = vmatpush.bf16.msra.mxu2 %v9999_v16 }
 0x3d8   : > { %3655 = vmatmul.bf16.gmra.mxu2 %v3371_v28  ;;  %3744 = vmatmul.bf16.gmra.mxu3 %v13109_v21  ;;  %v3109_v33 = vunpack.c.l.bf16 %v3040_v61  ;;  %v3110_v4 = vunpack.c.h.bf16 %v3040_v61 }
 0x3d9   : > { %3833 = vmatmul.bf16.gmra.mxu0 %v3371_v28 }
 0x3da   : > { %v3175_v6 = vadd.f32 %v12751_v5, %v3109_v33  ;;  %v3176_v59 = vadd.f32 %v12753_v10, %v3110_v4  ;;  %v10847_v4 = vld [vmem:[%s16465_s9 + $0x14] sm:$0xf] }
 0x3db   : > { %v3001_v20 = vpop.f32.mrf.mxu1  ;;  %v3616_v47 = vpop.f32.mrf.mxu2 }
 0x3dc   : > { %v3002_v38 = vadd.f32 %v3001_v20, %v12998_v25  ;;  %v3705_v29 = vpop.f32.mrf.mxu3  ;;  %v10024_v25 = vld [vmem:[%s16465_s9 + $0x38] sm:$0xf0]  ;;  %v3335_v26 = vmax.f32 %v3175_v6, 0.0  ;;  %v3336_v15 = vmax.f32 %v3176_v59, 0.0 }
 0x3dd   : > { %v13120_v32 = vadd.f32 %v3705_v29, %v3616_v47  ;;  %v10027_v55 = vor.u32 %v10851_v39, %v10024_v25 }
 0x3de   : > { %v3041_v45 = vpack.c.bf16 %v3002_v38, %v12954_v51  ;;  %v10008_v38 = vld [vmem:[%s16465_s9 + $0x18] sm:$0xf0] }
 0x3df   : > { %4116 = vmatpush.bf16.msra.mxu3 %v10027_v55 }
 0x3e0   : > { %v3111_v14 = vunpack.c.l.bf16 %v3041_v45  ;;  %v3112_v60 = vunpack.c.h.bf16 %v3041_v45 }
 0x3e2   : > { %v3177_v30 = vadd.f32 %v12751_v5, %v3111_v14  ;;  %v3178_v51 = vadd.f32 %v12753_v10, %v3112_v60 }
 0x3e3   : > { %v3004_v62 = vpop.f32.mrf.mxu1  ;;  %v3618_v56 = vpop.f32.mrf.mxu2 }
 0x3e4   : > { %v3005_v22 = vadd.f32 %v3004_v62, %v13017_v1  ;;  %v3707_v52 = vpop.f32.mrf.mxu3  ;;  %v3337_v27 = vmax.f32 %v3177_v30, 0.0  ;;  %v3338_v58 = vmax.f32 %v3178_v51, 0.0  ;;  %v10845_v30 = vld [vmem:[%s16465_s9 + $0x4] sm:$0xf]  ;;  %v10000_v51 = vld [vmem:[%s16465_s9 + $0x8] sm:$0xf0] }
 0x3e5   : > { %v13136_v37 = vadd.f32 %v3707_v52, %v3618_v56  ;;  %v10003_v52 = vor.u32 %v10845_v30, %v10000_v51 }
 0x3e6   : > { %3892 = vmatmul.bf16.gmra.mxu1 %v12957_v57  ;;  %v3373_v41 = vpack.c.bf16 %v3337_v27, %v3335_v26  ;;  %v13139_v48 = vpack.c.bf16 %v3338_v58, %v3336_v15  ;;  %v3042_v3 = vpack.c.bf16 %v3005_v22, %v12970_v53  ;;  %v10016_v57 = vld [vmem:[%s16465_s9 + $0x28] sm:$0xf0]  ;;  %v13172_v27 = vpop.f32.mrf.mxu0  ;;  %s764_s9 = sand.u32 1, %s11255_s29  }
 0x3e7   : > { %v10019_v33 = vor.u32 %v10849_v46, %v10016_v57  ;;  %s9481_s7 = sshll.u32 %s764_s9, 8 }
 0x3e8   : > { %3660 = vmatmul.bf16.gmra.mxu2 %v3373_v41  ;;  %3749 = vmatmul.bf16.gmra.mxu3 %v13139_v48  ;;  %v3113_v1 = vunpack.c.l.bf16 %v3042_v3  ;;  %v3114_v28 = vunpack.c.h.bf16 %v3042_v3  ;;  %s16076_s29 = scalar_lea.vmem [#allocation2], %s9481_s7  }
 0x3e9   : > { %3838 = vmatmul.bf16.gmra.mxu0 %v3373_v41  ;;  %4117 = vmatpush.bf16.msra.mxu3 %v10019_v33 }
 0x3ea   : > { %v3179_v29 = vadd.f32 %v12751_v5, %v3113_v1  ;;  %v3180_v45 = vadd.f32 %v12753_v10, %v3114_v28  ;;  %v10120_v1 = vld [vmem:[%s16466_s10 + $0x78] sm:$0xf0] }
 0x3eb   : > { %v3006_v61 = vpop.f32.mrf.mxu1  ;;  %v3621_v19 = vpop.f32.mrf.mxu2 }
 0x3ec   : > { %v3007_v53 = vadd.f32 %v3006_v61, %v13033_v13  ;;  %v3710_v16 = vpop.f32.mrf.mxu3  ;;  %v10011_v13 = vor.u32 %v10847_v4, %v10008_v38  ;;  %v3339_v25 = vmax.f32 %v3179_v29, 0.0  ;;  %v3340_v55 = vmax.f32 %v3180_v45, 0.0 }
 0x3ed   : > { %v13152_v20 = vadd.f32 %v3710_v16, %v3621_v19 }
 0x3ee   : > { %v3043_v47 = vpack.c.bf16 %v3007_v53, %v12984_v0  ;;  %4118 = vmatpush.bf16.msra.mxu3 %v10011_v13  ;;  %v13191_v33 = vpop.f32.mrf.mxu0 }
 0x3f0   : > { %v3115_v6 = vunpack.c.l.bf16 %v3043_v47  ;;  %v3116_v14 = vunpack.c.h.bf16 %v3043_v47 }
 0x3f2   : > { %v3181_v60 = vadd.f32 %v12751_v5, %v3115_v6  ;;  %v3182_v0 = vadd.f32 %v12753_v10, %v3116_v14  ;;  %4119 = vmatpush.bf16.msra.mxu3 %v10003_v52  ;;  %v11177_v52 = vld [vmem:[%s11518_s30] sm:$0xff] }
 0x3f3   : > { %v3009_v59 = vpop.f32.mrf.mxu1  ;;  %v3623_v39 = vpop.f32.mrf.mxu2 }
 0x3f4   : > { %v3010_v62 = vadd.f32 %v3009_v59, %v13046_v12  ;;  %v3712_v56 = vpop.f32.mrf.mxu3  ;;  %v3341_v26 = vmax.f32 %v3181_v60, 0.0  ;;  %v3342_v22 = vmax.f32 %v3182_v0, 0.0  ;;  %v10907_v12 = vld [vmem:[%s16466_s10 + $0x74] sm:$0xf] }
 0x3f5   : > { %v13174_v15 = vadd.f32 %v3712_v56, %v3623_v39  ;;  %v10123_v28 = vor.u32 %v10907_v12, %v10120_v1 }
 0x3f6   : > { %3897 = vmatmul.bf16.gmra.mxu1 %v12989_v42  ;;  %v3375_v58 = vpack.c.bf16 %v3341_v26, %v3339_v25  ;;  %v13177_v41 = vpack.c.bf16 %v3342_v22, %v3340_v55  ;;  %v3044_v3 = vpack.c.bf16 %v3010_v62, %v12994_v63 }
 0x3f7   : > { %4936 = vmatpush.bf16.msrb.mxu2 %v10123_v28 }
 0x3f8   : > { %3665 = vmatmul.bf16.gmra.mxu2 %v3375_v58  ;;  %3754 = vmatmul.bf16.gmra.mxu3 %v13177_v41  ;;  %v3117_v19 = vunpack.c.l.bf16 %v3044_v3  ;;  %v3118_v46 = vunpack.c.h.bf16 %v3044_v3  ;;  %v10112_v3 = vld [vmem:[%s16466_s10 + $0x68] sm:$0xf0] }
 0x3f9   : > { %3843 = vmatmul.bf16.gmra.mxu0 %v3375_v58  ;;  %v10905_v58 = vld [vmem:[%s16466_s10 + $0x64] sm:$0xf] }
 0x3fa   : > { %v3183_v38 = vadd.f32 %v12751_v5, %v3117_v19  ;;  %v3184_v29 = vadd.f32 %v12753_v10, %v3118_v46  ;;  %v10115_v12 = vor.u32 %v10905_v58, %v10112_v3 }
 0x3fb   : > { %v3011_v42 = vpop.f32.mrf.mxu1  ;;  %v3626_v61 = vpop.f32.mrf.mxu2 }
 0x3fc   : > { %v3012_v63 = vadd.f32 %v3011_v42, %v13060_v40  ;;  %v3715_v57 = vpop.f32.mrf.mxu3  ;;  %v3343_v60 = vmax.f32 %v3183_v38, 0.0  ;;  %v3344_v59 = vmax.f32 %v3184_v29, 0.0  ;;  %4937 = vmatpush.bf16.msrb.mxu2 %v10115_v12 }
 0x3fd   : > { %v13188_v53 = vadd.f32 %v3715_v57, %v3626_v61  ;;  %v10118_v57 = vld [vmem:[%s16466_s10 + $0x70] sm:$0xf] }
 0x3fe   : > { %v3045_v16 = vpack.c.bf16 %v3012_v63, %v13004_v54 }
 0x400   : > { %v3119_v47 = vunpack.c.l.bf16 %v3045_v16  ;;  %v3120_v4 = vunpack.c.h.bf16 %v3045_v16  ;;  %v10908_v16 = vld [vmem:[%s16466_s10 + $0x74] sm:$0xf0] }
 0x402   : > { %v3185_v45 = vadd.f32 %v12751_v5, %v3119_v47  ;;  %v3186_v13 = vadd.f32 %v12753_v10, %v3120_v4  ;;  %v13205_v5 = vpop.f32.mrf.mxu0  ;;  %v10119_v47 = vor.u32 %v10908_v16, %v10118_v57  ;;  %v11178_v4 = vld [vmem:[%s11518_s30 + $0x8] sm:$0xff] }
 0x403   : > { %v3628_v6 = vpop.f32.mrf.mxu2  ;;  %v13197_v14 = vpop.f32.mrf.mxu1 }
 0x404   : > { %v3717_v40 = vpop.f32.mrf.mxu3  ;;  %v3345_v0 = vmax.f32 %v3185_v45, 0.0  ;;  %v3346_v54 = vmax.f32 %v3186_v13, 0.0  ;;  %4758 = vmatpush.bf16.msra.mxu0 %v10119_v47 }
 0x405   : > { %v13199_v39 = vadd.f32 %v3717_v40, %v3628_v6 }
 0x406   : > { %3902 = vmatmul.bf16.gmra.mxu1 %v13007_v35  ;;  %v3377_v25 = vpack.c.bf16 %v3345_v0, %v3343_v60  ;;  %v13202_v55 = vpack.c.bf16 %v3346_v54, %v3344_v59  ;;  %v10903_v59 = vld [vmem:[%s16466_s10 + $0x54] sm:$0xf]  ;;  %v10104_v54 = vld [vmem:[%s16466_s10 + $0x58] sm:$0xf0] }
 0x408   : > { %3670 = vmatmul.bf16.gmra.mxu2 %v3377_v25  ;;  %3759 = vmatmul.bf16.gmra.mxu3 %v13202_v55 }
 0x409   : > { %3848 = vmatmul.bf16.gmra.mxu0 %v3377_v25  ;;  %v10107_v25 = vor.u32 %v10903_v59, %v10104_v54  ;;  %v11181_v59 = vld [vmem:[%s11518_s30 + $0x20] sm:$0xff] }
 0x40a   : > { %v10901_v54 = vld [vmem:[%s16466_s10 + $0x44] sm:$0xf] }
 0x40b   : > { %v3631_v10 = vpop.f32.mrf.mxu2  ;;  %v13207_v30 = vpop.f32.mrf.mxu1  ;;  %4938 = vmatpush.bf16.msrb.mxu2 %v10107_v25  ;;  %v10096_v25 = vld [vmem:[%s16466_s10 + $0x48] sm:$0xf0] }
 0x40c   : > { %v3720_v51 = vpop.f32.mrf.mxu3 }
 0x40d   : > { %v13209_v62 = vadd.f32 %v3720_v51, %v3631_v10 }
 0x413   : > { %v3633_v56 = vpop.f32.mrf.mxu2  ;;  %v13211_v26 = vpop.f32.mrf.mxu1 }
 0x414   : > { %v3722_v35 = vpop.f32.mrf.mxu3 }
 0x415   : > { %v13213_v22 = vadd.f32 %v3722_v35, %v3633_v56 }
 0x416   : > { %3907 = vmatmul.bf16.gmra.mxu1 %v13039_v49 }
 0x417   : > { %16467 = vst [vmem:[#allocation7_spill] sm:$0xff] %v13213_v22  ;;  %v10919_v22 = vld [vmem:[%s16466_s10 + $0xd4] sm:$0xf] }
 0x418   : > { %4031 = vmatmul.bf16.vlgmr.msra.gmra.mxu2 %v11177_v52  ;;  %4120 = vmatmul.bf16.vlgmr.msra.gmra.mxu3 %v11177_v52 }
 0x41b   : > { %v3636_v1 = vpop.f32.mrf.mxu2  ;;  %v13223_v28 = vpop.f32.mrf.mxu1 }
 0x41c   : > { %v3725_v42 = vpop.f32.mrf.mxu3 }
 0x41d   : > { %v13225_v61 = vadd.f32 %v3725_v42, %v3636_v1  ;;  %v10110_v1 = vld [vmem:[%s16466_s10 + $0x60] sm:$0xf]  ;;  %v10906_v42 = vld [vmem:[%s16466_s10 + $0x64] sm:$0xf0] }
 0x41f   : > { %16468 = vst [vmem:[#allocation8_spill] sm:$0xff] %v13225_v61 }
 0x423   : > { %v3638_v49 = vpop.f32.mrf.mxu2  ;;  %v13227_v19 = vpop.f32.mrf.mxu1 }
 0x424   : > { %v3727_v46 = vpop.f32.mrf.mxu3 }
 0x425   : > { %v13229_v63 = vadd.f32 %v3727_v46, %v3638_v49  ;;  %v10111_v49 = vor.u32 %v10906_v42, %v10110_v1  ;;  %v11180_v46 = vld [vmem:[%s11518_s30 + $0x18] sm:$0xff]  ;;  %v10923_v42 = vld [vmem:[%s16466_s10 + $0xf4] sm:$0xf] }
 0x426   : > { %3912 = vmatmul.bf16.gmra.mxu1 %v13057_v7  ;;  %v11179_v7 = vld [vmem:[%s11518_s30 + $0x10] sm:$0xff] }
 0x427   : > { %16469 = vst [vmem:[#allocation9_spill] sm:$0xff] %v13229_v63  ;;  %4759 = vmatpush.bf16.msra.mxu0 %v10111_v49  ;;  %v10184_v49 = vld [vmem:[%s16466_s10 + $0xf8] sm:$0xf0] }
 0x428   : > { %4036 = vmatmul.bf16.gmra.mxu2 %v11178_v4  ;;  %4125 = vmatmul.bf16.gmra.mxu3 %v11178_v4 }
 0x42b   : > { %v3641_v38 = vpop.f32.mrf.mxu2  ;;  %v13239_v29 = vpop.f32.mrf.mxu1 }
 0x42c   : > { %v3730_v45 = vpop.f32.mrf.mxu3 }
 0x42d   : > { %v13241_v13 = vadd.f32 %v3730_v45, %v3641_v38 }
 0x42f   : > { %16470 = vst [vmem:[#allocation10_spill] sm:$0xff] %v13241_v13  ;;  %v5146_v13 = vld [vmem:[%s16485_s11] sm:$0x3] }
 0x433   : > { %v3643_v6 = vpop.f32.mrf.mxu2  ;;  %v13243_v40 = vpop.f32.mrf.mxu1 }
 0x434   : > { %v3732_v60 = vpop.f32.mrf.mxu3 }
 0x435   : > { %v13245_v0 = vadd.f32 %v3732_v60, %v3643_v6 }
 0x436   : > { %3917 = vmatmul.bf16.gmra.mxu1 %v13089_v44  ;;  %v13259_v44 = vpop.f32.mrf.mxu0 }
 0x437   : > { %16471 = vst [vmem:[#allocation11_spill] sm:$0xff] %v13245_v0  ;;  %v4237_v0 = vld [vmem:[#allocation1 + $0x9] sm:$0xff] }
 0x438   : > { %4041 = vmatmul.bf16.gmra.mxu2 %v11179_v7  ;;  %4130 = vmatmul.bf16.gmra.mxu3 %v11179_v7 }
 0x43b   : > { %v3646_v10 = vpop.f32.mrf.mxu2  ;;  %v13255_v51 = vpop.f32.mrf.mxu1 }
 0x43c   : > { %v3735_v56 = vpop.f32.mrf.mxu3 }
 0x43d   : > { %v13257_v35 = vadd.f32 %v3735_v56, %v3646_v10  ;;  %v10099_v10 = vor.u32 %v10901_v54, %v10096_v25  ;;  %v10182_v25 = vld [vmem:[%s16466_s10 + $0xf0] sm:$0xf] }
 0x43e   : > { %v13273_v57 = vpop.f32.mrf.mxu0 }
 0x43f   : > { %16472 = vst [vmem:[#allocation12_spill] sm:$0xff] %v13257_v35  ;;  %4939 = vmatpush.bf16.msrb.mxu2 %v10099_v10  ;;  %v10924_v10 = vld [vmem:[%s16466_s10 + $0xf4] sm:$0xf0]  ;;  %v4236_v35 = vld [vmem:[#allocation1] sm:$0xff] }
 0x440   : > { %5148 = vst [vmem:[#allocation1] ss:$9 sm:$0xff] %v5146_v13 }
 0x443   : > { %v3648_v52 = vpop.f32.mrf.mxu2  ;;  %v13261_v58 = vpop.f32.mrf.mxu1 }
 0x444   : > { %v3737_v3 = vpop.f32.mrf.mxu3 }
 0x445   : > { %v13263_v12 = vadd.f32 %v3737_v3, %v3648_v52 }
 0x446   : > { %3922 = vmatmul.bf16.gmra.mxu1 %v13109_v21  ;;  %v13279_v45 = vpop.f32.mrf.mxu0 }
 0x447   : > { %16473 = vst [vmem:[#allocation13_spill] sm:$0xff] %v13263_v12 }
 0x448   : > { %4046 = vmatmul.bf16.gmra.mxu2 %v11180_v46  ;;  %4135 = vmatmul.bf16.gmra.mxu3 %v11180_v46  ;;  %v10187_v46 = vor.u32 %v10923_v42, %v10184_v49  ;;  %v11182_v49 = vld [vmem:[%s11518_s30 + $0x28] sm:$0xff] }
 0x44a   : > { %5025 = vmatpush.bf16.msrb.mxu3 %v10187_v46 }
 0x44b   : > { %v3651_v16 = vpop.f32.mrf.mxu2  ;;  %v13275_v47 = vpop.f32.mrf.mxu1 }
 0x44c   : > { %v3740_v4 = vpop.f32.mrf.mxu3 }
 0x44d   : > { %v13277_v38 = vadd.f32 %v3740_v4, %v3651_v16 }
 0x44e   : > { %v13293_v3 = vpop.f32.mrf.mxu0 }
 0x44f   : > { %16474 = vst [vmem:[#allocation14_spill] sm:$0xff] %v13277_v38 }
 0x453   : > { %v3653_v6 = vpop.f32.mrf.mxu2  ;;  %v13281_v7 = vpop.f32.mrf.mxu1 }
 0x454   : > { %v3742_v60 = vpop.f32.mrf.mxu3 }
 0x455   : > { %v13283_v21 = vadd.f32 %v3742_v60, %v3653_v6  ;;  %v10102_v60 = vld [vmem:[%s16466_s10 + $0x50] sm:$0xf] }
 0x456   : > { %3927 = vmatmul.bf16.gmra.mxu1 %v13139_v48 }
 0x457   : > { %16475 = vst [vmem:[#allocation15_spill] sm:$0xff] %v13283_v21  ;;  %v10900_v21 = vld [vmem:[%s16466_s10 + $0x34] sm:$0xf0] }
 0x458   : > { %4051 = vmatmul.bf16.gmra.mxu2 %v11181_v59  ;;  %4140 = vmatmul.bf16.gmra.mxu3 %v11181_v59  ;;  %v10904_v59 = vld [vmem:[%s16466_s10 + $0x54] sm:$0xf0] }
 0x459   : > { %v10103_v54 = vor.u32 %v10904_v59, %v10102_v60 }
 0x45b   : > { %v3656_v56 = vpop.f32.mrf.mxu2  ;;  %v13297_v48 = vpop.f32.mrf.mxu1  ;;  %4760 = vmatpush.bf16.msra.mxu0 %v10103_v54 }
 0x45c   : > { %v3745_v52 = vpop.f32.mrf.mxu3 }
 0x45d   : > { %v13295_v1 = vadd.f32 %v3745_v52, %v3656_v56  ;;  %v13320_v56 = vpop.f32.mrf.mxu0  ;;  %v10183_v52 = vor.u32 %v10924_v10, %v10182_v25  ;;  %v10174_v25 = vld [vmem:[%s16466_s10 + $0xe0] sm:$0xf]  ;;  %v10922_v10 = vld [vmem:[%s16466_s10 + $0xe4] sm:$0xf0] }
 0x45f   : > { %16476 = vst [vmem:[#allocation16_spill] sm:$0xff] %v13295_v1  ;;  %4847 = vmatpush.bf16.msrb.mxu1 %v10183_v52  ;;  %v10175_v52 = vor.u32 %v10922_v10, %v10174_v25  ;;  %v10899_v25 = vld [vmem:[%s16466_s10 + $0x34] sm:$0xf] }
 0x463   : > { %v3658_v16 = vpop.f32.mrf.mxu2  ;;  %v13322_v42 = vpop.f32.mrf.mxu1  ;;  %4848 = vmatpush.bf16.msrb.mxu1 %v10175_v52 }
 0x464   : > { %v3747_v4 = vpop.f32.mrf.mxu3 }
 0x465   : > { %v13305_v6 = vadd.f32 %v3747_v4, %v3658_v16  ;;  %v13327_v4 = vpop.f32.mrf.mxu0 }
 0x466   : > { %3932 = vmatmul.bf16.gmra.mxu1 %v13177_v41 }
 0x467   : > { %16477 = vst [vmem:[#allocation17_spill] sm:$0xff] %v13305_v6  ;;  %v10158_v6 = vld [vmem:[%s16466_s10 + $0xc0] sm:$0xf] }
 0x468   : > { %4056 = vmatmul.bf16.gmra.mxu2 %v11182_v49  ;;  %4145 = vmatmul.bf16.gmra.mxu3 %v11182_v49 }
 0x46b   : > { %v3661_v41 = vpop.f32.mrf.mxu2  ;;  %v13329_v60 = vpop.f32.mrf.mxu1 }
 0x46c   : > { %v3750_v46 = vpop.f32.mrf.mxu3 }
 0x46d   : > { %v13325_v16 = vadd.f32 %v3750_v46, %v3661_v41  ;;  %v10166_v41 = vld [vmem:[%s16466_s10 + $0xd0] sm:$0xf]  ;;  %v10920_v46 = vld [vmem:[%s16466_s10 + $0xd4] sm:$0xf0] }
 0x46f   : > { %16478 = vst [vmem:[#allocation18_spill] sm:$0xff] %v13325_v16  ;;  %v11183_v16 = vld [vmem:[%s11518_s30 + $0x30] sm:$0xff] }
 0x473   : > { %v3663_v59 = vpop.f32.mrf.mxu2  ;;  %v13364_v1 = vpop.f32.mrf.mxu1 }
 0x474   : > { %v3752_v54 = vpop.f32.mrf.mxu3 }
 0x475   : > { %v13337_v49 = vadd.f32 %v3752_v54, %v3663_v59  ;;  %v10167_v59 = vor.u32 %v10920_v46, %v10166_v41  ;;  %v13353_v54 = vpop.f32.mrf.mxu0 }
 0x476   : > { %3937 = vmatmul.bf16.gmra.mxu1 %v13202_v55  ;;  %v10088_v55 = vld [vmem:[%s16466_s10 + $0x38] sm:$0xf0] }
 0x477   : > { %16479 = vst [vmem:[#allocation19_spill] sm:$0xff] %v13337_v49  ;;  %v10091_v10 = vor.u32 %v10899_v25, %v10088_v55  ;;  %4849 = vmatpush.bf16.msrb.mxu1 %v10167_v59  ;;  %v10094_v49 = vld [vmem:[%s16466_s10 + $0x40] sm:$0xf]  ;;  %v10918_v25 = vld [vmem:[%s16466_s10 + $0xc4] sm:$0xf0] }
 0x478   : > { %4061 = vmatmul.bf16.gmra.mxu2 %v11183_v16  ;;  %4150 = vmatmul.bf16.gmra.mxu3 %v11183_v16  ;;  %v10902_v16 = vld [vmem:[%s16466_s10 + $0x44] sm:$0xf0]  ;;  %v10159_v59 = vor.u32 %v10918_v25, %v10158_v6 }
 0x479   : > { %4940 = vmatpush.bf16.msrb.mxu2 %v10091_v10  ;;  %v10095_v46 = vor.u32 %v10902_v16, %v10094_v49  ;;  %v10086_v10 = vld [vmem:[%s16466_s10 + $0x30] sm:$0xf] }
 0x47a   : > { %v10087_v38 = vor.u32 %v10900_v21, %v10086_v10  ;;  %v10150_v49 = vld [vmem:[%s16466_s10 + $0xb0] sm:$0xf]  ;;  %v10898_v21 = vld [vmem:[%s16466_s10 + $0x24] sm:$0xf0] }
 0x47b   : > { %v3666_v52 = vpop.f32.mrf.mxu2  ;;  %4761 = vmatpush.bf16.msra.mxu0 %v10095_v46  ;;  %4850 = vmatpush.bf16.msrb.mxu1 %v10159_v59  ;;  %v10142_v46 = vld [vmem:[%s16466_s10 + $0xa0] sm:$0xf]  ;;  %v13405_v12 = vpop.f32.mrf.mxu1 }
 0x47c   : > { %v3755_v41 = vpop.f32.mrf.mxu3 }
 0x47d   : > { %v13369_v55 = vadd.f32 %v3755_v41, %v3666_v52  ;;  %v10916_v52 = vld [vmem:[%s16466_s10 + $0xb4] sm:$0xf0]  ;;  %v10078_v41 = vld [vmem:[%s16466_s10 + $0x20] sm:$0xf]  ;;  %v13395_v10 = vpop.f32.mrf.mxu0 }
 0x47e   : > { %v10151_v6 = vor.u32 %v10916_v52, %v10150_v49  ;;  %v10079_v59 = vor.u32 %v10898_v21, %v10078_v41  ;;  %v10921_v52 = vld [vmem:[%s16466_s10 + $0xe4] sm:$0xf]  ;;  %v10070_v21 = vld [vmem:[%s16466_s10 + $0x10] sm:$0xf] }
 0x47f   : > { %16480 = vst [vmem:[#allocation20_spill] sm:$0xff] %v13369_v55  ;;  %4762 = vmatpush.bf16.msra.mxu0 %v10087_v38  ;;  %v10914_v38 = vld [vmem:[%s16466_s10 + $0xa4] sm:$0xf0] }
 0x480   : > { %4851 = vmatpush.bf16.msrb.mxu1 %v10151_v6  ;;  %v10176_v6 = vld [vmem:[%s16466_s10 + $0xe8] sm:$0xf0]  ;;  %v10143_v55 = vor.u32 %v10914_v38, %v10142_v46 }
 0x481   : > { %v10179_v41 = vor.u32 %v10921_v52, %v10176_v6  ;;  %v10062_v52 = vld [vmem:[%s16466_s10] sm:$0xf]  ;;  %v10894_v6 = vld [vmem:[%s16466_s10 + $0x4] sm:$0xf0] }
 0x483   : > { %v3668_v16 = vpop.f32.mrf.mxu2  ;;  %4763 = vmatpush.bf16.msra.mxu0 %v10079_v59  ;;  %5026 = vmatpush.bf16.msrb.mxu3 %v10179_v41  ;;  %v10910_v41 = vld [vmem:[%s16466_s10 + $0x84] sm:$0xf0] }
 0x484   : > { %v3757_v25 = vpop.f32.mrf.mxu3  ;;  %4852 = vmatpush.bf16.msrb.mxu1 %v10143_v55  ;;  %v10912_v55 = vld [vmem:[%s16466_s10 + $0x94] sm:$0xf0] }
 0x485   : > { %v13397_v49 = vadd.f32 %v3757_v25, %v3668_v16  ;;  %v10896_v16 = vld [vmem:[%s16466_s10 + $0x14] sm:$0xf0]  ;;  %v10134_v25 = vld [vmem:[%s16466_s10 + $0x90] sm:$0xf] }
 0x486   : > { %v10071_v46 = vor.u32 %v10896_v16, %v10070_v21  ;;  %v10135_v59 = vor.u32 %v10912_v55, %v10134_v25  ;;  %v10063_v16 = vor.u32 %v10894_v6, %v10062_v52  ;;  %v13434_v55 = vpop.f32.mrf.mxu0 }
 0x487   : > { %16481 = vst [vmem:[#allocation21_spill] sm:$0xff] %v13397_v49  ;;  %v11184_v49 = vld [vmem:[%s11518_s30 + $0x38] sm:$0xff] }
 0x488   : > { %4066 = vmatmul.bf16.gmra.mxu2 %v11184_v49  ;;  %4155 = vmatmul.bf16.gmra.mxu3 %v11184_v49  ;;  %v10126_v49 = vld [vmem:[%s16466_s10 + $0x80] sm:$0xf]  ;;  %16483 = vst [vmem:[#allocation23_spill] sm:$0xff] %v13434_v55 }
 0x489   : > { %4764 = vmatpush.bf16.msra.mxu0 %v10071_v46  ;;  %4853 = vmatpush.bf16.msrb.mxu1 %v10135_v59  ;;  %v10127_v46 = vor.u32 %v10910_v41, %v10126_v49  ;;  %v13436_v59 = vpop.f32.mrf.mxu1 }
 0x48a   : > { %16484 = vst [vmem:[#allocation24_spill] sm:$0xff] %v13436_v59 }
 0x48b   : > { %v3671_v38 = vpop.f32.mrf.mxu2 }
 0x48c   : > { %v3760_v21 = vpop.f32.mrf.mxu3 }
 0x48d   : > { %v13432_v25 = vadd.f32 %v3760_v21, %v3671_v38  ;;  %4765 = vmatpush.bf16.msra.mxu0 %v10063_v16  ;;  %4854 = vmatpush.bf16.msrb.mxu1 %v10127_v46  ;;  %v11185_v38 = vld [vmem:[%s11518_s30 + $0x40] sm:$0xff]  ;;  %v10080_v16 = vld [vmem:[%s16466_s10 + $0x28] sm:$0xf0]  ;;  %v3864_v46 = vadd.f32 %v13197_v14, %v13081_v43 }
 0x48e   : > { %v13444_v49 = vpop.f32.mrf.mxu0  ;;  %v10897_v21 = vld [vmem:[%s16466_s10 + $0x24] sm:$0xf] }
 0x48f   : > { %16482 = vst [vmem:[#allocation22_spill] sm:$0xff] %v13432_v25  ;;  %v10083_v13 = vor.u32 %v10897_v21, %v10080_v16  ;;  %v10168_v21 = vld [vmem:[%s16466_s10 + $0xd8] sm:$0xf0] }
 0x490   : > { %16487 = vst [vmem:[#allocation26_spill] sm:$0xff] %v13444_v49  ;;  %v4241_v49 = vpack.i.b16 %v4237_v0, %v4237_v0  ;;  %v10171_v43 = vor.u32 %v10919_v22, %v10168_v21 }
 0x491   : > { %v13452_v41 = vpop.f32.mrf.mxu1  ;;  %4941 = vmatpush.bf16.msrb.mxu2 %v10083_v13 }
 0x492   : > { %v4243_v55 = vperm.slane %v4241_v49, 0  ;;  %5027 = vmatpush.bf16.msrb.mxu3 %v10171_v43 }
 0x493   : > { %v3673_v52 = vpop.f32.mrf.mxu2 }
 0x494   : > { %v3762_v6 = vpop.f32.mrf.mxu3 }
 0x495   : > { %v13441_v63 = vadd.f32 %v3762_v6, %v3673_v52 }
 0x496   : > { %v13465_v14 = vpop.f32.mrf.mxu0 }
 0x497   : > { %16486 = vst [vmem:[#allocation25_spill] sm:$0xff] %v13441_v63  ;;  %v4238_v63 = vpack.i.b16 %v4236_v35, %v4236_v35 }
 0x498   : > { %4071 = vmatmul.bf16.gmra.mxu2 %v11185_v38  ;;  %4160 = vmatmul.bf16.gmra.mxu3 %v11185_v38 }
 0x499   : > { %v4240_v59 = vperm.slane %v4238_v63, 0  ;;  %v13467_v0 = vpop.f32.mrf.mxu1 }
 0x49b   : > { %v4032_v52 = vpop.f32.mrf.mxu2 }
 0x49c   : > { %v4033_v6 = vadd.f32 %v4032_v52, %v13020_v2  ;;  %v4121_v38 = vpop.f32.mrf.mxu3  ;;  %v3866_v2 = vadd.f32 %v13207_v30, %v13093_v17  ;;  %v11186_v17 = vld [vmem:[%s11518_s30 + $0x48] sm:$0xff] }
 0x49d   : > { %v4122_v25 = vadd.f32 %v4121_v38, %v3864_v46  ;;  %v13472_v46 = vunpack.c.l.bf16 %v4243_v55 }
 0x49f   : > { %v4201_v61 = vpack.c.bf16 %v4122_v25, %v4033_v6  ;;  %v13469_v25 = vunpack.c.l.bf16 %v4240_v59  ;;  %v3869_v59 = vadd.f32 %v13211_v26, %v13106_v34 }
 0x4a1   : > { %v4244_v63 = vunpack.c.l.bf16 %v4201_v61  ;;  %v4245_v13 = vunpack.c.h.bf16 %v4201_v61 }
 0x4a3   : > { %v4034_v35 = vpop.f32.mrf.mxu2  ;;  %v4310_v6 = vadd.f32 %v13469_v25, %v4244_v63  ;;  %v4311_v30 = vadd.f32 %v13472_v46, %v4245_v13  ;;  %v13482_v63 = vpop.f32.mrf.mxu0 }
 0x4a4   : > { %v4035_v49 = vadd.f32 %v4034_v35, %v13036_v31  ;;  %v4123_v16 = vpop.f32.mrf.mxu3 }
 0x4a5   : > { %v4124_v52 = vadd.f32 %v4123_v16, %v3866_v2  ;;  %v4470_v43 = vmax.f32 %v4310_v6, 0.0 }
 0x4a7   : > { %v4202_v22 = vpack.c.bf16 %v4124_v52, %v4035_v49  ;;  %v4471_v49 = vmax.f32 %v4311_v30, 0.0 }
 0x4a8   : > { %4076 = vmatmul.bf16.gmra.mxu2 %v11186_v17  ;;  %4165 = vmatmul.bf16.gmra.mxu3 %v11186_v17  ;;  %v13484_v17 = vpop.f32.mrf.mxu1 }
 0x4a9   : > { %v4246_v38 = vunpack.c.l.bf16 %v4202_v22  ;;  %v4247_v21 = vunpack.c.h.bf16 %v4202_v22 }
 0x4ab   : > { %v4312_v31 = vadd.f32 %v13469_v25, %v4246_v38  ;;  %v4313_v61 = vadd.f32 %v13472_v46, %v4247_v21  ;;  %v4037_v55 = vpop.f32.mrf.mxu2 }
 0x4ac   : > { %v4038_v2 = vadd.f32 %v4037_v55, %v13044_v24  ;;  %v4126_v35 = vpop.f32.mrf.mxu3  ;;  %v3871_v24 = vadd.f32 %v13223_v28, %v13124_v36  ;;  %v10072_v28 = vld [vmem:[%s16466_s10 + $0x18] sm:$0xf0] }
 0x4ad   : > { %v4472_v16 = vmax.f32 %v4312_v31, 0.0  ;;  %v4473_v52 = vmax.f32 %v4313_v61, 0.0  ;;  %v4127_v13 = vadd.f32 %v4126_v35, %v3869_v59  ;;  %v13495_v61 = vpop.f32.mrf.mxu0 }
 0x4ae   : > { %16488 = vst [vmem:[#allocation27_spill] sm:$0xff] %v13495_v61 }
 0x4af   : > { %v13486_v22 = vpack.c.bf16 %v4472_v16, %v4470_v43  ;;  %v13488_v34 = vpack.c.bf16 %v4473_v52, %v4471_v49  ;;  %v4203_v26 = vpack.c.bf16 %v4127_v13, %v4038_v2  ;;  %v11187_v2 = vld [vmem:[%s11518_s30 + $0x50] sm:$0xff]  ;;  %v3874_v13 = vadd.f32 %v13227_v19, %v13143_v8  ;;  %v10160_v19 = vld [vmem:[%s16466_s10 + $0xc8] sm:$0xf0] }
 0x4b0   : > { %v13497_v43 = vpop.f32.mrf.mxu1 }
 0x4b1   : > { %4766 = vmatmul.bf16.vlgmr.msra.gmra.mxu0 %v13486_v22  ;;  %4855 = vmatmul.bf16.vlgmr.msrb.gmra.mxu1 %v13488_v34  ;;  %v4248_v30 = vunpack.c.l.bf16 %v4203_v26  ;;  %v4249_v59 = vunpack.c.h.bf16 %v4203_v26  ;;  %16489 = vst [vmem:[#allocation28_spill] sm:$0xff] %v13497_v43 }
 0x4b3   : > { %v4039_v6 = vpop.f32.mrf.mxu2  ;;  %v4314_v35 = vadd.f32 %v13469_v25, %v4248_v30  ;;  %v4315_v36 = vadd.f32 %v13472_v46, %v4249_v59 }
 0x4b4   : > { %v4040_v38 = vadd.f32 %v4039_v6, %v13054_v11  ;;  %v4128_v21 = vpop.f32.mrf.mxu3  ;;  %v10895_v11 = vld [vmem:[%s16466_s10 + $0x14] sm:$0xf] }
 0x4b5   : > { %v4129_v31 = vadd.f32 %v4128_v21, %v3871_v24  ;;  %v10075_v52 = vor.u32 %v10895_v11, %v10072_v28  ;;  %v4474_v21 = vmax.f32 %v4314_v35, 0.0  ;;  %v13517_v8 = vpop.f32.mrf.mxu0 }
 0x4b7   : > { %v4204_v55 = vpack.c.bf16 %v4129_v31, %v4040_v38  ;;  %4942 = vmatpush.bf16.msrb.mxu2 %v10075_v52 }
 0x4b8   : > { %4081 = vmatmul.bf16.gmra.mxu2 %v11187_v2  ;;  %4170 = vmatmul.bf16.gmra.mxu3 %v11187_v2  ;;  %v13527_v35 = vpop.f32.mrf.mxu1 }
 0x4b9   : > { %v4250_v49 = vunpack.c.l.bf16 %v4204_v55  ;;  %v4251_v16 = vunpack.c.h.bf16 %v4204_v55  ;;  %v4475_v55 = vmax.f32 %v4315_v36, 0.0 }
 0x4bb   : > { %v4042_v26 = vpop.f32.mrf.mxu2  ;;  %v4316_v24 = vadd.f32 %v13469_v25, %v4250_v49  ;;  %v4317_v6 = vadd.f32 %v13472_v46, %v4251_v16  ;;  %v3876_v16 = vadd.f32 %v13239_v29, %v13172_v27  ;;  %v3879_v27 = vadd.f32 %v13243_v40, %v13191_v33 }
 0x4bc   : > { %v4043_v30 = vadd.f32 %v4042_v26, %v13070_v50  ;;  %v4131_v38 = vpop.f32.mrf.mxu3  ;;  %v10917_v50 = vld [vmem:[%s16466_s10 + $0xc4] sm:$0xf] }
 0x4bd   : > { %v4132_v59 = vadd.f32 %v4131_v38, %v3874_v13  ;;  %v4476_v31 = vmax.f32 %v4316_v24, 0.0  ;;  %v4477_v2 = vmax.f32 %v4317_v6, 0.0  ;;  %v10163_v49 = vor.u32 %v10917_v50, %v10160_v19  ;;  %v13537_v29 = vpop.f32.mrf.mxu0 }
 0x4bf   : > { %v4205_v43 = vpack.c.bf16 %v4132_v59, %v4043_v30  ;;  %v13513_v61 = vpack.c.bf16 %v4476_v31, %v4474_v21  ;;  %v13515_v11 = vpack.c.bf16 %v4477_v2, %v4475_v55  ;;  %5028 = vmatpush.bf16.msrb.mxu3 %v10163_v49  ;;  %v11188_v30 = vld [vmem:[%s11518_s30 + $0x58] sm:$0xff] }
 0x4c0   : > { %v13541_v2 = vpop.f32.mrf.mxu1 }
 0x4c1   : > { %4771 = vmatmul.bf16.gmra.mxu0 %v13513_v61  ;;  %4860 = vmatmul.bf16.gmra.mxu1 %v13515_v11  ;;  %v4252_v28 = vunpack.c.l.bf16 %v4205_v43  ;;  %v4253_v26 = vunpack.c.h.bf16 %v4205_v43 }
 0x4c3   : > { %v4044_v36 = vpop.f32.mrf.mxu2  ;;  %v4318_v38 = vadd.f32 %v13469_v25, %v4252_v28  ;;  %v4319_v31 = vadd.f32 %v13472_v46, %v4253_v26  ;;  %v3881_v26 = vadd.f32 %v13255_v51, %v13205_v5  ;;  %v10064_v51 = vld [vmem:[%s16466_s10 + $0x8] sm:$0xf0] }
 0x4c4   : > { %v4045_v52 = vadd.f32 %v4044_v36, %v13086_v23  ;;  %v4133_v13 = vpop.f32.mrf.mxu3 }
 0x4c5   : > { %v4134_v24 = vadd.f32 %v4133_v13, %v3876_v16  ;;  %v4478_v49 = vmax.f32 %v4318_v38, 0.0  ;;  %v4479_v28 = vmax.f32 %v4319_v31, 0.0  ;;  %v13553_v38 = vpop.f32.mrf.mxu0 }
 0x4c7   : > { %v4206_v6 = vpack.c.bf16 %v4134_v24, %v4045_v52 }
 0x4c8   : > { %4086 = vmatmul.bf16.gmra.mxu2 %v11188_v30  ;;  %4175 = vmatmul.bf16.gmra.mxu3 %v11188_v30  ;;  %v13555_v31 = vpop.f32.mrf.mxu1 }
 0x4c9   : > { %v4254_v21 = vunpack.c.l.bf16 %v4206_v6  ;;  %v4255_v59 = vunpack.c.h.bf16 %v4206_v6 }
 0x4cb   : > { %v4047_v23 = vpop.f32.mrf.mxu2  ;;  %v4320_v55 = vadd.f32 %v13469_v25, %v4254_v21  ;;  %v4321_v43 = vadd.f32 %v13472_v46, %v4255_v59 }
 0x4cc   : > { %v4048_v50 = vadd.f32 %v4047_v23, %v13096_v9  ;;  %v4136_v19 = vpop.f32.mrf.mxu3  ;;  %v11189_v23 = vld [vmem:[%s11518_s30 + $0x60] sm:$0xff] }
 0x4cd   : > { %v4137_v16 = vadd.f32 %v4136_v19, %v3879_v27  ;;  %v4480_v36 = vmax.f32 %v4320_v55, 0.0  ;;  %v4481_v52 = vmax.f32 %v4321_v43, 0.0 }
 0x4cf   : > { %v4207_v13 = vpack.c.bf16 %v4137_v16, %v4048_v50  ;;  %v13544_v33 = vpack.c.bf16 %v4480_v36, %v4478_v49  ;;  %v13546_v40 = vpack.c.bf16 %v4481_v52, %v4479_v28  ;;  %v3884_v49 = vadd.f32 %v13261_v58, %v13259_v44 }
 0x4d0   : > { %v13577_v44 = vpop.f32.mrf.mxu1 }
 0x4d1   : > { %4776 = vmatmul.bf16.gmra.mxu0 %v13544_v33  ;;  %4865 = vmatmul.bf16.gmra.mxu1 %v13546_v40  ;;  %v4256_v24 = vunpack.c.l.bf16 %v4207_v13  ;;  %v4257_v21 = vunpack.c.h.bf16 %v4207_v13 }
 0x4d3   : > { %v4049_v9 = vpop.f32.mrf.mxu2  ;;  %v4322_v55 = vadd.f32 %v13469_v25, %v4256_v24  ;;  %v4323_v5 = vadd.f32 %v13472_v46, %v4257_v21  ;;  %v13571_v21 = vpop.f32.mrf.mxu0 }
 0x4d4   : > { %v4050_v6 = vadd.f32 %v4049_v9, %v13104_v18  ;;  %v4138_v30 = vpop.f32.mrf.mxu3  ;;  %v10893_v18 = vld [vmem:[%s16466_s10 + $0x4] sm:$0xf] }
 0x4d5   : > { %v4139_v59 = vadd.f32 %v4138_v30, %v3881_v26  ;;  %v10067_v19 = vor.u32 %v10893_v18, %v10064_v51  ;;  %v4482_v26 = vmax.f32 %v4322_v55, 0.0 }
 0x4d7   : > { %v4208_v27 = vpack.c.bf16 %v4139_v59, %v4050_v6  ;;  %4943 = vmatpush.bf16.msrb.mxu2 %v10067_v19  ;;  %v4483_v6 = vmax.f32 %v4323_v5, 0.0 }
 0x4d8   : > { %4091 = vmatmul.bf16.gmra.mxu2 %v11189_v23  ;;  %4180 = vmatmul.bf16.gmra.mxu3 %v11189_v23  ;;  %v10152_v23 = vld [vmem:[%s16466_s10 + $0xb8] sm:$0xf0] }
 0x4d9   : > { %v4258_v43 = vunpack.c.l.bf16 %v4208_v27  ;;  %v4259_v50 = vunpack.c.h.bf16 %v4208_v27 }
 0x4db   : > { %v4052_v16 = vpop.f32.mrf.mxu2  ;;  %v4324_v36 = vadd.f32 %v13469_v25, %v4258_v43  ;;  %v4325_v28 = vadd.f32 %v13472_v46, %v4259_v50  ;;  %v3886_v43 = vadd.f32 %v13275_v47, %v13273_v57  ;;  %v13595_v47 = vpop.f32.mrf.mxu1 }
 0x4dc   : > { %v4053_v52 = vadd.f32 %v4052_v16, %v13120_v32  ;;  %v4141_v13 = vpop.f32.mrf.mxu3  ;;  %v10915_v32 = vld [vmem:[%s16466_s10 + $0xb4] sm:$0xf] }
 0x4dd   : > { %v4142_v9 = vadd.f32 %v4141_v13, %v3884_v49  ;;  %v4484_v24 = vmax.f32 %v4324_v36, 0.0  ;;  %v4485_v30 = vmax.f32 %v4325_v28, 0.0  ;;  %v10155_v55 = vor.u32 %v10915_v32, %v10152_v23  ;;  %v11190_v36 = vld [vmem:[%s11518_s30 + $0x68] sm:$0xff] }
 0x4df   : > { %v13573_v59 = vpack.c.bf16 %v4484_v24, %v4482_v26  ;;  %v13575_v27 = vpack.c.bf16 %v4485_v30, %v4483_v6  ;;  %v4209_v58 = vpack.c.bf16 %v4142_v9, %v4053_v52  ;;  %5029 = vmatpush.bf16.msrb.mxu3 %v10155_v55  ;;  %v13592_v52 = vpop.f32.mrf.mxu0  ;;  %v10913_v30 = vld [vmem:[%s16466_s10 + $0xa4] sm:$0xf] }
 0x4e1   : > { %4781 = vmatmul.bf16.gmra.mxu0 %v13573_v59  ;;  %4870 = vmatmul.bf16.gmra.mxu1 %v13575_v27  ;;  %v4260_v5 = vunpack.c.l.bf16 %v4209_v58  ;;  %v4261_v19 = vunpack.c.h.bf16 %v4209_v58  ;;  %v10144_v58 = vld [vmem:[%s16466_s10 + $0xa8] sm:$0xf0] }
 0x4e3   : > { %v4054_v50 = vpop.f32.mrf.mxu2  ;;  %v4326_v28 = vadd.f32 %v13469_v25, %v4260_v5  ;;  %v4327_v57 = vadd.f32 %v13472_v46, %v4261_v19  ;;  %v10911_v19 = vld [vmem:[%s16466_s10 + $0x94] sm:$0xf] }
 0x4e4   : > { %v4055_v18 = vadd.f32 %v4054_v50, %v13136_v37  ;;  %v4143_v51 = vpop.f32.mrf.mxu3  ;;  %v3889_v37 = vadd.f32 %v13281_v7, %v13279_v45 }
 0x4e5   : > { %v4144_v49 = vadd.f32 %v4143_v51, %v3886_v43  ;;  %v4486_v55 = vmax.f32 %v4326_v28, 0.0  ;;  %v10147_v43 = vor.u32 %v10913_v30, %v10144_v58  ;;  %v4487_v7 = vmax.f32 %v4327_v57, 0.0  ;;  %v10128_v57 = vld [vmem:[%s16466_s10 + $0x88] sm:$0xf0] }
 0x4e7   : > { %v4210_v16 = vpack.c.bf16 %v4144_v49, %v4055_v18  ;;  %5030 = vmatpush.bf16.msrb.mxu3 %v10147_v43  ;;  %v13622_v28 = vpop.f32.mrf.mxu0 }
 0x4e8   : > { %4096 = vmatmul.bf16.gmra.mxu2 %v11190_v36  ;;  %4185 = vmatmul.bf16.gmra.mxu3 %v11190_v36  ;;  %v3891_v36 = vadd.f32 %v13297_v48, %v13293_v3 }
 0x4e9   : > { %v4262_v13 = vunpack.c.l.bf16 %v4210_v16  ;;  %v4263_v26 = vunpack.c.h.bf16 %v4210_v16 }
 0x4eb   : > { %v4057_v9 = vpop.f32.mrf.mxu2  ;;  %v4328_v24 = vadd.f32 %v13469_v25, %v4262_v13  ;;  %v4329_v6 = vadd.f32 %v13472_v46, %v4263_v26  ;;  %v10909_v26 = vld [vmem:[%s16466_s10 + $0x84] sm:$0xf] }
 0x4ec   : > { %v4058_v32 = vadd.f32 %v4057_v9, %v13152_v20  ;;  %v4146_v23 = vpop.f32.mrf.mxu3  ;;  %v10136_v20 = vld [vmem:[%s16466_s10 + $0x98] sm:$0xf0]  ;;  %v10131_v30 = vor.u32 %v10909_v26, %v10128_v57 }
 0x4ed   : > { %v4147_v50 = vadd.f32 %v4146_v23, %v3889_v37  ;;  %v4488_v45 = vmax.f32 %v4328_v24, 0.0  ;;  %v4489_v5 = vmax.f32 %v4329_v6, 0.0  ;;  %v10139_v16 = vor.u32 %v10911_v19, %v10136_v20  ;;  %v13630_v37 = vpop.f32.mrf.mxu1 }
 0x4ef   : > { %v13608_v18 = vpack.c.bf16 %v4488_v45, %v4486_v55  ;;  %v13610_v51 = vpack.c.bf16 %v4489_v5, %v4487_v7  ;;  %v4211_v49 = vpack.c.bf16 %v4147_v50, %v4058_v32  ;;  %5031 = vmatpush.bf16.msrb.mxu3 %v10139_v16  ;;  %v11191_v32 = vld [vmem:[%s11518_s30 + $0x70] sm:$0xff]  ;;  %v3894_v5 = vadd.f32 %v13322_v42, %v13320_v56  ;;  %v13647_v26 = vpop.f32.mrf.mxu0 }
 0x4f0   : > { %v10939_v45 = vld [vmem:[%s16411_s12 + $0x74] sm:$0xf] }
 0x4f1   : > { %4786 = vmatmul.bf16.gmra.mxu0 %v13608_v18  ;;  %4875 = vmatmul.bf16.gmra.mxu1 %v13610_v51  ;;  %v4264_v9 = vunpack.c.l.bf16 %v4211_v49  ;;  %v4265_v58 = vunpack.c.h.bf16 %v4211_v49 }
 0x4f3   : > { %v4059_v13 = vpop.f32.mrf.mxu2  ;;  %5032 = vmatpush.bf16.msrb.mxu3 %v10131_v30  ;;  %v4330_v23 = vadd.f32 %v13469_v25, %v4264_v9  ;;  %v4331_v50 = vadd.f32 %v13472_v46, %v4265_v58 }
 0x4f4   : > { %v4060_v24 = vadd.f32 %v4059_v13, %v13174_v15  ;;  %v4148_v6 = vpop.f32.mrf.mxu3  ;;  %v10248_v15 = vld [vmem:[%s16411_s12 + $0x78] sm:$0xf0] }
 0x4f5   : > { %v4149_v3 = vadd.f32 %v4148_v6, %v3891_v36  ;;  %v10251_v7 = vor.u32 %v10939_v45, %v10248_v15  ;;  %v4490_v13 = vmax.f32 %v4330_v23, 0.0  ;;  %v13649_v30 = vpop.f32.mrf.mxu1 }
 0x4f7   : > { %v4212_v48 = vpack.c.bf16 %v4149_v3, %v4060_v24  ;;  %5849 = vmatpush.bf16.msra.mxu2 %v10251_v7  ;;  %v4491_v24 = vmax.f32 %v4331_v50, 0.0  ;;  %v13660_v50 = vpop.f32.mrf.mxu0  ;;  %v11192_v7 = vld [vmem:[%s11518_s30 + $0x78] sm:$0xff] }
 0x4f8   : > { %4101 = vmatmul.bf16.gmra.mxu2 %v11191_v32  ;;  %4190 = vmatmul.bf16.gmra.mxu3 %v11191_v32 }
 0x4f9   : > { %v4266_v55 = vunpack.c.l.bf16 %v4212_v48  ;;  %v4267_v43 = vunpack.c.h.bf16 %v4212_v48 }
 0x4fb   : > { %v4062_v19 = vpop.f32.mrf.mxu2  ;;  %v4332_v20 = vadd.f32 %v13469_v25, %v4266_v55  ;;  %v4333_v49 = vadd.f32 %v13472_v46, %v4267_v43 }
 0x4fc   : > { %v4063_v16 = vadd.f32 %v4062_v19, %v13188_v53  ;;  %v4151_v36 = vpop.f32.mrf.mxu3  ;;  %v3896_v53 = vadd.f32 %v13329_v60, %v13327_v4 }
 0x4fd   : > { %v4152_v57 = vadd.f32 %v4151_v36, %v3894_v5  ;;  %v4492_v9 = vmax.f32 %v4332_v20, 0.0  ;;  %v4493_v6 = vmax.f32 %v4333_v49, 0.0  ;;  %v13662_v15 = vpop.f32.mrf.mxu1 }
 0x4ff   : > { %v13651_v56 = vpack.c.bf16 %v4492_v9, %v4490_v13  ;;  %v13653_v42 = vpack.c.bf16 %v4493_v6, %v4491_v24  ;;  %v4213_v58 = vpack.c.bf16 %v4152_v57, %v4063_v16 }
 0x501   : > { %4791 = vmatmul.bf16.gmra.mxu0 %v13651_v56  ;;  %4880 = vmatmul.bf16.gmra.mxu1 %v13653_v42  ;;  %v4268_v48 = vunpack.c.l.bf16 %v4213_v58  ;;  %v4269_v55 = vunpack.c.h.bf16 %v4213_v58 }
 0x503   : > { %v4064_v3 = vpop.f32.mrf.mxu2  ;;  %v4334_v5 = vadd.f32 %v13469_v25, %v4268_v48  ;;  %v4335_v4 = vadd.f32 %v13472_v46, %v4269_v55  ;;  %v16490_v55 = vld [vmem:[#allocation7_spill] sm:$0xff] }
 0x504   : > { %v4065_v32 = vadd.f32 %v4064_v3, %v13199_v39  ;;  %v4153_v23 = vpop.f32.mrf.mxu3  ;;  %v3899_v39 = vadd.f32 %v13364_v1, %v13353_v54 }
 0x505   : > { %v4154_v43 = vadd.f32 %v4153_v23, %v3896_v53  ;;  %v4494_v57 = vmax.f32 %v4334_v5, 0.0  ;;  %v4495_v6 = vmax.f32 %v4335_v4, 0.0  ;;  %v13680_v1 = vpop.f32.mrf.mxu1 }
 0x507   : > { %v4214_v45 = vpack.c.bf16 %v4154_v43, %v4065_v32  ;;  %v13676_v32 = vpop.f32.mrf.mxu0 }
 0x508   : > { %4106 = vmatmul.bf16.gmra.mxu2 %v11192_v7  ;;  %4195 = vmatmul.bf16.gmra.mxu3 %v11192_v7 }
 0x509   : > { %v4270_v19 = vunpack.c.l.bf16 %v4214_v45  ;;  %v4271_v20 = vunpack.c.h.bf16 %v4214_v45 }
 0x50b   : > { %v4067_v60 = vpop.f32.mrf.mxu2  ;;  %v4336_v49 = vadd.f32 %v13469_v25, %v4270_v19  ;;  %v4337_v16 = vadd.f32 %v13472_v46, %v4271_v20 }
 0x50c   : > { %v4068_v36 = vadd.f32 %v4067_v60, %v13209_v62  ;;  %v4156_v13 = vpop.f32.mrf.mxu3  ;;  %v3901_v62 = vadd.f32 %v13405_v12, %v13395_v10  ;;  %v10937_v12 = vld [vmem:[%s16411_s12 + $0x64] sm:$0xf]  ;;  %v10240_v10 = vld [vmem:[%s16411_s12 + $0x68] sm:$0xf0] }
 0x50d   : > { %v4157_v9 = vadd.f32 %v4156_v13, %v3899_v39  ;;  %v4496_v24 = vmax.f32 %v4336_v49, 0.0  ;;  %v4497_v58 = vmax.f32 %v4337_v16, 0.0  ;;  %v10243_v49 = vor.u32 %v10937_v12, %v10240_v10  ;;  %v16491_v16 = vld [vmem:[#allocation23_spill] sm:$0xff] }
 0x50f   : > { %v13672_v53 = vpack.c.bf16 %v4496_v24, %v4494_v57  ;;  %v13674_v3 = vpack.c.bf16 %v4497_v58, %v4495_v6  ;;  %v4215_v48 = vpack.c.bf16 %v4157_v9, %v4068_v36  ;;  %v16492_v36 = vld [vmem:[#allocation24_spill] sm:$0xff]  ;;  %v13697_v13 = vpop.f32.mrf.mxu0  ;;  %v13701_v24 = vpop.f32.mrf.mxu1  ;;  %5850 = vmatpush.bf16.msra.mxu2 %v10243_v49 }
 0x510   : > { %v16493_v6 = vld [vmem:[#allocation8_spill] sm:$0xff] }
 0x511   : > { %4796 = vmatmul.bf16.gmra.mxu0 %v13672_v53  ;;  %4885 = vmatmul.bf16.gmra.mxu1 %v13674_v3  ;;  %v4272_v23 = vunpack.c.l.bf16 %v4215_v48  ;;  %v4273_v7 = vunpack.c.h.bf16 %v4215_v48 }
 0x513   : > { %v4069_v54 = vpop.f32.mrf.mxu2  ;;  %v4338_v20 = vadd.f32 %v13469_v25, %v4272_v23  ;;  %v4339_v60 = vadd.f32 %v13472_v46, %v4273_v7 }
 0x514   : > { %v4070_v43 = vadd.f32 %v4069_v54, %v16490_v55  ;;  %v4158_v45 = vpop.f32.mrf.mxu3 }
 0x515   : > { %v4159_v5 = vadd.f32 %v4158_v45, %v3901_v62  ;;  %v4498_v62 = vmax.f32 %v4338_v20, 0.0  ;;  %v4499_v55 = vmax.f32 %v4339_v60, 0.0  ;;  %v16495_v20 = vld [vmem:[#allocation9_spill] sm:$0xff] }
 0x517   : > { %v4216_v19 = vpack.c.bf16 %v4159_v5, %v4070_v43 }
 0x518   : > { %4944 = vmatmul.bf16.vlgmr.msrb.gmra.mxu2 %v13486_v22  ;;  %5033 = vmatmul.bf16.vlgmr.msrb.gmra.mxu3 %v13488_v34  ;;  %v3904_v22 = vadd.f32 %v16492_v36, %v16491_v16  ;;  %v13713_v36 = vpop.f32.mrf.mxu0 }
 0x519   : > { %v4274_v4 = vunpack.c.l.bf16 %v4216_v19  ;;  %v4275_v39 = vunpack.c.h.bf16 %v4216_v19  ;;  %v16494_v19 = vld [vmem:[#allocation26_spill] sm:$0xff] }
 0x51b   : > { %v4072_v34 = vpop.f32.mrf.mxu2  ;;  %v4340_v57 = vadd.f32 %v13469_v25, %v4274_v4  ;;  %v4341_v9 = vadd.f32 %v13472_v46, %v4275_v39  ;;  %v3906_v4 = vadd.f32 %v13452_v41, %v16494_v19 }
 0x51c   : > { %v4073_v58 = vadd.f32 %v4072_v34, %v16493_v6  ;;  %v4161_v48 = vpop.f32.mrf.mxu3 }
 0x51d   : > { %v4162_v54 = vadd.f32 %v4161_v48, %v3904_v22  ;;  %v4500_v23 = vmax.f32 %v4340_v57, 0.0  ;;  %v4501_v43 = vmax.f32 %v4341_v9, 0.0  ;;  %v13715_v22 = vpop.f32.mrf.mxu1  ;;  %v10940_v48 = vld [vmem:[%s16411_s12 + $0x74] sm:$0xf0] }
 0x51f   : > { %v13704_v45 = vpack.c.bf16 %v4500_v23, %v4498_v62  ;;  %v13706_v7 = vpack.c.bf16 %v4501_v43, %v4499_v55  ;;  %v4217_v5 = vpack.c.bf16 %v4162_v54, %v4073_v58  ;;  %v10246_v58 = vld [vmem:[%s16411_s12 + $0x70] sm:$0xf]  ;;  %v16496_v55 = vld [vmem:[#allocation10_spill] sm:$0xff] }
 0x520   : > { %v10247_v62 = vor.u32 %v10940_v48, %v10246_v58 }
 0x521   : > { %4801 = vmatmul.bf16.gmra.mxu0 %v13704_v45  ;;  %4890 = vmatmul.bf16.gmra.mxu1 %v13706_v7  ;;  %v4276_v12 = vunpack.c.l.bf16 %v4217_v5  ;;  %v4277_v16 = vunpack.c.h.bf16 %v4217_v5 }
 0x522   : > { %5671 = vmatpush.bf16.msrb.mxu0 %v10247_v62 }
 0x523   : > { %v4074_v39 = vpop.f32.mrf.mxu2  ;;  %v4342_v57 = vadd.f32 %v13469_v25, %v4276_v12  ;;  %v4343_v6 = vadd.f32 %v13472_v46, %v4277_v16 }
 0x524   : > { %v4075_v10 = vadd.f32 %v4074_v39, %v16495_v20  ;;  %v4163_v49 = vpop.f32.mrf.mxu3 }
 0x525   : > { %v4164_v60 = vadd.f32 %v4163_v49, %v3906_v4  ;;  %v4502_v19 = vmax.f32 %v4342_v57, 0.0  ;;  %v4503_v12 = vmax.f32 %v4343_v6, 0.0 }
 0x527   : > { %v4218_v34 = vpack.c.bf16 %v4164_v60, %v4075_v10  ;;  %v3911_v60 = vadd.f32 %v13484_v17, %v13482_v63 }
 0x528   : > { %4949 = vmatmul.bf16.gmra.mxu2 %v13513_v61  ;;  %5038 = vmatmul.bf16.gmra.mxu3 %v13515_v11  ;;  %v3909_v61 = vadd.f32 %v13467_v0, %v13465_v14 }
 0x529   : > { %v4278_v9 = vunpack.c.l.bf16 %v4218_v34  ;;  %v4279_v41 = vunpack.c.h.bf16 %v4218_v34 }
 0x52b   : > { %v4077_v54 = vpop.f32.mrf.mxu2  ;;  %v4344_v11 = vadd.f32 %v13469_v25, %v4278_v9  ;;  %v4345_v23 = vadd.f32 %v13472_v46, %v4279_v41  ;;  %v16497_v9 = vld [vmem:[#allocation11_spill] sm:$0xff] }
 0x52c   : > { %v4078_v43 = vadd.f32 %v4077_v54, %v16496_v55  ;;  %v4166_v5 = vpop.f32.mrf.mxu3  ;;  %v10935_v55 = vld [vmem:[%s16411_s12 + $0x54] sm:$0xf] }
 0x52d   : > { %v4167_v4 = vadd.f32 %v4166_v5, %v3909_v61  ;;  %v4504_v39 = vmax.f32 %v4344_v11, 0.0  ;;  %v4505_v20 = vmax.f32 %v4345_v23, 0.0 }
 0x52e   : > { %v13732_v10 = vpop.f32.mrf.mxu0  ;;  %v13734_v49 = vpop.f32.mrf.mxu1 }
 0x52f   : > { %v13736_v16 = vpack.c.bf16 %v4504_v39, %v4502_v19  ;;  %v13738_v14 = vpack.c.bf16 %v4505_v20, %v4503_v12  ;;  %v4219_v0 = vpack.c.bf16 %v4167_v4, %v4078_v43  ;;  %v10232_v43 = vld [vmem:[%s16411_s12 + $0x58] sm:$0xf0]  ;;  %v16498_v19 = vld [vmem:[#allocation27_spill] sm:$0xff]  ;;  %v16499_v4 = vld [vmem:[#allocation28_spill] sm:$0xff] }
 0x530   : > { %v10235_v5 = vor.u32 %v10935_v55, %v10232_v43  ;;  %v16500_v20 = vld [vmem:[#allocation12_spill] sm:$0xff] }
 0x531   : > { %4806 = vmatmul.bf16.gmra.mxu0 %v13736_v16  ;;  %4895 = vmatmul.bf16.gmra.mxu1 %v13738_v14  ;;  %v4280_v57 = vunpack.c.l.bf16 %v4219_v0  ;;  %v4281_v58 = vunpack.c.h.bf16 %v4219_v0 }
 0x532   : > { %5851 = vmatpush.bf16.msra.mxu2 %v10235_v5 }
 0x533   : > { %v4079_v34 = vpop.f32.mrf.mxu2  ;;  %v4346_v11 = vadd.f32 %v13469_v25, %v4280_v57  ;;  %v4347_v17 = vadd.f32 %v13472_v46, %v4281_v58 }
 0x534   : > { %v4080_v41 = vadd.f32 %v4079_v34, %v16497_v9  ;;  %v4168_v6 = vpop.f32.mrf.mxu3 }
 0x535   : > { %v4169_v48 = vadd.f32 %v4168_v6, %v3911_v60  ;;  %v4506_v34 = vmax.f32 %v4346_v11, 0.0  ;;  %v3916_v11 = vadd.f32 %v13527_v35, %v13517_v8 }
 0x536   : > { %v13745_v62 = vpop.f32.mrf.mxu0  ;;  %v13747_v61 = vpop.f32.mrf.mxu1 }
 0x537   : > { %v4220_v54 = vpack.c.bf16 %v4169_v48, %v4080_v41  ;;  %v4507_v41 = vmax.f32 %v4347_v17, 0.0  ;;  %v16501_v17 = vld [vmem:[#allocation13_spill] sm:$0xff] }
 0x538   : > { %4954 = vmatmul.bf16.gmra.mxu2 %v13544_v33  ;;  %5043 = vmatmul.bf16.gmra.mxu3 %v13546_v40  ;;  %v3914_v33 = vadd.f32 %v16499_v4, %v16498_v19 }
 0x539   : > { %v4282_v23 = vunpack.c.l.bf16 %v4220_v54  ;;  %v4283_v63 = vunpack.c.h.bf16 %v4220_v54 }
 0x53b   : > { %v4082_v39 = vpop.f32.mrf.mxu2  ;;  %v4348_v40 = vadd.f32 %v13469_v25, %v4282_v23  ;;  %v4349_v12 = vadd.f32 %v13472_v46, %v4283_v63 }
 0x53c   : > { %v4083_v0 = vadd.f32 %v4082_v39, %v16500_v20  ;;  %v4171_v60 = vpop.f32.mrf.mxu3 }
 0x53d   : > { %v4172_v57 = vadd.f32 %v4171_v60, %v3914_v33  ;;  %v4508_v9 = vmax.f32 %v4348_v40, 0.0  ;;  %v4509_v6 = vmax.f32 %v4349_v12, 0.0  ;;  %v10238_v60 = vld [vmem:[%s16411_s12 + $0x60] sm:$0xf] }
 0x53e   : > { %v13764_v58 = vpop.f32.mrf.mxu0  ;;  %v13766_v48 = vpop.f32.mrf.mxu1 }
 0x53f   : > { %v13768_v54 = vpack.c.bf16 %v4508_v9, %v4506_v34  ;;  %v13770_v55 = vpack.c.bf16 %v4509_v6, %v4507_v41  ;;  %v4221_v23 = vpack.c.bf16 %v4172_v57, %v4083_v0  ;;  %v10938_v34 = vld [vmem:[%s16411_s12 + $0x64] sm:$0xf0]  ;;  %v16502_v6 = vld [vmem:[#allocation14_spill] sm:$0xff] }
 0x540   : > { %v10239_v57 = vor.u32 %v10938_v34, %v10238_v60 }
 0x541   : > { %4811 = vmatmul.bf16.gmra.mxu0 %v13768_v54  ;;  %4900 = vmatmul.bf16.gmra.mxu1 %v13770_v55  ;;  %v4284_v43 = vunpack.c.l.bf16 %v4221_v23  ;;  %v4285_v4 = vunpack.c.h.bf16 %v4221_v23 }
 0x542   : > { %5672 = vmatpush.bf16.msrb.mxu0 %v10239_v57 }
 0x543   : > { %v4084_v63 = vpop.f32.mrf.mxu2  ;;  %v4350_v20 = vadd.f32 %v13469_v25, %v4284_v43  ;;  %v4351_v35 = vadd.f32 %v13472_v46, %v4285_v4 }
 0x544   : > { %v4085_v5 = vadd.f32 %v4084_v63, %v16501_v17  ;;  %v4173_v19 = vpop.f32.mrf.mxu3 }
 0x545   : > { %v4174_v33 = vadd.f32 %v4173_v19, %v3916_v11  ;;  %v4510_v63 = vmax.f32 %v4350_v20, 0.0  ;;  %v3921_v20 = vadd.f32 %v13555_v31, %v13553_v38 }
 0x546   : > { %v13777_v39 = vpop.f32.mrf.mxu0  ;;  %v13779_v40 = vpop.f32.mrf.mxu1 }
 0x547   : > { %v4222_v12 = vpack.c.bf16 %v4174_v33, %v4085_v5  ;;  %v4511_v5 = vmax.f32 %v4351_v35, 0.0  ;;  %v16503_v35 = vld [vmem:[#allocation15_spill] sm:$0xff] }
 0x548   : > { %4959 = vmatmul.bf16.gmra.mxu2 %v13573_v59  ;;  %5048 = vmatmul.bf16.gmra.mxu3 %v13575_v27  ;;  %v3919_v59 = vadd.f32 %v13541_v2, %v13537_v29 }
 0x549   : > { %v4286_v0 = vunpack.c.l.bf16 %v4222_v12  ;;  %v4287_v8 = vunpack.c.h.bf16 %v4222_v12 }
 0x54b   : > { %v4087_v9 = vpop.f32.mrf.mxu2  ;;  %v4352_v27 = vadd.f32 %v13469_v25, %v4286_v0  ;;  %v4353_v41 = vadd.f32 %v13472_v46, %v4287_v8 }
 0x54c   : > { %v4088_v23 = vadd.f32 %v4087_v9, %v16502_v6  ;;  %v4176_v11 = vpop.f32.mrf.mxu3 }
 0x54d   : > { %v4177_v43 = vadd.f32 %v4176_v11, %v3919_v59  ;;  %v4512_v17 = vmax.f32 %v4352_v27, 0.0  ;;  %v4513_v19 = vmax.f32 %v4353_v41, 0.0  ;;  %v10933_v11 = vld [vmem:[%s16411_s12 + $0x44] sm:$0xf] }
 0x54e   : > { %v13796_v4 = vpop.f32.mrf.mxu0  ;;  %v13798_v33 = vpop.f32.mrf.mxu1 }
 0x54f   : > { %v13800_v12 = vpack.c.bf16 %v4512_v17, %v4510_v63  ;;  %v13802_v29 = vpack.c.bf16 %v4513_v19, %v4511_v5  ;;  %v4223_v2 = vpack.c.bf16 %v4177_v43, %v4088_v23  ;;  %v10224_v63 = vld [vmem:[%s16411_s12 + $0x48] sm:$0xf0]  ;;  %v16504_v19 = vld [vmem:[#allocation16_spill] sm:$0xff] }
 0x550   : > { %v10227_v43 = vor.u32 %v10933_v11, %v10224_v63 }
 0x551   : > { %4816 = vmatmul.bf16.gmra.mxu0 %v13800_v12  ;;  %4905 = vmatmul.bf16.gmra.mxu1 %v13802_v29  ;;  %v4288_v8 = vunpack.c.l.bf16 %v4223_v2  ;;  %v4289_v57 = vunpack.c.h.bf16 %v4223_v2 }
 0x552   : > { %5852 = vmatpush.bf16.msra.mxu2 %v10227_v43  ;;  %v16505_v43 = vld [vmem:[#allocation17_spill] sm:$0xff] }
 0x553   : > { %v4089_v0 = vpop.f32.mrf.mxu2  ;;  %v4354_v6 = vadd.f32 %v13469_v25, %v4288_v8  ;;  %v4355_v31 = vadd.f32 %v13472_v46, %v4289_v57 }
 0x554   : > { %v4090_v60 = vadd.f32 %v4089_v0, %v16503_v35  ;;  %v4178_v34 = vpop.f32.mrf.mxu3 }
 0x555   : > { %v4179_v59 = vadd.f32 %v4178_v34, %v3921_v20  ;;  %v4514_v0 = vmax.f32 %v4354_v6, 0.0  ;;  %v10955_v6 = vld [vmem:[%s16411_s12 + $0xf4] sm:$0xf] }
 0x556   : > { %v13809_v9 = vpop.f32.mrf.mxu0  ;;  %v13811_v27 = vpop.f32.mrf.mxu1 }
 0x557   : > { %v4224_v41 = vpack.c.bf16 %v4179_v59, %v4090_v60  ;;  %v4515_v60 = vmax.f32 %v4355_v31, 0.0  ;;  %v3926_v31 = vadd.f32 %v13595_v47, %v13592_v52 }
 0x558   : > { %4964 = vmatmul.bf16.gmra.mxu2 %v13608_v18  ;;  %5053 = vmatmul.bf16.gmra.mxu3 %v13610_v51  ;;  %v3924_v18 = vadd.f32 %v13577_v44, %v13571_v21 }
 0x559   : > { %v4290_v23 = vunpack.c.l.bf16 %v4224_v41  ;;  %v4291_v38 = vunpack.c.h.bf16 %v4224_v41 }
 0x55b   : > { %v4092_v17 = vpop.f32.mrf.mxu2  ;;  %v4356_v51 = vadd.f32 %v13469_v25, %v4290_v23  ;;  %v4357_v5 = vadd.f32 %v13472_v46, %v4291_v38  ;;  %v10312_v23 = vld [vmem:[%s16411_s12 + $0xf8] sm:$0xf0] }
 0x55c   : > { %v4093_v2 = vadd.f32 %v4092_v17, %v16504_v19  ;;  %v4181_v20 = vpop.f32.mrf.mxu3  ;;  %v10315_v38 = vor.u32 %v10955_v6, %v10312_v23 }
 0x55d   : > { %v4182_v8 = vadd.f32 %v4181_v20, %v3924_v18  ;;  %v4516_v35 = vmax.f32 %v4356_v51, 0.0  ;;  %v4517_v34 = vmax.f32 %v4357_v5, 0.0 }
 0x55e   : > { %v13828_v57 = vpop.f32.mrf.mxu0  ;;  %v13830_v59 = vpop.f32.mrf.mxu1  ;;  %5938 = vmatpush.bf16.msra.mxu3 %v10315_v38 }
 0x55f   : > { %v13832_v41 = vpack.c.bf16 %v4516_v35, %v4514_v0  ;;  %v13834_v21 = vpack.c.bf16 %v4517_v34, %v4515_v60  ;;  %v4225_v44 = vpack.c.bf16 %v4182_v8, %v4093_v2  ;;  %v10230_v35 = vld [vmem:[%s16411_s12 + $0x50] sm:$0xf]  ;;  %v10936_v60 = vld [vmem:[%s16411_s12 + $0x54] sm:$0xf0] }
 0x560   : > { %v10231_v34 = vor.u32 %v10936_v60, %v10230_v35 }
 0x561   : > { %4821 = vmatmul.bf16.gmra.mxu0 %v13832_v41  ;;  %4910 = vmatmul.bf16.gmra.mxu1 %v13834_v21  ;;  %v4292_v63 = vunpack.c.l.bf16 %v4225_v44  ;;  %v4293_v51 = vunpack.c.h.bf16 %v4225_v44  ;;  %v3929_v44 = vadd.f32 %v13630_v37, %v13622_v28 }
 0x562   : > { %5673 = vmatpush.bf16.msrb.mxu0 %v10231_v34 }
 0x563   : > { %v4094_v11 = vpop.f32.mrf.mxu2  ;;  %v4358_v0 = vadd.f32 %v13469_v25, %v4292_v63  ;;  %v4359_v8 = vadd.f32 %v13472_v46, %v4293_v51 }
 0x564   : > { %v4095_v18 = vadd.f32 %v4094_v11, %v16505_v43  ;;  %v4183_v17 = vpop.f32.mrf.mxu3  ;;  %v16506_v11 = vld [vmem:[#allocation18_spill] sm:$0xff] }
 0x565   : > { %v4184_v5 = vadd.f32 %v4183_v17, %v3926_v31 }
 0x566   : > { %v13847_v19 = vpop.f32.mrf.mxu0  ;;  %v13849_v2 = vpop.f32.mrf.mxu1 }
 0x567   : > { %v4226_v20 = vpack.c.bf16 %v4184_v5, %v4095_v18  ;;  %v4518_v18 = vmax.f32 %v4358_v0, 0.0  ;;  %v4519_v5 = vmax.f32 %v4359_v8, 0.0  ;;  %v3931_v0 = vadd.f32 %v13649_v30, %v13647_v26  ;;  %v10302_v8 = vld [vmem:[%s16411_s12 + $0xe0] sm:$0xf]  ;;  %v10294_v30 = vld [vmem:[%s16411_s12 + $0xd0] sm:$0xf] }
 0x568   : > { %4969 = vmatmul.bf16.gmra.mxu2 %v13651_v56  ;;  %5058 = vmatmul.bf16.gmra.mxu3 %v13653_v42  ;;  %v10310_v56 = vld [vmem:[%s16411_s12 + $0xf0] sm:$0xf]  ;;  %v10956_v42 = vld [vmem:[%s16411_s12 + $0xf4] sm:$0xf0] }
 0x569   : > { %v4294_v52 = vunpack.c.l.bf16 %v4226_v20  ;;  %v4295_v47 = vunpack.c.h.bf16 %v4226_v20  ;;  %v10311_v31 = vor.u32 %v10956_v42, %v10310_v56  ;;  %v10954_v56 = vld [vmem:[%s16411_s12 + $0xe4] sm:$0xf0] }
 0x56a   : > { %v16507_v42 = vld [vmem:[#allocation19_spill] sm:$0xff] }
 0x56b   : > { %v4097_v6 = vpop.f32.mrf.mxu2  ;;  %v4360_v23 = vadd.f32 %v13469_v25, %v4294_v52  ;;  %v4361_v38 = vadd.f32 %v13472_v46, %v4295_v47  ;;  %5760 = vmatpush.bf16.msra.mxu1 %v10311_v31 }
 0x56c   : > { %v4098_v63 = vadd.f32 %v4097_v6, %v16506_v11  ;;  %v4186_v43 = vpop.f32.mrf.mxu3 }
 0x56d   : > { %v4187_v17 = vadd.f32 %v4186_v43, %v3929_v44  ;;  %v4520_v51 = vmax.f32 %v4360_v23, 0.0  ;;  %v4521_v20 = vmax.f32 %v4361_v38, 0.0  ;;  %v10303_v23 = vor.u32 %v10954_v56, %v10302_v8  ;;  %v10952_v43 = vld [vmem:[%s16411_s12 + $0xd4] sm:$0xf0] }
 0x56e   : > { %v13872_v35 = vpop.f32.mrf.mxu0  ;;  %v13874_v60 = vpop.f32.mrf.mxu1 }
 0x56f   : > { %v13876_v28 = vpack.c.bf16 %v4520_v51, %v4518_v18  ;;  %v13878_v37 = vpack.c.bf16 %v4521_v20, %v4519_v5  ;;  %v4227_v52 = vpack.c.bf16 %v4187_v17, %v4098_v63  ;;  %5761 = vmatpush.bf16.msra.mxu1 %v10303_v23  ;;  %v10295_v17 = vor.u32 %v10952_v43, %v10294_v30 }
 0x571   : > { %4826 = vmatmul.bf16.gmra.mxu0 %v13876_v28  ;;  %4915 = vmatmul.bf16.gmra.mxu1 %v13878_v37  ;;  %v4296_v34 = vunpack.c.l.bf16 %v4227_v52  ;;  %v4297_v38 = vunpack.c.h.bf16 %v4227_v52  ;;  %v10931_v52 = vld [vmem:[%s16411_s12 + $0x34] sm:$0xf] }
 0x573   : > { %v4099_v47 = vpop.f32.mrf.mxu2  ;;  %v4362_v18 = vadd.f32 %v13469_v25, %v4296_v34  ;;  %v4363_v20 = vadd.f32 %v13472_v46, %v4297_v38  ;;  %5762 = vmatpush.bf16.msra.mxu1 %v10295_v17  ;;  %v10222_v34 = vld [vmem:[%s16411_s12 + $0x40] sm:$0xf] }
 0x574   : > { %v4100_v44 = vadd.f32 %v4099_v47, %v16507_v42  ;;  %v4188_v6 = vpop.f32.mrf.mxu3  ;;  %v10934_v42 = vld [vmem:[%s16411_s12 + $0x44] sm:$0xf0] }
 0x575   : > { %v4189_v31 = vadd.f32 %v4188_v6, %v3931_v0  ;;  %v10216_v0 = vld [vmem:[%s16411_s12 + $0x38] sm:$0xf0]  ;;  %v16508_v6 = vld [vmem:[#allocation20_spill] sm:$0xff]  ;;  %v10223_v38 = vor.u32 %v10934_v42, %v10222_v34  ;;  %v4523_v43 = vmax.f32 %v4363_v20, 0.0  ;;  %v3936_v42 = vadd.f32 %v13680_v1, %v13676_v32  ;;  %v10946_v32 = vld [vmem:[%s16411_s12 + $0xa4] sm:$0xf0] }
 0x576   : > { %v13891_v11 = vpop.f32.mrf.mxu0  ;;  %v13893_v63 = vpop.f32.mrf.mxu1  ;;  %v10219_v47 = vor.u32 %v10931_v52, %v10216_v0  ;;  %v10278_v20 = vld [vmem:[%s16411_s12 + $0xb0] sm:$0xf] }
 0x577   : > { %v4228_v26 = vpack.c.bf16 %v4189_v31, %v4100_v44  ;;  %v10286_v44 = vld [vmem:[%s16411_s12 + $0xc0] sm:$0xf]  ;;  %v10950_v31 = vld [vmem:[%s16411_s12 + $0xc4] sm:$0xf0]  ;;  %5674 = vmatpush.bf16.msrb.mxu0 %v10223_v38  ;;  %v16509_v38 = vld [vmem:[#allocation21_spill] sm:$0xff] }
 0x578   : > { %4974 = vmatmul.bf16.gmra.mxu2 %v13672_v53  ;;  %5063 = vmatmul.bf16.gmra.mxu3 %v13674_v3  ;;  %v3934_v53 = vadd.f32 %v13662_v15, %v13660_v50  ;;  %v4522_v15 = vmax.f32 %v4362_v18, 0.0  ;;  %v10287_v52 = vor.u32 %v10950_v31, %v10286_v44  ;;  %v10214_v18 = vld [vmem:[%s16411_s12 + $0x30] sm:$0xf] }
 0x579   : > { %v4298_v51 = vunpack.c.l.bf16 %v4228_v26  ;;  %v4299_v5 = vunpack.c.h.bf16 %v4228_v26  ;;  %5853 = vmatpush.bf16.msra.mxu2 %v10219_v47  ;;  %v10932_v47 = vld [vmem:[%s16411_s12 + $0x34] sm:$0xf0] }
 0x57a   : > { %5763 = vmatpush.bf16.msra.mxu1 %v10287_v52  ;;  %v10304_v52 = vld [vmem:[%s16411_s12 + $0xe8] sm:$0xf0] }
 0x57b   : > { %v4102_v3 = vpop.f32.mrf.mxu2  ;;  %v4364_v8 = vadd.f32 %v13469_v25, %v4298_v51  ;;  %v4365_v56 = vadd.f32 %v13472_v46, %v4299_v5 }
 0x57c   : > { %v4103_v23 = vadd.f32 %v4102_v3, %v16508_v6  ;;  %v4191_v50 = vpop.f32.mrf.mxu3  ;;  %v10206_v6 = vld [vmem:[%s16411_s12 + $0x20] sm:$0xf] }
 0x57d   : > { %v4192_v26 = vadd.f32 %v4191_v50, %v3934_v53  ;;  %v4524_v30 = vmax.f32 %v4364_v8, 0.0  ;;  %v4525_v17 = vmax.f32 %v4365_v56, 0.0  ;;  %v10215_v8 = vor.u32 %v10932_v47, %v10214_v18  ;;  %v10948_v56 = vld [vmem:[%s16411_s12 + $0xb4] sm:$0xf0]  ;;  %v10270_v50 = vld [vmem:[%s16411_s12 + $0xa0] sm:$0xf] }
 0x57e   : > { %v13928_v51 = vpop.f32.mrf.mxu0  ;;  %v13930_v5 = vpop.f32.mrf.mxu1  ;;  %v10279_v34 = vor.u32 %v10948_v56, %v10278_v20  ;;  %v10271_v18 = vor.u32 %v10946_v32, %v10270_v50  ;;  %v10190_v32 = vld [vmem:[%s16411_s12] sm:$0xf] }
 0x57f   : > { %v13932_v0 = vpack.c.bf16 %v4524_v30, %v4522_v15  ;;  %v13934_v3 = vpack.c.bf16 %v4525_v17, %v4523_v43  ;;  %v4229_v53 = vpack.c.bf16 %v4192_v26, %v4103_v23  ;;  %5675 = vmatpush.bf16.msrb.mxu0 %v10215_v8  ;;  %v10930_v23 = vld [vmem:[%s16411_s12 + $0x24] sm:$0xf0]  ;;  %v10953_v17 = vld [vmem:[%s16411_s12 + $0xe4] sm:$0xf] }
 0x580   : > { %5764 = vmatpush.bf16.msra.mxu1 %v10279_v34  ;;  %v10207_v30 = vor.u32 %v10930_v23, %v10206_v6  ;;  %v10307_v8 = vor.u32 %v10953_v17, %v10304_v52  ;;  %v10928_v34 = vld [vmem:[%s16411_s12 + $0x14] sm:$0xf0]  ;;  %v16510_v17 = vld [vmem:[#allocation22_spill] sm:$0xff] }
 0x581   : > { %4831 = vmatmul.bf16.gmra.mxu0 %v13932_v0  ;;  %4920 = vmatmul.bf16.gmra.mxu1 %v13934_v3  ;;  %v4300_v15 = vunpack.c.l.bf16 %v4229_v53  ;;  %v4301_v1 = vunpack.c.h.bf16 %v4229_v53  ;;  %v10198_v53 = vld [vmem:[%s16411_s12 + $0x10] sm:$0xf]  ;;  %v10944_v23 = vld [vmem:[%s16411_s12 + $0x94] sm:$0xf0] }
 0x582   : > { %v10199_v6 = vor.u32 %v10928_v34, %v10198_v53  ;;  %5939 = vmatpush.bf16.msra.mxu3 %v10307_v8  ;;  %v10942_v8 = vld [vmem:[%s16411_s12 + $0x84] sm:$0xf0] }
 0x583   : > { %v4104_v44 = vpop.f32.mrf.mxu2  ;;  %5676 = vmatpush.bf16.msrb.mxu0 %v10207_v30 }
 0x584   : > { %v4105_v31 = vadd.f32 %v4104_v44, %v16509_v38  ;;  %v4193_v26 = vpop.f32.mrf.mxu3  ;;  %v4366_v44 = vadd.f32 %v13469_v25, %v4300_v15  ;;  %5765 = vmatpush.bf16.msra.mxu1 %v10271_v18 }
 0x585   : > { %v4194_v43 = vadd.f32 %v4193_v26, %v3936_v42  ;;  %v10262_v42 = vld [vmem:[%s16411_s12 + $0x90] sm:$0xf] }
 0x586   : > { %v13971_v47 = vpop.f32.mrf.mxu0  ;;  %v13973_v20 = vpop.f32.mrf.mxu1  ;;  %v10263_v26 = vor.u32 %v10944_v23, %v10262_v42 }
 0x587   : > { %v4230_v56 = vpack.c.bf16 %v4194_v43, %v4105_v31  ;;  %v4367_v31 = vadd.f32 %v13472_v46, %v4301_v1  ;;  %5677 = vmatpush.bf16.msrb.mxu0 %v10199_v6  ;;  %v10926_v1 = vld [vmem:[%s16411_s12 + $0x4] sm:$0xf0]  ;;  %v10254_v43 = vld [vmem:[%s16411_s12 + $0x80] sm:$0xf] }
 0x588   : > { %4979 = vmatmul.bf16.gmra.mxu2 %v13704_v45  ;;  %5068 = vmatmul.bf16.gmra.mxu3 %v13706_v7  ;;  %v3939_v45 = vadd.f32 %v13701_v24, %v13697_v13  ;;  %v4526_v24 = vmax.f32 %v4366_v44, 0.0  ;;  %v10191_v18 = vor.u32 %v10926_v1, %v10190_v32 }
 0x589   : > { %v4302_v50 = vunpack.c.l.bf16 %v4230_v56  ;;  %v4303_v38 = vunpack.c.h.bf16 %v4230_v56  ;;  %v4527_v34 = vmax.f32 %v4367_v31, 0.0  ;;  %5766 = vmatpush.bf16.msra.mxu1 %v10263_v26  ;;  %v3941_v31 = vadd.f32 %v13715_v22, %v13713_v36 }
 0x58b   : > { %v4107_v30 = vpop.f32.mrf.mxu2  ;;  %v4368_v7 = vadd.f32 %v13469_v25, %v4302_v50  ;;  %v4369_v15 = vadd.f32 %v13472_v46, %v4303_v38  ;;  %5678 = vmatpush.bf16.msrb.mxu0 %v10191_v18  ;;  %v10255_v50 = vor.u32 %v10942_v8, %v10254_v43  ;;  %v5150_v8 = vld [vmem:[#allocation1 + $0x9] sm:$0xff] }
 0x58c   : > { %v4108_v52 = vadd.f32 %v4107_v30, %v16510_v17  ;;  %v4196_v13 = vpop.f32.mrf.mxu3 }
 0x58d   : > { %v4197_v56 = vadd.f32 %v4196_v13, %v3939_v45  ;;  %v4528_v53 = vmax.f32 %v4368_v7, 0.0  ;;  %v4529_v42 = vmax.f32 %v4369_v15, 0.0  ;;  %5767 = vmatpush.bf16.msra.mxu1 %v10255_v50  ;;  %v16511_v7 = vld [vmem:[#allocation25_spill] sm:$0xff] }
 0x58e   : > { %v14008_v6 = vpop.f32.mrf.mxu0  ;;  %v14010_v23 = vpop.f32.mrf.mxu1 }
 0x58f   : > { %v14012_v38 = vpack.c.bf16 %v4528_v53, %v4526_v24  ;;  %v14014_v30 = vpack.c.bf16 %v4529_v42, %v4527_v34  ;;  %v4231_v44 = vpack.c.bf16 %v4197_v56, %v4108_v52  ;;  %v5149_v24 = vld [vmem:[#allocation1] sm:$0xff]  ;;  %v10208_v34 = vld [vmem:[%s16411_s12 + $0x28] sm:$0xf0] }
 0x590   : > { %v10929_v53 = vld [vmem:[%s16411_s12 + $0x24] sm:$0xf] }
 0x591   : > { %4836 = vmatmul.bf16.gmra.mxu0 %v14012_v38  ;;  %4925 = vmatmul.bf16.gmra.mxu1 %v14014_v30  ;;  %v4304_v45 = vunpack.c.l.bf16 %v4231_v44  ;;  %v4305_v1 = vunpack.c.h.bf16 %v4231_v44  ;;  %v10211_v42 = vor.u32 %v10929_v53, %v10208_v34 }
 0x593   : > { %v4109_v26 = vpop.f32.mrf.mxu2  ;;  %v4370_v18 = vadd.f32 %v13469_v25, %v4304_v45  ;;  %v4371_v56 = vadd.f32 %v13472_v46, %v4305_v1  ;;  %5854 = vmatpush.bf16.msra.mxu2 %v10211_v42 }
 0x594   : > { %v4110_v15 = vadd.f32 %v4109_v26, %v16511_v7  ;;  %v4198_v32 = vpop.f32.mrf.mxu3  ;;  %v5154_v26 = vpack.i.b16 %v5150_v8, %v5150_v8 }
 0x595   : > { %v4199_v43 = vadd.f32 %v4198_v32, %v3941_v31  ;;  %v5151_v31 = vpack.i.b16 %v5149_v24, %v5149_v24  ;;  %v4530_v45 = vmax.f32 %v4370_v18, 0.0  ;;  %v4531_v32 = vmax.f32 %v4371_v56, 0.0  ;;  %v10951_v18 = vld [vmem:[%s16411_s12 + $0xd4] sm:$0xf] }
 0x596   : > { %v14021_v17 = vpop.f32.mrf.mxu0  ;;  %v14023_v13 = vpop.f32.mrf.mxu1 }
 0x597   : > { %v4232_v52 = vpack.c.bf16 %v4199_v43, %v4110_v15  ;;  %v4857_v43 = vadd.f32 %v13734_v49, %v13732_v10  ;;  %v5153_v24 = vperm.slane %v5151_v31, 0  ;;  %v10296_v10 = vld [vmem:[%s16411_s12 + $0xd8] sm:$0xf0] }
 0x598   : > { %4984 = vmatmul.bf16.gmra.mxu2 %v13736_v16  ;;  %5073 = vmatmul.bf16.gmra.mxu3 %v13738_v14  ;;  %v10299_v49 = vor.u32 %v10951_v18, %v10296_v10 }
 0x599   : > { %v4306_v36 = vunpack.c.l.bf16 %v4232_v52  ;;  %v4307_v22 = vunpack.c.h.bf16 %v4232_v52  ;;  %v14055_v56 = vunpack.c.l.bf16 %v5153_v24 }
 0x59a   : > { %5940 = vmatpush.bf16.msra.mxu3 %v10299_v49 }
 0x59b   : > { %v4945_v16 = vpop.f32.mrf.mxu2  ;;  %v4372_v14 = vadd.f32 %v13469_v25, %v4306_v36  ;;  %v4373_v50 = vadd.f32 %v13472_v46, %v4307_v22  ;;  %v5156_v36 = vperm.slane %v5154_v26, 0 }
 0x59c   : > { %v5034_v44 = vpop.f32.mrf.mxu3 }
 0x59d   : > { %v5035_v7 = vadd.f32 %v5034_v44, %v4945_v16  ;;  %v4532_v15 = vmax.f32 %v4372_v14, 0.0  ;;  %v4533_v1 = vmax.f32 %v4373_v50, 0.0  ;;  %v4859_v16 = vadd.f32 %v13747_v61, %v13745_v62 }
 0x59e   : > { %v14039_v52 = vpop.f32.mrf.mxu0  ;;  %v14041_v53 = vpop.f32.mrf.mxu1  ;;  %v14059_v50 = vunpack.c.l.bf16 %v5156_v36 }
 0x59f   : > { %v14043_v34 = vpack.c.bf16 %v4532_v15, %v4530_v45  ;;  %v14045_v25 = vpack.c.bf16 %v4533_v1, %v4531_v32  ;;  %v5114_v46 = vpack.c.bf16 %v5035_v7, %v4857_v43 }
 0x5a1   : > { %4841 = vmatmul.bf16.gmra.mxu0 %v14043_v34  ;;  %4930 = vmatmul.bf16.gmra.mxu1 %v14045_v25  ;;  %v5157_v8 = vunpack.c.l.bf16 %v5114_v46  ;;  %v5158_v14 = vunpack.c.h.bf16 %v5114_v46 }
 0x5a3   : > { %v4947_v22 = vpop.f32.mrf.mxu2  ;;  %v5223_v7 = vadd.f32 %v14055_v56, %v5157_v8  ;;  %v5224_v15 = vadd.f32 %v14059_v50, %v5158_v14 }
 0x5a4   : > { %v5036_v42 = vpop.f32.mrf.mxu3 }
 0x5a5   : > { %v5037_v44 = vadd.f32 %v5036_v42, %v4947_v22  ;;  %v5383_v46 = vmax.f32 %v5223_v7, 0.0  ;;  %v5384_v36 = vmax.f32 %v5224_v15, 0.0  ;;  %v4864_v7 = vadd.f32 %v13779_v40, %v13777_v39  ;;  %v10927_v39 = vld [vmem:[%s16411_s12 + $0x14] sm:$0xf]  ;;  %v10200_v40 = vld [vmem:[%s16411_s12 + $0x18] sm:$0xf0] }
 0x5a6   : > { %v14061_v31 = vpop.f32.mrf.mxu0  ;;  %v14063_v26 = vpop.f32.mrf.mxu1 }
 0x5a7   : > { %v5115_v45 = vpack.c.bf16 %v5037_v44, %v4859_v16 }
 0x5a8   : > { %4989 = vmatmul.bf16.gmra.mxu2 %v13768_v54  ;;  %5078 = vmatmul.bf16.gmra.mxu3 %v13770_v55  ;;  %v4862_v54 = vadd.f32 %v13766_v48, %v13764_v58 }
 0x5a9   : > { %v5159_v32 = vunpack.c.l.bf16 %v5115_v45  ;;  %v5160_v1 = vunpack.c.h.bf16 %v5115_v45 }
 0x5ab   : > { %v5225_v62 = vadd.f32 %v14055_v56, %v5159_v32  ;;  %v5226_v61 = vadd.f32 %v14059_v50, %v5160_v1  ;;  %v4950_v43 = vpop.f32.mrf.mxu2 }
 0x5ac   : > { %v5039_v24 = vpop.f32.mrf.mxu3 }
 0x5ad   : > { %v5385_v18 = vmax.f32 %v5225_v62, 0.0  ;;  %v5386_v10 = vmax.f32 %v5226_v61, 0.0  ;;  %v5040_v49 = vadd.f32 %v5039_v24, %v4950_v43  ;;  %v10203_v24 = vor.u32 %v10927_v39, %v10200_v40 }
 0x5ae   : > { %v14073_v22 = vpop.f32.mrf.mxu0  ;;  %v14075_v55 = vpop.f32.mrf.mxu1  ;;  %v4869_v39 = vadd.f32 %v13811_v27, %v13809_v9 }
 0x5af   : > { %v14077_v8 = vpack.c.bf16 %v5385_v18, %v5383_v46  ;;  %v14079_v42 = vpack.c.bf16 %v5386_v10, %v5384_v36  ;;  %v5116_v16 = vpack.c.bf16 %v5040_v49, %v4862_v54  ;;  %5855 = vmatpush.bf16.msra.mxu2 %v10203_v24 }
 0x5b1   : > { %5679 = vmatmul.bf16.vlgmr.msrb.gmra.mxu0 %v14077_v8  ;;  %5768 = vmatmul.bf16.vlgmr.msra.gmra.mxu1 %v14079_v42  ;;  %v5161_v44 = vunpack.c.l.bf16 %v5116_v16  ;;  %v5162_v58 = vunpack.c.h.bf16 %v5116_v16 }
 0x5b3   : > { %v4952_v14 = vpop.f32.mrf.mxu2  ;;  %v5227_v62 = vadd.f32 %v14055_v56, %v5161_v44  ;;  %v5228_v46 = vadd.f32 %v14059_v50, %v5162_v58  ;;  %v4867_v44 = vadd.f32 %v13798_v33, %v13796_v4  ;;  %v10288_v4 = vld [vmem:[%s16411_s12 + $0xc8] sm:$0xf0] }
 0x5b4   : > { %v5041_v45 = vpop.f32.mrf.mxu3 }
 0x5b5   : > { %v5042_v48 = vadd.f32 %v5041_v45, %v4952_v14  ;;  %v5387_v10 = vmax.f32 %v5227_v62, 0.0  ;;  %v5388_v16 = vmax.f32 %v5228_v46, 0.0  ;;  %v10949_v62 = vld [vmem:[%s16411_s12 + $0xc4] sm:$0xf] }
 0x5b6   : > { %v14085_v15 = vpop.f32.mrf.mxu0  ;;  %v14087_v32 = vpop.f32.mrf.mxu1  ;;  %v10291_v33 = vor.u32 %v10949_v62, %v10288_v4 }
 0x5b7   : > { %v5117_v1 = vpack.c.bf16 %v5042_v48, %v4864_v7 }
 0x5b8   : > { %4994 = vmatmul.bf16.gmra.mxu2 %v13800_v12  ;;  %5083 = vmatmul.bf16.gmra.mxu3 %v13802_v29 }
 0x5b9   : > { %v5163_v61 = vunpack.c.l.bf16 %v5117_v1  ;;  %v5164_v43 = vunpack.c.h.bf16 %v5117_v1  ;;  %5941 = vmatpush.bf16.msra.mxu3 %v10291_v33 }
 0x5bb   : > { %v4955_v36 = vpop.f32.mrf.mxu2  ;;  %v5229_v12 = vadd.f32 %v14055_v56, %v5163_v61  ;;  %v5230_v29 = vadd.f32 %v14059_v50, %v5164_v43 }
 0x5bc   : > { %v5044_v18 = vpop.f32.mrf.mxu3 }
 0x5bd   : > { %v5045_v49 = vadd.f32 %v5044_v18, %v4955_v36  ;;  %v5389_v54 = vmax.f32 %v5229_v12, 0.0  ;;  %v5390_v14 = vmax.f32 %v5230_v29, 0.0 }
 0x5be   : > { %v14103_v45 = vpop.f32.mrf.mxu0  ;;  %v14105_v7 = vpop.f32.mrf.mxu1 }
 0x5bf   : > { %v14107_v58 = vpack.c.bf16 %v5389_v54, %v5387_v10  ;;  %v14109_v48 = vpack.c.bf16 %v5390_v14, %v5388_v16  ;;  %v5118_v1 = vpack.c.bf16 %v5045_v49, %v4867_v44 }
 0x5c1   : > { %5684 = vmatmul.bf16.gmra.mxu0 %v14107_v58  ;;  %5773 = vmatmul.bf16.gmra.mxu1 %v14109_v48  ;;  %v5165_v43 = vunpack.c.l.bf16 %v5118_v1  ;;  %v5166_v40 = vunpack.c.h.bf16 %v5118_v1 }
 0x5c3   : > { %v4957_v61 = vpop.f32.mrf.mxu2  ;;  %v5231_v18 = vadd.f32 %v14055_v56, %v5165_v43  ;;  %v5232_v54 = vadd.f32 %v14059_v50, %v5166_v40 }
 0x5c4   : > { %v5046_v46 = vpop.f32.mrf.mxu3 }
 0x5c5   : > { %v5047_v24 = vadd.f32 %v5046_v46, %v4957_v61  ;;  %v5391_v44 = vmax.f32 %v5231_v18, 0.0  ;;  %v5392_v4 = vmax.f32 %v5232_v54, 0.0  ;;  %v4874_v18 = vadd.f32 %v13849_v2, %v13847_v19  ;;  %v10925_v19 = vld [vmem:[%s16411_s12 + $0x4] sm:$0xf]  ;;  %v10192_v2 = vld [vmem:[%s16411_s12 + $0x8] sm:$0xf0] }
 0x5c6   : > { %v14121_v36 = vpop.f32.mrf.mxu0  ;;  %v14123_v12 = vpop.f32.mrf.mxu1 }
 0x5c7   : > { %v5119_v29 = vpack.c.bf16 %v5047_v24, %v4869_v39 }
 0x5c8   : > { %4999 = vmatmul.bf16.gmra.mxu2 %v13832_v41  ;;  %5088 = vmatmul.bf16.gmra.mxu3 %v13834_v21  ;;  %v4872_v41 = vadd.f32 %v13830_v59, %v13828_v57 }
 0x5c9   : > { %v5167_v10 = vunpack.c.l.bf16 %v5119_v29  ;;  %v5168_v49 = vunpack.c.h.bf16 %v5119_v29 }
 0x5cb   : > { %v4960_v16 = vpop.f32.mrf.mxu2  ;;  %v5233_v9 = vadd.f32 %v14055_v56, %v5167_v10  ;;  %v5234_v27 = vadd.f32 %v14059_v50, %v5168_v49 }
 0x5cc   : > { %v5049_v14 = vpop.f32.mrf.mxu3 }
 0x5cd   : > { %v5050_v1 = vadd.f32 %v5049_v14, %v4960_v16  ;;  %v5393_v62 = vmax.f32 %v5233_v9, 0.0  ;;  %v5394_v33 = vmax.f32 %v5234_v27, 0.0 }
 0x5ce   : > { %v14133_v21 = vpop.f32.mrf.mxu0  ;;  %v14135_v61 = vpop.f32.mrf.mxu1 }
 0x5cf   : > { %v14137_v43 = vpack.c.bf16 %v5393_v62, %v5391_v44  ;;  %v14139_v46 = vpack.c.bf16 %v5394_v33, %v5392_v4  ;;  %v5120_v39 = vpack.c.bf16 %v5050_v1, %v4872_v41  ;;  %v10195_v44 = vor.u32 %v10925_v19, %v10192_v2 }
 0x5d0   : > { %v4879_v19 = vadd.f32 %v13893_v63, %v13891_v11 }
 0x5d1   : > { %5689 = vmatmul.bf16.gmra.mxu0 %v14137_v43  ;;  %5778 = vmatmul.bf16.gmra.mxu1 %v14139_v46  ;;  %v5169_v24 = vunpack.c.l.bf16 %v5120_v39  ;;  %v5170_v57 = vunpack.c.h.bf16 %v5120_v39 }
 0x5d2   : > { %5856 = vmatpush.bf16.msra.mxu2 %v10195_v44 }
 0x5d3   : > { %v4962_v40 = vpop.f32.mrf.mxu2  ;;  %v5235_v16 = vadd.f32 %v14055_v56, %v5169_v24  ;;  %v5236_v14 = vadd.f32 %v14059_v50, %v5170_v57  ;;  %v4877_v24 = vadd.f32 %v13874_v60, %v13872_v35  ;;  %v10280_v35 = vld [vmem:[%s16411_s12 + $0xb8] sm:$0xf0] }
 0x5d4   : > { %v5051_v29 = vpop.f32.mrf.mxu3 }
 0x5d5   : > { %v5052_v59 = vadd.f32 %v5051_v29, %v4962_v40  ;;  %v5395_v4 = vmax.f32 %v5235_v16, 0.0  ;;  %v5396_v39 = vmax.f32 %v5236_v14, 0.0  ;;  %v10947_v16 = vld [vmem:[%s16411_s12 + $0xb4] sm:$0xf] }
 0x5d6   : > { %v14145_v10 = vpop.f32.mrf.mxu0  ;;  %v14147_v49 = vpop.f32.mrf.mxu1  ;;  %v10283_v60 = vor.u32 %v10947_v16, %v10280_v35 }
 0x5d7   : > { %v5121_v54 = vpack.c.bf16 %v5052_v59, %v4874_v18 }
 0x5d8   : > { %5004 = vmatmul.bf16.gmra.mxu2 %v13876_v28  ;;  %5093 = vmatmul.bf16.gmra.mxu3 %v13878_v37 }
 0x5d9   : > { %v5171_v9 = vunpack.c.l.bf16 %v5121_v54  ;;  %v5172_v27 = vunpack.c.h.bf16 %v5121_v54  ;;  %5942 = vmatpush.bf16.msra.mxu3 %v10283_v60 }
 0x5db   : > { %v4965_v1 = vpop.f32.mrf.mxu2  ;;  %v5237_v28 = vadd.f32 %v14055_v56, %v5171_v9  ;;  %v5238_v37 = vadd.f32 %v14059_v50, %v5172_v27 }
 0x5dc   : > { %v5054_v62 = vpop.f32.mrf.mxu3 }
 0x5dd   : > { %v5055_v33 = vadd.f32 %v5054_v62, %v4965_v1  ;;  %v5397_v41 = vmax.f32 %v5237_v28, 0.0  ;;  %v5398_v40 = vmax.f32 %v5238_v37, 0.0 }
 0x5de   : > { %v14163_v29 = vpop.f32.mrf.mxu0  ;;  %v14165_v18 = vpop.f32.mrf.mxu1 }
 0x5df   : > { %v14167_v57 = vpack.c.bf16 %v5397_v41, %v5395_v4  ;;  %v14169_v59 = vpack.c.bf16 %v5398_v40, %v5396_v39  ;;  %v5122_v54 = vpack.c.bf16 %v5055_v33, %v4877_v24  ;;  %v10945_v40 = vld [vmem:[%s16411_s12 + $0xa4] sm:$0xf] }
 0x5e1   : > { %5694 = vmatmul.bf16.gmra.mxu0 %v14167_v57  ;;  %5783 = vmatmul.bf16.gmra.mxu1 %v14169_v59  ;;  %v5173_v27 = vunpack.c.l.bf16 %v5122_v54  ;;  %v5174_v2 = vunpack.c.h.bf16 %v5122_v54 }
 0x5e3   : > { %v4967_v9 = vpop.f32.mrf.mxu2  ;;  %v5239_v62 = vadd.f32 %v14055_v56, %v5173_v27  ;;  %v5240_v41 = vadd.f32 %v14059_v50, %v5174_v2  ;;  %v4882_v27 = vadd.f32 %v13930_v5, %v13928_v51  ;;  %v10941_v5 = vld [vmem:[%s16411_s12 + $0x84] sm:$0xf] }
 0x5e4   : > { %v5056_v14 = vpop.f32.mrf.mxu3 }
 0x5e5   : > { %v5057_v44 = vadd.f32 %v5056_v14, %v4967_v9  ;;  %v5399_v24 = vmax.f32 %v5239_v62, 0.0  ;;  %v5400_v60 = vmax.f32 %v5240_v41, 0.0  ;;  %v10264_v62 = vld [vmem:[%s16411_s12 + $0x98] sm:$0xf0]  ;;  %v10256_v41 = vld [vmem:[%s16411_s12 + $0x88] sm:$0xf0] }
 0x5e6   : > { %v14181_v1 = vpop.f32.mrf.mxu0  ;;  %v14183_v28 = vpop.f32.mrf.mxu1 }
 0x5e7   : > { %v5123_v37 = vpack.c.bf16 %v5057_v44, %v4879_v19 }
 0x5e8   : > { %5009 = vmatmul.bf16.gmra.mxu2 %v13932_v0  ;;  %5098 = vmatmul.bf16.gmra.mxu3 %v13934_v3  ;;  %v10272_v0 = vld [vmem:[%s16411_s12 + $0xa8] sm:$0xf0] }
 0x5e9   : > { %v5175_v4 = vunpack.c.l.bf16 %v5123_v37  ;;  %v5176_v33 = vunpack.c.h.bf16 %v5123_v37  ;;  %v10275_v54 = vor.u32 %v10945_v40, %v10272_v0  ;;  %v10943_v37 = vld [vmem:[%s16411_s12 + $0x94] sm:$0xf]  ;;  %v4884_v40 = vadd.f32 %v13973_v20, %v13971_v47  ;;  %v10376_v20 = vld [vmem:[%s16413_s14 + $0x78] sm:$0xf0] }
 0x5ea   : > { %v10971_v47 = vld [vmem:[%s16413_s14 + $0x74] sm:$0xf] }
 0x5eb   : > { %v4970_v39 = vpop.f32.mrf.mxu2  ;;  %v5241_v11 = vadd.f32 %v14055_v56, %v5175_v4  ;;  %v5242_v63 = vadd.f32 %v14059_v50, %v5176_v33  ;;  %5943 = vmatpush.bf16.msra.mxu3 %v10275_v54  ;;  %v10267_v33 = vor.u32 %v10943_v37, %v10264_v62  ;;  %v10379_v37 = vor.u32 %v10971_v47, %v10376_v20 }
 0x5ec   : > { %v5059_v3 = vpop.f32.mrf.mxu3 }
 0x5ed   : > { %v5060_v16 = vadd.f32 %v5059_v3, %v4970_v39  ;;  %v5401_v35 = vmax.f32 %v5241_v11, 0.0  ;;  %v5402_v9 = vmax.f32 %v5242_v63, 0.0  ;;  %v10259_v63 = vor.u32 %v10941_v5, %v10256_v41  ;;  %6762 = vmatpush.bf16.msrb.mxu2 %v10379_v37 }
 0x5ee   : > { %v14199_v14 = vpop.f32.mrf.mxu0  ;;  %v14201_v19 = vpop.f32.mrf.mxu1 }
 0x5ef   : > { %v14203_v2 = vpack.c.bf16 %v5401_v35, %v5399_v24  ;;  %v14205_v44 = vpack.c.bf16 %v5402_v9, %v5400_v60  ;;  %v5124_v4 = vpack.c.bf16 %v5060_v16, %v4882_v27  ;;  %5944 = vmatpush.bf16.msra.mxu3 %v10267_v33 }
 0x5f1   : > { %5699 = vmatmul.bf16.gmra.mxu0 %v14203_v2  ;;  %5788 = vmatmul.bf16.gmra.mxu1 %v14205_v44  ;;  %v5177_v39 = vunpack.c.l.bf16 %v5124_v4  ;;  %v5178_v0 = vunpack.c.h.bf16 %v5124_v4 }
 0x5f3   : > { %v4972_v51 = vpop.f32.mrf.mxu2  ;;  %5945 = vmatpush.bf16.msra.mxu3 %v10259_v63  ;;  %v5243_v35 = vadd.f32 %v14055_v56, %v5177_v39  ;;  %v5244_v27 = vadd.f32 %v14059_v50, %v5178_v0 }
 0x5f4   : > { %v5061_v11 = vpop.f32.mrf.mxu3 }
 0x5f5   : > { %v5062_v3 = vadd.f32 %v5061_v11, %v4972_v51  ;;  %v5403_v33 = vmax.f32 %v5243_v35, 0.0  ;;  %v5404_v41 = vmax.f32 %v5244_v27, 0.0  ;;  %v4887_v11 = vadd.f32 %v14010_v23, %v14008_v6 }
 0x5f6   : > { %v14223_v24 = vpop.f32.mrf.mxu0  ;;  %v14225_v54 = vpop.f32.mrf.mxu1  ;;  %v4889_v27 = vadd.f32 %v14023_v13, %v14021_v17 }
 0x5f7   : > { %v5125_v16 = vpack.c.bf16 %v5062_v3, %v4884_v40 }
 0x5f8   : > { %5014 = vmatmul.bf16.gmra.mxu2 %v14012_v38  ;;  %5103 = vmatmul.bf16.gmra.mxu3 %v14014_v30 }
 0x5f9   : > { %v5179_v60 = vunpack.c.l.bf16 %v5125_v16  ;;  %v5180_v9 = vunpack.c.h.bf16 %v5125_v16 }
 0x5fb   : > { %v4975_v62 = vpop.f32.mrf.mxu2  ;;  %v5245_v38 = vadd.f32 %v14055_v56, %v5179_v60  ;;  %v5246_v30 = vadd.f32 %v14059_v50, %v5180_v9 }
 0x5fc   : > { %v5064_v4 = vpop.f32.mrf.mxu3 }
 0x5fd   : > { %v5065_v51 = vadd.f32 %v5064_v4, %v4975_v62  ;;  %v5405_v5 = vmax.f32 %v5245_v38, 0.0  ;;  %v5406_v39 = vmax.f32 %v5246_v30, 0.0 }
 0x5fe   : > { %v14241_v63 = vpop.f32.mrf.mxu0  ;;  %v14243_v40 = vpop.f32.mrf.mxu1 }
 0x5ff   : > { %v14245_v0 = vpack.c.bf16 %v5405_v5, %v5403_v33  ;;  %v14247_v3 = vpack.c.bf16 %v5406_v39, %v5404_v41  ;;  %v5126_v16 = vpack.c.bf16 %v5065_v51, %v4887_v11 }
 0x601   : > { %5704 = vmatmul.bf16.gmra.mxu0 %v14245_v0  ;;  %5793 = vmatmul.bf16.gmra.mxu1 %v14247_v3  ;;  %v5181_v60 = vunpack.c.l.bf16 %v5126_v16  ;;  %v5182_v6 = vunpack.c.h.bf16 %v5126_v16 }
 0x603   : > { %v4977_v35 = vpop.f32.mrf.mxu2  ;;  %v5247_v62 = vadd.f32 %v14055_v56, %v5181_v60  ;;  %v5248_v4 = vadd.f32 %v14059_v50, %v5182_v6 }
 0x604   : > { %v5066_v9 = vpop.f32.mrf.mxu3 }
 0x605   : > { %v5067_v23 = vadd.f32 %v5066_v9, %v4977_v35  ;;  %v5407_v5 = vmax.f32 %v5247_v62, 0.0  ;;  %v5408_v11 = vmax.f32 %v5248_v4, 0.0  ;;  %v4894_v62 = vadd.f32 %v14063_v26, %v14061_v31  ;;  %v10969_v31 = vld [vmem:[%s16413_s14 + $0x64] sm:$0xf]  ;;  %v10368_v26 = vld [vmem:[%s16413_s14 + $0x68] sm:$0xf0] }
 0x606   : > { %v14253_v47 = vpop.f32.mrf.mxu0  ;;  %v14255_v20 = vpop.f32.mrf.mxu1 }
 0x607   : > { %v5127_v37 = vpack.c.bf16 %v5067_v23, %v4889_v27 }
 0x608   : > { %5019 = vmatmul.bf16.gmra.mxu2 %v14043_v34  ;;  %5108 = vmatmul.bf16.gmra.mxu3 %v14045_v25  ;;  %v4892_v34 = vadd.f32 %v14041_v53, %v14039_v52 }
 0x609   : > { %v5183_v38 = vunpack.c.l.bf16 %v5127_v37  ;;  %v5184_v30 = vunpack.c.h.bf16 %v5127_v37 }
 0x60b   : > { %v4980_v33 = vpop.f32.mrf.mxu2  ;;  %v5249_v17 = vadd.f32 %v14055_v56, %v5183_v38  ;;  %v5250_v13 = vadd.f32 %v14059_v50, %v5184_v30 }
 0x60c   : > { %v5069_v51 = vpop.f32.mrf.mxu3 }
 0x60d   : > { %v5070_v41 = vadd.f32 %v5069_v51, %v4980_v33  ;;  %v5409_v39 = vmax.f32 %v5249_v17, 0.0  ;;  %v5410_v16 = vmax.f32 %v5250_v13, 0.0 }
 0x60e   : > { %v14265_v25 = vpop.f32.mrf.mxu0  ;;  %v14267_v35 = vpop.f32.mrf.mxu1 }
 0x60f   : > { %v14269_v60 = vpack.c.bf16 %v5409_v39, %v5407_v5  ;;  %v14271_v9 = vpack.c.bf16 %v5410_v16, %v5408_v11  ;;  %v5128_v27 = vpack.c.bf16 %v5070_v41, %v4892_v34  ;;  %v10371_v5 = vor.u32 %v10969_v31, %v10368_v26 }
 0x611   : > { %5709 = vmatmul.bf16.gmra.mxu0 %v14269_v60  ;;  %5798 = vmatmul.bf16.gmra.mxu1 %v14271_v9  ;;  %v5185_v23 = vunpack.c.l.bf16 %v5128_v27  ;;  %v5186_v52 = vunpack.c.h.bf16 %v5128_v27 }
 0x612   : > { %6763 = vmatpush.bf16.msrb.mxu2 %v10371_v5 }
 0x613   : > { %v4982_v6 = vpop.f32.mrf.mxu2  ;;  %v5251_v33 = vadd.f32 %v14055_v56, %v5185_v23  ;;  %v5252_v51 = vadd.f32 %v14059_v50, %v5186_v52  ;;  %v4897_v23 = vadd.f32 %v14075_v55, %v14073_v22 }
 0x614   : > { %v5071_v37 = vpop.f32.mrf.mxu3 }
 0x615   : > { %v5072_v53 = vadd.f32 %v5071_v37, %v4982_v6  ;;  %v5411_v11 = vmax.f32 %v5251_v33, 0.0  ;;  %v5412_v27 = vmax.f32 %v5252_v51, 0.0  ;;  %v4899_v51 = vadd.f32 %v14087_v32, %v14085_v15  ;;  %v10374_v15 = vld [vmem:[%s16413_s14 + $0x70] sm:$0xf]  ;;  %v10972_v32 = vld [vmem:[%s16413_s14 + $0x74] sm:$0xf0] }
 0x616   : > { %v14277_v38 = vpop.f32.mrf.mxu0  ;;  %v14279_v30 = vpop.f32.mrf.mxu1 }
 0x617   : > { %v5129_v4 = vpack.c.bf16 %v5072_v53, %v4894_v62 }
 0x618   : > { %5857 = vmatmul.bf16.vlgmr.msra.gmra.mxu2 %v14077_v8  ;;  %5946 = vmatmul.bf16.vlgmr.msra.gmra.mxu3 %v14079_v42 }
 0x619   : > { %v5187_v17 = vunpack.c.l.bf16 %v5129_v4  ;;  %v5188_v13 = vunpack.c.h.bf16 %v5129_v4 }
 0x61b   : > { %v4985_v41 = vpop.f32.mrf.mxu2  ;;  %v5253_v8 = vadd.f32 %v14055_v56, %v5187_v17  ;;  %v5254_v42 = vadd.f32 %v14059_v50, %v5188_v13 }
 0x61c   : > { %v5074_v39 = vpop.f32.mrf.mxu3 }
 0x61d   : > { %v5075_v16 = vadd.f32 %v5074_v39, %v4985_v41  ;;  %v5413_v34 = vmax.f32 %v5253_v8, 0.0  ;;  %v5414_v6 = vmax.f32 %v5254_v42, 0.0 }
 0x61e   : > { %v14295_v37 = vpop.f32.mrf.mxu0  ;;  %v14297_v62 = vpop.f32.mrf.mxu1 }
 0x61f   : > { %v14299_v52 = vpack.c.bf16 %v5413_v34, %v5411_v11  ;;  %v14301_v53 = vpack.c.bf16 %v5414_v6, %v5412_v27  ;;  %v5130_v4 = vpack.c.bf16 %v5075_v16, %v4897_v23  ;;  %v10375_v11 = vor.u32 %v10972_v32, %v10374_v15 }
 0x621   : > { %5714 = vmatmul.bf16.gmra.mxu0 %v14299_v52  ;;  %5803 = vmatmul.bf16.gmra.mxu1 %v14301_v53  ;;  %v5189_v17 = vunpack.c.l.bf16 %v5130_v4  ;;  %v5190_v22 = vunpack.c.h.bf16 %v5130_v4 }
 0x622   : > { %6584 = vmatpush.bf16.msra.mxu0 %v10375_v11 }
 0x623   : > { %v4987_v33 = vpop.f32.mrf.mxu2  ;;  %v5255_v41 = vadd.f32 %v14055_v56, %v5189_v17  ;;  %v5256_v39 = vadd.f32 %v14059_v50, %v5190_v22  ;;  %v4902_v17 = vadd.f32 %v14105_v7, %v14103_v45 }
 0x624   : > { %v5076_v13 = vpop.f32.mrf.mxu3 }
 0x625   : > { %v5077_v55 = vadd.f32 %v5076_v13, %v4987_v33  ;;  %v5415_v27 = vmax.f32 %v5255_v41, 0.0  ;;  %v5416_v4 = vmax.f32 %v5256_v39, 0.0  ;;  %v4904_v39 = vadd.f32 %v14123_v12, %v14121_v36  ;;  %v10967_v36 = vld [vmem:[%s16413_s14 + $0x54] sm:$0xf]  ;;  %v10360_v12 = vld [vmem:[%s16413_s14 + $0x58] sm:$0xf0] }
 0x626   : > { %v14307_v31 = vpop.f32.mrf.mxu0  ;;  %v14309_v26 = vpop.f32.mrf.mxu1 }
 0x627   : > { %v5131_v5 = vpack.c.bf16 %v5077_v55, %v4899_v51 }
 0x628   : > { %5862 = vmatmul.bf16.gmra.mxu2 %v14107_v58  ;;  %5951 = vmatmul.bf16.gmra.mxu3 %v14109_v48 }
 0x629   : > { %v5191_v8 = vunpack.c.l.bf16 %v5131_v5  ;;  %v5192_v42 = vunpack.c.h.bf16 %v5131_v5 }
 0x62b   : > { %v4990_v16 = vpop.f32.mrf.mxu2  ;;  %v5257_v58 = vadd.f32 %v14055_v56, %v5191_v8  ;;  %v5258_v48 = vadd.f32 %v14059_v50, %v5192_v42 }
 0x62c   : > { %v5079_v34 = vpop.f32.mrf.mxu3 }
 0x62d   : > { %v5080_v6 = vadd.f32 %v5079_v34, %v4990_v16  ;;  %v5417_v23 = vmax.f32 %v5257_v58, 0.0  ;;  %v5418_v33 = vmax.f32 %v5258_v48, 0.0 }
 0x62e   : > { %v14325_v13 = vpop.f32.mrf.mxu0  ;;  %v14327_v51 = vpop.f32.mrf.mxu1 }
 0x62f   : > { %v14329_v22 = vpack.c.bf16 %v5417_v23, %v5415_v27  ;;  %v14331_v55 = vpack.c.bf16 %v5418_v33, %v5416_v4  ;;  %v5132_v5 = vpack.c.bf16 %v5080_v6, %v4902_v17  ;;  %v10363_v27 = vor.u32 %v10967_v36, %v10360_v12 }
 0x631   : > { %5719 = vmatmul.bf16.gmra.mxu0 %v14329_v22  ;;  %5808 = vmatmul.bf16.gmra.mxu1 %v14331_v55  ;;  %v5193_v8 = vunpack.c.l.bf16 %v5132_v5  ;;  %v5194_v45 = vunpack.c.h.bf16 %v5132_v5 }
 0x632   : > { %6764 = vmatpush.bf16.msrb.mxu2 %v10363_v27 }
 0x633   : > { %v4992_v41 = vpop.f32.mrf.mxu2  ;;  %v5259_v16 = vadd.f32 %v14055_v56, %v5193_v8  ;;  %v5260_v34 = vadd.f32 %v14059_v50, %v5194_v45  ;;  %v4907_v8 = vadd.f32 %v14135_v61, %v14133_v21 }
 0x634   : > { %v5081_v42 = vpop.f32.mrf.mxu3 }
 0x635   : > { %v5082_v7 = vadd.f32 %v5081_v42, %v4992_v41  ;;  %v5419_v4 = vmax.f32 %v5259_v16, 0.0  ;;  %v5420_v5 = vmax.f32 %v5260_v34, 0.0  ;;  %v4909_v34 = vadd.f32 %v14147_v49, %v14145_v10  ;;  %v10366_v10 = vld [vmem:[%s16413_s14 + $0x60] sm:$0xf]  ;;  %v10970_v49 = vld [vmem:[%s16413_s14 + $0x64] sm:$0xf0] }
 0x636   : > { %v14337_v15 = vpop.f32.mrf.mxu0  ;;  %v14339_v32 = vpop.f32.mrf.mxu1 }
 0x637   : > { %v5133_v11 = vpack.c.bf16 %v5082_v7, %v4904_v39 }
 0x638   : > { %5867 = vmatmul.bf16.gmra.mxu2 %v14137_v43  ;;  %5956 = vmatmul.bf16.gmra.mxu3 %v14139_v46 }
 0x639   : > { %v5195_v58 = vunpack.c.l.bf16 %v5133_v11  ;;  %v5196_v48 = vunpack.c.h.bf16 %v5133_v11 }
 0x63b   : > { %v4995_v6 = vpop.f32.mrf.mxu2  ;;  %v5261_v43 = vadd.f32 %v14055_v56, %v5195_v58  ;;  %v5262_v46 = vadd.f32 %v14059_v50, %v5196_v48 }
 0x63c   : > { %v5084_v23 = vpop.f32.mrf.mxu3 }
 0x63d   : > { %v5085_v33 = vadd.f32 %v5084_v23, %v4995_v6  ;;  %v5421_v17 = vmax.f32 %v5261_v43, 0.0  ;;  %v5422_v41 = vmax.f32 %v5262_v46, 0.0 }
 0x63e   : > { %v14355_v42 = vpop.f32.mrf.mxu0  ;;  %v14357_v39 = vpop.f32.mrf.mxu1 }
 0x63f   : > { %v14359_v45 = vpack.c.bf16 %v5421_v17, %v5419_v4  ;;  %v14361_v7 = vpack.c.bf16 %v5422_v41, %v5420_v5  ;;  %v5134_v11 = vpack.c.bf16 %v5085_v33, %v4907_v8  ;;  %v10367_v4 = vor.u32 %v10970_v49, %v10366_v10 }
 0x641   : > { %5724 = vmatmul.bf16.gmra.mxu0 %v14359_v45  ;;  %5813 = vmatmul.bf16.gmra.mxu1 %v14361_v7  ;;  %v5197_v58 = vunpack.c.l.bf16 %v5134_v11  ;;  %v5198_v21 = vunpack.c.h.bf16 %v5134_v11 }
 0x642   : > { %6585 = vmatpush.bf16.msra.mxu0 %v10367_v4 }
 0x643   : > { %v4997_v16 = vpop.f32.mrf.mxu2  ;;  %v5263_v6 = vadd.f32 %v14055_v56, %v5197_v58  ;;  %v5264_v23 = vadd.f32 %v14059_v50, %v5198_v21  ;;  %v4912_v58 = vadd.f32 %v14165_v18, %v14163_v29 }
 0x644   : > { %v5086_v48 = vpop.f32.mrf.mxu3 }
 0x645   : > { %v5087_v61 = vadd.f32 %v5086_v48, %v4997_v16  ;;  %v5423_v5 = vmax.f32 %v5263_v6, 0.0  ;;  %v5424_v11 = vmax.f32 %v5264_v23, 0.0  ;;  %v4914_v23 = vadd.f32 %v14183_v28, %v14181_v1  ;;  %v10965_v1 = vld [vmem:[%s16413_s14 + $0x44] sm:$0xf]  ;;  %v10352_v28 = vld [vmem:[%s16413_s14 + $0x48] sm:$0xf0] }
 0x646   : > { %v14367_v36 = vpop.f32.mrf.mxu0  ;;  %v14369_v12 = vpop.f32.mrf.mxu1 }
 0x647   : > { %v5135_v27 = vpack.c.bf16 %v5087_v61, %v4909_v34 }
 0x648   : > { %5872 = vmatmul.bf16.gmra.mxu2 %v14167_v57  ;;  %5961 = vmatmul.bf16.gmra.mxu3 %v14169_v59 }
 0x649   : > { %v5199_v43 = vunpack.c.l.bf16 %v5135_v27  ;;  %v5200_v46 = vunpack.c.h.bf16 %v5135_v27 }
 0x64b   : > { %v5000_v33 = vpop.f32.mrf.mxu2  ;;  %v5265_v57 = vadd.f32 %v14055_v56, %v5199_v43  ;;  %v5266_v59 = vadd.f32 %v14059_v50, %v5200_v46 }
 0x64c   : > { %v5089_v17 = vpop.f32.mrf.mxu3 }
 0x64d   : > { %v5090_v41 = vadd.f32 %v5089_v17, %v5000_v33  ;;  %v5425_v8 = vmax.f32 %v5265_v57, 0.0  ;;  %v5426_v16 = vmax.f32 %v5266_v59, 0.0 }
 0x64e   : > { %v14385_v48 = vpop.f32.mrf.mxu0  ;;  %v14387_v34 = vpop.f32.mrf.mxu1 }
 0x64f   : > { %v14389_v21 = vpack.c.bf16 %v5425_v8, %v5423_v5  ;;  %v14391_v61 = vpack.c.bf16 %v5426_v16, %v5424_v11  ;;  %v5136_v27 = vpack.c.bf16 %v5090_v41, %v4912_v58  ;;  %v10355_v5 = vor.u32 %v10965_v1, %v10352_v28 }
 0x650   : > { %v4919_v1 = vadd.f32 %v14225_v54, %v14223_v24  ;;  %v10358_v24 = vld [vmem:[%s16413_s14 + $0x50] sm:$0xf]  ;;  %v10968_v54 = vld [vmem:[%s16413_s14 + $0x54] sm:$0xf0] }
 0x651   : > { %5729 = vmatmul.bf16.gmra.mxu0 %v14389_v21  ;;  %5818 = vmatmul.bf16.gmra.mxu1 %v14391_v61  ;;  %v5201_v43 = vunpack.c.l.bf16 %v5136_v27  ;;  %v5202_v29 = vunpack.c.h.bf16 %v5136_v27 }
 0x652   : > { %6765 = vmatpush.bf16.msrb.mxu2 %v10355_v5 }
 0x653   : > { %v5002_v6 = vpop.f32.mrf.mxu2  ;;  %v5267_v33 = vadd.f32 %v14055_v56, %v5201_v43  ;;  %v5268_v17 = vadd.f32 %v14059_v50, %v5202_v29  ;;  %v4917_v43 = vadd.f32 %v14201_v19, %v14199_v14  ;;  %v10440_v14 = vld [vmem:[%s16413_s14 + $0xf8] sm:$0xf0] }
 0x654   : > { %v5091_v46 = vpop.f32.mrf.mxu3 }
 0x655   : > { %v5092_v18 = vadd.f32 %v5091_v46, %v5002_v6  ;;  %v5427_v11 = vmax.f32 %v5267_v33, 0.0  ;;  %v5428_v27 = vmax.f32 %v5268_v17, 0.0  ;;  %v10987_v33 = vld [vmem:[%s16413_s14 + $0xf4] sm:$0xf] }
 0x656   : > { %v14397_v10 = vpop.f32.mrf.mxu0  ;;  %v14399_v49 = vpop.f32.mrf.mxu1  ;;  %v10443_v19 = vor.u32 %v10987_v33, %v10440_v14 }
 0x657   : > { %v5137_v4 = vpack.c.bf16 %v5092_v18, %v4914_v23 }
 0x658   : > { %5877 = vmatmul.bf16.gmra.mxu2 %v14203_v2  ;;  %5966 = vmatmul.bf16.gmra.mxu3 %v14205_v44 }
 0x659   : > { %v5203_v57 = vunpack.c.l.bf16 %v5137_v4  ;;  %v5204_v59 = vunpack.c.h.bf16 %v5137_v4  ;;  %6851 = vmatpush.bf16.msrb.mxu3 %v10443_v19 }
 0x65b   : > { %v5005_v41 = vpop.f32.mrf.mxu2  ;;  %v5269_v2 = vadd.f32 %v14055_v56, %v5203_v57  ;;  %v5270_v44 = vadd.f32 %v14059_v50, %v5204_v59 }
 0x65c   : > { %v5094_v8 = vpop.f32.mrf.mxu3 }
 0x65d   : > { %v5095_v16 = vadd.f32 %v5094_v8, %v5005_v41  ;;  %v5429_v58 = vmax.f32 %v5269_v2, 0.0  ;;  %v5430_v6 = vmax.f32 %v5270_v44, 0.0 }
 0x65e   : > { %v14415_v46 = vpop.f32.mrf.mxu0  ;;  %v14417_v23 = vpop.f32.mrf.mxu1 }
 0x65f   : > { %v14419_v29 = vpack.c.bf16 %v5429_v58, %v5427_v11  ;;  %v14421_v18 = vpack.c.bf16 %v5430_v6, %v5428_v27  ;;  %v5138_v4 = vpack.c.bf16 %v5095_v16, %v4917_v43  ;;  %v10359_v27 = vor.u32 %v10968_v54, %v10358_v24 }
 0x661   : > { %5734 = vmatmul.bf16.gmra.mxu0 %v14419_v29  ;;  %5823 = vmatmul.bf16.gmra.mxu1 %v14421_v18  ;;  %v5205_v59 = vunpack.c.l.bf16 %v5138_v4  ;;  %v5206_v28 = vunpack.c.h.bf16 %v5138_v4 }
 0x662   : > { %6586 = vmatpush.bf16.msra.mxu0 %v10359_v27  ;;  %v6059_v27 = vld [vmem:[%s16412_s13] sm:$0x3] }
 0x663   : > { %v5007_v57 = vpop.f32.mrf.mxu2  ;;  %v5271_v8 = vadd.f32 %v14055_v56, %v5205_v59  ;;  %v5272_v58 = vadd.f32 %v14059_v50, %v5206_v28  ;;  %v4922_v28 = vadd.f32 %v14243_v40, %v14241_v63  ;;  %v10986_v63 = vld [vmem:[%s16413_s14 + $0xe4] sm:$0xf0]  ;;  %6061 = vst [vmem:[#allocation1] ss:$9 sm:$0xff] %v6059_v27 }
 0x664   : > { %v5096_v17 = vpop.f32.mrf.mxu3 }
 0x665   : > { %v5097_v5 = vadd.f32 %v5096_v17, %v5007_v57  ;;  %v5431_v19 = vmax.f32 %v5271_v8, 0.0  ;;  %v5432_v17 = vmax.f32 %v5272_v58, 0.0  ;;  %v10430_v58 = vld [vmem:[%s16413_s14 + $0xe0] sm:$0xf] }
 0x666   : > { %v14433_v41 = vpop.f32.mrf.mxu0  ;;  %v14435_v2 = vpop.f32.mrf.mxu1 }
 0x667   : > { %v5139_v44 = vpack.c.bf16 %v5097_v5, %v4919_v1 }
 0x668   : > { %5882 = vmatmul.bf16.gmra.mxu2 %v14245_v0  ;;  %5971 = vmatmul.bf16.gmra.mxu3 %v14247_v3  ;;  %v10438_v0 = vld [vmem:[%s16413_s14 + $0xf0] sm:$0xf]  ;;  %v10988_v3 = vld [vmem:[%s16413_s14 + $0xf4] sm:$0xf0] }
 0x669   : > { %v5207_v11 = vunpack.c.l.bf16 %v5139_v44  ;;  %v5208_v16 = vunpack.c.h.bf16 %v5139_v44  ;;  %v10439_v33 = vor.u32 %v10988_v3, %v10438_v0  ;;  %v10431_v0 = vor.u32 %v10986_v63, %v10430_v58  ;;  %v10350_v63 = vld [vmem:[%s16413_s14 + $0x40] sm:$0xf] }
 0x66a   : > { %v4924_v3 = vadd.f32 %v14255_v20, %v14253_v47 }
 0x66b   : > { %v5010_v6 = vpop.f32.mrf.mxu2  ;;  %v5273_v43 = vadd.f32 %v14055_v56, %v5207_v11  ;;  %v5274_v4 = vadd.f32 %v14059_v50, %v5208_v16  ;;  %6673 = vmatpush.bf16.msrb.mxu1 %v10439_v33 }
 0x66c   : > { %v5099_v14 = vpop.f32.mrf.mxu3 }
 0x66d   : > { %v5100_v57 = vadd.f32 %v5099_v14, %v5010_v6  ;;  %v5433_v59 = vmax.f32 %v5273_v43, 0.0  ;;  %v5434_v1 = vmax.f32 %v5274_v4, 0.0 }
 0x66e   : > { %v14457_v5 = vpop.f32.mrf.mxu0  ;;  %v14459_v44 = vpop.f32.mrf.mxu1 }
 0x66f   : > { %v14461_v24 = vpack.c.bf16 %v5433_v59, %v5431_v19  ;;  %v14463_v11 = vpack.c.bf16 %v5434_v1, %v5432_v17  ;;  %v5140_v16 = vpack.c.bf16 %v5100_v57, %v4922_v28  ;;  %6674 = vmatpush.bf16.msrb.mxu1 %v10431_v0  ;;  %v10422_v19 = vld [vmem:[%s16413_s14 + $0xd0] sm:$0xf]  ;;  %v10984_v57 = vld [vmem:[%s16413_s14 + $0xd4] sm:$0xf0]  ;;  %v10963_v28 = vld [vmem:[%s16413_s14 + $0x34] sm:$0xf] }
 0x670   : > { %v10423_v20 = vor.u32 %v10984_v57, %v10422_v19 }
 0x671   : > { %5739 = vmatmul.bf16.gmra.mxu0 %v14461_v24  ;;  %5828 = vmatmul.bf16.gmra.mxu1 %v14463_v11  ;;  %v5209_v40 = vunpack.c.l.bf16 %v5140_v16  ;;  %v5210_v6 = vunpack.c.h.bf16 %v5140_v16  ;;  %v10344_v16 = vld [vmem:[%s16413_s14 + $0x38] sm:$0xf0] }
 0x673   : > { %v5012_v8 = vpop.f32.mrf.mxu2  ;;  %v5275_v47 = vadd.f32 %v14055_v56, %v5209_v40  ;;  %v5276_v1 = vadd.f32 %v14059_v50, %v5210_v6  ;;  %6675 = vmatpush.bf16.msrb.mxu1 %v10423_v20  ;;  %v10966_v40 = vld [vmem:[%s16413_s14 + $0x44] sm:$0xf0]  ;;  %v4927_v20 = vadd.f32 %v14267_v35, %v14265_v25  ;;  %v10406_v25 = vld [vmem:[%s16413_s14 + $0xb0] sm:$0xf] }
 0x674   : > { %v5101_v54 = vpop.f32.mrf.mxu3  ;;  %v10982_v6 = vld [vmem:[%s16413_s14 + $0xc4] sm:$0xf0] }
 0x675   : > { %v5102_v43 = vadd.f32 %v5101_v54, %v5012_v8  ;;  %v10347_v8 = vor.u32 %v10963_v28, %v10344_v16  ;;  %v10414_v54 = vld [vmem:[%s16413_s14 + $0xc0] sm:$0xf]  ;;  %v5435_v27 = vmax.f32 %v5275_v47, 0.0  ;;  %v5436_v19 = vmax.f32 %v5276_v1, 0.0  ;;  %v10964_v1 = vld [vmem:[%s16413_s14 + $0x34] sm:$0xf0] }
 0x676   : > { %v14478_v4 = vpop.f32.mrf.mxu0  ;;  %v14480_v33 = vpop.f32.mrf.mxu1  ;;  %v10415_v28 = vor.u32 %v10982_v6, %v10414_v54  ;;  %v10962_v54 = vld [vmem:[%s16413_s14 + $0x24] sm:$0xf0] }
 0x677   : > { %v5141_v14 = vpack.c.bf16 %v5102_v43, %v4924_v3  ;;  %6766 = vmatpush.bf16.msrb.mxu2 %v10347_v8  ;;  %v10351_v3 = vor.u32 %v10966_v40, %v10350_v63  ;;  %v10342_v8 = vld [vmem:[%s16413_s14 + $0x30] sm:$0xf]  ;;  %v10334_v40 = vld [vmem:[%s16413_s14 + $0x20] sm:$0xf] }
 0x678   : > { %5887 = vmatmul.bf16.gmra.mxu2 %v14269_v60  ;;  %5976 = vmatmul.bf16.gmra.mxu3 %v14271_v9  ;;  %v10335_v6 = vor.u32 %v10962_v54, %v10334_v40  ;;  %v10976_v40 = vld [vmem:[%s16413_s14 + $0x94] sm:$0xf0] }
 0x679   : > { %v5211_v59 = vunpack.c.l.bf16 %v5141_v14  ;;  %v5212_v17 = vunpack.c.h.bf16 %v5141_v14  ;;  %6587 = vmatpush.bf16.msra.mxu0 %v10351_v3  ;;  %6676 = vmatpush.bf16.msrb.mxu1 %v10415_v28  ;;  %v10432_v28 = vld [vmem:[%s16413_s14 + $0xe8] sm:$0xf0] }
 0x67b   : > { %v5015_v60 = vpop.f32.mrf.mxu2  ;;  %v5277_v9 = vadd.f32 %v14055_v56, %v5211_v59  ;;  %v5278_v58 = vadd.f32 %v14059_v50, %v5212_v17 }
 0x67c   : > { %v5104_v0 = vpop.f32.mrf.mxu3 }
 0x67d   : > { %v5105_v43 = vadd.f32 %v5104_v0, %v5015_v60  ;;  %v5437_v14 = vmax.f32 %v5277_v9, 0.0  ;;  %v5438_v57 = vmax.f32 %v5278_v58, 0.0  ;;  %v10343_v60 = vor.u32 %v10964_v1, %v10342_v8  ;;  %v10980_v9 = vld [vmem:[%s16413_s14 + $0xb4] sm:$0xf0]  ;;  %v10398_v0 = vld [vmem:[%s16413_s14 + $0xa0] sm:$0xf] }
 0x67e   : > { %v14514_v59 = vpop.f32.mrf.mxu0  ;;  %v14516_v17 = vpop.f32.mrf.mxu1  ;;  %v10407_v58 = vor.u32 %v10980_v9, %v10406_v25 }
 0x67f   : > { %v14518_v47 = vpack.c.bf16 %v5437_v14, %v5435_v27  ;;  %v14520_v16 = vpack.c.bf16 %v5438_v57, %v5436_v19  ;;  %v5142_v35 = vpack.c.bf16 %v5105_v43, %v4927_v20  ;;  %6588 = vmatpush.bf16.msra.mxu0 %v10343_v60  ;;  %v10978_v43 = vld [vmem:[%s16413_s14 + $0xa4] sm:$0xf0]  ;;  %v4929_v14 = vadd.f32 %v14279_v30, %v14277_v38  ;;  %v10985_v20 = vld [vmem:[%s16413_s14 + $0xe4] sm:$0xf]  ;;  %v10326_v38 = vld [vmem:[%s16413_s14 + $0x10] sm:$0xf] }
 0x680   : > { %6677 = vmatpush.bf16.msrb.mxu1 %v10407_v58  ;;  %v10399_v8 = vor.u32 %v10978_v43, %v10398_v0  ;;  %v10435_v60 = vor.u32 %v10985_v20, %v10432_v28  ;;  %v10960_v30 = vld [vmem:[%s16413_s14 + $0x14] sm:$0xf0] }
 0x681   : > { %5744 = vmatmul.bf16.gmra.mxu0 %v14518_v47  ;;  %5833 = vmatmul.bf16.gmra.mxu1 %v14520_v16  ;;  %v5213_v27 = vunpack.c.l.bf16 %v5142_v35  ;;  %v5214_v19 = vunpack.c.h.bf16 %v5142_v35  ;;  %v10390_v35 = vld [vmem:[%s16413_s14 + $0x90] sm:$0xf] }
 0x682   : > { %6852 = vmatpush.bf16.msrb.mxu3 %v10435_v60 }
 0x683   : > { %v5017_v63 = vpop.f32.mrf.mxu2  ;;  %6589 = vmatpush.bf16.msra.mxu0 %v10335_v6  ;;  %v5279_v58 = vadd.f32 %v14055_v56, %v5213_v27  ;;  %v10391_v6 = vor.u32 %v10976_v40, %v10390_v35  ;;  %v10318_v27 = vld [vmem:[%s16413_s14] sm:$0xf]  ;;  %v4932_v35 = vadd.f32 %v14297_v62, %v14295_v37  ;;  %v4934_v37 = vadd.f32 %v14309_v26, %v14307_v31  ;;  %v10961_v31 = vld [vmem:[%s16413_s14 + $0x24] sm:$0xf]  ;;  %v10336_v26 = vld [vmem:[%s16413_s14 + $0x28] sm:$0xf0] }
 0x684   : > { %v5106_v3 = vpop.f32.mrf.mxu3  ;;  %6678 = vmatpush.bf16.msrb.mxu1 %v10399_v8  ;;  %v10974_v8 = vld [vmem:[%s16413_s14 + $0x84] sm:$0xf0] }
 0x685   : > { %v5107_v57 = vadd.f32 %v5106_v3, %v5017_v63  ;;  %v10327_v63 = vor.u32 %v10960_v30, %v10326_v38  ;;  %v5280_v3 = vadd.f32 %v14059_v50, %v5214_v19  ;;  %v10382_v19 = vld [vmem:[%s16413_s14 + $0x80] sm:$0xf]  ;;  %v5439_v20 = vmax.f32 %v5279_v58, 0.0 }
 0x686   : > { %v14556_v1 = vpop.f32.mrf.mxu0  ;;  %v14558_v25 = vpop.f32.mrf.mxu1 }
 0x687   : > { %v5143_v9 = vpack.c.bf16 %v5107_v57, %v4929_v14  ;;  %6590 = vmatpush.bf16.msra.mxu0 %v10327_v63  ;;  %v10958_v14 = vld [vmem:[%s16413_s14 + $0x4] sm:$0xf0]  ;;  %v5440_v38 = vmax.f32 %v5280_v3, 0.0 }
 0x688   : > { %5892 = vmatmul.bf16.gmra.mxu2 %v14299_v52  ;;  %5981 = vmatmul.bf16.gmra.mxu3 %v14301_v53  ;;  %v10319_v28 = vor.u32 %v10958_v14, %v10318_v27 }
 0x689   : > { %v5215_v54 = vunpack.c.l.bf16 %v5143_v9  ;;  %v5216_v0 = vunpack.c.h.bf16 %v5143_v9  ;;  %6679 = vmatpush.bf16.msrb.mxu1 %v10391_v6 }
 0x68b   : > { %v5020_v43 = vpop.f32.mrf.mxu2  ;;  %v5281_v52 = vadd.f32 %v14055_v56, %v5215_v54  ;;  %v5282_v53 = vadd.f32 %v14059_v50, %v5216_v0  ;;  %6591 = vmatpush.bf16.msra.mxu0 %v10319_v28  ;;  %v10383_v54 = vor.u32 %v10974_v8, %v10382_v19 }
 0x68c   : > { %v5109_v57 = vpop.f32.mrf.mxu3 }
 0x68d   : > { %v5110_v60 = vadd.f32 %v5109_v57, %v5020_v43  ;;  %v5441_v9 = vmax.f32 %v5281_v52, 0.0  ;;  %v5442_v30 = vmax.f32 %v5282_v53, 0.0  ;;  %6680 = vmatpush.bf16.msrb.mxu1 %v10383_v54  ;;  %v6062_v57 = vld [vmem:[#allocation1] sm:$0xff] }
 0x68e   : > { %v14592_v63 = vpop.f32.mrf.mxu0  ;;  %v14594_v40 = vpop.f32.mrf.mxu1  ;;  %v6064_v54 = vpack.i.b16 %v6062_v57, %v6062_v57 }
 0x68f   : > { %v14596_v58 = vpack.c.bf16 %v5441_v9, %v5439_v20  ;;  %v14598_v0 = vpack.c.bf16 %v5442_v30, %v5440_v38  ;;  %v5144_v27 = vpack.c.bf16 %v5110_v60, %v4932_v35  ;;  %v6063_v60 = vld [vmem:[#allocation1 + $0x9] sm:$0xff]  ;;  %v10339_v38 = vor.u32 %v10961_v31, %v10336_v26 }
 0x690   : > { %v6066_v57 = vperm.slane %v6064_v54, 0 }
 0x691   : > { %5749 = vmatmul.bf16.gmra.mxu0 %v14596_v58  ;;  %5838 = vmatmul.bf16.gmra.mxu1 %v14598_v0  ;;  %v5217_v6 = vunpack.c.l.bf16 %v5144_v27  ;;  %v5218_v62 = vunpack.c.h.bf16 %v5144_v27  ;;  %v6067_v27 = vpack.i.b16 %v6063_v60, %v6063_v60 }
 0x692   : > { %6767 = vmatpush.bf16.msrb.mxu2 %v10339_v38 }
 0x693   : > { %v5022_v3 = vpop.f32.mrf.mxu2  ;;  %v5283_v20 = vadd.f32 %v14055_v56, %v5217_v6  ;;  %v5284_v9 = vadd.f32 %v14059_v50, %v5218_v62 }
 0x694   : > { %v5111_v43 = vpop.f32.mrf.mxu3 }
 0x695   : > { %v5112_v52 = vadd.f32 %v5111_v43, %v5022_v3  ;;  %v5443_v3 = vmax.f32 %v5283_v20, 0.0  ;;  %v10983_v20 = vld [vmem:[%s16413_s14 + $0xd4] sm:$0xf] }
 0x696   : > { %v14604_v53 = vpop.f32.mrf.mxu0  ;;  %v14606_v14 = vpop.f32.mrf.mxu1 }
 0x697   : > { %v5145_v19 = vpack.c.bf16 %v5112_v52, %v4934_v37  ;;  %v5444_v37 = vmax.f32 %v5284_v9, 0.0  ;;  %v5770_v52 = vadd.f32 %v14327_v51, %v14325_v13  ;;  %v10424_v13 = vld [vmem:[%s16413_s14 + $0xd8] sm:$0xf0]  ;;  %v14638_v9 = vunpack.c.l.bf16 %v6066_v57 }
 0x698   : > { %5897 = vmatmul.bf16.gmra.mxu2 %v14329_v22  ;;  %5986 = vmatmul.bf16.gmra.mxu3 %v14331_v55  ;;  %v10427_v51 = vor.u32 %v10983_v20, %v10424_v13 }
 0x699   : > { %v5219_v28 = vunpack.c.l.bf16 %v5145_v19  ;;  %v5220_v8 = vunpack.c.h.bf16 %v5145_v19 }
 0x69a   : > { %6853 = vmatpush.bf16.msrb.mxu3 %v10427_v51 }
 0x69b   : > { %v5858_v22 = vpop.f32.mrf.mxu2  ;;  %v5285_v55 = vadd.f32 %v14055_v56, %v5219_v28  ;;  %v5286_v30 = vadd.f32 %v14059_v50, %v5220_v8  ;;  %v6069_v28 = vperm.slane %v6067_v27, 0 }
 0x69c   : > { %v5947_v35 = vpop.f32.mrf.mxu3 }
 0x69d   : > { %v5948_v6 = vadd.f32 %v5947_v35, %v5858_v22  ;;  %v5445_v43 = vmax.f32 %v5285_v55, 0.0  ;;  %v5446_v62 = vmax.f32 %v5286_v30, 0.0  ;;  %v5772_v22 = vadd.f32 %v14339_v32, %v14337_v15 }
 0x69e   : > { %v14622_v19 = vpop.f32.mrf.mxu0  ;;  %v14624_v31 = vpop.f32.mrf.mxu1  ;;  %v14642_v30 = vunpack.c.l.bf16 %v6069_v28 }
 0x69f   : > { %v14626_v26 = vpack.c.bf16 %v5445_v43, %v5443_v3  ;;  %v14628_v56 = vpack.c.bf16 %v5446_v62, %v5444_v37  ;;  %v6027_v50 = vpack.c.bf16 %v5948_v6, %v5770_v52 }
 0x6a1   : > { %5754 = vmatmul.bf16.gmra.mxu0 %v14626_v26  ;;  %5843 = vmatmul.bf16.gmra.mxu1 %v14628_v56  ;;  %v6070_v60 = vunpack.c.l.bf16 %v6027_v50  ;;  %v6071_v55 = vunpack.c.h.bf16 %v6027_v50 }
 0x6a3   : > { %v5860_v8 = vpop.f32.mrf.mxu2  ;;  %v6136_v6 = vadd.f32 %v14638_v9, %v6070_v60  ;;  %v6137_v43 = vadd.f32 %v14642_v30, %v6071_v55 }
 0x6a4   : > { %v5949_v38 = vpop.f32.mrf.mxu3 }
 0x6a5   : > { %v5950_v35 = vadd.f32 %v5949_v38, %v5860_v8  ;;  %v6296_v50 = vmax.f32 %v6136_v6, 0.0  ;;  %v6297_v28 = vmax.f32 %v6137_v43, 0.0  ;;  %v5777_v6 = vadd.f32 %v14369_v12, %v14367_v36  ;;  %v10959_v36 = vld [vmem:[%s16413_s14 + $0x14] sm:$0xf]  ;;  %v10328_v12 = vld [vmem:[%s16413_s14 + $0x18] sm:$0xf0] }
 0x6a6   : > { %v14644_v54 = vpop.f32.mrf.mxu0  ;;  %v14646_v27 = vpop.f32.mrf.mxu1 }
 0x6a7   : > { %v6028_v3 = vpack.c.bf16 %v5950_v35, %v5772_v22 }
 0x6a8   : > { %5902 = vmatmul.bf16.gmra.mxu2 %v14359_v45  ;;  %5991 = vmatmul.bf16.gmra.mxu3 %v14361_v7  ;;  %v5775_v45 = vadd.f32 %v14357_v39, %v14355_v42 }
 0x6a9   : > { %v6072_v37 = vunpack.c.l.bf16 %v6028_v3  ;;  %v6073_v62 = vunpack.c.h.bf16 %v6028_v3 }
 0x6ab   : > { %v6138_v15 = vadd.f32 %v14638_v9, %v6072_v37  ;;  %v6139_v32 = vadd.f32 %v14642_v30, %v6073_v62  ;;  %v5863_v52 = vpop.f32.mrf.mxu2 }
 0x6ac   : > { %v5952_v57 = vpop.f32.mrf.mxu3 }
 0x6ad   : > { %v6298_v20 = vmax.f32 %v6138_v15, 0.0  ;;  %v6299_v13 = vmax.f32 %v6139_v32, 0.0  ;;  %v5953_v51 = vadd.f32 %v5952_v57, %v5863_v52  ;;  %v10331_v57 = vor.u32 %v10959_v36, %v10328_v12 }
 0x6ae   : > { %v14656_v8 = vpop.f32.mrf.mxu0  ;;  %v14658_v7 = vpop.f32.mrf.mxu1  ;;  %v5782_v36 = vadd.f32 %v14399_v49, %v14397_v10 }
 0x6af   : > { %v14660_v60 = vpack.c.bf16 %v6298_v20, %v6296_v50  ;;  %v14662_v38 = vpack.c.bf16 %v6299_v13, %v6297_v28  ;;  %v6029_v22 = vpack.c.bf16 %v5953_v51, %v5775_v45  ;;  %6768 = vmatpush.bf16.msrb.mxu2 %v10331_v57 }
 0x6b1   : > { %6592 = vmatmul.bf16.vlgmr.msra.gmra.mxu0 %v14660_v60  ;;  %6681 = vmatmul.bf16.vlgmr.msrb.gmra.mxu1 %v14662_v38  ;;  %v6074_v35 = vunpack.c.l.bf16 %v6029_v22  ;;  %v6075_v42 = vunpack.c.h.bf16 %v6029_v22 }
 0x6b3   : > { %v5865_v55 = vpop.f32.mrf.mxu2  ;;  %v6140_v15 = vadd.f32 %v14638_v9, %v6074_v35  ;;  %v6141_v50 = vadd.f32 %v14642_v30, %v6075_v42  ;;  %v5780_v35 = vadd.f32 %v14387_v34, %v14385_v48  ;;  %v10416_v48 = vld [vmem:[%s16413_s14 + $0xc8] sm:$0xf0] }
 0x6b4   : > { %v5954_v3 = vpop.f32.mrf.mxu3 }
 0x6b5   : > { %v5955_v39 = vadd.f32 %v5954_v3, %v5865_v55  ;;  %v6300_v13 = vmax.f32 %v6140_v15, 0.0  ;;  %v6301_v22 = vmax.f32 %v6141_v50, 0.0  ;;  %v10981_v15 = vld [vmem:[%s16413_s14 + $0xc4] sm:$0xf] }
 0x6b6   : > { %v14668_v43 = vpop.f32.mrf.mxu0  ;;  %v14670_v37 = vpop.f32.mrf.mxu1  ;;  %v10419_v34 = vor.u32 %v10981_v15, %v10416_v48 }
 0x6b7   : > { %v6030_v62 = vpack.c.bf16 %v5955_v39, %v5777_v6 }
 0x6b8   : > { %5907 = vmatmul.bf16.gmra.mxu2 %v14389_v21  ;;  %5996 = vmatmul.bf16.gmra.mxu3 %v14391_v61 }
 0x6b9   : > { %v6076_v32 = vunpack.c.l.bf16 %v6030_v62  ;;  %v6077_v52 = vunpack.c.h.bf16 %v6030_v62  ;;  %6854 = vmatpush.bf16.msrb.mxu3 %v10419_v34 }
 0x6bb   : > { %v5868_v28 = vpop.f32.mrf.mxu2  ;;  %v6142_v21 = vadd.f32 %v14638_v9, %v6076_v32  ;;  %v6143_v61 = vadd.f32 %v14642_v30, %v6077_v52 }
 0x6bc   : > { %v5957_v20 = vpop.f32.mrf.mxu3 }
 0x6bd   : > { %v5958_v51 = vadd.f32 %v5957_v20, %v5868_v28  ;;  %v6302_v45 = vmax.f32 %v6142_v21, 0.0  ;;  %v6303_v55 = vmax.f32 %v6143_v61, 0.0 }
 0x6be   : > { %v14686_v3 = vpop.f32.mrf.mxu0  ;;  %v14688_v6 = vpop.f32.mrf.mxu1 }
 0x6bf   : > { %v14690_v42 = vpack.c.bf16 %v6302_v45, %v6300_v13  ;;  %v14692_v39 = vpack.c.bf16 %v6303_v55, %v6301_v22  ;;  %v6031_v62 = vpack.c.bf16 %v5958_v51, %v5780_v35 }
 0x6c1   : > { %6597 = vmatmul.bf16.gmra.mxu0 %v14690_v42  ;;  %6686 = vmatmul.bf16.gmra.mxu1 %v14692_v39  ;;  %v6078_v52 = vunpack.c.l.bf16 %v6031_v62  ;;  %v6079_v12 = vunpack.c.h.bf16 %v6031_v62 }
 0x6c3   : > { %v5870_v32 = vpop.f32.mrf.mxu2  ;;  %v6144_v20 = vadd.f32 %v14638_v9, %v6078_v52  ;;  %v6145_v45 = vadd.f32 %v14642_v30, %v6079_v12 }
 0x6c4   : > { %v5959_v50 = vpop.f32.mrf.mxu3 }
 0x6c5   : > { %v5960_v57 = vadd.f32 %v5959_v50, %v5870_v32  ;;  %v6304_v35 = vmax.f32 %v6144_v20, 0.0  ;;  %v6305_v48 = vmax.f32 %v6145_v45, 0.0  ;;  %v5787_v20 = vadd.f32 %v14435_v2, %v14433_v41  ;;  %v10957_v41 = vld [vmem:[%s16413_s14 + $0x4] sm:$0xf]  ;;  %v10320_v2 = vld [vmem:[%s16413_s14 + $0x8] sm:$0xf0] }
 0x6c6   : > { %v14704_v28 = vpop.f32.mrf.mxu0  ;;  %v14706_v21 = vpop.f32.mrf.mxu1 }
 0x6c7   : > { %v6032_v61 = vpack.c.bf16 %v5960_v57, %v5782_v36 }
 0x6c8   : > { %5912 = vmatmul.bf16.gmra.mxu2 %v14419_v29  ;;  %6001 = vmatmul.bf16.gmra.mxu3 %v14421_v18  ;;  %v5785_v29 = vadd.f32 %v14417_v23, %v14415_v46 }
 0x6c9   : > { %v6080_v13 = vunpack.c.l.bf16 %v6032_v61  ;;  %v6081_v51 = vunpack.c.h.bf16 %v6032_v61 }
 0x6cb   : > { %v5873_v22 = vpop.f32.mrf.mxu2  ;;  %v6146_v10 = vadd.f32 %v14638_v9, %v6080_v13  ;;  %v6147_v49 = vadd.f32 %v14642_v30, %v6081_v51 }
 0x6cc   : > { %v5962_v55 = vpop.f32.mrf.mxu3 }
 0x6cd   : > { %v5963_v62 = vadd.f32 %v5962_v55, %v5873_v22  ;;  %v6306_v15 = vmax.f32 %v6146_v10, 0.0  ;;  %v6307_v34 = vmax.f32 %v6147_v49, 0.0 }
 0x6ce   : > { %v14716_v18 = vpop.f32.mrf.mxu0  ;;  %v14718_v32 = vpop.f32.mrf.mxu1 }
 0x6cf   : > { %v14720_v52 = vpack.c.bf16 %v6306_v15, %v6304_v35  ;;  %v14722_v50 = vpack.c.bf16 %v6307_v34, %v6305_v48  ;;  %v6033_v36 = vpack.c.bf16 %v5963_v62, %v5785_v29  ;;  %v10323_v35 = vor.u32 %v10957_v41, %v10320_v2 }
 0x6d0   : > { %v5792_v41 = vadd.f32 %v14480_v33, %v14478_v4 }
 0x6d1   : > { %6602 = vmatmul.bf16.gmra.mxu0 %v14720_v52  ;;  %6691 = vmatmul.bf16.gmra.mxu1 %v14722_v50  ;;  %v6082_v57 = vunpack.c.l.bf16 %v6033_v36  ;;  %v6083_v46 = vunpack.c.h.bf16 %v6033_v36 }
 0x6d2   : > { %6769 = vmatpush.bf16.msrb.mxu2 %v10323_v35 }
 0x6d3   : > { %v5875_v12 = vpop.f32.mrf.mxu2  ;;  %v6148_v22 = vadd.f32 %v14638_v9, %v6082_v57  ;;  %v6149_v55 = vadd.f32 %v14642_v30, %v6083_v46  ;;  %v5790_v57 = vadd.f32 %v14459_v44, %v14457_v5  ;;  %v10408_v5 = vld [vmem:[%s16413_s14 + $0xb8] sm:$0xf0] }
 0x6d4   : > { %v5964_v61 = vpop.f32.mrf.mxu3 }
 0x6d5   : > { %v5965_v23 = vadd.f32 %v5964_v61, %v5875_v12  ;;  %v6308_v48 = vmax.f32 %v6148_v22, 0.0  ;;  %v6309_v36 = vmax.f32 %v6149_v55, 0.0  ;;  %v10979_v22 = vld [vmem:[%s16413_s14 + $0xb4] sm:$0xf] }
 0x6d6   : > { %v14728_v13 = vpop.f32.mrf.mxu0  ;;  %v14730_v51 = vpop.f32.mrf.mxu1  ;;  %v10411_v44 = vor.u32 %v10979_v22, %v10408_v5 }
 0x6d7   : > { %v6034_v45 = vpack.c.bf16 %v5965_v23, %v5787_v20 }
 0x6d8   : > { %5917 = vmatmul.bf16.gmra.mxu2 %v14461_v24  ;;  %6006 = vmatmul.bf16.gmra.mxu3 %v14463_v11 }
 0x6d9   : > { %v6084_v10 = vunpack.c.l.bf16 %v6034_v45  ;;  %v6085_v49 = vunpack.c.h.bf16 %v6034_v45  ;;  %6855 = vmatpush.bf16.msrb.mxu3 %v10411_v44 }
 0x6db   : > { %v5878_v62 = vpop.f32.mrf.mxu2  ;;  %v6150_v24 = vadd.f32 %v14638_v9, %v6084_v10  ;;  %v6151_v11 = vadd.f32 %v14642_v30, %v6085_v49 }
 0x6dc   : > { %v5967_v15 = vpop.f32.mrf.mxu3 }
 0x6dd   : > { %v5968_v34 = vadd.f32 %v5967_v15, %v5878_v62  ;;  %v6310_v29 = vmax.f32 %v6150_v24, 0.0  ;;  %v6311_v12 = vmax.f32 %v6151_v11, 0.0 }
 0x6de   : > { %v14746_v61 = vpop.f32.mrf.mxu0  ;;  %v14748_v20 = vpop.f32.mrf.mxu1 }
 0x6df   : > { %v14750_v46 = vpack.c.bf16 %v6310_v29, %v6308_v48  ;;  %v14752_v23 = vpack.c.bf16 %v6311_v12, %v6309_v36  ;;  %v6035_v45 = vpack.c.bf16 %v5968_v34, %v5790_v57  ;;  %v10977_v12 = vld [vmem:[%s16413_s14 + $0xa4] sm:$0xf] }
 0x6e1   : > { %6607 = vmatmul.bf16.gmra.mxu0 %v14750_v46  ;;  %6696 = vmatmul.bf16.gmra.mxu1 %v14752_v23  ;;  %v6086_v49 = vunpack.c.l.bf16 %v6035_v45  ;;  %v6087_v2 = vunpack.c.h.bf16 %v6035_v45 }
 0x6e3   : > { %v5880_v10 = vpop.f32.mrf.mxu2  ;;  %v6152_v15 = vadd.f32 %v14638_v9, %v6086_v49  ;;  %v6153_v29 = vadd.f32 %v14642_v30, %v6087_v2  ;;  %v5795_v49 = vadd.f32 %v14516_v17, %v14514_v59  ;;  %v10973_v17 = vld [vmem:[%s16413_s14 + $0x84] sm:$0xf] }
 0x6e4   : > { %v5969_v55 = vpop.f32.mrf.mxu3 }
 0x6e5   : > { %v5970_v35 = vadd.f32 %v5969_v55, %v5880_v10  ;;  %v6312_v57 = vmax.f32 %v6152_v15, 0.0  ;;  %v6313_v44 = vmax.f32 %v6153_v29, 0.0  ;;  %v10392_v15 = vld [vmem:[%s16413_s14 + $0x98] sm:$0xf0]  ;;  %v10384_v29 = vld [vmem:[%s16413_s14 + $0x88] sm:$0xf0] }
 0x6e6   : > { %v14764_v62 = vpop.f32.mrf.mxu0  ;;  %v14766_v24 = vpop.f32.mrf.mxu1 }
 0x6e7   : > { %v6036_v11 = vpack.c.bf16 %v5970_v35, %v5792_v41 }
 0x6e8   : > { %5922 = vmatmul.bf16.gmra.mxu2 %v14518_v47  ;;  %6011 = vmatmul.bf16.gmra.mxu3 %v14520_v16  ;;  %v10400_v47 = vld [vmem:[%s16413_s14 + $0xa8] sm:$0xf0] }
 0x6e9   : > { %v6088_v48 = vunpack.c.l.bf16 %v6036_v11  ;;  %v6089_v34 = vunpack.c.h.bf16 %v6036_v11  ;;  %v10403_v45 = vor.u32 %v10977_v12, %v10400_v47  ;;  %v10975_v11 = vld [vmem:[%s16413_s14 + $0x94] sm:$0xf]  ;;  %v5797_v12 = vadd.f32 %v14558_v25, %v14556_v1  ;;  %v10566_v1 = vld [vmem:[%s16415_s16 + $0x70] sm:$0xf]  ;;  %v11004_v25 = vld [vmem:[%s16415_s16 + $0x74] sm:$0xf0] }
 0x6eb   : > { %v5883_v36 = vpop.f32.mrf.mxu2  ;;  %v6154_v4 = vadd.f32 %v14638_v9, %v6088_v48  ;;  %v6155_v33 = vadd.f32 %v14642_v30, %v6089_v34  ;;  %6856 = vmatpush.bf16.msrb.mxu3 %v10403_v45  ;;  %v10395_v34 = vor.u32 %v10975_v11, %v10392_v15  ;;  %v10567_v11 = vor.u32 %v11004_v25, %v10566_v1 }
 0x6ec   : > { %v5972_v16 = vpop.f32.mrf.mxu3 }
 0x6ed   : > { %v5973_v22 = vadd.f32 %v5972_v16, %v5883_v36  ;;  %v6314_v5 = vmax.f32 %v6154_v4, 0.0  ;;  %v6315_v10 = vmax.f32 %v6155_v33, 0.0  ;;  %v10387_v33 = vor.u32 %v10973_v17, %v10384_v29  ;;  %7611 = vmatpush.bf16.msra.mxu2 %v10567_v11 }
 0x6ee   : > { %v14782_v55 = vpop.f32.mrf.mxu0  ;;  %v14784_v41 = vpop.f32.mrf.mxu1 }
 0x6ef   : > { %v14786_v2 = vpack.c.bf16 %v6314_v5, %v6312_v57  ;;  %v14788_v35 = vpack.c.bf16 %v6315_v10, %v6313_v44  ;;  %v6037_v48 = vpack.c.bf16 %v5973_v22, %v5795_v49  ;;  %6857 = vmatpush.bf16.msrb.mxu3 %v10395_v34 }
 0x6f1   : > { %6612 = vmatmul.bf16.gmra.mxu0 %v14786_v2  ;;  %6701 = vmatmul.bf16.gmra.mxu1 %v14788_v35  ;;  %v6090_v36 = vunpack.c.l.bf16 %v6037_v48  ;;  %v6091_v47 = vunpack.c.h.bf16 %v6037_v48 }
 0x6f3   : > { %v5885_v59 = vpop.f32.mrf.mxu2  ;;  %6858 = vmatpush.bf16.msrb.mxu3 %v10387_v33  ;;  %v6156_v5 = vadd.f32 %v14638_v9, %v6090_v36  ;;  %v6157_v49 = vadd.f32 %v14642_v30, %v6091_v47 }
 0x6f4   : > { %v5974_v4 = vpop.f32.mrf.mxu3 }
 0x6f5   : > { %v5975_v16 = vadd.f32 %v5974_v4, %v5885_v59  ;;  %v6316_v34 = vmax.f32 %v6156_v5, 0.0  ;;  %v6317_v29 = vmax.f32 %v6157_v49, 0.0  ;;  %v5800_v4 = vadd.f32 %v14594_v40, %v14592_v63 }
 0x6f6   : > { %v14806_v57 = vpop.f32.mrf.mxu0  ;;  %v14808_v45 = vpop.f32.mrf.mxu1  ;;  %v5802_v49 = vadd.f32 %v14606_v14, %v14604_v53 }
 0x6f7   : > { %v6038_v22 = vpack.c.bf16 %v5975_v16, %v5797_v12 }
 0x6f8   : > { %5927 = vmatmul.bf16.gmra.mxu2 %v14596_v58  ;;  %6016 = vmatmul.bf16.gmra.mxu3 %v14598_v0 }
 0x6f9   : > { %v6092_v44 = vunpack.c.l.bf16 %v6038_v22  ;;  %v6093_v10 = vunpack.c.h.bf16 %v6038_v22 }
 0x6fb   : > { %v5888_v15 = vpop.f32.mrf.mxu2  ;;  %v6158_v58 = vadd.f32 %v14638_v9, %v6092_v44  ;;  %v6159_v0 = vadd.f32 %v14642_v30, %v6093_v10 }
 0x6fc   : > { %v5977_v48 = vpop.f32.mrf.mxu3 }
 0x6fd   : > { %v5978_v59 = vadd.f32 %v5977_v48, %v5888_v15  ;;  %v6318_v17 = vmax.f32 %v6158_v58, 0.0  ;;  %v6319_v36 = vmax.f32 %v6159_v0, 0.0 }
 0x6fe   : > { %v14824_v33 = vpop.f32.mrf.mxu0  ;;  %v14826_v12 = vpop.f32.mrf.mxu1 }
 0x6ff   : > { %v14828_v47 = vpack.c.bf16 %v6318_v17, %v6316_v34  ;;  %v14830_v16 = vpack.c.bf16 %v6319_v36, %v6317_v29  ;;  %v6039_v22 = vpack.c.bf16 %v5978_v59, %v5800_v4 }
 0x701   : > { %6617 = vmatmul.bf16.gmra.mxu0 %v14828_v47  ;;  %6706 = vmatmul.bf16.gmra.mxu1 %v14830_v16  ;;  %v6094_v44 = vunpack.c.l.bf16 %v6039_v22  ;;  %v6095_v63 = vunpack.c.h.bf16 %v6039_v22 }
 0x703   : > { %v5890_v5 = vpop.f32.mrf.mxu2  ;;  %v6160_v15 = vadd.f32 %v14638_v9, %v6094_v44  ;;  %v6161_v48 = vadd.f32 %v14642_v30, %v6095_v63 }
 0x704   : > { %v5979_v10 = vpop.f32.mrf.mxu3 }
 0x705   : > { %v5980_v40 = vadd.f32 %v5979_v10, %v5890_v5  ;;  %v6320_v17 = vmax.f32 %v6160_v15, 0.0  ;;  %v6321_v4 = vmax.f32 %v6161_v48, 0.0  ;;  %v5807_v15 = vadd.f32 %v14646_v27, %v14644_v54  ;;  %v10558_v54 = vld [vmem:[%s16415_s16 + $0x60] sm:$0xf]  ;;  %v11002_v27 = vld [vmem:[%s16415_s16 + $0x64] sm:$0xf0] }
 0x706   : > { %v14836_v1 = vpop.f32.mrf.mxu0  ;;  %v14838_v25 = vpop.f32.mrf.mxu1 }
 0x707   : > { %v6040_v11 = vpack.c.bf16 %v5980_v40, %v5802_v49 }
 0x708   : > { %5932 = vmatmul.bf16.gmra.mxu2 %v14626_v26  ;;  %6021 = vmatmul.bf16.gmra.mxu3 %v14628_v56  ;;  %v5805_v26 = vadd.f32 %v14624_v31, %v14622_v19 }
 0x709   : > { %v6096_v58 = vunpack.c.l.bf16 %v6040_v11  ;;  %v6097_v0 = vunpack.c.h.bf16 %v6040_v11 }
 0x70b   : > { %v5893_v34 = vpop.f32.mrf.mxu2  ;;  %v6162_v53 = vadd.f32 %v14638_v9, %v6096_v58  ;;  %v6163_v14 = vadd.f32 %v14642_v30, %v6097_v0 }
 0x70c   : > { %v5982_v59 = vpop.f32.mrf.mxu3 }
 0x70d   : > { %v5983_v29 = vadd.f32 %v5982_v59, %v5893_v34  ;;  %v6322_v36 = vmax.f32 %v6162_v53, 0.0  ;;  %v6323_v22 = vmax.f32 %v6163_v14, 0.0 }
 0x70e   : > { %v14848_v56 = vpop.f32.mrf.mxu0  ;;  %v14850_v5 = vpop.f32.mrf.mxu1 }
 0x70f   : > { %v14852_v44 = vpack.c.bf16 %v6322_v36, %v6320_v17  ;;  %v14854_v10 = vpack.c.bf16 %v6323_v22, %v6321_v4  ;;  %v6041_v49 = vpack.c.bf16 %v5983_v29, %v5805_v26  ;;  %v10559_v17 = vor.u32 %v11002_v27, %v10558_v54 }
 0x711   : > { %6622 = vmatmul.bf16.gmra.mxu0 %v14852_v44  ;;  %6711 = vmatmul.bf16.gmra.mxu1 %v14854_v10  ;;  %v6098_v40 = vunpack.c.l.bf16 %v6041_v49  ;;  %v6099_v19 = vunpack.c.h.bf16 %v6041_v49 }
 0x712   : > { %7612 = vmatpush.bf16.msra.mxu2 %v10559_v17 }
 0x713   : > { %v5895_v63 = vpop.f32.mrf.mxu2  ;;  %v6164_v34 = vadd.f32 %v14638_v9, %v6098_v40  ;;  %v6165_v59 = vadd.f32 %v14642_v30, %v6099_v19  ;;  %v5810_v40 = vadd.f32 %v14658_v7, %v14656_v8 }
 0x714   : > { %v5984_v11 = vpop.f32.mrf.mxu3 }
 0x715   : > { %v5985_v31 = vadd.f32 %v5984_v11, %v5895_v63  ;;  %v6324_v4 = vmax.f32 %v6164_v34, 0.0  ;;  %v6325_v49 = vmax.f32 %v6165_v59, 0.0  ;;  %v5812_v59 = vadd.f32 %v14670_v37, %v14668_v43  ;;  %v10502_v43 = vld [vmem:[%s16416_s17 + $0x70] sm:$0xf]  ;;  %v11036_v37 = vld [vmem:[%s16416_s17 + $0x74] sm:$0xf0] }
 0x716   : > { %v14860_v58 = vpop.f32.mrf.mxu0  ;;  %v14862_v0 = vpop.f32.mrf.mxu1 }
 0x717   : > { %v6042_v48 = vpack.c.bf16 %v5985_v31, %v5807_v15 }
 0x718   : > { %6770 = vmatmul.bf16.vlgmr.msrb.gmra.mxu2 %v14660_v60  ;;  %6859 = vmatmul.bf16.vlgmr.msrb.gmra.mxu3 %v14662_v38 }
 0x719   : > { %v6100_v53 = vunpack.c.l.bf16 %v6042_v48  ;;  %v6101_v14 = vunpack.c.h.bf16 %v6042_v48 }
 0x71b   : > { %v5898_v29 = vpop.f32.mrf.mxu2  ;;  %v6166_v60 = vadd.f32 %v14638_v9, %v6100_v53  ;;  %v6167_v38 = vadd.f32 %v14642_v30, %v6101_v14 }
 0x71c   : > { %v5987_v36 = vpop.f32.mrf.mxu3 }
 0x71d   : > { %v5988_v22 = vadd.f32 %v5987_v36, %v5898_v29  ;;  %v6326_v26 = vmax.f32 %v6166_v60, 0.0  ;;  %v6327_v63 = vmax.f32 %v6167_v38, 0.0 }
 0x71e   : > { %v14878_v11 = vpop.f32.mrf.mxu0  ;;  %v14880_v15 = vpop.f32.mrf.mxu1 }
 0x71f   : > { %v14882_v19 = vpack.c.bf16 %v6326_v26, %v6324_v4  ;;  %v14884_v31 = vpack.c.bf16 %v6327_v63, %v6325_v49  ;;  %v6043_v48 = vpack.c.bf16 %v5988_v22, %v5810_v40  ;;  %v10503_v4 = vor.u32 %v11036_v37, %v10502_v43 }
 0x720   : > { %v5817_v43 = vadd.f32 %v14706_v21, %v14704_v28  ;;  %v10550_v28 = vld [vmem:[%s16415_s16 + $0x50] sm:$0xf]  ;;  %v11000_v21 = vld [vmem:[%s16415_s16 + $0x54] sm:$0xf0] }
 0x721   : > { %6627 = vmatmul.bf16.gmra.mxu0 %v14882_v19  ;;  %6716 = vmatmul.bf16.gmra.mxu1 %v14884_v31  ;;  %v6102_v53 = vunpack.c.l.bf16 %v6043_v48  ;;  %v6103_v8 = vunpack.c.h.bf16 %v6043_v48 }
 0x722   : > { %7273 = vmatpush.bf16.msrb.mxu0 %v10503_v4 }
 0x723   : > { %v5900_v34 = vpop.f32.mrf.mxu2  ;;  %v6168_v29 = vadd.f32 %v14638_v9, %v6102_v53  ;;  %v6169_v36 = vadd.f32 %v14642_v30, %v6103_v8  ;;  %v5815_v53 = vadd.f32 %v14688_v6, %v14686_v3 }
 0x724   : > { %v5989_v14 = vpop.f32.mrf.mxu3 }
 0x725   : > { %v5990_v7 = vadd.f32 %v5989_v14, %v5900_v34  ;;  %v6328_v49 = vmax.f32 %v6168_v29, 0.0  ;;  %v6329_v48 = vmax.f32 %v6169_v36, 0.0 }
 0x726   : > { %v14890_v54 = vpop.f32.mrf.mxu0  ;;  %v14892_v27 = vpop.f32.mrf.mxu1 }
 0x727   : > { %v6044_v17 = vpack.c.bf16 %v5990_v7, %v5812_v59 }
 0x728   : > { %6775 = vmatmul.bf16.gmra.mxu2 %v14690_v42  ;;  %6864 = vmatmul.bf16.gmra.mxu3 %v14692_v39 }
 0x729   : > { %v6104_v60 = vunpack.c.l.bf16 %v6044_v17  ;;  %v6105_v38 = vunpack.c.h.bf16 %v6044_v17 }
 0x72b   : > { %v5903_v22 = vpop.f32.mrf.mxu2  ;;  %v6170_v42 = vadd.f32 %v14638_v9, %v6104_v60  ;;  %v6171_v39 = vadd.f32 %v14642_v30, %v6105_v38 }
 0x72c   : > { %v5992_v26 = vpop.f32.mrf.mxu3 }
 0x72d   : > { %v5993_v63 = vadd.f32 %v5992_v26, %v5903_v22  ;;  %v6330_v40 = vmax.f32 %v6170_v42, 0.0  ;;  %v6331_v34 = vmax.f32 %v6171_v39, 0.0 }
 0x72e   : > { %v6593_v14 = vpop.f32.mrf.mxu0  ;;  %v6682_v59 = vpop.f32.mrf.mxu1 }
 0x72f   : > { %v14908_v8 = vadd.f32 %v6682_v59, %v6593_v14  ;;  %v14910_v7 = vpack.c.bf16 %v6330_v40, %v6328_v49  ;;  %v14912_v17 = vpack.c.bf16 %v6331_v34, %v6329_v48  ;;  %v6045_v60 = vpack.c.bf16 %v5993_v63, %v5815_v53 }
 0x730   : > { %v10551_v40 = vor.u32 %v11000_v21, %v10550_v28 }
 0x731   : > { %6632 = vmatmul.bf16.gmra.mxu0 %v14910_v7  ;;  %6721 = vmatmul.bf16.gmra.mxu1 %v14912_v17  ;;  %v6106_v38 = vunpack.c.l.bf16 %v6045_v60  ;;  %v6107_v3 = vunpack.c.h.bf16 %v6045_v60 }
 0x732   : > { %7613 = vmatpush.bf16.msra.mxu2 %v10551_v40 }
 0x733   : > { %v5905_v29 = vpop.f32.mrf.mxu2  ;;  %v6172_v39 = vadd.f32 %v14638_v9, %v6106_v38  ;;  %v6173_v63 = vadd.f32 %v14642_v30, %v6107_v3  ;;  %v5820_v38 = vadd.f32 %v14718_v32, %v14716_v18 }
 0x734   : > { %v5994_v36 = vpop.f32.mrf.mxu3 }
 0x735   : > { %v5995_v6 = vadd.f32 %v5994_v36, %v5905_v29  ;;  %v6332_v53 = vmax.f32 %v6172_v39, 0.0  ;;  %v6333_v60 = vmax.f32 %v6173_v63, 0.0 }
 0x736   : > { %v6595_v37 = vpop.f32.mrf.mxu0  ;;  %v6684_v4 = vpop.f32.mrf.mxu1 }
 0x737   : > { %v6046_v22 = vpack.c.bf16 %v5995_v6, %v5817_v43  ;;  %v14918_v42 = vadd.f32 %v6684_v4, %v6595_v37 }
 0x738   : > { %6780 = vmatmul.bf16.gmra.mxu2 %v14720_v52  ;;  %6869 = vmatmul.bf16.gmra.mxu3 %v14722_v50 }
 0x739   : > { %v6108_v26 = vunpack.c.l.bf16 %v6046_v22  ;;  %v6109_v49 = vunpack.c.h.bf16 %v6046_v22 }
 0x73b   : > { %v5908_v48 = vpop.f32.mrf.mxu2  ;;  %v6174_v52 = vadd.f32 %v14638_v9, %v6108_v26  ;;  %v6175_v50 = vadd.f32 %v14642_v30, %v6109_v49  ;;  %v5822_v49 = vadd.f32 %v14730_v51, %v14728_v13  ;;  %v10494_v13 = vld [vmem:[%s16416_s17 + $0x60] sm:$0xf]  ;;  %v11034_v51 = vld [vmem:[%s16416_s17 + $0x64] sm:$0xf0] }
 0x73c   : > { %v5997_v34 = vpop.f32.mrf.mxu3 }
 0x73d   : > { %v5998_v14 = vadd.f32 %v5997_v34, %v5908_v48  ;;  %v6334_v59 = vmax.f32 %v6174_v52, 0.0  ;;  %v6335_v29 = vmax.f32 %v6175_v50, 0.0 }
 0x73e   : > { %v6598_v36 = vpop.f32.mrf.mxu0  ;;  %v6687_v43 = vpop.f32.mrf.mxu1 }
 0x73f   : > { %v14934_v3 = vadd.f32 %v6687_v43, %v6598_v36  ;;  %v14936_v6 = vpack.c.bf16 %v6334_v59, %v6332_v53  ;;  %v14938_v37 = vpack.c.bf16 %v6335_v29, %v6333_v60  ;;  %v6047_v4 = vpack.c.bf16 %v5998_v14, %v5820_v38 }
 0x740   : > { %v10495_v53 = vor.u32 %v11034_v51, %v10494_v13 }
 0x741   : > { %6637 = vmatmul.bf16.gmra.mxu0 %v14936_v6  ;;  %6726 = vmatmul.bf16.gmra.mxu1 %v14938_v37  ;;  %v6110_v39 = vunpack.c.l.bf16 %v6047_v4  ;;  %v6111_v18 = vunpack.c.h.bf16 %v6047_v4  ;;  %v5825_v4 = vadd.f32 %v14748_v20, %v14746_v61 }
 0x742   : > { %7274 = vmatpush.bf16.msrb.mxu0 %v10495_v53 }
 0x743   : > { %v5910_v22 = vpop.f32.mrf.mxu2  ;;  %v6176_v48 = vadd.f32 %v14638_v9, %v6110_v39  ;;  %v6177_v34 = vadd.f32 %v14642_v30, %v6111_v18 }
 0x744   : > { %v5999_v26 = vpop.f32.mrf.mxu3 }
 0x745   : > { %v6000_v32 = vadd.f32 %v5999_v26, %v5910_v22  ;;  %v6336_v60 = vmax.f32 %v6176_v48, 0.0  ;;  %v6337_v36 = vmax.f32 %v6177_v34, 0.0  ;;  %v5827_v48 = vadd.f32 %v14766_v24, %v14764_v62  ;;  %v10542_v62 = vld [vmem:[%s16415_s16 + $0x40] sm:$0xf]  ;;  %v10998_v24 = vld [vmem:[%s16415_s16 + $0x44] sm:$0xf0] }
 0x746   : > { %v6600_v63 = vpop.f32.mrf.mxu0  ;;  %v6689_v28 = vpop.f32.mrf.mxu1 }
 0x747   : > { %v6048_v21 = vpack.c.bf16 %v6000_v32, %v5822_v49  ;;  %v14944_v40 = vadd.f32 %v6689_v28, %v6600_v63 }
 0x748   : > { %6785 = vmatmul.bf16.gmra.mxu2 %v14750_v46  ;;  %6874 = vmatmul.bf16.gmra.mxu3 %v14752_v23 }
 0x749   : > { %v6112_v52 = vunpack.c.l.bf16 %v6048_v21  ;;  %v6113_v50 = vunpack.c.h.bf16 %v6048_v21 }
 0x74b   : > { %v5913_v14 = vpop.f32.mrf.mxu2  ;;  %v6178_v46 = vadd.f32 %v14638_v9, %v6112_v52  ;;  %v6179_v23 = vadd.f32 %v14642_v30, %v6113_v50 }
 0x74c   : > { %v6002_v59 = vpop.f32.mrf.mxu3 }
 0x74d   : > { %v6003_v29 = vadd.f32 %v6002_v59, %v5913_v14  ;;  %v6338_v38 = vmax.f32 %v6178_v46, 0.0  ;;  %v6339_v43 = vmax.f32 %v6179_v23, 0.0  ;;  %v10543_v23 = vor.u32 %v10998_v24, %v10542_v62 }
 0x74e   : > { %v6603_v22 = vpop.f32.mrf.mxu0  ;;  %v6692_v39 = vpop.f32.mrf.mxu1 }
 0x74f   : > { %v14960_v26 = vadd.f32 %v6692_v39, %v6603_v22  ;;  %v14962_v49 = vpack.c.bf16 %v6338_v38, %v6336_v60  ;;  %v14964_v18 = vpack.c.bf16 %v6339_v43, %v6337_v36  ;;  %v6049_v32 = vpack.c.bf16 %v6003_v29, %v5825_v4  ;;  %7614 = vmatpush.bf16.msra.mxu2 %v10543_v23 }
 0x750   : > { %v5830_v22 = vadd.f32 %v14784_v41, %v14782_v55  ;;  %v11020_v55 = vld [vmem:[%s16415_s16 + $0xf4] sm:$0xf0] }
 0x751   : > { %6642 = vmatmul.bf16.gmra.mxu0 %v14962_v49  ;;  %6731 = vmatmul.bf16.gmra.mxu1 %v14964_v18  ;;  %v6114_v28 = vunpack.c.l.bf16 %v6049_v32  ;;  %v6115_v61 = vunpack.c.h.bf16 %v6049_v32 }
 0x753   : > { %v5915_v63 = vpop.f32.mrf.mxu2  ;;  %v6180_v51 = vadd.f32 %v14638_v9, %v6114_v28  ;;  %v6181_v46 = vadd.f32 %v14642_v30, %v6115_v61  ;;  %v10630_v61 = vld [vmem:[%s16415_s16 + $0xf0] sm:$0xf] }
 0x754   : > { %v6004_v21 = vpop.f32.mrf.mxu3  ;;  %v10631_v41 = vor.u32 %v11020_v55, %v10630_v61 }
 0x755   : > { %v6005_v20 = vadd.f32 %v6004_v21, %v5915_v63  ;;  %v6340_v29 = vmax.f32 %v6180_v51, 0.0  ;;  %v6341_v43 = vmax.f32 %v6181_v46, 0.0 }
 0x756   : > { %v6605_v52 = vpop.f32.mrf.mxu0  ;;  %v6694_v50 = vpop.f32.mrf.mxu1  ;;  %7700 = vmatpush.bf16.msra.mxu3 %v10631_v41 }
 0x757   : > { %v6050_v34 = vpack.c.bf16 %v6005_v20, %v5827_v48  ;;  %v14970_v13 = vadd.f32 %v6694_v50, %v6605_v52 }
 0x758   : > { %6790 = vmatmul.bf16.gmra.mxu2 %v14786_v2  ;;  %6879 = vmatmul.bf16.gmra.mxu3 %v14788_v35 }
 0x759   : > { %v6116_v53 = vunpack.c.l.bf16 %v6050_v34  ;;  %v6117_v14 = vunpack.c.h.bf16 %v6050_v34  ;;  %v5832_v34 = vadd.f32 %v14808_v45, %v14806_v57  ;;  %v10486_v57 = vld [vmem:[%s16416_s17 + $0x50] sm:$0xf]  ;;  %v11032_v45 = vld [vmem:[%s16416_s17 + $0x54] sm:$0xf0] }
 0x75b   : > { %v5918_v59 = vpop.f32.mrf.mxu2  ;;  %v6182_v2 = vadd.f32 %v14638_v9, %v6116_v53  ;;  %v6183_v35 = vadd.f32 %v14642_v30, %v6117_v14 }
 0x75c   : > { %v6007_v60 = vpop.f32.mrf.mxu3 }
 0x75d   : > { %v6008_v38 = vadd.f32 %v6007_v60, %v5918_v59  ;;  %v6342_v36 = vmax.f32 %v6182_v2, 0.0  ;;  %v6343_v4 = vmax.f32 %v6183_v35, 0.0  ;;  %v10487_v60 = vor.u32 %v11032_v45, %v10486_v57 }
 0x75e   : > { %v6608_v39 = vpop.f32.mrf.mxu0  ;;  %v6697_v32 = vpop.f32.mrf.mxu1 }
 0x75f   : > { %v14986_v63 = vadd.f32 %v6697_v32, %v6608_v39  ;;  %v14988_v28 = vpack.c.bf16 %v6342_v36, %v6340_v29  ;;  %v14990_v21 = vpack.c.bf16 %v6343_v4, %v6341_v43  ;;  %v6051_v48 = vpack.c.bf16 %v6008_v38, %v5830_v22  ;;  %7275 = vmatpush.bf16.msrb.mxu0 %v10487_v60 }
 0x760   : > { %v5835_v32 = vadd.f32 %v14826_v12, %v14824_v33  ;;  %v11033_v12 = vld [vmem:[%s16416_s17 + $0x64] sm:$0xf] }
 0x761   : > { %6647 = vmatmul.bf16.gmra.mxu0 %v14988_v28  ;;  %6736 = vmatmul.bf16.gmra.mxu1 %v14990_v21  ;;  %v6118_v52 = vunpack.c.l.bf16 %v6051_v48  ;;  %v6119_v51 = vunpack.c.h.bf16 %v6051_v48 }
 0x763   : > { %v5920_v20 = vpop.f32.mrf.mxu2  ;;  %v6184_v23 = vadd.f32 %v14638_v9, %v6118_v52  ;;  %v6185_v35 = vadd.f32 %v14642_v30, %v6119_v51  ;;  %v11035_v52 = vld [vmem:[%s16416_s17 + $0x74] sm:$0xf] }
 0x764   : > { %v6009_v50 = vpop.f32.mrf.mxu3 }
 0x765   : > { %v6010_v53 = vadd.f32 %v6009_v50, %v5920_v20  ;;  %v6344_v36 = vmax.f32 %v6184_v23, 0.0  ;;  %v6345_v22 = vmax.f32 %v6185_v35, 0.0  ;;  %v10504_v50 = vld [vmem:[%s16416_s17 + $0x78] sm:$0xf0]  ;;  %v6972_v23 = vld [vmem:[%s16414_s15] sm:$0x3] }
 0x766   : > { %v6610_v14 = vpop.f32.mrf.mxu0  ;;  %v6699_v46 = vpop.f32.mrf.mxu1  ;;  %v10507_v51 = vor.u32 %v11035_v52, %v10504_v50  ;;  %6974 = vst [vmem:[#allocation1] ss:$9 sm:$0xff] %v6972_v23  ;;  %v11029_v52 = vld [vmem:[%s16416_s17 + $0x44] sm:$0xf] }
 0x767   : > { %v6052_v62 = vpack.c.bf16 %v6010_v53, %v5832_v34  ;;  %v15002_v24 = vadd.f32 %v6699_v46, %v6610_v14  ;;  %v10496_v53 = vld [vmem:[%s16416_s17 + $0x68] sm:$0xf0] }
 0x768   : > { %6795 = vmatmul.bf16.gmra.mxu2 %v14828_v47  ;;  %6884 = vmatmul.bf16.gmra.mxu3 %v14830_v16 }
 0x769   : > { %v6120_v59 = vunpack.c.l.bf16 %v6052_v62  ;;  %v6121_v2 = vunpack.c.h.bf16 %v6052_v62  ;;  %7362 = vmatpush.bf16.msra.mxu1 %v10507_v51  ;;  %v10499_v62 = vor.u32 %v11033_v12, %v10496_v53 }
 0x76b   : > { %v5923_v29 = vpop.f32.mrf.mxu2  ;;  %v6186_v47 = vadd.f32 %v14638_v9, %v6120_v59  ;;  %v6187_v16 = vadd.f32 %v14642_v30, %v6121_v2  ;;  %v5837_v59 = vadd.f32 %v14838_v25, %v14836_v1 }
 0x76c   : > { %v6012_v38 = vpop.f32.mrf.mxu3 }
 0x76d   : > { %v6013_v43 = vadd.f32 %v6012_v38, %v5923_v29  ;;  %v6346_v4 = vmax.f32 %v6186_v47, 0.0  ;;  %v6347_v39 = vmax.f32 %v6187_v16, 0.0  ;;  %7363 = vmatpush.bf16.msra.mxu1 %v10499_v62  ;;  %v11031_v47 = vld [vmem:[%s16416_s17 + $0x54] sm:$0xf]  ;;  %v10488_v16 = vld [vmem:[%s16416_s17 + $0x58] sm:$0xf0]  ;;  %v5840_v62 = vadd.f32 %v14850_v5, %v14848_v56 }
 0x76e   : > { %v6613_v48 = vpop.f32.mrf.mxu0  ;;  %v6702_v61 = vpop.f32.mrf.mxu1  ;;  %v10491_v25 = vor.u32 %v11031_v47, %v10488_v16  ;;  %v11028_v47 = vld [vmem:[%s16416_s17 + $0x34] sm:$0xf0]  ;;  %v11027_v56 = vld [vmem:[%s16416_s17 + $0x34] sm:$0xf] }
 0x76f   : > { %v15018_v55 = vadd.f32 %v6702_v61, %v6613_v48  ;;  %v15020_v41 = vpack.c.bf16 %v6346_v4, %v6344_v36  ;;  %v15022_v20 = vpack.c.bf16 %v6347_v39, %v6345_v22  ;;  %v6053_v34 = vpack.c.bf16 %v6013_v43, %v5835_v32  ;;  %v10534_v4 = vld [vmem:[%s16415_s16 + $0x30] sm:$0xf]  ;;  %v10996_v22 = vld [vmem:[%s16415_s16 + $0x34] sm:$0xf0]  ;;  %v10478_v48 = vld [vmem:[%s16416_s17 + $0x40] sm:$0xf] }
 0x770   : > { %v10535_v39 = vor.u32 %v10996_v22, %v10534_v4  ;;  %v11030_v61 = vld [vmem:[%s16416_s17 + $0x44] sm:$0xf0]  ;;  %v10462_v4 = vld [vmem:[%s16416_s17 + $0x20] sm:$0xf] }
 0x771   : > { %6652 = vmatmul.bf16.gmra.mxu0 %v15020_v41  ;;  %6741 = vmatmul.bf16.gmra.mxu1 %v15022_v20  ;;  %v6122_v14 = vunpack.c.l.bf16 %v6053_v34  ;;  %v6123_v2 = vunpack.c.h.bf16 %v6053_v34  ;;  %v10479_v51 = vor.u32 %v11030_v61, %v10478_v48  ;;  %v10464_v48 = vld [vmem:[%s16416_s17 + $0x28] sm:$0xf0]  ;;  %v5842_v61 = vadd.f32 %v14862_v0, %v14860_v58  ;;  %v11023_v58 = vld [vmem:[%s16416_s17 + $0x14] sm:$0xf] }
 0x772   : > { %7364 = vmatpush.bf16.msra.mxu1 %v10491_v25  ;;  %7615 = vmatpush.bf16.msra.mxu2 %v10535_v39 }
 0x773   : > { %v5925_v33 = vpop.f32.mrf.mxu2  ;;  %v6188_v1 = vadd.f32 %v14638_v9, %v6122_v14  ;;  %v6189_v43 = vadd.f32 %v14642_v30, %v6123_v2  ;;  %7276 = vmatpush.bf16.msrb.mxu0 %v10479_v51 }
 0x774   : > { %v6014_v46 = vpop.f32.mrf.mxu3 }
 0x775   : > { %v6015_v35 = vadd.f32 %v6014_v46, %v5925_v33  ;;  %v6348_v34 = vmax.f32 %v6188_v1, 0.0  ;;  %v10480_v33 = vld [vmem:[%s16416_s17 + $0x48] sm:$0xf0]  ;;  %v6349_v14 = vmax.f32 %v6189_v43, 0.0  ;;  %v10472_v1 = vld [vmem:[%s16416_s17 + $0x38] sm:$0xf0] }
 0x776   : > { %v6615_v57 = vpop.f32.mrf.mxu0  ;;  %v6704_v45 = vpop.f32.mrf.mxu1  ;;  %v10483_v2 = vor.u32 %v11029_v52, %v10480_v33  ;;  %v10475_v25 = vor.u32 %v11027_v56, %v10472_v1  ;;  %v11018_v43 = vld [vmem:[%s16415_s16 + $0xe4] sm:$0xf0] }
 0x777   : > { %v6054_v60 = vpack.c.bf16 %v6015_v35, %v5837_v59  ;;  %v15043_v29 = vadd.f32 %v6704_v45, %v6615_v57  ;;  %v11022_v1 = vld [vmem:[%s16416_s17 + $0x4] sm:$0xf0] }
 0x778   : > { %6800 = vmatmul.bf16.gmra.mxu2 %v14852_v44  ;;  %6889 = vmatmul.bf16.gmra.mxu3 %v14854_v10 }
 0x779   : > { %v6124_v38 = vunpack.c.l.bf16 %v6054_v60  ;;  %v6125_v36 = vunpack.c.h.bf16 %v6054_v60  ;;  %v10470_v60 = vld [vmem:[%s16416_s17 + $0x30] sm:$0xf]  ;;  %7365 = vmatpush.bf16.msra.mxu1 %v10483_v2 }
 0x77a   : > { %v10471_v16 = vor.u32 %v11028_v47, %v10470_v60 }
 0x77b   : > { %v5928_v44 = vpop.f32.mrf.mxu2  ;;  %v6190_v10 = vadd.f32 %v14638_v9, %v6124_v38  ;;  %v6191_v32 = vadd.f32 %v14642_v30, %v6125_v36  ;;  %v10622_v36 = vld [vmem:[%s16415_s16 + $0xe0] sm:$0xf] }
 0x77c   : > { %v6017_v50 = vpop.f32.mrf.mxu3  ;;  %7277 = vmatpush.bf16.msrb.mxu0 %v10471_v16 }
 0x77d   : > { %v6018_v12 = vadd.f32 %v6017_v50, %v5928_v44  ;;  %v6350_v53 = vmax.f32 %v6190_v10, 0.0  ;;  %v6351_v46 = vmax.f32 %v6191_v32, 0.0  ;;  %v10623_v44 = vor.u32 %v11018_v43, %v10622_v36  ;;  %7366 = vmatpush.bf16.msra.mxu1 %v10475_v25  ;;  %v11026_v10 = vld [vmem:[%s16416_s17 + $0x24] sm:$0xf0]  ;;  %v11025_v32 = vld [vmem:[%s16416_s17 + $0x24] sm:$0xf] }
 0x77e   : > { %v6618_v23 = vpop.f32.mrf.mxu0  ;;  %v6707_v59 = vpop.f32.mrf.mxu1  ;;  %v11021_v25 = vld [vmem:[%s16416_s17 + $0x4] sm:$0xf] }
 0x77f   : > { %v15077_v35 = vadd.f32 %v6707_v59, %v6618_v23  ;;  %v15079_v57 = vpack.c.bf16 %v6350_v53, %v6348_v34  ;;  %v15081_v45 = vpack.c.bf16 %v6351_v46, %v6349_v14  ;;  %v6055_v5 = vpack.c.bf16 %v6018_v12, %v5840_v62  ;;  %7701 = vmatpush.bf16.msra.mxu3 %v10623_v44  ;;  %v10454_v46 = vld [vmem:[%s16416_s17 + $0x10] sm:$0xf]  ;;  %v11024_v62 = vld [vmem:[%s16416_s17 + $0x14] sm:$0xf0]  ;;  %v10456_v59 = vld [vmem:[%s16416_s17 + $0x18] sm:$0xf0] }
 0x780   : > { %v10463_v34 = vor.u32 %v11026_v10, %v10462_v4  ;;  %v10467_v12 = vor.u32 %v11025_v32, %v10464_v48  ;;  %v10455_v23 = vor.u32 %v11024_v62, %v10454_v46  ;;  %v10459_v56 = vor.u32 %v11023_v58, %v10456_v59  ;;  %v10448_v4 = vld [vmem:[%s16416_s17 + $0x8] sm:$0xf0] }
 0x781   : > { %6657 = vmatmul.bf16.gmra.mxu0 %v15079_v57  ;;  %6746 = vmatmul.bf16.gmra.mxu1 %v15081_v45  ;;  %v6126_v22 = vunpack.c.l.bf16 %v6055_v5  ;;  %v6127_v52 = vunpack.c.h.bf16 %v6055_v5  ;;  %v5845_v32 = vadd.f32 %v14880_v15, %v14878_v11  ;;  %v5847_v11 = vadd.f32 %v14892_v27, %v14890_v54  ;;  %v10526_v54 = vld [vmem:[%s16415_s16 + $0x20] sm:$0xf]  ;;  %v10994_v27 = vld [vmem:[%s16415_s16 + $0x24] sm:$0xf0] }
 0x782   : > { %7278 = vmatpush.bf16.msrb.mxu0 %v10463_v34  ;;  %7367 = vmatpush.bf16.msra.mxu1 %v10467_v12 }
 0x783   : > { %v5930_v38 = vpop.f32.mrf.mxu2  ;;  %v6192_v0 = vadd.f32 %v14638_v9, %v6126_v22  ;;  %v6193_v47 = vadd.f32 %v14642_v30, %v6127_v52  ;;  %v10451_v52 = vor.u32 %v11021_v25, %v10448_v4 }
 0x784   : > { %v6019_v39 = vpop.f32.mrf.mxu3 }
 0x785   : > { %v6020_v50 = vadd.f32 %v6019_v39, %v5930_v38  ;;  %v6352_v36 = vmax.f32 %v6192_v0, 0.0  ;;  %v6353_v44 = vmax.f32 %v6193_v47, 0.0 }
 0x786   : > { %v6620_v51 = vpop.f32.mrf.mxu0  ;;  %v6709_v33 = vpop.f32.mrf.mxu1  ;;  %7279 = vmatpush.bf16.msrb.mxu0 %v10455_v23  ;;  %7368 = vmatpush.bf16.msra.mxu1 %v10459_v56 }
 0x787   : > { %v6056_v53 = vpack.c.bf16 %v6020_v50, %v5842_v61  ;;  %v15117_v14 = vadd.f32 %v6709_v33, %v6620_v51 }
 0x788   : > { %6805 = vmatmul.bf16.gmra.mxu2 %v14882_v19  ;;  %6894 = vmatmul.bf16.gmra.mxu3 %v14884_v31  ;;  %v10446_v31 = vld [vmem:[%s16416_s17] sm:$0xf] }
 0x789   : > { %v6128_v2 = vunpack.c.l.bf16 %v6056_v53  ;;  %v6129_v60 = vunpack.c.h.bf16 %v6056_v53  ;;  %v10447_v43 = vor.u32 %v11022_v1, %v10446_v31 }
 0x78a   : > { %7369 = vmatpush.bf16.msra.mxu1 %v10451_v52  ;;  %v11016_v52 = vld [vmem:[%s16415_s16 + $0xd4] sm:$0xf0] }
 0x78b   : > { %v5933_v5 = vpop.f32.mrf.mxu2  ;;  %v6194_v16 = vadd.f32 %v14638_v9, %v6128_v2  ;;  %v6195_v19 = vadd.f32 %v14642_v30, %v6129_v60  ;;  %7280 = vmatpush.bf16.msrb.mxu0 %v10447_v43 }
 0x78c   : > { %v6022_v38 = vpop.f32.mrf.mxu3 }
 0x78d   : > { %v6023_v22 = vadd.f32 %v6022_v38, %v5933_v5  ;;  %v6354_v39 = vmax.f32 %v6194_v16, 0.0  ;;  %v6355_v10 = vmax.f32 %v6195_v19, 0.0  ;;  %v10527_v5 = vor.u32 %v10994_v27, %v10526_v54  ;;  %v6975_v19 = vld [vmem:[#allocation1] sm:$0xff] }
 0x78e   : > { %v6623_v48 = vpop.f32.mrf.mxu0  ;;  %v6712_v61 = vpop.f32.mrf.mxu1 }
 0x78f   : > { %v15151_v50 = vadd.f32 %v6712_v61, %v6623_v48  ;;  %v15153_v34 = vpack.c.bf16 %v6354_v39, %v6352_v36  ;;  %v15155_v51 = vpack.c.bf16 %v6355_v10, %v6353_v44  ;;  %v6057_v33 = vpack.c.bf16 %v6023_v22, %v5845_v32  ;;  %7616 = vmatpush.bf16.msra.mxu2 %v10527_v5 }
 0x790   : > { %v6977_v22 = vpack.i.b16 %v6975_v19, %v6975_v19 }
 0x791   : > { %6662 = vmatmul.bf16.gmra.mxu0 %v15153_v34  ;;  %6751 = vmatmul.bf16.gmra.mxu1 %v15155_v51  ;;  %v6130_v53 = vunpack.c.l.bf16 %v6057_v33  ;;  %v6131_v15 = vunpack.c.h.bf16 %v6057_v33 }
 0x792   : > { %v6979_v33 = vperm.slane %v6977_v22, 0 }
 0x793   : > { %v5935_v12 = vpop.f32.mrf.mxu2  ;;  %v6196_v2 = vadd.f32 %v14638_v9, %v6130_v53  ;;  %v6197_v56 = vadd.f32 %v14642_v30, %v6131_v15 }
 0x794   : > { %v6024_v46 = vpop.f32.mrf.mxu3  ;;  %v15190_v15 = vunpack.c.l.bf16 %v6979_v33 }
 0x795   : > { %v6025_v62 = vadd.f32 %v6024_v46, %v5935_v12  ;;  %v6356_v25 = vmax.f32 %v6196_v2, 0.0  ;;  %v6357_v43 = vmax.f32 %v6197_v56, 0.0 }
 0x796   : > { %v6625_v58 = vpop.f32.mrf.mxu0  ;;  %v6714_v0 = vpop.f32.mrf.mxu1 }
 0x797   : > { %v6058_v23 = vpack.c.bf16 %v6025_v62, %v5847_v11  ;;  %v15161_v59 = vadd.f32 %v6714_v0, %v6625_v58 }
 0x798   : > { %6810 = vmatmul.bf16.gmra.mxu2 %v14910_v7  ;;  %6899 = vmatmul.bf16.gmra.mxu3 %v14912_v17  ;;  %v6976_v7 = vld [vmem:[#allocation1 + $0x9] sm:$0xff] }
 0x799   : > { %v6132_v60 = vunpack.c.l.bf16 %v6058_v23  ;;  %v6133_v47 = vunpack.c.h.bf16 %v6058_v23  ;;  %v6980_v39 = vpack.i.b16 %v6976_v7, %v6976_v7 }
 0x79b   : > { %v6771_v16 = vpop.f32.mrf.mxu2  ;;  %v6198_v17 = vadd.f32 %v14638_v9, %v6132_v60  ;;  %v6199_v31 = vadd.f32 %v14642_v30, %v6133_v47  ;;  %v10614_v30 = vld [vmem:[%s16415_s16 + $0xd0] sm:$0xf] }
 0x79c   : > { %v6860_v1 = vpop.f32.mrf.mxu3  ;;  %v10615_v12 = vor.u32 %v11016_v52, %v10614_v30 }
 0x79d   : > { %v6861_v38 = vadd.f32 %v6860_v1, %v6771_v16  ;;  %v6358_v36 = vmax.f32 %v6198_v17, 0.0  ;;  %v6359_v4 = vmax.f32 %v6199_v31, 0.0 }
 0x79e   : > { %v6628_v44 = vpop.f32.mrf.mxu0  ;;  %v6717_v10 = vpop.f32.mrf.mxu1  ;;  %7702 = vmatpush.bf16.msra.mxu3 %v10615_v12  ;;  %v10992_v12 = vld [vmem:[%s16415_s16 + $0x14] sm:$0xf0] }
 0x79f   : > { %v6940_v32 = vpack.c.bf16 %v6861_v38, %v14908_v8  ;;  %v15176_v48 = vadd.f32 %v6717_v10, %v6628_v44  ;;  %v15178_v61 = vpack.c.bf16 %v6358_v36, %v6356_v25  ;;  %v15180_v9 = vpack.c.bf16 %v6359_v4, %v6357_v43  ;;  %v11193_v36 = vld [vmem:[%s11518_s30] sm:$0xff] }
 0x7a0   : > { %v6982_v8 = vperm.slane %v6980_v39, 0 }
 0x7a1   : > { %6667 = vmatmul.bf16.gmra.mxu0 %v15178_v61  ;;  %6756 = vmatmul.bf16.gmra.mxu1 %v15180_v9  ;;  %v6983_v23 = vunpack.c.l.bf16 %v6940_v32  ;;  %v6984_v2 = vunpack.c.h.bf16 %v6940_v32 }
 0x7a2   : > { %v15192_v62 = vunpack.c.l.bf16 %v6982_v8  ;;  %v10518_v8 = vld [vmem:[%s16415_s16 + $0x10] sm:$0xf] }
 0x7a3   : > { %v6773_v53 = vpop.f32.mrf.mxu2  ;;  %v7049_v27 = vadd.f32 %v15190_v15, %v6983_v23 }
 0x7a4   : > { %v6862_v46 = vpop.f32.mrf.mxu3  ;;  %v7050_v5 = vadd.f32 %v15192_v62, %v6984_v2 }
 0x7a5   : > { %v6863_v11 = vadd.f32 %v6862_v46, %v6773_v53  ;;  %v10519_v53 = vor.u32 %v10992_v12, %v10518_v8 }
 0x7a6   : > { %v6630_v58 = vpop.f32.mrf.mxu0  ;;  %v6719_v0 = vpop.f32.mrf.mxu1 }
 0x7a7   : > { %v6941_v60 = vpack.c.bf16 %v6863_v11, %v14918_v42  ;;  %v15195_v47 = vadd.f32 %v6719_v0, %v6630_v58  ;;  %7617 = vmatpush.bf16.msra.mxu2 %v10519_v53 }
 0x7a8   : > { %6815 = vmatmul.bf16.gmra.mxu2 %v14936_v6  ;;  %6904 = vmatmul.bf16.gmra.mxu3 %v14938_v37 }
 0x7a9   : > { %v6985_v56 = vunpack.c.l.bf16 %v6941_v60  ;;  %v6986_v54 = vunpack.c.h.bf16 %v6941_v60 }
 0x7ab   : > { %v7051_v16 = vadd.f32 %v15190_v15, %v6985_v56  ;;  %v7052_v19 = vadd.f32 %v15192_v62, %v6986_v54  ;;  %v6776_v7 = vpop.f32.mrf.mxu2 }
 0x7ac   : > { %v6865_v17 = vpop.f32.mrf.mxu3 }
 0x7ad   : > { %v15203_v42 = vpack.c.bf16 %v7051_v16, %v7049_v27  ;;  %v15205_v31 = vpack.c.bf16 %v7052_v19, %v7050_v5  ;;  %v6866_v6 = vadd.f32 %v6865_v17, %v6776_v7  ;;  %v11194_v5 = vld [vmem:[%s11518_s30 + $0x8] sm:$0xff]  ;;  %v10606_v16 = vld [vmem:[%s16415_s16 + $0xc0] sm:$0xf] }
 0x7ae   : > { %v6633_v1 = vpop.f32.mrf.mxu0  ;;  %v6722_v37 = vpop.f32.mrf.mxu1  ;;  %v11014_v19 = vld [vmem:[%s16415_s16 + $0xc4] sm:$0xf0] }
 0x7af   : > { %v6942_v25 = vpack.c.bf16 %v6866_v6, %v14934_v3  ;;  %v15208_v38 = vadd.f32 %v6722_v37, %v6633_v1  ;;  %v10607_v7 = vor.u32 %v11014_v19, %v10606_v16  ;;  %v10510_v19 = vld [vmem:[%s16415_s16] sm:$0xf] }
 0x7b1   : > { %7281 = vmatmul.bf16.vlgmr.msrb.gmra.mxu0 %v11193_v36  ;;  %7370 = vmatmul.bf16.vlgmr.msra.gmra.mxu1 %v11193_v36  ;;  %v6987_v10 = vunpack.c.l.bf16 %v6942_v25  ;;  %v6988_v32 = vunpack.c.h.bf16 %v6942_v25 }
 0x7b2   : > { %7703 = vmatpush.bf16.msra.mxu3 %v10607_v7  ;;  %v10990_v7 = vld [vmem:[%s16415_s16 + $0x4] sm:$0xf0] }
 0x7b3   : > { %v6778_v43 = vpop.f32.mrf.mxu2 }
 0x7b4   : > { %v6867_v4 = vpop.f32.mrf.mxu3 }
 0x7b5   : > { %v6868_v22 = vadd.f32 %v6867_v4, %v6778_v43 }
 0x7b6   : > { %v6635_v39 = vpop.f32.mrf.mxu0  ;;  %v6724_v44 = vpop.f32.mrf.mxu1 }
 0x7b7   : > { %v6943_v30 = vpack.c.bf16 %v6868_v22, %v14944_v40  ;;  %v15212_v52 = vadd.f32 %v6724_v44, %v6635_v39  ;;  %v7053_v40 = vadd.f32 %v15190_v15, %v6987_v10 }
 0x7b8   : > { %6820 = vmatmul.bf16.gmra.mxu2 %v14962_v49  ;;  %6909 = vmatmul.bf16.gmra.mxu3 %v14964_v18  ;;  %v7054_v49 = vadd.f32 %v15192_v62, %v6988_v32 }
 0x7b9   : > { %v6989_v3 = vunpack.c.l.bf16 %v6943_v30  ;;  %v6990_v33 = vunpack.c.h.bf16 %v6943_v30 }
 0x7bb   : > { %v6781_v46 = vpop.f32.mrf.mxu2  ;;  %v7055_v11 = vadd.f32 %v15190_v15, %v6989_v3  ;;  %v7056_v18 = vadd.f32 %v15192_v62, %v6990_v33 }
 0x7bc   : > { %v6870_v58 = vpop.f32.mrf.mxu3 }
 0x7bd   : > { %v6871_v0 = vadd.f32 %v6870_v58, %v6781_v46  ;;  %v15226_v23 = vpack.c.bf16 %v7055_v11, %v7053_v40  ;;  %v15228_v2 = vpack.c.bf16 %v7056_v18, %v7054_v49  ;;  %v11195_v40 = vld [vmem:[%s11518_s30 + $0x10] sm:$0xff] }
 0x7be   : > { %v6638_v60 = vpop.f32.mrf.mxu0  ;;  %v6727_v56 = vpop.f32.mrf.mxu1 }
 0x7bf   : > { %v6944_v54 = vpack.c.bf16 %v6871_v0, %v14960_v26  ;;  %v15231_v27 = vadd.f32 %v6727_v56, %v6638_v60 }
 0x7c1   : > { %7286 = vmatmul.bf16.gmra.mxu0 %v11194_v5  ;;  %7375 = vmatmul.bf16.gmra.mxu1 %v11194_v5  ;;  %v6991_v25 = vunpack.c.l.bf16 %v6944_v54  ;;  %v6992_v36 = vunpack.c.h.bf16 %v6944_v54 }
 0x7c3   : > { %v6783_v17 = vpop.f32.mrf.mxu2  ;;  %v7057_v10 = vadd.f32 %v15190_v15, %v6991_v25  ;;  %v7058_v30 = vadd.f32 %v15192_v62, %v6992_v36 }
 0x7c4   : > { %v6872_v6 = vpop.f32.mrf.mxu3 }
 0x7c5   : > { %v6873_v1 = vadd.f32 %v6872_v6, %v6783_v17  ;;  %v10511_v17 = vor.u32 %v10990_v7, %v10510_v19 }
 0x7c6   : > { %v6640_v37 = vpop.f32.mrf.mxu0  ;;  %v6729_v26 = vpop.f32.mrf.mxu1 }
 0x7c7   : > { %v6945_v43 = vpack.c.bf16 %v6873_v1, %v14970_v13  ;;  %v15241_v4 = vadd.f32 %v6729_v26, %v6640_v37  ;;  %7618 = vmatpush.bf16.msra.mxu2 %v10511_v17 }
 0x7c8   : > { %6825 = vmatmul.bf16.gmra.mxu2 %v14988_v28  ;;  %6914 = vmatmul.bf16.gmra.mxu3 %v14990_v21 }
 0x7c9   : > { %v6993_v22 = vunpack.c.l.bf16 %v6945_v43  ;;  %v6994_v39 = vunpack.c.h.bf16 %v6945_v43 }
 0x7cb   : > { %v6786_v44 = vpop.f32.mrf.mxu2  ;;  %v7059_v32 = vadd.f32 %v15190_v15, %v6993_v22  ;;  %v7060_v3 = vadd.f32 %v15192_v62, %v6994_v39 }
 0x7cc   : > { %v6875_v33 = vpop.f32.mrf.mxu3 }
 0x7cd   : > { %v6876_v13 = vadd.f32 %v6875_v33, %v6786_v44  ;;  %v15249_v8 = vpack.c.bf16 %v7059_v32, %v7057_v10  ;;  %v15251_v12 = vpack.c.bf16 %v7060_v3, %v7058_v30  ;;  %v11196_v10 = vld [vmem:[%s11518_s30 + $0x18] sm:$0xff]  ;;  %v10598_v32 = vld [vmem:[%s16415_s16 + $0xb0] sm:$0xf] }
 0x7ce   : > { %v6643_v28 = vpop.f32.mrf.mxu0  ;;  %v6732_v21 = vpop.f32.mrf.mxu1  ;;  %v11012_v30 = vld [vmem:[%s16415_s16 + $0xb4] sm:$0xf0] }
 0x7cf   : > { %v6946_v53 = vpack.c.bf16 %v6876_v13, %v14986_v63  ;;  %v15254_v46 = vadd.f32 %v6732_v21, %v6643_v28  ;;  %v10599_v3 = vor.u32 %v11012_v30, %v10598_v32 }
 0x7d1   : > { %7291 = vmatmul.bf16.gmra.mxu0 %v11195_v40  ;;  %7380 = vmatmul.bf16.gmra.mxu1 %v11195_v40  ;;  %v6995_v60 = vunpack.c.l.bf16 %v6946_v53  ;;  %v6996_v56 = vunpack.c.h.bf16 %v6946_v53 }
 0x7d2   : > { %7704 = vmatpush.bf16.msra.mxu3 %v10599_v3 }
 0x7d3   : > { %v6788_v11 = vpop.f32.mrf.mxu2 }
 0x7d4   : > { %v6877_v49 = vpop.f32.mrf.mxu3 }
 0x7d5   : > { %v6878_v18 = vadd.f32 %v6877_v49, %v6788_v11 }
 0x7d6   : > { %v6645_v58 = vpop.f32.mrf.mxu0  ;;  %v6734_v0 = vpop.f32.mrf.mxu1 }
 0x7d7   : > { %v6947_v54 = vpack.c.bf16 %v6878_v18, %v15002_v24  ;;  %v15258_v5 = vadd.f32 %v6734_v0, %v6645_v58  ;;  %v7061_v24 = vadd.f32 %v15190_v15, %v6995_v60  ;;  %v10590_v60 = vld [vmem:[%s16415_s16 + $0xa0] sm:$0xf] }
 0x7d8   : > { %6830 = vmatmul.bf16.gmra.mxu2 %v15020_v41  ;;  %6919 = vmatmul.bf16.gmra.mxu3 %v15022_v20  ;;  %v7062_v41 = vadd.f32 %v15192_v62, %v6996_v56  ;;  %v11010_v56 = vld [vmem:[%s16415_s16 + $0xa4] sm:$0xf0] }
 0x7d9   : > { %v6997_v63 = vunpack.c.l.bf16 %v6947_v54  ;;  %v6998_v16 = vunpack.c.h.bf16 %v6947_v54 }
 0x7db   : > { %v6791_v6 = vpop.f32.mrf.mxu2  ;;  %v7063_v1 = vadd.f32 %v15190_v15, %v6997_v63  ;;  %v7064_v20 = vadd.f32 %v15192_v62, %v6998_v16  ;;  %v10591_v16 = vor.u32 %v11010_v56, %v10590_v60 }
 0x7dc   : > { %v6880_v37 = vpop.f32.mrf.mxu3 }
 0x7dd   : > { %v6881_v26 = vadd.f32 %v6880_v37, %v6791_v6  ;;  %v15272_v25 = vpack.c.bf16 %v7063_v1, %v7061_v24  ;;  %v15274_v36 = vpack.c.bf16 %v7064_v20, %v7062_v41  ;;  %7705 = vmatpush.bf16.msra.mxu3 %v10591_v16  ;;  %v10582_v20 = vld [vmem:[%s16415_s16 + $0x90] sm:$0xf]  ;;  %v11008_v37 = vld [vmem:[%s16415_s16 + $0x94] sm:$0xf0]  ;;  %v11198_v16 = vld [vmem:[%s11518_s30 + $0x28] sm:$0xff] }
 0x7de   : > { %v6648_v43 = vpop.f32.mrf.mxu0  ;;  %v6737_v22 = vpop.f32.mrf.mxu1 }
 0x7df   : > { %v6948_v39 = vpack.c.bf16 %v6881_v26, %v15018_v55  ;;  %v15277_v44 = vadd.f32 %v6737_v22, %v6648_v43  ;;  %v10583_v26 = vor.u32 %v11008_v37, %v10582_v20  ;;  %v11197_v43 = vld [vmem:[%s11518_s30 + $0x20] sm:$0xff] }
 0x7e1   : > { %7296 = vmatmul.bf16.gmra.mxu0 %v11196_v10  ;;  %7385 = vmatmul.bf16.gmra.mxu1 %v11196_v10  ;;  %v6999_v53 = vunpack.c.l.bf16 %v6948_v39  ;;  %v7000_v40 = vunpack.c.h.bf16 %v6948_v39  ;;  %v11006_v39 = vld [vmem:[%s16415_s16 + $0x84] sm:$0xf0] }
 0x7e2   : > { %7706 = vmatpush.bf16.msra.mxu3 %v10583_v26 }
 0x7e3   : > { %v6793_v33 = vpop.f32.mrf.mxu2  ;;  %v7065_v54 = vadd.f32 %v15190_v15, %v6999_v53 }
 0x7e4   : > { %v6882_v13 = vpop.f32.mrf.mxu3 }
 0x7e5   : > { %v6883_v28 = vadd.f32 %v6882_v13, %v6793_v33 }
 0x7e6   : > { %v6650_v21 = vpop.f32.mrf.mxu0  ;;  %v6739_v55 = vpop.f32.mrf.mxu1 }
 0x7e7   : > { %v6949_v11 = vpack.c.bf16 %v6883_v28, %v15043_v29  ;;  %v15287_v49 = vadd.f32 %v6739_v55, %v6650_v21 }
 0x7e8   : > { %6835 = vmatmul.bf16.gmra.mxu2 %v15079_v57  ;;  %6924 = vmatmul.bf16.gmra.mxu3 %v15081_v45  ;;  %v7066_v57 = vadd.f32 %v15192_v62, %v7000_v40 }
 0x7e9   : > { %v7001_v18 = vunpack.c.l.bf16 %v6949_v11  ;;  %v7002_v58 = vunpack.c.h.bf16 %v6949_v11  ;;  %v11044_v11 = vld [vmem:[%s16418_s19 + $0x38] sm:$0xff] }
 0x7ea   : > { %8245 = vmatpush.bf16.msrb.mxu2 %v11044_v11 }
 0x7eb   : > { %v6796_v0 = vpop.f32.mrf.mxu2  ;;  %v7067_v29 = vadd.f32 %v15190_v15, %v7001_v18  ;;  %v7068_v45 = vadd.f32 %v15192_v62, %v7002_v58 }
 0x7ec   : > { %v6885_v63 = vpop.f32.mrf.mxu3 }
 0x7ed   : > { %v6886_v19 = vadd.f32 %v6885_v63, %v6796_v0  ;;  %v15301_v7 = vpack.c.bf16 %v7067_v29, %v7065_v54  ;;  %v15303_v17 = vpack.c.bf16 %v7068_v45, %v7066_v57 }
 0x7ee   : > { %v6653_v6 = vpop.f32.mrf.mxu0  ;;  %v6742_v24 = vpop.f32.mrf.mxu1 }
 0x7ef   : > { %v6950_v1 = vpack.c.bf16 %v6886_v19, %v15077_v35  ;;  %v15306_v41 = vadd.f32 %v6742_v24, %v6653_v6  ;;  %v10574_v35 = vld [vmem:[%s16415_s16 + $0x80] sm:$0xf] }
 0x7f0   : > { %v10575_v32 = vor.u32 %v11006_v39, %v10574_v35 }
 0x7f1   : > { %7301 = vmatmul.bf16.gmra.mxu0 %v11197_v43  ;;  %7390 = vmatmul.bf16.gmra.mxu1 %v11197_v43  ;;  %v7003_v13 = vunpack.c.l.bf16 %v6950_v1  ;;  %v7004_v28 = vunpack.c.h.bf16 %v6950_v1 }
 0x7f2   : > { %7707 = vmatpush.bf16.msra.mxu3 %v10575_v32 }
 0x7f3   : > { %v6798_v22 = vpop.f32.mrf.mxu2  ;;  %v7069_v58 = vadd.f32 %v15190_v15, %v7003_v13 }
 0x7f4   : > { %v6887_v10 = vpop.f32.mrf.mxu3 }
 0x7f5   : > { %v6888_v30 = vadd.f32 %v6887_v10, %v6798_v22 }
 0x7f6   : > { %v6655_v3 = vpop.f32.mrf.mxu0  ;;  %v6744_v33 = vpop.f32.mrf.mxu1 }
 0x7f7   : > { %v6951_v21 = vpack.c.bf16 %v6888_v30, %v15117_v14  ;;  %v15322_v55 = vadd.f32 %v6744_v33, %v6655_v3  ;;  %v7070_v14 = vadd.f32 %v15192_v62, %v7004_v28 }
 0x7f8   : > { %6840 = vmatmul.bf16.gmra.mxu2 %v15153_v34  ;;  %6929 = vmatmul.bf16.gmra.mxu3 %v15155_v51 }
 0x7f9   : > { %v7005_v53 = vunpack.c.l.bf16 %v6951_v21  ;;  %v7006_v40 = vunpack.c.h.bf16 %v6951_v21 }
 0x7fb   : > { %v6801_v18 = vpop.f32.mrf.mxu2  ;;  %v7071_v0 = vadd.f32 %v15190_v15, %v7005_v53  ;;  %v7072_v60 = vadd.f32 %v15192_v62, %v7006_v40  ;;  %v11199_v40 = vld [vmem:[%s11518_s30 + $0x30] sm:$0xff] }
 0x7fc   : > { %v6890_v34 = vpop.f32.mrf.mxu3 }
 0x7fd   : > { %v6891_v56 = vadd.f32 %v6890_v34, %v6801_v18  ;;  %v15333_v51 = vpack.c.bf16 %v7071_v0, %v7069_v58  ;;  %v15335_v54 = vpack.c.bf16 %v7072_v60, %v7070_v14 }
 0x7fe   : > { %v6658_v29 = vpop.f32.mrf.mxu0  ;;  %v6747_v57 = vpop.f32.mrf.mxu1 }
 0x7ff   : > { %v6952_v45 = vpack.c.bf16 %v6891_v56, %v15151_v50  ;;  %v15338_v63 = vadd.f32 %v6747_v57, %v6658_v29 }
 0x801   : > { %7306 = vmatmul.bf16.gmra.mxu0 %v11198_v16  ;;  %7395 = vmatmul.bf16.gmra.mxu1 %v11198_v16  ;;  %v7007_v37 = vunpack.c.l.bf16 %v6952_v45  ;;  %v7008_v26 = vunpack.c.h.bf16 %v6952_v45  ;;  %v11043_v45 = vld [vmem:[%s16418_s19 + $0x30] sm:$0xff] }
 0x802   : > { %8246 = vmatpush.bf16.msrb.mxu2 %v11043_v45 }
 0x803   : > { %v6803_v19 = vpop.f32.mrf.mxu2  ;;  %v7073_v10 = vadd.f32 %v15190_v15, %v7007_v37  ;;  %v7074_v30 = vadd.f32 %v15192_v62, %v7008_v26 }
 0x804   : > { %v6892_v6 = vpop.f32.mrf.mxu3 }
 0x805   : > { %v6893_v24 = vadd.f32 %v6892_v6, %v6803_v19 }
 0x806   : > { %v6660_v1 = vpop.f32.mrf.mxu0  ;;  %v6749_v20 = vpop.f32.mrf.mxu1 }
 0x807   : > { %v6953_v43 = vpack.c.bf16 %v6893_v24, %v15161_v59  ;;  %v15342_v22 = vadd.f32 %v6749_v20, %v6660_v1 }
 0x808   : > { %6845 = vmatmul.bf16.gmra.mxu2 %v15178_v61  ;;  %6934 = vmatmul.bf16.gmra.mxu3 %v15180_v9 }
 0x809   : > { %v7009_v50 = vunpack.c.l.bf16 %v6953_v43  ;;  %v7010_v35 = vunpack.c.h.bf16 %v6953_v43 }
 0x80b   : > { %v6806_v39 = vpop.f32.mrf.mxu2  ;;  %v7075_v32 = vadd.f32 %v15190_v15, %v7009_v50  ;;  %v7076_v3 = vadd.f32 %v15192_v62, %v7010_v35 }
 0x80c   : > { %v6895_v33 = vpop.f32.mrf.mxu3 }
 0x80d   : > { %v6896_v59 = vadd.f32 %v6895_v33, %v6806_v39  ;;  %v15350_v13 = vpack.c.bf16 %v7075_v32, %v7073_v10  ;;  %v15352_v28 = vpack.c.bf16 %v7076_v3, %v7074_v30  ;;  %v11200_v10 = vld [vmem:[%s11518_s30 + $0x38] sm:$0xff] }
 0x80e   : > { %v6663_v61 = vpop.f32.mrf.mxu0  ;;  %v6752_v9 = vpop.f32.mrf.mxu1 }
 0x80f   : > { %v6954_v21 = vpack.c.bf16 %v6896_v59, %v15176_v48  ;;  %v15355_v53 = vadd.f32 %v6752_v9, %v6663_v61 }
 0x811   : > { %7311 = vmatmul.bf16.gmra.mxu0 %v11199_v40  ;;  %7400 = vmatmul.bf16.gmra.mxu1 %v11199_v40  ;;  %v7011_v60 = vunpack.c.l.bf16 %v6954_v21  ;;  %v7012_v34 = vunpack.c.h.bf16 %v6954_v21 }
 0x813   : > { %v6808_v11 = vpop.f32.mrf.mxu2  ;;  %v7077_v19 = vadd.f32 %v15190_v15, %v7011_v60 }
 0x814   : > { %v6897_v18 = vpop.f32.mrf.mxu3 }
 0x815   : > { %v6898_v58 = vadd.f32 %v6897_v18, %v6808_v11  ;;  %v11003_v18 = vld [vmem:[%s16415_s16 + $0x74] sm:$0xf] }
 0x816   : > { %v6665_v0 = vpop.f32.mrf.mxu0  ;;  %v6754_v14 = vpop.f32.mrf.mxu1 }
 0x817   : > { %v6955_v56 = vpack.c.bf16 %v6898_v58, %v15195_v47  ;;  %v15359_v29 = vadd.f32 %v6754_v14, %v6665_v0  ;;  %v7078_v47 = vadd.f32 %v15192_v62, %v7012_v34  ;;  %v10568_v58 = vld [vmem:[%s16415_s16 + $0x78] sm:$0xf0] }
 0x818   : > { %7619 = vmatmul.bf16.vlgmr.msra.gmra.mxu2 %v15203_v42  ;;  %7708 = vmatmul.bf16.vlgmr.msra.gmra.mxu3 %v15205_v31  ;;  %v10571_v0 = vor.u32 %v11003_v18, %v10568_v58 }
 0x819   : > { %v7013_v48 = vunpack.c.l.bf16 %v6955_v56  ;;  %v7014_v57 = vunpack.c.h.bf16 %v6955_v56 }
 0x81a   : > { %7789 = vmatpush.bf16.msra.mxu0 %v10571_v0 }
 0x81b   : > { %v6811_v16 = vpop.f32.mrf.mxu2  ;;  %v7079_v6 = vadd.f32 %v15190_v15, %v7013_v48  ;;  %v7080_v24 = vadd.f32 %v15192_v62, %v7014_v57 }
 0x81c   : > { %v6900_v1 = vpop.f32.mrf.mxu3 }
 0x81d   : > { %v6901_v20 = vadd.f32 %v6900_v1, %v6811_v16  ;;  %v15370_v37 = vpack.c.bf16 %v7079_v6, %v7077_v19  ;;  %v15372_v26 = vpack.c.bf16 %v7080_v24, %v7078_v47  ;;  %v11201_v24 = vld [vmem:[%s11518_s30 + $0x40] sm:$0xff] }
 0x81e   : > { %v6668_v43 = vpop.f32.mrf.mxu0  ;;  %v6757_v50 = vpop.f32.mrf.mxu1 }
 0x81f   : > { %v6956_v35 = vpack.c.bf16 %v6901_v20, %v15208_v38  ;;  %v15375_v39 = vadd.f32 %v6757_v50, %v6668_v43 }
 0x821   : > { %7316 = vmatmul.bf16.gmra.mxu0 %v11200_v10  ;;  %7405 = vmatmul.bf16.gmra.mxu1 %v11200_v10  ;;  %v7015_v61 = vunpack.c.l.bf16 %v6956_v35  ;;  %v7016_v9 = vunpack.c.h.bf16 %v6956_v35 }
 0x823   : > { %v6813_v32 = vpop.f32.mrf.mxu2  ;;  %v7082_v34 = vadd.f32 %v15192_v62, %v7016_v9 }
 0x824   : > { %v6902_v30 = vpop.f32.mrf.mxu3 }
 0x825   : > { %v6903_v3 = vadd.f32 %v6902_v30, %v6813_v32 }
 0x826   : > { %v6670_v33 = vpop.f32.mrf.mxu0  ;;  %v6759_v59 = vpop.f32.mrf.mxu1 }
 0x827   : > { %v6957_v21 = vpack.c.bf16 %v6903_v3, %v15212_v52  ;;  %v15379_v40 = vadd.f32 %v6759_v59, %v6670_v33  ;;  %v7081_v52 = vadd.f32 %v15190_v15, %v7015_v61  ;;  %v11042_v33 = vld [vmem:[%s16418_s19 + $0x28] sm:$0xff] }
 0x828   : > { %7624 = vmatmul.bf16.gmra.mxu2 %v15226_v23  ;;  %7713 = vmatmul.bf16.gmra.mxu3 %v15228_v2 }
 0x829   : > { %v7017_v38 = vunpack.c.l.bf16 %v6957_v21  ;;  %v7018_v11 = vunpack.c.h.bf16 %v6957_v21  ;;  %8247 = vmatpush.bf16.msrb.mxu2 %v11042_v33 }
 0x82b   : > { %v6816_v14 = vpop.f32.mrf.mxu2  ;;  %v7083_v60 = vadd.f32 %v15190_v15, %v7017_v38  ;;  %v7084_v56 = vadd.f32 %v15192_v62, %v7018_v11 }
 0x82c   : > { %v6905_v48 = vpop.f32.mrf.mxu3 }
 0x82d   : > { %v6906_v57 = vadd.f32 %v6905_v48, %v6816_v14  ;;  %v15393_v45 = vpack.c.bf16 %v7083_v60, %v7081_v52  ;;  %v15395_v16 = vpack.c.bf16 %v7084_v56, %v7082_v34  ;;  %v11202_v60 = vld [vmem:[%s11518_s30 + $0x48] sm:$0xff] }
 0x82e   : > { %v15397_v19 = vpop.f32.mrf.mxu0  ;;  %v15399_v6 = vpop.f32.mrf.mxu1 }
 0x82f   : > { %16512 = vst [vmem:[#allocation7_spill] sm:$0xff] %v15399_v6  ;;  %v6958_v47 = vpack.c.bf16 %v6906_v57, %v15231_v27 }
 0x831   : > { %7321 = vmatmul.bf16.gmra.mxu0 %v11201_v24  ;;  %7410 = vmatmul.bf16.gmra.mxu1 %v11201_v24  ;;  %v7019_v10 = vunpack.c.l.bf16 %v6958_v47  ;;  %v7020_v32 = vunpack.c.h.bf16 %v6958_v47 }
 0x833   : > { %v6818_v1 = vpop.f32.mrf.mxu2  ;;  %v7085_v61 = vadd.f32 %v15190_v15, %v7019_v10  ;;  %v7086_v21 = vadd.f32 %v15192_v62, %v7020_v32  ;;  %v11001_v10 = vld [vmem:[%s16415_s16 + $0x64] sm:$0xf]  ;;  %v10560_v32 = vld [vmem:[%s16415_s16 + $0x68] sm:$0xf0] }
 0x834   : > { %v6907_v20 = vpop.f32.mrf.mxu3 }
 0x835   : > { %v6908_v43 = vadd.f32 %v6907_v20, %v6818_v1 }
 0x836   : > { %v15403_v50 = vpop.f32.mrf.mxu0  ;;  %v15405_v35 = vpop.f32.mrf.mxu1 }
 0x837   : > { %16513 = vst [vmem:[#allocation23_spill] sm:$0xff] %v15405_v35  ;;  %v6959_v30 = vpack.c.bf16 %v6908_v43, %v15241_v4 }
 0x838   : > { %7629 = vmatmul.bf16.gmra.mxu2 %v15249_v8  ;;  %7718 = vmatmul.bf16.gmra.mxu3 %v15251_v12 }
 0x839   : > { %v7021_v3 = vunpack.c.l.bf16 %v6959_v30  ;;  %v7022_v27 = vunpack.c.h.bf16 %v6959_v30  ;;  %v10563_v30 = vor.u32 %v11001_v10, %v10560_v32  ;;  %v11041_v32 = vld [vmem:[%s16418_s19 + $0x20] sm:$0xff] }
 0x83a   : > { %8248 = vmatpush.bf16.msrb.mxu2 %v11041_v32 }
 0x83b   : > { %v6821_v59 = vpop.f32.mrf.mxu2  ;;  %v7087_v9 = vadd.f32 %v15190_v15, %v7021_v3  ;;  %v7088_v4 = vadd.f32 %v15192_v62, %v7022_v27  ;;  %7790 = vmatpush.bf16.msra.mxu0 %v10563_v30 }
 0x83c   : > { %v6910_v38 = vpop.f32.mrf.mxu3 }
 0x83d   : > { %v6911_v11 = vadd.f32 %v6910_v38, %v6821_v59  ;;  %v15417_v18 = vpack.c.bf16 %v7087_v9, %v7085_v61  ;;  %v15419_v58 = vpack.c.bf16 %v7088_v4, %v7086_v21 }
 0x83e   : > { %v15421_v0 = vpop.f32.mrf.mxu0  ;;  %v15423_v14 = vpop.f32.mrf.mxu1 }
 0x83f   : > { %16514 = vst [vmem:[#allocation24_spill] sm:$0xff] %v15423_v14  ;;  %v6960_v52 = vpack.c.bf16 %v6911_v11, %v15254_v46 }
 0x841   : > { %7326 = vmatmul.bf16.gmra.mxu0 %v11202_v60  ;;  %7415 = vmatmul.bf16.gmra.mxu1 %v11202_v60  ;;  %v7023_v24 = vunpack.c.l.bf16 %v6960_v52  ;;  %v7024_v1 = vunpack.c.h.bf16 %v6960_v52  ;;  %v11203_v60 = vld [vmem:[%s11518_s30 + $0x50] sm:$0xff] }
 0x843   : > { %v6823_v34 = vpop.f32.mrf.mxu2  ;;  %v7089_v27 = vadd.f32 %v15190_v15, %v7023_v24  ;;  %v7090_v33 = vadd.f32 %v15192_v62, %v7024_v1 }
 0x844   : > { %v6912_v56 = vpop.f32.mrf.mxu3 }
 0x845   : > { %v6913_v48 = vadd.f32 %v6912_v56, %v6823_v34 }
 0x846   : > { %v15427_v57 = vpop.f32.mrf.mxu0  ;;  %v15429_v47 = vpop.f32.mrf.mxu1 }
 0x847   : > { %16515 = vst [vmem:[#allocation8_spill] sm:$0xff] %v15429_v47  ;;  %v6961_v20 = vpack.c.bf16 %v6913_v48, %v15258_v5 }
 0x848   : > { %7634 = vmatmul.bf16.gmra.mxu2 %v15272_v25  ;;  %7723 = vmatmul.bf16.gmra.mxu3 %v15274_v36 }
 0x849   : > { %v7025_v43 = vunpack.c.l.bf16 %v6961_v20  ;;  %v7026_v46 = vunpack.c.h.bf16 %v6961_v20 }
 0x84b   : > { %v6826_v3 = vpop.f32.mrf.mxu2  ;;  %v7091_v5 = vadd.f32 %v15190_v15, %v7025_v43  ;;  %v7092_v59 = vadd.f32 %v15192_v62, %v7026_v46 }
 0x84c   : > { %v6915_v61 = vpop.f32.mrf.mxu3 }
 0x84d   : > { %v6916_v9 = vadd.f32 %v6915_v61, %v6826_v3  ;;  %v15444_v21 = vpack.c.bf16 %v7091_v5, %v7089_v27  ;;  %v15446_v4 = vpack.c.bf16 %v7092_v59, %v7090_v33 }
 0x84e   : > { %v15448_v38 = vpop.f32.mrf.mxu0  ;;  %v15450_v11 = vpop.f32.mrf.mxu1 }
 0x84f   : > { %16516 = vst [vmem:[#allocation26_spill] sm:$0xff] %v15450_v11  ;;  %v6962_v52 = vpack.c.bf16 %v6916_v9, %v15277_v44 }
 0x851   : > { %7331 = vmatmul.bf16.gmra.mxu0 %v11203_v60  ;;  %7420 = vmatmul.bf16.gmra.mxu1 %v11203_v60  ;;  %v7027_v20 = vunpack.c.l.bf16 %v6962_v52  ;;  %v7028_v43 = vunpack.c.h.bf16 %v6962_v52 }
 0x853   : > { %v6828_v34 = vpop.f32.mrf.mxu2  ;;  %v7093_v3 = vadd.f32 %v15190_v15, %v7027_v20  ;;  %v7094_v5 = vadd.f32 %v15192_v62, %v7028_v43 }
 0x854   : > { %v6917_v56 = vpop.f32.mrf.mxu3 }
 0x855   : > { %v6918_v48 = vadd.f32 %v6917_v56, %v6828_v34  ;;  %v11204_v56 = vld [vmem:[%s11518_s30 + $0x58] sm:$0xff] }
 0x856   : > { %v15454_v24 = vpop.f32.mrf.mxu0  ;;  %v15456_v1 = vpop.f32.mrf.mxu1 }
 0x857   : > { %16517 = vst [vmem:[#allocation9_spill] sm:$0xff] %v15456_v1  ;;  %v6963_v46 = vpack.c.bf16 %v6918_v48, %v15287_v49 }
 0x858   : > { %7639 = vmatmul.bf16.gmra.mxu2 %v15301_v7  ;;  %7728 = vmatmul.bf16.gmra.mxu3 %v15303_v17 }
 0x859   : > { %v7029_v10 = vunpack.c.l.bf16 %v6963_v46  ;;  %v7030_v44 = vunpack.c.h.bf16 %v6963_v46 }
 0x85b   : > { %v6831_v30 = vpop.f32.mrf.mxu2  ;;  %v7095_v27 = vadd.f32 %v15190_v15, %v7029_v10  ;;  %v7096_v49 = vadd.f32 %v15192_v62, %v7030_v44 }
 0x85c   : > { %v6920_v33 = vpop.f32.mrf.mxu3 }
 0x85d   : > { %v6921_v59 = vadd.f32 %v6920_v33, %v6831_v30  ;;  %v15468_v61 = vpack.c.bf16 %v7095_v27, %v7093_v3  ;;  %v15470_v9 = vpack.c.bf16 %v7096_v49, %v7094_v5  ;;  %v10999_v27 = vld [vmem:[%s16415_s16 + $0x54] sm:$0xf]  ;;  %v10552_v5 = vld [vmem:[%s16415_s16 + $0x58] sm:$0xf0] }
 0x85e   : > { %v15472_v52 = vpop.f32.mrf.mxu0  ;;  %v15474_v60 = vpop.f32.mrf.mxu1  ;;  %v10555_v49 = vor.u32 %v10999_v27, %v10552_v5 }
 0x85f   : > { %16518 = vst [vmem:[#allocation10_spill] sm:$0xff] %v15474_v60  ;;  %v6964_v34 = vpack.c.bf16 %v6921_v59, %v15306_v41 }
 0x860   : > { %7791 = vmatpush.bf16.msra.mxu0 %v10555_v49 }
 0x861   : > { %7336 = vmatmul.bf16.gmra.mxu0 %v11204_v56  ;;  %7425 = vmatmul.bf16.gmra.mxu1 %v11204_v56  ;;  %v7031_v44 = vunpack.c.l.bf16 %v6964_v34  ;;  %v7032_v32 = vunpack.c.h.bf16 %v6964_v34 }
 0x863   : > { %v6833_v48 = vpop.f32.mrf.mxu2  ;;  %v7097_v59 = vadd.f32 %v15190_v15, %v7031_v44  ;;  %v7098_v34 = vadd.f32 %v15192_v62, %v7032_v32  ;;  %v11019_v44 = vld [vmem:[%s16415_s16 + $0xf4] sm:$0xf]  ;;  %v10632_v32 = vld [vmem:[%s16415_s16 + $0xf8] sm:$0xf0] }
 0x864   : > { %v6922_v20 = vpop.f32.mrf.mxu3 }
 0x865   : > { %v6923_v43 = vadd.f32 %v6922_v20, %v6833_v48 }
 0x866   : > { %v15478_v46 = vpop.f32.mrf.mxu0  ;;  %v15480_v10 = vpop.f32.mrf.mxu1 }
 0x867   : > { %16519 = vst [vmem:[#allocation11_spill] sm:$0xff] %v15480_v10  ;;  %v6965_v30 = vpack.c.bf16 %v6923_v43, %v15322_v55 }
 0x868   : > { %7644 = vmatmul.bf16.gmra.mxu2 %v15333_v51  ;;  %7733 = vmatmul.bf16.gmra.mxu3 %v15335_v54 }
 0x869   : > { %v7033_v3 = vunpack.c.l.bf16 %v6965_v30  ;;  %v7034_v41 = vunpack.c.h.bf16 %v6965_v30 }
 0x86b   : > { %v6836_v33 = vpop.f32.mrf.mxu2  ;;  %v7099_v55 = vadd.f32 %v15190_v15, %v7033_v3  ;;  %v7100_v56 = vadd.f32 %v15192_v62, %v7034_v41  ;;  %v10635_v3 = vor.u32 %v11019_v44, %v10632_v32  ;;  %v11205_v41 = vld [vmem:[%s11518_s30 + $0x60] sm:$0xff] }
 0x86c   : > { %v6925_v48 = vpop.f32.mrf.mxu3 }
 0x86d   : > { %v6926_v20 = vadd.f32 %v6925_v48, %v6836_v33  ;;  %v15495_v43 = vpack.c.bf16 %v7099_v55, %v7097_v59  ;;  %v15497_v30 = vpack.c.bf16 %v7100_v56, %v7098_v34  ;;  %7878 = vmatpush.bf16.msrb.mxu1 %v10635_v3  ;;  %v11017_v33 = vld [vmem:[%s16415_s16 + $0xe4] sm:$0xf]  ;;  %v11015_v3 = vld [vmem:[%s16415_s16 + $0xd4] sm:$0xf] }
 0x86e   : > { %v15499_v10 = vpop.f32.mrf.mxu0  ;;  %v15501_v27 = vpop.f32.mrf.mxu1 }
 0x86f   : > { %16520 = vst [vmem:[#allocation27_spill] sm:$0xff] %v15501_v27  ;;  %v6966_v5 = vpack.c.bf16 %v6926_v20, %v15338_v63  ;;  %v10624_v63 = vld [vmem:[%s16415_s16 + $0xe8] sm:$0xf0] }
 0x870   : > { %v10627_v55 = vor.u32 %v11017_v33, %v10624_v63  ;;  %v10608_v27 = vld [vmem:[%s16415_s16 + $0xc8] sm:$0xf0] }
 0x871   : > { %7341 = vmatmul.bf16.gmra.mxu0 %v11205_v41  ;;  %7430 = vmatmul.bf16.gmra.mxu1 %v11205_v41  ;;  %v7035_v20 = vunpack.c.l.bf16 %v6966_v5  ;;  %v7036_v44 = vunpack.c.h.bf16 %v6966_v5  ;;  %v10616_v41 = vld [vmem:[%s16415_s16 + $0xd8] sm:$0xf0] }
 0x872   : > { %7879 = vmatpush.bf16.msrb.mxu1 %v10627_v55  ;;  %v11040_v5 = vld [vmem:[%s16418_s19 + $0x18] sm:$0xff]  ;;  %v10544_v55 = vld [vmem:[%s16415_s16 + $0x48] sm:$0xf0] }
 0x873   : > { %v6838_v49 = vpop.f32.mrf.mxu2  ;;  %8249 = vmatpush.bf16.msrb.mxu2 %v11040_v5 }
 0x874   : > { %v6927_v59 = vpop.f32.mrf.mxu3 }
 0x875   : > { %v6928_v34 = vadd.f32 %v6927_v59, %v6838_v49  ;;  %v10619_v49 = vor.u32 %v11015_v3, %v10616_v41  ;;  %v10997_v59 = vld [vmem:[%s16415_s16 + $0x44] sm:$0xf]  ;;  %v7102_v41 = vadd.f32 %v15192_v62, %v7036_v44 }
 0x876   : > { %v15517_v56 = vpop.f32.mrf.mxu0  ;;  %v15519_v48 = vpop.f32.mrf.mxu1 }
 0x877   : > { %16521 = vst [vmem:[#allocation28_spill] sm:$0xff] %v15519_v48  ;;  %v6967_v32 = vpack.c.bf16 %v6928_v34, %v15342_v22  ;;  %7880 = vmatpush.bf16.msrb.mxu1 %v10619_v49  ;;  %v11013_v34 = vld [vmem:[%s16415_s16 + $0xc4] sm:$0xf]  ;;  %v10547_v48 = vor.u32 %v10997_v59, %v10544_v55  ;;  %v11206_v55 = vld [vmem:[%s11518_s30 + $0x68] sm:$0xff] }
 0x878   : > { %7649 = vmatmul.bf16.gmra.mxu2 %v15350_v13  ;;  %7738 = vmatmul.bf16.gmra.mxu3 %v15352_v28  ;;  %v10611_v1 = vor.u32 %v11013_v34, %v10608_v27  ;;  %v10536_v27 = vld [vmem:[%s16415_s16 + $0x38] sm:$0xf0]  ;;  %v10528_v34 = vld [vmem:[%s16415_s16 + $0x28] sm:$0xf0] }
 0x879   : > { %v7037_v33 = vunpack.c.l.bf16 %v6967_v32  ;;  %v7038_v63 = vunpack.c.h.bf16 %v6967_v32  ;;  %v7101_v32 = vadd.f32 %v15190_v15, %v7035_v20  ;;  %7792 = vmatpush.bf16.msra.mxu0 %v10547_v48  ;;  %v10600_v48 = vld [vmem:[%s16415_s16 + $0xb8] sm:$0xf0] }
 0x87b   : > { %v6841_v22 = vpop.f32.mrf.mxu2  ;;  %v7103_v3 = vadd.f32 %v15190_v15, %v7037_v33  ;;  %v7104_v49 = vadd.f32 %v15192_v62, %v7038_v63  ;;  %7881 = vmatpush.bf16.msrb.mxu1 %v10611_v1  ;;  %v10995_v63 = vld [vmem:[%s16415_s16 + $0x34] sm:$0xf] }
 0x87c   : > { %v6930_v5 = vpop.f32.mrf.mxu3  ;;  %v10539_v59 = vor.u32 %v10995_v63, %v10536_v27 }
 0x87d   : > { %v6931_v60 = vadd.f32 %v6930_v5, %v6841_v22  ;;  %v15549_v11 = vpack.c.bf16 %v7103_v3, %v7101_v32  ;;  %v15551_v47 = vpack.c.bf16 %v7104_v49, %v7102_v41  ;;  %v11011_v22 = vld [vmem:[%s16415_s16 + $0xb4] sm:$0xf]  ;;  %v11009_v32 = vld [vmem:[%s16415_s16 + $0xa4] sm:$0xf]  ;;  %v10592_v49 = vld [vmem:[%s16415_s16 + $0xa8] sm:$0xf0] }
 0x87e   : > { %v15553_v20 = vpop.f32.mrf.mxu0  ;;  %v15555_v33 = vpop.f32.mrf.mxu1  ;;  %7793 = vmatpush.bf16.msra.mxu0 %v10539_v59  ;;  %v10595_v63 = vor.u32 %v11009_v32, %v10592_v49  ;;  %v10989_v49 = vld [vmem:[%s16415_s16 + $0x4] sm:$0xf] }
 0x87f   : > { %16522 = vst [vmem:[#allocation12_spill] sm:$0xff] %v15555_v33  ;;  %v6968_v44 = vpack.c.bf16 %v6931_v60, %v15355_v53  ;;  %v10603_v53 = vor.u32 %v11011_v22, %v10600_v48  ;;  %v10993_v60 = vld [vmem:[%s16415_s16 + $0x24] sm:$0xf] }
 0x880   : > { %v10531_v41 = vor.u32 %v10993_v60, %v10528_v34  ;;  %v10520_v60 = vld [vmem:[%s16415_s16 + $0x18] sm:$0xf0] }
 0x881   : > { %7346 = vmatmul.bf16.gmra.mxu0 %v11206_v55  ;;  %7435 = vmatmul.bf16.gmra.mxu1 %v11206_v55  ;;  %v7039_v59 = vunpack.c.l.bf16 %v6968_v44  ;;  %v7040_v48 = vunpack.c.h.bf16 %v6968_v44 }
 0x882   : > { %7882 = vmatpush.bf16.msrb.mxu1 %v10603_v53  ;;  %7794 = vmatpush.bf16.msra.mxu0 %v10531_v41  ;;  %v10991_v53 = vld [vmem:[%s16415_s16 + $0x14] sm:$0xf] }
 0x883   : > { %v6843_v1 = vpop.f32.mrf.mxu2  ;;  %v10523_v44 = vor.u32 %v10991_v53, %v10520_v60  ;;  %v7105_v53 = vadd.f32 %v15190_v15, %v7039_v59  ;;  %v7106_v60 = vadd.f32 %v15192_v62, %v7040_v48 }
 0x884   : > { %v6932_v3 = vpop.f32.mrf.mxu3 }
 0x885   : > { %v6933_v5 = vadd.f32 %v6932_v3, %v6843_v1  ;;  %v11007_v1 = vld [vmem:[%s16415_s16 + $0x94] sm:$0xf] }
 0x886   : > { %v15583_v27 = vpop.f32.mrf.mxu0  ;;  %v15585_v22 = vpop.f32.mrf.mxu1  ;;  %7883 = vmatpush.bf16.msrb.mxu1 %v10595_v63  ;;  %7795 = vmatpush.bf16.msra.mxu0 %v10523_v44  ;;  %v11005_v63 = vld [vmem:[%s16415_s16 + $0x84] sm:$0xf] }
 0x887   : > { %16523 = vst [vmem:[#allocation13_spill] sm:$0xff] %v15585_v22  ;;  %v6969_v55 = vpack.c.bf16 %v6933_v5, %v15359_v29  ;;  %v10584_v29 = vld [vmem:[%s16415_s16 + $0x98] sm:$0xf0]  ;;  %v10512_v5 = vld [vmem:[%s16415_s16 + $0x8] sm:$0xf0] }
 0x888   : > { %7654 = vmatmul.bf16.gmra.mxu2 %v15370_v37  ;;  %7743 = vmatmul.bf16.gmra.mxu3 %v15372_v26  ;;  %v10587_v3 = vor.u32 %v11007_v1, %v10584_v29  ;;  %v10515_v29 = vor.u32 %v10989_v49, %v10512_v5 }
 0x889   : > { %v7041_v34 = vunpack.c.l.bf16 %v6969_v55  ;;  %v7042_v32 = vunpack.c.h.bf16 %v6969_v55 }
 0x88a   : > { %7884 = vmatpush.bf16.msrb.mxu1 %v10587_v3  ;;  %v10576_v3 = vld [vmem:[%s16415_s16 + $0x88] sm:$0xf0]  ;;  %7796 = vmatpush.bf16.msra.mxu0 %v10515_v29 }
 0x88b   : > { %v6846_v41 = vpop.f32.mrf.mxu2  ;;  %v7107_v55 = vadd.f32 %v15190_v15, %v7041_v34  ;;  %v7108_v1 = vadd.f32 %v15192_v62, %v7042_v32  ;;  %v10579_v33 = vor.u32 %v11005_v63, %v10576_v3  ;;  %v11207_v34 = vld [vmem:[%s11518_s30 + $0x70] sm:$0xff] }
 0x88c   : > { %v6935_v44 = vpop.f32.mrf.mxu3 }
 0x88d   : > { %v6936_v22 = vadd.f32 %v6935_v44, %v6846_v41  ;;  %v15618_v14 = vpack.c.bf16 %v7107_v55, %v7105_v53  ;;  %v15620_v35 = vpack.c.bf16 %v7108_v1, %v7106_v60  ;;  %v11052_v53 = vld [vmem:[%s16420_s21 + $0x38] sm:$0xff]  ;;  %v7999_v44 = vld [vmem:[%s16417_s18] sm:$0x1] }
 0x88e   : > { %v15622_v59 = vpop.f32.mrf.mxu0  ;;  %v15624_v6 = vpop.f32.mrf.mxu1  ;;  %7885 = vmatpush.bf16.msrb.mxu1 %v10579_v33  ;;  %8612 = vmatpush.bf16.msrb.mxu3 %v11052_v53 }
 0x88f   : > { %16524 = vst [vmem:[#allocation14_spill] sm:$0xff] %v15624_v6  ;;  %v6970_v48 = vpack.c.bf16 %v6936_v22, %v15375_v39 }
 0x891   : > { %7351 = vmatmul.bf16.gmra.mxu0 %v11207_v34  ;;  %7440 = vmatmul.bf16.gmra.mxu1 %v11207_v34  ;;  %v7043_v55 = vunpack.c.l.bf16 %v6970_v48  ;;  %v7044_v60 = vunpack.c.h.bf16 %v6970_v48 }
 0x893   : > { %v6848_v32 = vpop.f32.mrf.mxu2  ;;  %v7109_v29 = vadd.f32 %v15190_v15, %v7043_v55  ;;  %v7110_v48 = vadd.f32 %v15192_v62, %v7044_v60  ;;  %v11208_v55 = vld [vmem:[%s11518_s30 + $0x78] sm:$0xff]  ;;  %s11061_s30 = sshll.u32 (%p11452_p4), %s16556_s25, 8 }
 0x894   : > { %v6937_v49 = vpop.f32.mrf.mxu3  ;;  %s16264_s2 = scalar_lea.vmem (%p11452_p4), %s16557_s5, %s11061_s30  }
 0x895   : > { %v6938_v5 = vadd.f32 %v6937_v49, %v6848_v32 }
 0x896   : > { %v15628_v41 = vpop.f32.mrf.mxu0  ;;  %v15630_v63 = vpop.f32.mrf.mxu1 }
 0x897   : > { %16525 = vst [vmem:[#allocation15_spill] sm:$0xff] %v15630_v63  ;;  %v6971_v1 = vpack.c.bf16 %v6938_v5, %v15379_v40 }
 0x898   : > { %7659 = vmatmul.bf16.gmra.mxu2 %v15393_v45  ;;  %7748 = vmatmul.bf16.gmra.mxu3 %v15395_v16 }
 0x899   : > { %v7045_v39 = vunpack.c.l.bf16 %v6971_v1  ;;  %v7046_v33 = vunpack.c.h.bf16 %v6971_v1  ;;  %v8001_v1 = vpack.i.b16 %v7999_v44, %v7999_v44 }
 0x89b   : > { %v7620_v22 = vpop.f32.mrf.mxu2  ;;  %v7111_v3 = vadd.f32 %v15190_v15, %v7045_v39  ;;  %v7112_v40 = vadd.f32 %v15192_v62, %v7046_v33  ;;  %v11039_v15 = vld [vmem:[%s16418_s19 + $0x10] sm:$0xff] }
 0x89c   : > { %v7621_v34 = vadd.f32 %v7620_v22, %v15397_v19  ;;  %v7709_v32 = vpop.f32.mrf.mxu3  ;;  %8250 = vmatpush.bf16.msrb.mxu2 %v11039_v15  ;;  %v8003_v19 = vperm.slane %v8001_v1, 0 }
 0x89d   : > { %v15646_v49 = vpack.c.bf16 %v7111_v3, %v7109_v29  ;;  %v15648_v5 = vpack.c.bf16 %v7112_v40, %v7110_v48 }
 0x89e   : > { %v7710_v53 = vadd.f32 %v7709_v32, %v7621_v34  ;;  %v15650_v63 = vpop.f32.mrf.mxu0  ;;  %v15652_v6 = vpop.f32.mrf.mxu1  ;;  %v15659_v44 = vunpack.c.l.bf16 %v8003_v19 }
 0x8a0   : > { %v7967_v62 = vpack.c.bf16 %v7710_v53, %v7710_v53 }
 0x8a1   : > { %7356 = vmatmul.bf16.gmra.mxu0 %v11208_v55  ;;  %7445 = vmatmul.bf16.gmra.mxu1 %v11208_v55 }
 0x8a2   : > { %v8004_v22 = vunpack.c.l.bf16 %v7967_v62 }
 0x8a3   : > { %v7622_v60 = vpop.f32.mrf.mxu2 }
 0x8a4   : > { %v7623_v39 = vadd.f32 %v7622_v60, %v15403_v50  ;;  %v7711_v33 = vpop.f32.mrf.mxu3  ;;  %v8037_v34 = vadd.f32 %v15659_v44, %v8004_v22 }
 0x8a6   : > { %v7712_v29 = vadd.f32 %v7711_v33, %v7623_v39  ;;  %v15661_v3 = vpop.f32.mrf.mxu0  ;;  %v15663_v48 = vpop.f32.mrf.mxu1  ;;  %v8133_v55 = vmax.f32 %v8037_v34, 0.0 }
 0x8a8   : > { %v7968_v40 = vpack.c.bf16 %v7712_v29, %v7712_v29  ;;  %7664 = vmatmul.bf16.gmra.mxu2 %v15417_v18  ;;  %7753 = vmatmul.bf16.gmra.mxu3 %v15419_v58 }
 0x8aa   : > { %v8005_v32 = vunpack.c.l.bf16 %v7968_v40 }
 0x8ab   : > { %v7625_v53 = vpop.f32.mrf.mxu2 }
 0x8ac   : > { %v8038_v50 = vadd.f32 %v15659_v44, %v8005_v32  ;;  %v7626_v1 = vadd.f32 %v7625_v53, %v15421_v0  ;;  %v7714_v15 = vpop.f32.mrf.mxu3 }
 0x8ae   : > { %v8134_v62 = vmax.f32 %v8038_v50, 0.0  ;;  %v7715_v19 = vadd.f32 %v7714_v15, %v7626_v1  ;;  %v15670_v60 = vpop.f32.mrf.mxu0  ;;  %v15672_v39 = vpop.f32.mrf.mxu1  ;;  %v11051_v1 = vld [vmem:[%s16420_s21 + $0x30] sm:$0xff] }
 0x8af   : > { %8613 = vmatpush.bf16.msrb.mxu3 %v11051_v1  ;;  %v11038_v1 = vld [vmem:[%s16418_s19 + $0x8] sm:$0xff] }
 0x8b0   : > { %v15674_v33 = vpack.c.bf16 %v8134_v62, %v8133_v55  ;;  %v7969_v22 = vpack.c.bf16 %v7715_v19, %v7715_v19  ;;  %8251 = vmatpush.bf16.msrb.mxu2 %v11038_v1 }
 0x8b1   : > { %7797 = vmatmul.bf16.vlgmr.msra.gmra.mxu0 %v15203_v42  ;;  %7886 = vmatmul.bf16.vlgmr.msrb.gmra.mxu1 %v15205_v31 }
 0x8b2   : > { %v8006_v0 = vunpack.c.l.bf16 %v7969_v22 }
 0x8b3   : > { %v7627_v29 = vpop.f32.mrf.mxu2 }
 0x8b4   : > { %v7628_v40 = vadd.f32 %v7627_v29, %v15427_v57  ;;  %v7716_v32 = vpop.f32.mrf.mxu3  ;;  %v8039_v42 = vadd.f32 %v15659_v44, %v8006_v0 }
 0x8b6   : > { %v7717_v53 = vadd.f32 %v7716_v32, %v7628_v40  ;;  %v15679_v34 = vpop.f32.mrf.mxu0  ;;  %v15681_v50 = vpop.f32.mrf.mxu1  ;;  %v8135_v22 = vmax.f32 %v8039_v42, 0.0 }
 0x8b8   : > { %v7970_v15 = vpack.c.bf16 %v7717_v53, %v7717_v53  ;;  %7669 = vmatmul.bf16.gmra.mxu2 %v15444_v21  ;;  %7758 = vmatmul.bf16.gmra.mxu3 %v15446_v4 }
 0x8ba   : > { %v8007_v31 = vunpack.c.l.bf16 %v7970_v15 }
 0x8bb   : > { %v7630_v57 = vpop.f32.mrf.mxu2 }
 0x8bc   : > { %v8040_v55 = vadd.f32 %v15659_v44, %v8007_v31  ;;  %v7631_v62 = vadd.f32 %v7630_v57, %v15448_v38  ;;  %v7719_v19 = vpop.f32.mrf.mxu3 }
 0x8be   : > { %v8136_v29 = vmax.f32 %v8040_v55, 0.0  ;;  %v7720_v40 = vadd.f32 %v7719_v19, %v7631_v62  ;;  %v15691_v32 = vpop.f32.mrf.mxu0  ;;  %v15693_v53 = vpop.f32.mrf.mxu1 }
 0x8bf   : > { %16526 = vst [vmem:[#allocation16_spill] sm:$0xff] %v15693_v53 }
 0x8c0   : > { %v15698_v0 = vpack.c.bf16 %v8136_v29, %v8135_v22  ;;  %v7971_v38 = vpack.c.bf16 %v7720_v40, %v7720_v40 }
 0x8c1   : > { %7802 = vmatmul.bf16.gmra.mxu0 %v15226_v23  ;;  %7891 = vmatmul.bf16.gmra.mxu1 %v15228_v2 }
 0x8c2   : > { %v8008_v57 = vunpack.c.l.bf16 %v7971_v38 }
 0x8c3   : > { %v7632_v15 = vpop.f32.mrf.mxu2 }
 0x8c4   : > { %v7633_v42 = vadd.f32 %v7632_v15, %v15454_v24  ;;  %v7721_v31 = vpop.f32.mrf.mxu3  ;;  %v8041_v23 = vadd.f32 %v15659_v44, %v8008_v57 }
 0x8c6   : > { %v7722_v55 = vadd.f32 %v7721_v31, %v7633_v42  ;;  %v15703_v62 = vpop.f32.mrf.mxu0  ;;  %v15705_v19 = vpop.f32.mrf.mxu1  ;;  %v8137_v1 = vmax.f32 %v8041_v23, 0.0 }
 0x8c7   : > { %16527 = vst [vmem:[#allocation17_spill] sm:$0xff] %v15705_v19 }
 0x8c8   : > { %v7972_v53 = vpack.c.bf16 %v7722_v55, %v7722_v55  ;;  %7674 = vmatmul.bf16.gmra.mxu2 %v15468_v61  ;;  %7763 = vmatmul.bf16.gmra.mxu3 %v15470_v9 }
 0x8ca   : > { %v8009_v22 = vunpack.c.l.bf16 %v7972_v53 }
 0x8cb   : > { %v7635_v2 = vpop.f32.mrf.mxu2 }
 0x8cc   : > { %v8042_v29 = vadd.f32 %v15659_v44, %v8009_v22  ;;  %v7636_v24 = vadd.f32 %v7635_v2, %v15472_v52  ;;  %v7724_v40 = vpop.f32.mrf.mxu3 }
 0x8ce   : > { %v8138_v38 = vmax.f32 %v8042_v29, 0.0  ;;  %v7725_v15 = vadd.f32 %v7724_v40, %v7636_v24  ;;  %v15712_v42 = vpop.f32.mrf.mxu0  ;;  %v15714_v31 = vpop.f32.mrf.mxu1  ;;  %v11050_v24 = vld [vmem:[%s16420_s21 + $0x28] sm:$0xff] }
 0x8cf   : > { %8614 = vmatpush.bf16.msrb.mxu3 %v11050_v24  ;;  %v11037_v24 = vld [vmem:[%s16418_s19] sm:$0xff] }
 0x8d0   : > { %v15716_v55 = vpack.c.bf16 %v8138_v38, %v8137_v1  ;;  %v7973_v53 = vpack.c.bf16 %v7725_v15, %v7725_v15  ;;  %8252 = vmatpush.bf16.msrb.mxu2 %v11037_v24 }
 0x8d1   : > { %7807 = vmatmul.bf16.gmra.mxu0 %v15249_v8  ;;  %7896 = vmatmul.bf16.gmra.mxu1 %v15251_v12 }
 0x8d2   : > { %v8010_v52 = vunpack.c.l.bf16 %v7973_v53 }
 0x8d3   : > { %v7637_v57 = vpop.f32.mrf.mxu2 }
 0x8d4   : > { %v7638_v22 = vadd.f32 %v7637_v57, %v15478_v46  ;;  %v7726_v19 = vpop.f32.mrf.mxu3  ;;  %v8043_v8 = vadd.f32 %v15659_v44, %v8010_v52 }
 0x8d6   : > { %v7727_v2 = vadd.f32 %v7726_v19, %v7638_v22  ;;  %v15721_v23 = vpop.f32.mrf.mxu0  ;;  %v15723_v29 = vpop.f32.mrf.mxu1  ;;  %v8139_v15 = vmax.f32 %v8043_v8, 0.0 }
 0x8d8   : > { %v7974_v40 = vpack.c.bf16 %v7727_v2, %v7727_v2  ;;  %7679 = vmatmul.bf16.gmra.mxu2 %v15495_v43  ;;  %7768 = vmatmul.bf16.gmra.mxu3 %v15497_v30 }
 0x8da   : > { %v8011_v12 = vunpack.c.l.bf16 %v7974_v40 }
 0x8db   : > { %v7640_v46 = vpop.f32.mrf.mxu2 }
 0x8dc   : > { %v8044_v19 = vadd.f32 %v15659_v44, %v8011_v12  ;;  %v7641_v1 = vadd.f32 %v7640_v46, %v15499_v10  ;;  %v7729_v38 = vpop.f32.mrf.mxu3 }
 0x8de   : > { %v8140_v53 = vmax.f32 %v8044_v19, 0.0  ;;  %v7730_v57 = vadd.f32 %v7729_v38, %v7641_v1  ;;  %v15733_v22 = vpop.f32.mrf.mxu0  ;;  %v15735_v2 = vpop.f32.mrf.mxu1 }
 0x8df   : > { %16528 = vst [vmem:[#allocation18_spill] sm:$0xff] %v15735_v2 }
 0x8e0   : > { %v15740_v52 = vpack.c.bf16 %v8140_v53, %v8139_v15  ;;  %v7975_v10 = vpack.c.bf16 %v7730_v57, %v7730_v57 }
 0x8e1   : > { %7812 = vmatmul.bf16.gmra.mxu0 %v15272_v25  ;;  %7901 = vmatmul.bf16.gmra.mxu1 %v15274_v36 }
 0x8e2   : > { %v8012_v46 = vunpack.c.l.bf16 %v7975_v10 }
 0x8e3   : > { %v7642_v40 = vpop.f32.mrf.mxu2 }
 0x8e4   : > { %v7643_v8 = vadd.f32 %v7642_v40, %v15517_v56  ;;  %v7731_v12 = vpop.f32.mrf.mxu3  ;;  %v8045_v25 = vadd.f32 %v15659_v44, %v8012_v46 }
 0x8e6   : > { %v7732_v19 = vadd.f32 %v7731_v12, %v7643_v8  ;;  %v15745_v1 = vpop.f32.mrf.mxu0  ;;  %v15747_v38 = vpop.f32.mrf.mxu1  ;;  %v8141_v24 = vmax.f32 %v8045_v25, 0.0 }
 0x8e7   : > { %16529 = vst [vmem:[#allocation19_spill] sm:$0xff] %v15747_v38 }
 0x8e8   : > { %v7976_v2 = vpack.c.bf16 %v7732_v19, %v7732_v19  ;;  %7684 = vmatmul.bf16.gmra.mxu2 %v15549_v11  ;;  %7773 = vmatmul.bf16.gmra.mxu3 %v15551_v47 }
 0x8ea   : > { %v8013_v15 = vunpack.c.l.bf16 %v7976_v2 }
 0x8eb   : > { %v7645_v36 = vpop.f32.mrf.mxu2 }
 0x8ec   : > { %v8046_v53 = vadd.f32 %v15659_v44, %v8013_v15  ;;  %v7646_v56 = vadd.f32 %v7645_v36, %v15553_v20  ;;  %v7734_v57 = vpop.f32.mrf.mxu3 }
 0x8ee   : > { %v8142_v10 = vmax.f32 %v8046_v53, 0.0  ;;  %v7735_v40 = vadd.f32 %v7734_v57, %v7646_v56  ;;  %v15754_v8 = vpop.f32.mrf.mxu0  ;;  %v15756_v12 = vpop.f32.mrf.mxu1  ;;  %v11049_v56 = vld [vmem:[%s16420_s21 + $0x20] sm:$0xff] }
 0x8ef   : > { %8615 = vmatpush.bf16.msrb.mxu3 %v11049_v56 }
 0x8f0   : > { %v15758_v19 = vpack.c.bf16 %v8142_v10, %v8141_v24  ;;  %v7977_v2 = vpack.c.bf16 %v7735_v40, %v7735_v40 }
 0x8f1   : > { %7817 = vmatmul.bf16.gmra.mxu0 %v15301_v7  ;;  %7906 = vmatmul.bf16.gmra.mxu1 %v15303_v17 }
 0x8f2   : > { %v8014_v20 = vunpack.c.l.bf16 %v7977_v2 }
 0x8f3   : > { %v7647_v46 = vpop.f32.mrf.mxu2 }
 0x8f4   : > { %v7648_v15 = vadd.f32 %v7647_v46, %v15583_v27  ;;  %v7736_v38 = vpop.f32.mrf.mxu3  ;;  %v8047_v7 = vadd.f32 %v15659_v44, %v8014_v20 }
 0x8f6   : > { %v7737_v36 = vadd.f32 %v7736_v38, %v7648_v15  ;;  %v15763_v25 = vpop.f32.mrf.mxu0  ;;  %v15765_v53 = vpop.f32.mrf.mxu1  ;;  %v8143_v40 = vmax.f32 %v8047_v7, 0.0 }
 0x8f7   : > { %16530 = vst [vmem:[#allocation20_spill] sm:$0xff] %v15765_v53 }
 0x8f8   : > { %v7978_v57 = vpack.c.bf16 %v7737_v36, %v7737_v36  ;;  %7689 = vmatmul.bf16.gmra.mxu2 %v15618_v14  ;;  %7778 = vmatmul.bf16.gmra.mxu3 %v15620_v35 }
 0x8fa   : > { %v8015_v17 = vunpack.c.l.bf16 %v7978_v57 }
 0x8fb   : > { %v7650_v27 = vpop.f32.mrf.mxu2 }
 0x8fc   : > { %v8048_v38 = vadd.f32 %v15659_v44, %v8015_v17  ;;  %v7651_v24 = vadd.f32 %v7650_v27, %v15622_v59  ;;  %v7739_v10 = vpop.f32.mrf.mxu3 }
 0x8fe   : > { %v8144_v2 = vmax.f32 %v8048_v38, 0.0  ;;  %v7740_v46 = vadd.f32 %v7739_v10, %v7651_v24  ;;  %v15775_v15 = vpop.f32.mrf.mxu0  ;;  %v15777_v36 = vpop.f32.mrf.mxu1 }
 0x900   : > { %v15779_v53 = vpack.c.bf16 %v8144_v2, %v8143_v40  ;;  %v7979_v20 = vpack.c.bf16 %v7740_v46, %v7740_v46 }
 0x901   : > { %7822 = vmatmul.bf16.gmra.mxu0 %v15333_v51  ;;  %7911 = vmatmul.bf16.gmra.mxu1 %v15335_v54 }
 0x902   : > { %v8016_v59 = vunpack.c.l.bf16 %v7979_v20 }
 0x903   : > { %v7652_v56 = vpop.f32.mrf.mxu2 }
 0x904   : > { %v7653_v57 = vadd.f32 %v7652_v56, %v15628_v41  ;;  %v7741_v17 = vpop.f32.mrf.mxu3  ;;  %v8049_v51 = vadd.f32 %v15659_v44, %v8016_v59 }
 0x906   : > { %v7742_v27 = vadd.f32 %v7741_v17, %v7653_v57  ;;  %v15784_v7 = vpop.f32.mrf.mxu0  ;;  %v15786_v38 = vpop.f32.mrf.mxu1  ;;  %v8145_v46 = vmax.f32 %v8049_v51, 0.0 }
 0x907   : > { %16531 = vst [vmem:[#allocation21_spill] sm:$0xff] %v15786_v38 }
 0x908   : > { %v7980_v24 = vpack.c.bf16 %v7742_v27, %v7742_v27  ;;  %7694 = vmatmul.bf16.gmra.mxu2 %v15646_v49  ;;  %7783 = vmatmul.bf16.gmra.mxu3 %v15648_v5 }
 0x90a   : > { %v8017_v10 = vunpack.c.l.bf16 %v7980_v24 }
 0x90b   : > { %v7655_v54 = vpop.f32.mrf.mxu2 }
 0x90c   : > { %v8050_v40 = vadd.f32 %v15659_v44, %v8017_v10  ;;  %v7656_v41 = vadd.f32 %v7655_v54, %v15650_v63  ;;  %v7744_v2 = vpop.f32.mrf.mxu3 }
 0x90e   : > { %v8146_v20 = vmax.f32 %v8050_v40, 0.0  ;;  %v7745_v56 = vadd.f32 %v7744_v2, %v7656_v41  ;;  %v15793_v57 = vpop.f32.mrf.mxu0  ;;  %v15795_v17 = vpop.f32.mrf.mxu1  ;;  %v11048_v41 = vld [vmem:[%s16420_s21 + $0x18] sm:$0xff] }
 0x90f   : > { %8616 = vmatpush.bf16.msrb.mxu3 %v11048_v41 }
 0x910   : > { %v15797_v27 = vpack.c.bf16 %v8146_v20, %v8145_v46  ;;  %v7981_v59 = vpack.c.bf16 %v7745_v56, %v7745_v56 }
 0x911   : > { %7827 = vmatmul.bf16.gmra.mxu0 %v15350_v13  ;;  %7916 = vmatmul.bf16.gmra.mxu1 %v15352_v28 }
 0x912   : > { %v8018_v63 = vunpack.c.l.bf16 %v7981_v59 }
 0x913   : > { %v7657_v24 = vpop.f32.mrf.mxu2 }
 0x914   : > { %v7658_v10 = vadd.f32 %v7657_v24, %v15661_v3  ;;  %v7746_v38 = vpop.f32.mrf.mxu3  ;;  %v8051_v13 = vadd.f32 %v15659_v44, %v8018_v63 }
 0x916   : > { %v7747_v54 = vadd.f32 %v7746_v38, %v7658_v10  ;;  %v15802_v51 = vpop.f32.mrf.mxu0  ;;  %v15804_v40 = vpop.f32.mrf.mxu1  ;;  %v8147_v56 = vmax.f32 %v8051_v13, 0.0 }
 0x917   : > { %16532 = vst [vmem:[#allocation22_spill] sm:$0xff] %v15804_v40 }
 0x918   : > { %v7982_v2 = vpack.c.bf16 %v7747_v54, %v7747_v54  ;;  %8253 = vmatmul.bf16.vlgmr.msrb.gmra.mxu2 %v15674_v33 }
 0x91a   : > { %v8019_v28 = vunpack.c.l.bf16 %v7982_v2 }
 0x91b   : > { %v7660_v46 = vpop.f32.mrf.mxu2 }
 0x91c   : > { %v8052_v3 = vadd.f32 %v15659_v44, %v8019_v28  ;;  %v7661_v38 = vadd.f32 %v7660_v46, %v15670_v60  ;;  %v7749_v20 = vpop.f32.mrf.mxu3 }
 0x91e   : > { %v8148_v59 = vmax.f32 %v8052_v3, 0.0  ;;  %v7750_v24 = vadd.f32 %v7749_v20, %v7661_v38  ;;  %v15813_v10 = vpop.f32.mrf.mxu0  ;;  %v15815_v40 = vpop.f32.mrf.mxu1 }
 0x920   : > { %v15817_v54 = vpack.c.bf16 %v8148_v59, %v8147_v56  ;;  %v7983_v33 = vpack.c.bf16 %v7750_v24, %v7750_v24 }
 0x921   : > { %7832 = vmatmul.bf16.gmra.mxu0 %v15370_v37  ;;  %7921 = vmatmul.bf16.gmra.mxu1 %v15372_v26 }
 0x922   : > { %v8020_v60 = vunpack.c.l.bf16 %v7983_v33 }
 0x923   : > { %v7662_v63 = vpop.f32.mrf.mxu2 }
 0x924   : > { %v7663_v41 = vadd.f32 %v7662_v63, %v15679_v34  ;;  %v7751_v2 = vpop.f32.mrf.mxu3  ;;  %v8053_v38 = vadd.f32 %v15659_v44, %v8020_v60 }
 0x926   : > { %v7752_v28 = vadd.f32 %v7751_v2, %v7663_v41  ;;  %v15822_v13 = vpop.f32.mrf.mxu0  ;;  %v15824_v46 = vpop.f32.mrf.mxu1  ;;  %v8149_v34 = vmax.f32 %v8053_v38, 0.0  ;;  %v11060_v2 = vld [vmem:[%s16422_s23 + $0x38] sm:$0xff] }
 0x927   : > { %16533 = vst [vmem:[#allocation25_spill] sm:$0xff] %v15824_v46  ;;  %8979 = vmatpush.bf16.msrb.mxu0 %v11060_v2 }
 0x928   : > { %v7984_v3 = vpack.c.bf16 %v7752_v28, %v7752_v28  ;;  %8258 = vmatmul.bf16.gmra.mxu2 %v15698_v0  ;;  %v16534_v28 = vld [vmem:[#allocation7_spill] sm:$0xff] }
 0x92a   : > { %v8021_v20 = vunpack.c.l.bf16 %v7984_v3 }
 0x92b   : > { %v7665_v37 = vpop.f32.mrf.mxu2 }
 0x92c   : > { %v8054_v26 = vadd.f32 %v15659_v44, %v8021_v20  ;;  %v7666_v56 = vadd.f32 %v7665_v37, %v15691_v32  ;;  %v7754_v59 = vpop.f32.mrf.mxu3 }
 0x92e   : > { %v8150_v24 = vmax.f32 %v8054_v26, 0.0  ;;  %v7755_v33 = vadd.f32 %v7754_v59, %v7666_v56  ;;  %v7798_v63 = vpop.f32.mrf.mxu0  ;;  %v7887_v41 = vpop.f32.mrf.mxu1 }
 0x92f   : > { %v7799_v0 = vadd.f32 %v7798_v63, %v16534_v28 }
 0x930   : > { %v15834_v60 = vpack.c.bf16 %v8150_v24, %v8149_v34  ;;  %v7985_v32 = vpack.c.bf16 %v7755_v33, %v7755_v33  ;;  %v11047_v34 = vld [vmem:[%s16420_s21 + $0x10] sm:$0xff]  ;;  %v16535_v24 = vld [vmem:[#allocation23_spill] sm:$0xff] }
 0x931   : > { %v15836_v3 = vadd.f32 %v7887_v41, %v7799_v0  ;;  %7837 = vmatmul.bf16.gmra.mxu0 %v15393_v45  ;;  %7926 = vmatmul.bf16.gmra.mxu1 %v15395_v16 }
 0x932   : > { %v8022_v26 = vunpack.c.l.bf16 %v7985_v32  ;;  %8617 = vmatpush.bf16.msrb.mxu3 %v11047_v34 }
 0x933   : > { %v7667_v38 = vpop.f32.mrf.mxu2 }
 0x934   : > { %v7668_v20 = vadd.f32 %v7667_v38, %v15703_v62  ;;  %v7756_v37 = vpop.f32.mrf.mxu3  ;;  %v8055_v16 = vadd.f32 %v15659_v44, %v8022_v26 }
 0x936   : > { %v7757_v56 = vadd.f32 %v7756_v37, %v7668_v20  ;;  %v7800_v59 = vpop.f32.mrf.mxu0  ;;  %v7889_v46 = vpop.f32.mrf.mxu1  ;;  %v8151_v32 = vmax.f32 %v8055_v16, 0.0 }
 0x937   : > { %v7801_v63 = vadd.f32 %v7800_v59, %v16535_v24 }
 0x938   : > { %v7986_v41 = vpack.c.bf16 %v7757_v56, %v7757_v56  ;;  %8263 = vmatmul.bf16.gmra.mxu2 %v15716_v55  ;;  %v16536_v56 = vld [vmem:[#allocation24_spill] sm:$0xff] }
 0x939   : > { %v15846_v45 = vadd.f32 %v7889_v46, %v7801_v63 }
 0x93a   : > { %v8023_v62 = vunpack.c.l.bf16 %v7986_v41 }
 0x93b   : > { %v7670_v33 = vpop.f32.mrf.mxu2 }
 0x93c   : > { %v8056_v2 = vadd.f32 %v15659_v44, %v8023_v62  ;;  %v7671_v28 = vadd.f32 %v7670_v33, %v15712_v42  ;;  %v7759_v0 = vpop.f32.mrf.mxu3 }
 0x93e   : > { %v8152_v38 = vmax.f32 %v8056_v2, 0.0  ;;  %v7760_v20 = vadd.f32 %v7759_v0, %v7671_v28  ;;  %v7803_v37 = vpop.f32.mrf.mxu0  ;;  %v7892_v59 = vpop.f32.mrf.mxu1  ;;  %v16537_v2 = vld [vmem:[#allocation8_spill] sm:$0xff] }
 0x93f   : > { %v7804_v24 = vadd.f32 %v7803_v37, %v16536_v56 }
 0x940   : > { %v15852_v55 = vpack.c.bf16 %v8152_v38, %v8151_v32  ;;  %v7987_v26 = vpack.c.bf16 %v7760_v20, %v7760_v20 }
 0x941   : > { %v15854_v46 = vadd.f32 %v7892_v59, %v7804_v24  ;;  %7842 = vmatmul.bf16.gmra.mxu0 %v15417_v18  ;;  %7931 = vmatmul.bf16.gmra.mxu1 %v15419_v58 }
 0x942   : > { %v8024_v41 = vunpack.c.l.bf16 %v7987_v26 }
 0x943   : > { %v7672_v34 = vpop.f32.mrf.mxu2 }
 0x944   : > { %v7673_v42 = vadd.f32 %v7672_v34, %v15721_v23  ;;  %v7761_v63 = vpop.f32.mrf.mxu3  ;;  %v8057_v18 = vadd.f32 %v15659_v44, %v8024_v41 }
 0x946   : > { %v7762_v16 = vadd.f32 %v7761_v63, %v7673_v42  ;;  %v7805_v62 = vpop.f32.mrf.mxu0  ;;  %v7894_v33 = vpop.f32.mrf.mxu1  ;;  %v8153_v59 = vmax.f32 %v8057_v18, 0.0  ;;  %v16538_v42 = vld [vmem:[#allocation26_spill] sm:$0xff] }
 0x947   : > { %v7806_v28 = vadd.f32 %v7805_v62, %v16537_v2 }
 0x948   : > { %v7988_v0 = vpack.c.bf16 %v7762_v16, %v7762_v16  ;;  %8268 = vmatmul.bf16.gmra.mxu2 %v15740_v52  ;;  %v11059_v52 = vld [vmem:[%s16422_s23 + $0x30] sm:$0xff] }
 0x949   : > { %v15861_v32 = vadd.f32 %v7894_v33, %v7806_v28  ;;  %8980 = vmatpush.bf16.msrb.mxu0 %v11059_v52 }
 0x94a   : > { %v8025_v38 = vunpack.c.l.bf16 %v7988_v0 }
 0x94b   : > { %v7675_v58 = vpop.f32.mrf.mxu2 }
 0x94c   : > { %v8058_v20 = vadd.f32 %v15659_v44, %v8025_v38  ;;  %v7676_v23 = vadd.f32 %v7675_v58, %v15733_v22  ;;  %v7764_v37 = vpop.f32.mrf.mxu3  ;;  %v11046_v58 = vld [vmem:[%s16420_s21 + $0x8] sm:$0xff] }
 0x94d   : > { %8618 = vmatpush.bf16.msrb.mxu3 %v11046_v58 }
 0x94e   : > { %v8154_v56 = vmax.f32 %v8058_v20, 0.0  ;;  %v7765_v24 = vadd.f32 %v7764_v37, %v7676_v23  ;;  %v7808_v26 = vpop.f32.mrf.mxu0  ;;  %v7897_v34 = vpop.f32.mrf.mxu1  ;;  %v16539_v20 = vld [vmem:[#allocation9_spill] sm:$0xff] }
 0x94f   : > { %v7809_v63 = vadd.f32 %v7808_v26, %v16538_v42 }
 0x950   : > { %v15870_v41 = vpack.c.bf16 %v8154_v56, %v8153_v59  ;;  %v7989_v22 = vpack.c.bf16 %v7765_v24, %v7765_v24 }
 0x951   : > { %v15872_v16 = vadd.f32 %v7897_v34, %v7809_v63  ;;  %7847 = vmatmul.bf16.gmra.mxu0 %v15444_v21  ;;  %7936 = vmatmul.bf16.gmra.mxu1 %v15446_v4 }
 0x952   : > { %v8026_v28 = vunpack.c.l.bf16 %v7989_v22 }
 0x953   : > { %v7677_v62 = vpop.f32.mrf.mxu2 }
 0x954   : > { %v7678_v33 = vadd.f32 %v7677_v62, %v15745_v1  ;;  %v7766_v2 = vpop.f32.mrf.mxu3  ;;  %v8059_v4 = vadd.f32 %v15659_v44, %v8026_v28  ;;  %v16540_v62 = vld [vmem:[#allocation10_spill] sm:$0xff] }
 0x956   : > { %v7767_v0 = vadd.f32 %v7766_v2, %v7678_v33  ;;  %v7810_v18 = vpop.f32.mrf.mxu0  ;;  %v7899_v38 = vpop.f32.mrf.mxu1  ;;  %v8155_v34 = vmax.f32 %v8059_v4, 0.0 }
 0x957   : > { %v7811_v23 = vadd.f32 %v7810_v18, %v16539_v20 }
 0x958   : > { %v7990_v37 = vpack.c.bf16 %v7767_v0, %v7767_v0  ;;  %8273 = vmatmul.bf16.gmra.mxu2 %v15758_v19 }
 0x959   : > { %v15882_v21 = vadd.f32 %v7899_v38, %v7811_v23  ;;  %v16541_v23 = vld [vmem:[#allocation11_spill] sm:$0xff] }
 0x95a   : > { %v8027_v1 = vunpack.c.l.bf16 %v7990_v37 }
 0x95b   : > { %v7680_v59 = vpop.f32.mrf.mxu2 }
 0x95c   : > { %v8060_v56 = vadd.f32 %v15659_v44, %v8027_v1  ;;  %v7681_v24 = vadd.f32 %v7680_v59, %v15754_v8  ;;  %v7769_v26 = vpop.f32.mrf.mxu3 }
 0x95e   : > { %v8156_v52 = vmax.f32 %v8060_v56, 0.0  ;;  %v7770_v42 = vadd.f32 %v7769_v26, %v7681_v24  ;;  %v7813_v63 = vpop.f32.mrf.mxu0  ;;  %v7902_v22 = vpop.f32.mrf.mxu1 }
 0x95f   : > { %v7814_v33 = vadd.f32 %v7813_v63, %v16540_v62  ;;  %v11058_v63 = vld [vmem:[%s16422_s23 + $0x28] sm:$0xff] }
 0x960   : > { %v15888_v19 = vpack.c.bf16 %v8156_v52, %v8155_v34  ;;  %v7991_v28 = vpack.c.bf16 %v7770_v42, %v7770_v42  ;;  %8981 = vmatpush.bf16.msrb.mxu0 %v11058_v63 }
 0x961   : > { %v15890_v2 = vadd.f32 %v7902_v22, %v7814_v33  ;;  %7852 = vmatmul.bf16.gmra.mxu0 %v15468_v61  ;;  %7941 = vmatmul.bf16.gmra.mxu1 %v15470_v9 }
 0x962   : > { %v8028_v38 = vunpack.c.l.bf16 %v7991_v28 }
 0x963   : > { %v7682_v0 = vpop.f32.mrf.mxu2 }
 0x964   : > { %v7683_v8 = vadd.f32 %v7682_v0, %v15763_v25  ;;  %v7771_v18 = vpop.f32.mrf.mxu3  ;;  %v8061_v61 = vadd.f32 %v15659_v44, %v8028_v38 }
 0x966   : > { %v7772_v58 = vadd.f32 %v7771_v18, %v7683_v8  ;;  %v7815_v20 = vpop.f32.mrf.mxu0  ;;  %v7904_v1 = vpop.f32.mrf.mxu1  ;;  %v8157_v34 = vmax.f32 %v8061_v61, 0.0  ;;  %v11045_v8 = vld [vmem:[%s16420_s21] sm:$0xff] }
 0x967   : > { %v7816_v37 = vadd.f32 %v7815_v20, %v16541_v23  ;;  %8619 = vmatpush.bf16.msrb.mxu3 %v11045_v8 }
 0x968   : > { %v7992_v4 = vpack.c.bf16 %v7772_v58, %v7772_v58  ;;  %8278 = vmatmul.bf16.gmra.mxu2 %v15779_v53 }
 0x969   : > { %v15897_v59 = vadd.f32 %v7904_v1, %v7816_v37 }
 0x96a   : > { %v8029_v56 = vunpack.c.l.bf16 %v7992_v4 }
 0x96b   : > { %v7685_v9 = vpop.f32.mrf.mxu2 }
 0x96c   : > { %v8062_v24 = vadd.f32 %v15659_v44, %v8029_v56  ;;  %v7686_v25 = vadd.f32 %v7685_v9, %v15775_v15  ;;  %v7774_v26 = vpop.f32.mrf.mxu3 }
 0x96e   : > { %v8158_v52 = vmax.f32 %v8062_v24, 0.0  ;;  %v7775_v42 = vadd.f32 %v7774_v26, %v7686_v25 }
 0x970   : > { %v15905_v53 = vpack.c.bf16 %v8158_v52, %v8157_v34  ;;  %v7993_v22 = vpack.c.bf16 %v7775_v42, %v7775_v42 }
 0x971   : > { %7857 = vmatmul.bf16.gmra.mxu0 %v15495_v43  ;;  %7946 = vmatmul.bf16.gmra.mxu1 %v15497_v30 }
 0x972   : > { %v8030_v28 = vunpack.c.l.bf16 %v7993_v22 }
 0x973   : > { %v7687_v62 = vpop.f32.mrf.mxu2 }
 0x974   : > { %v7688_v33 = vadd.f32 %v7687_v62, %v15784_v7  ;;  %v7776_v15 = vpop.f32.mrf.mxu3  ;;  %v8063_v38 = vadd.f32 %v15659_v44, %v8030_v28 }
 0x976   : > { %v7777_v0 = vadd.f32 %v7776_v15, %v7688_v33  ;;  %v8159_v23 = vmax.f32 %v8063_v38, 0.0 }
 0x978   : > { %v7994_v18 = vpack.c.bf16 %v7777_v0, %v7777_v0  ;;  %8283 = vmatmul.bf16.gmra.mxu2 %v15797_v27 }
 0x97a   : > { %v8031_v43 = vunpack.c.l.bf16 %v7994_v18  ;;  %v8366_v18 = vld [vmem:[%s16419_s20] sm:$0x1] }
 0x97b   : > { %v7690_v58 = vpop.f32.mrf.mxu2 }
 0x97c   : > { %v8064_v30 = vadd.f32 %v15659_v44, %v8031_v43  ;;  %v7691_v20 = vadd.f32 %v7690_v58, %v15793_v57  ;;  %v7779_v7 = vpop.f32.mrf.mxu3 }
 0x97e   : > { %v8160_v37 = vmax.f32 %v8064_v30, 0.0  ;;  %v7780_v4 = vadd.f32 %v7779_v7, %v7691_v20 }
 0x980   : > { %v15917_v1 = vpack.c.bf16 %v8160_v37, %v8159_v23  ;;  %v7995_v27 = vpack.c.bf16 %v7780_v4, %v7780_v4 }
 0x981   : > { %7862 = vmatmul.bf16.gmra.mxu0 %v15549_v11  ;;  %7951 = vmatmul.bf16.gmra.mxu1 %v15551_v47  ;;  %v11057_v47 = vld [vmem:[%s16422_s23 + $0x20] sm:$0xff] }
 0x982   : > { %v8032_v24 = vunpack.c.l.bf16 %v7995_v27  ;;  %8982 = vmatpush.bf16.msrb.mxu0 %v11057_v47 }
 0x983   : > { %v7692_v61 = vpop.f32.mrf.mxu2 }
 0x984   : > { %v7693_v56 = vadd.f32 %v7692_v61, %v15802_v51  ;;  %v7781_v9 = vpop.f32.mrf.mxu3  ;;  %v8065_v57 = vadd.f32 %v15659_v44, %v8032_v24 }
 0x986   : > { %v7782_v25 = vadd.f32 %v7781_v9, %v7693_v56  ;;  %v8161_v51 = vmax.f32 %v8065_v57, 0.0 }
 0x988   : > { %v7996_v26 = vpack.c.bf16 %v7782_v25, %v7782_v25  ;;  %8288 = vmatmul.bf16.gmra.mxu2 %v15817_v54 }
 0x98a   : > { %v8033_v34 = vunpack.c.l.bf16 %v7996_v26 }
 0x98b   : > { %v7695_v52 = vpop.f32.mrf.mxu2 }
 0x98c   : > { %v8066_v42 = vadd.f32 %v15659_v44, %v8033_v34  ;;  %v7696_v11 = vadd.f32 %v7695_v52, %v15813_v10  ;;  %v7784_v63 = vpop.f32.mrf.mxu3 }
 0x98e   : > { %v8162_v22 = vmax.f32 %v8066_v42, 0.0  ;;  %v7785_v62 = vadd.f32 %v7784_v63, %v7696_v11 }
 0x990   : > { %v15929_v33 = vpack.c.bf16 %v8162_v22, %v8161_v51  ;;  %v7997_v54 = vpack.c.bf16 %v7785_v62, %v7785_v62 }
 0x991   : > { %7867 = vmatmul.bf16.gmra.mxu0 %v15618_v14  ;;  %7956 = vmatmul.bf16.gmra.mxu1 %v15620_v35  ;;  %v8368_v14 = vpack.i.b16 %v8366_v18, %v8366_v18 }
 0x992   : > { %v8034_v0 = vunpack.c.l.bf16 %v7997_v54 }
 0x993   : > { %v7697_v15 = vpop.f32.mrf.mxu2  ;;  %v8370_v23 = vperm.slane %v8368_v14, 0 }
 0x994   : > { %v7698_v28 = vadd.f32 %v7697_v15, %v15822_v13  ;;  %v7786_v10 = vpop.f32.mrf.mxu3  ;;  %v8067_v43 = vadd.f32 %v15659_v44, %v8034_v0 }
 0x995   : > { %v15944_v27 = vunpack.c.l.bf16 %v8370_v23 }
 0x996   : > { %v7787_v8 = vadd.f32 %v7786_v10, %v7698_v28  ;;  %v8163_v20 = vmax.f32 %v8067_v43, 0.0 }
 0x998   : > { %v7998_v38 = vpack.c.bf16 %v7787_v8, %v7787_v8  ;;  %8293 = vmatmul.bf16.gmra.mxu2 %v15834_v60 }
 0x99a   : > { %v8035_v58 = vunpack.c.l.bf16 %v7998_v38 }
 0x99b   : > { %v8254_v30 = vpop.f32.mrf.mxu2 }
 0x99c   : > { %v8068_v35 = vadd.f32 %v15659_v44, %v8035_v58  ;;  %v8334_v13 = vpack.c.bf16 %v8254_v30, %v8254_v30 }
 0x99e   : > { %v8164_v7 = vmax.f32 %v8068_v35, 0.0  ;;  %v8371_v4 = vunpack.c.l.bf16 %v8334_v13 }
 0x9a0   : > { %v15940_v37 = vpack.c.bf16 %v8164_v7, %v8163_v20  ;;  %v8404_v56 = vadd.f32 %v15944_v27, %v8371_v4  ;;  %v15961_v20 = vpop.f32.mrf.mxu0 }
 0x9a1   : > { %7872 = vmatmul.bf16.gmra.mxu0 %v15646_v49  ;;  %7961 = vmatmul.bf16.gmra.mxu1 %v15648_v5  ;;  %v11056_v49 = vld [vmem:[%s16422_s23 + $0x18] sm:$0xff] }
 0x9a2   : > { %v8500_v24 = vmax.f32 %v8404_v56, 0.0  ;;  %8983 = vmatpush.bf16.msrb.mxu0 %v11056_v49 }
 0x9a3   : > { %v8256_v60 = vpop.f32.mrf.mxu2 }
 0x9a4   : > { %v8335_v61 = vpack.c.bf16 %v8256_v60, %v8256_v60 }
 0x9a6   : > { %v8372_v9 = vunpack.c.l.bf16 %v8335_v61 }
 0x9a8   : > { %v8405_v44 = vadd.f32 %v15944_v27, %v8372_v9  ;;  %8298 = vmatmul.bf16.gmra.mxu2 %v15852_v55 }
 0x9aa   : > { %v8501_v25 = vmax.f32 %v8405_v44, 0.0  ;;  %v15966_v44 = vpop.f32.mrf.mxu0 }
 0x9ab   : > { %v8259_v26 = vpop.f32.mrf.mxu2 }
 0x9ac   : > { %v8532_v5 = vpack.c.bf16 %v8501_v25, %v8500_v24  ;;  %v8336_v57 = vpack.c.bf16 %v8259_v26, %v8259_v26 }
 0x9ae   : > { %8620 = vmatmul.bf16.vlgmr.msrb.gmra.mxu3 %v8532_v5  ;;  %v8373_v34 = vunpack.c.l.bf16 %v8336_v57 }
 0x9b0   : > { %v8406_v11 = vadd.f32 %v15944_v27, %v8373_v34 }
 0x9b2   : > { %v8502_v55 = vmax.f32 %v8406_v11, 0.0  ;;  %v15969_v34 = vpop.f32.mrf.mxu0  ;;  %v11054_v11 = vld [vmem:[%s16422_s23 + $0x8] sm:$0xff] }
 0x9b3   : > { %v8261_v52 = vpop.f32.mrf.mxu2 }
 0x9b4   : > { %v8337_v42 = vpack.c.bf16 %v8261_v52, %v8261_v52 }
 0x9b6   : > { %v8374_v63 = vunpack.c.l.bf16 %v8337_v42 }
 0x9b8   : > { %v8407_v47 = vadd.f32 %v15944_v27, %v8374_v63  ;;  %8303 = vmatmul.bf16.gmra.mxu2 %v15870_v41  ;;  %v11055_v41 = vld [vmem:[%s16422_s23 + $0x10] sm:$0xff] }
 0x9b9   : > { %8984 = vmatpush.bf16.msrb.mxu0 %v11055_v41 }
 0x9ba   : > { %v8503_v51 = vmax.f32 %v8407_v47, 0.0 }
 0x9bb   : > { %v8264_v22 = vpop.f32.mrf.mxu2 }
 0x9bc   : > { %v8533_v62 = vpack.c.bf16 %v8503_v51, %v8502_v55  ;;  %v8338_v54 = vpack.c.bf16 %v8264_v22, %v8264_v22  ;;  %v15976_v51 = vpop.f32.mrf.mxu0 }
 0x9bd   : > { %8985 = vmatpush.bf16.msrb.mxu0 %v11054_v11 }
 0x9be   : > { %8625 = vmatmul.bf16.gmra.mxu3 %v8533_v62  ;;  %v8375_v15 = vunpack.c.l.bf16 %v8338_v54 }
 0x9c0   : > { %v8408_v0 = vadd.f32 %v15944_v27, %v8375_v15 }
 0x9c2   : > { %v8504_v38 = vmax.f32 %v8408_v0, 0.0 }
 0x9c3   : > { %v8266_v28 = vpop.f32.mrf.mxu2 }
 0x9c4   : > { %v8339_v10 = vpack.c.bf16 %v8266_v28, %v8266_v28 }
 0x9c6   : > { %v8376_v8 = vunpack.c.l.bf16 %v8339_v10 }
 0x9c8   : > { %v8409_v18 = vadd.f32 %v15944_v27, %v8376_v8  ;;  %8308 = vmatmul.bf16.gmra.mxu2 %v15888_v19  ;;  %v15981_v8 = vpop.f32.mrf.mxu0 }
 0x9ca   : > { %v8505_v43 = vmax.f32 %v8409_v18, 0.0 }
 0x9cb   : > { %v8269_v58 = vpop.f32.mrf.mxu2 }
 0x9cc   : > { %v8534_v14 = vpack.c.bf16 %v8505_v43, %v8504_v38  ;;  %v8340_v30 = vpack.c.bf16 %v8269_v58, %v8269_v58 }
 0x9ce   : > { %8630 = vmatmul.bf16.gmra.mxu3 %v8534_v14  ;;  %v8377_v35 = vunpack.c.l.bf16 %v8340_v30 }
 0x9d0   : > { %v8410_v23 = vadd.f32 %v15944_v27, %v8377_v35  ;;  %v15983_v30 = vpop.f32.mrf.mxu0 }
 0x9d2   : > { %v8506_v60 = vmax.f32 %v8410_v23, 0.0 }
 0x9d3   : > { %v8271_v7 = vpop.f32.mrf.mxu2 }
 0x9d4   : > { %v8341_v13 = vpack.c.bf16 %v8271_v7, %v8271_v7 }
 0x9d6   : > { %v8378_v4 = vunpack.c.l.bf16 %v8341_v13 }
 0x9d8   : > { %v8411_v19 = vadd.f32 %v15944_v27, %v8378_v4  ;;  %8313 = vmatmul.bf16.gmra.mxu2 %v15905_v53  ;;  %v11053_v4 = vld [vmem:[%s16422_s23] sm:$0xff] }
 0x9d9   : > { %8986 = vmatpush.bf16.msrb.mxu0 %v11053_v4 }
 0x9da   : > { %v8507_v61 = vmax.f32 %v8411_v19, 0.0 }
 0x9db   : > { %v8274_v56 = vpop.f32.mrf.mxu2 }
 0x9dc   : > { %v8535_v9 = vpack.c.bf16 %v8507_v61, %v8506_v60  ;;  %v8342_v24 = vpack.c.bf16 %v8274_v56, %v8274_v56  ;;  %v15991_v56 = vpop.f32.mrf.mxu0 }
 0x9de   : > { %8635 = vmatmul.bf16.gmra.mxu3 %v8535_v9  ;;  %v8379_v25 = vunpack.c.l.bf16 %v8342_v24 }
 0x9e0   : > { %v8412_v5 = vadd.f32 %v15944_v27, %v8379_v25 }
 0x9e2   : > { %v8508_v53 = vmax.f32 %v8412_v5, 0.0 }
 0x9e3   : > { %v8276_v49 = vpop.f32.mrf.mxu2 }
 0x9e4   : > { %v8343_v26 = vpack.c.bf16 %v8276_v49, %v8276_v49  ;;  %v15995_v5 = vpop.f32.mrf.mxu0 }
 0x9e6   : > { %v8380_v57 = vunpack.c.l.bf16 %v8343_v26 }
 0x9e8   : > { %v8413_v52 = vadd.f32 %v15944_v27, %v8380_v57  ;;  %8318 = vmatmul.bf16.gmra.mxu2 %v15917_v1 }
 0x9ea   : > { %v8509_v42 = vmax.f32 %v8413_v52, 0.0 }
 0x9eb   : > { %v8279_v63 = vpop.f32.mrf.mxu2 }
 0x9ec   : > { %v8536_v47 = vpack.c.bf16 %v8509_v42, %v8508_v53  ;;  %v8344_v55 = vpack.c.bf16 %v8279_v63, %v8279_v63 }
 0x9ee   : > { %8640 = vmatmul.bf16.gmra.mxu3 %v8536_v47  ;;  %v8381_v22 = vunpack.c.l.bf16 %v8344_v55  ;;  %v15997_v47 = vpop.f32.mrf.mxu0 }
 0x9f0   : > { %v8414_v15 = vadd.f32 %v15944_v27, %v8381_v22 }
 0x9f2   : > { %v8510_v10 = vmax.f32 %v8414_v15, 0.0 }
 0x9f3   : > { %v8281_v62 = vpop.f32.mrf.mxu2 }
 0x9f4   : > { %v8345_v54 = vpack.c.bf16 %v8281_v62, %v8281_v62 }
 0x9f6   : > { %v8382_v28 = vunpack.c.l.bf16 %v8345_v54 }
 0x9f8   : > { %v8415_v1 = vadd.f32 %v15944_v27, %v8382_v28  ;;  %8323 = vmatmul.bf16.gmra.mxu2 %v15929_v33 }
 0x9fa   : > { %v8511_v0 = vmax.f32 %v8415_v1, 0.0 }
 0x9fb   : > { %v8284_v18 = vpop.f32.mrf.mxu2 }
 0x9fc   : > { %v8537_v38 = vpack.c.bf16 %v8511_v0, %v8510_v10  ;;  %v8346_v43 = vpack.c.bf16 %v8284_v18, %v8284_v18  ;;  %v16001_v18 = vpop.f32.mrf.mxu0 }
 0x9fe   : > { %8645 = vmatmul.bf16.gmra.mxu3 %v8537_v38  ;;  %v8383_v41 = vunpack.c.l.bf16 %v8346_v43  ;;  %v8733_v38 = vld [vmem:[%s16421_s22] sm:$0x1] }
 0xa00   : > { %v8416_v35 = vadd.f32 %v15944_v27, %v8383_v41  ;;  %v8735_v41 = vpack.i.b16 %v8733_v38, %v8733_v38 }
 0xa02   : > { %v8512_v33 = vmax.f32 %v8416_v35, 0.0 }
 0xa03   : > { %v8286_v58 = vpop.f32.mrf.mxu2 }
 0xa04   : > { %v8347_v14 = vpack.c.bf16 %v8286_v58, %v8286_v58 }
 0xa06   : > { %v8384_v7 = vunpack.c.l.bf16 %v8347_v14 }
 0xa08   : > { %v8417_v13 = vadd.f32 %v15944_v27, %v8384_v7  ;;  %8328 = vmatmul.bf16.gmra.mxu2 %v15940_v37 }
 0xa0a   : > { %v8513_v23 = vmax.f32 %v8417_v13, 0.0  ;;  %v8737_v13 = vperm.slane %v8735_v41, 0 }
 0xa0b   : > { %v8289_v19 = vpop.f32.mrf.mxu2 }
 0xa0c   : > { %v8538_v60 = vpack.c.bf16 %v8513_v23, %v8512_v33  ;;  %v8348_v61 = vpack.c.bf16 %v8289_v19, %v8289_v19  ;;  %v16007_v19 = vpop.f32.mrf.mxu0 }
 0xa0e   : > { %8650 = vmatmul.bf16.gmra.mxu3 %v8538_v60  ;;  %v8385_v9 = vunpack.c.l.bf16 %v8348_v61  ;;  %v16009_v61 = vunpack.c.l.bf16 %v8737_v13 }
 0xa10   : > { %v8418_v49 = vadd.f32 %v15944_v27, %v8385_v9 }
 0xa12   : > { %v8514_v57 = vmax.f32 %v8418_v49, 0.0 }
 0xa13   : > { %v8291_v24 = vpop.f32.mrf.mxu2 }
 0xa14   : > { %v8349_v25 = vpack.c.bf16 %v8291_v24, %v8291_v24 }
 0xa16   : > { %v8386_v26 = vunpack.c.l.bf16 %v8349_v25 }
 0xa18   : > { %v8419_v37 = vadd.f32 %v15944_v27, %v8386_v26 }
 0xa1a   : > { %v8515_v52 = vmax.f32 %v8419_v37, 0.0 }
 0xa1b   : > { %v8294_v53 = vpop.f32.mrf.mxu2 }
 0xa1c   : > { %v8539_v42 = vpack.c.bf16 %v8515_v52, %v8514_v57  ;;  %v8350_v11 = vpack.c.bf16 %v8294_v53, %v8294_v53 }
 0xa1e   : > { %8655 = vmatmul.bf16.gmra.mxu3 %v8539_v42  ;;  %v8387_v63 = vunpack.c.l.bf16 %v8350_v11 }
 0xa20   : > { %v8420_v62 = vadd.f32 %v15944_v27, %v8387_v63 }
 0xa22   : > { %v8516_v28 = vmax.f32 %v8420_v62, 0.0 }
 0xa23   : > { %v8296_v55 = vpop.f32.mrf.mxu2 }
 0xa24   : > { %v8351_v22 = vpack.c.bf16 %v8296_v55, %v8296_v55 }
 0xa26   : > { %v8388_v54 = vunpack.c.l.bf16 %v8351_v22  ;;  %v16014_v22 = vpop.f32.mrf.mxu0 }
 0xa28   : > { %v8421_v15 = vadd.f32 %v15944_v27, %v8388_v54 }
 0xa2a   : > { %v8517_v1 = vmax.f32 %v8421_v15, 0.0 }
 0xa2b   : > { %v8299_v10 = vpop.f32.mrf.mxu2 }
 0xa2c   : > { %v8540_v0 = vpack.c.bf16 %v8517_v1, %v8516_v28  ;;  %v8352_v43 = vpack.c.bf16 %v8299_v10, %v8299_v10 }
 0xa2e   : > { %8660 = vmatmul.bf16.gmra.mxu3 %v8540_v0  ;;  %v8389_v14 = vunpack.c.l.bf16 %v8352_v43  ;;  %v16018_v13 = vpop.f32.mrf.mxu0 }
 0xa30   : > { %v8422_v23 = vadd.f32 %v15944_v27, %v8389_v14 }
 0xa31   : > { %v8621_v58 = vpop.f32.mrf.mxu3 }
 0xa32   : > { %v8701_v7 = vpack.c.bf16 %v8621_v58, %v8621_v58  ;;  %v8518_v25 = vmax.f32 %v8422_v23, 0.0 }
 0xa33   : > { %v8301_v35 = vpop.f32.mrf.mxu2 }
 0xa34   : > { %v8353_v33 = vpack.c.bf16 %v8301_v35, %v8301_v35  ;;  %v8738_v60 = vunpack.c.l.bf16 %v8701_v7 }
 0xa36   : > { %v8390_v4 = vunpack.c.l.bf16 %v8353_v33  ;;  %v8771_v57 = vadd.f32 %v16009_v61, %v8738_v60 }
 0xa38   : > { %v8423_v9 = vadd.f32 %v15944_v27, %v8390_v4  ;;  %v8867_v63 = vmax.f32 %v8771_v57, 0.0 }
 0xa39   : > { %v8623_v24 = vpop.f32.mrf.mxu3 }
 0xa3a   : > { %v8519_v49 = vmax.f32 %v8423_v9, 0.0  ;;  %v8702_v26 = vpack.c.bf16 %v8623_v24, %v8623_v24 }
 0xa3b   : > { %v8304_v37 = vpop.f32.mrf.mxu2 }
 0xa3c   : > { %v8739_v52 = vunpack.c.l.bf16 %v8702_v26  ;;  %v8541_v53 = vpack.c.bf16 %v8519_v49, %v8518_v25  ;;  %v8354_v11 = vpack.c.bf16 %v8304_v37, %v8304_v37 }
 0xa3e   : > { %v8772_v42 = vadd.f32 %v16009_v61, %v8739_v52  ;;  %8665 = vmatmul.bf16.gmra.mxu3 %v8541_v53  ;;  %v8391_v15 = vunpack.c.l.bf16 %v8354_v11  ;;  %v16022_v11 = vpop.f32.mrf.mxu0 }
 0xa40   : > { %v8868_v55 = vmax.f32 %v8772_v42, 0.0  ;;  %v8424_v0 = vadd.f32 %v15944_v27, %v8391_v15 }
 0xa41   : > { %v8626_v62 = vpop.f32.mrf.mxu3 }
 0xa42   : > { %v8899_v54 = vpack.c.bf16 %v8868_v55, %v8867_v63  ;;  %v8703_v1 = vpack.c.bf16 %v8626_v62, %v8626_v62  ;;  %v8520_v14 = vmax.f32 %v8424_v0, 0.0 }
 0xa43   : > { %v8306_v28 = vpop.f32.mrf.mxu2 }
 0xa44   : > { %v8355_v10 = vpack.c.bf16 %v8306_v28, %v8306_v28  ;;  %8987 = vmatmul.bf16.vlgmr.msrb.gmra.mxu0 %v8899_v54  ;;  %v8740_v43 = vunpack.c.l.bf16 %v8703_v1 }
 0xa46   : > { %v8392_v38 = vunpack.c.l.bf16 %v8355_v10  ;;  %v8773_v23 = vadd.f32 %v16009_v61, %v8740_v43 }
 0xa48   : > { %v8425_v41 = vadd.f32 %v15944_v27, %v8392_v38  ;;  %v8869_v25 = vmax.f32 %v8773_v23, 0.0 }
 0xa49   : > { %v8628_v58 = vpop.f32.mrf.mxu3 }
 0xa4a   : > { %v8521_v35 = vmax.f32 %v8425_v41, 0.0  ;;  %v8704_v7 = vpack.c.bf16 %v8628_v58, %v8628_v58 }
 0xa4b   : > { %v8309_v33 = vpop.f32.mrf.mxu2 }
 0xa4c   : > { %v8741_v4 = vunpack.c.l.bf16 %v8704_v7  ;;  %v8542_v60 = vpack.c.bf16 %v8521_v35, %v8520_v14  ;;  %v8356_v24 = vpack.c.bf16 %v8309_v33, %v8309_v33  ;;  %v16028_v35 = vpop.f32.mrf.mxu0 }
 0xa4e   : > { %v8774_v9 = vadd.f32 %v16009_v61, %v8741_v4  ;;  %8670 = vmatmul.bf16.gmra.mxu3 %v8542_v60  ;;  %v8393_v37 = vunpack.c.l.bf16 %v8356_v24 }
 0xa50   : > { %v8870_v49 = vmax.f32 %v8774_v9, 0.0  ;;  %v8426_v63 = vadd.f32 %v15944_v27, %v8393_v37 }
 0xa51   : > { %v8631_v26 = vpop.f32.mrf.mxu3 }
 0xa52   : > { %v8900_v57 = vpack.c.bf16 %v8870_v49, %v8869_v25  ;;  %v8705_v53 = vpack.c.bf16 %v8631_v26, %v8631_v26  ;;  %v8522_v28 = vmax.f32 %v8426_v63, 0.0 }
 0xa53   : > { %v8311_v52 = vpop.f32.mrf.mxu2 }
 0xa54   : > { %v8357_v42 = vpack.c.bf16 %v8311_v52, %v8311_v52  ;;  %8992 = vmatmul.bf16.gmra.mxu0 %v8900_v57  ;;  %v8742_v62 = vunpack.c.l.bf16 %v8705_v53  ;;  %v16032_v52 = vpop.f32.mrf.mxu0 }
 0xa56   : > { %v8394_v55 = vunpack.c.l.bf16 %v8357_v42  ;;  %v8775_v38 = vadd.f32 %v16009_v61, %v8742_v62 }
 0xa58   : > { %v8427_v54 = vadd.f32 %v15944_v27, %v8394_v55  ;;  %v8871_v7 = vmax.f32 %v8775_v38, 0.0 }
 0xa59   : > { %v8633_v15 = vpop.f32.mrf.mxu3 }
 0xa5a   : > { %v8523_v1 = vmax.f32 %v8427_v54, 0.0  ;;  %v8706_v10 = vpack.c.bf16 %v8633_v15, %v8633_v15 }
 0xa5b   : > { %v8314_v0 = vpop.f32.mrf.mxu2 }
 0xa5c   : > { %v8743_v43 = vunpack.c.l.bf16 %v8706_v10  ;;  %v8543_v41 = vpack.c.bf16 %v8523_v1, %v8522_v28  ;;  %v8358_v14 = vpack.c.bf16 %v8314_v0, %v8314_v0 }
 0xa5e   : > { %v8776_v58 = vadd.f32 %v16009_v61, %v8743_v43  ;;  %8675 = vmatmul.bf16.gmra.mxu3 %v8543_v41  ;;  %v8395_v4 = vunpack.c.l.bf16 %v8358_v14  ;;  %v16036_v14 = vpop.f32.mrf.mxu0 }
 0xa60   : > { %v8872_v33 = vmax.f32 %v8776_v58, 0.0  ;;  %v8428_v49 = vadd.f32 %v15944_v27, %v8395_v4 }
 0xa61   : > { %v8636_v23 = vpop.f32.mrf.mxu3 }
 0xa62   : > { %v8901_v60 = vpack.c.bf16 %v8872_v33, %v8871_v7  ;;  %v8707_v24 = vpack.c.bf16 %v8636_v23, %v8636_v23  ;;  %v8524_v42 = vmax.f32 %v8428_v49, 0.0 }
 0xa63   : > { %v8316_v9 = vpop.f32.mrf.mxu2 }
 0xa64   : > { %v8359_v25 = vpack.c.bf16 %v8316_v9, %v8316_v9  ;;  %8997 = vmatmul.bf16.gmra.mxu0 %v8901_v60  ;;  %v8744_v37 = vunpack.c.l.bf16 %v8707_v24 }
 0xa66   : > { %v8396_v26 = vunpack.c.l.bf16 %v8359_v25  ;;  %v8777_v54 = vadd.f32 %v16009_v61, %v8744_v37 }
 0xa68   : > { %v8429_v57 = vadd.f32 %v15944_v27, %v8396_v26  ;;  %v8873_v0 = vmax.f32 %v8777_v54, 0.0 }
 0xa69   : > { %v8638_v53 = vpop.f32.mrf.mxu3 }
 0xa6a   : > { %v8525_v63 = vmax.f32 %v8429_v57, 0.0  ;;  %v8708_v55 = vpack.c.bf16 %v8638_v53, %v8638_v53 }
 0xa6b   : > { %v8319_v62 = vpop.f32.mrf.mxu2 }
 0xa6c   : > { %v8745_v15 = vunpack.c.l.bf16 %v8708_v55  ;;  %v8544_v28 = vpack.c.bf16 %v8525_v63, %v8524_v42  ;;  %v8360_v10 = vpack.c.bf16 %v8319_v62, %v8319_v62  ;;  %v16041_v55 = vpop.f32.mrf.mxu0 }
 0xa6e   : > { %v8778_v1 = vadd.f32 %v16009_v61, %v8745_v15  ;;  %8680 = vmatmul.bf16.gmra.mxu3 %v8544_v28  ;;  %v8397_v41 = vunpack.c.l.bf16 %v8360_v10 }
 0xa70   : > { %v8874_v38 = vmax.f32 %v8778_v1, 0.0  ;;  %v8430_v4 = vadd.f32 %v15944_v27, %v8397_v41 }
 0xa71   : > { %v8641_v43 = vpop.f32.mrf.mxu3 }
 0xa72   : > { %v8902_v58 = vpack.c.bf16 %v8874_v38, %v8873_v0  ;;  %v8709_v33 = vpack.c.bf16 %v8641_v43, %v8641_v43  ;;  %v8526_v49 = vmax.f32 %v8430_v4, 0.0 }
 0xa73   : > { %v8321_v7 = vpop.f32.mrf.mxu2 }
 0xa74   : > { %v8361_v23 = vpack.c.bf16 %v8321_v7, %v8321_v7  ;;  %9002 = vmatmul.bf16.gmra.mxu0 %v8902_v58  ;;  %v8746_v9 = vunpack.c.l.bf16 %v8709_v33  ;;  %v16045_v33 = vpop.f32.mrf.mxu0 }
 0xa76   : > { %v8398_v60 = vunpack.c.l.bf16 %v8361_v23  ;;  %v8779_v53 = vadd.f32 %v16009_v61, %v8746_v9 }
 0xa78   : > { %v8431_v24 = vadd.f32 %v15944_v27, %v8398_v60  ;;  %v8875_v15 = vmax.f32 %v8779_v53, 0.0 }
 0xa79   : > { %v8643_v25 = vpop.f32.mrf.mxu3 }
 0xa7a   : > { %v8527_v26 = vmax.f32 %v8431_v24, 0.0  ;;  %v8710_v37 = vpack.c.bf16 %v8643_v25, %v8643_v25 }
 0xa7b   : > { %v8324_v57 = vpop.f32.mrf.mxu2 }
 0xa7c   : > { %v8747_v42 = vunpack.c.l.bf16 %v8710_v37  ;;  %v8545_v63 = vpack.c.bf16 %v8527_v26, %v8526_v49  ;;  %v8362_v54 = vpack.c.bf16 %v8324_v57, %v8324_v57 }
 0xa7e   : > { %v8780_v62 = vadd.f32 %v16009_v61, %v8747_v42  ;;  %8685 = vmatmul.bf16.gmra.mxu3 %v8545_v63  ;;  %v8399_v10 = vunpack.c.l.bf16 %v8362_v54  ;;  %v16050_v54 = vpop.f32.mrf.mxu0 }
 0xa80   : > { %v8876_v28 = vmax.f32 %v8780_v62, 0.0  ;;  %v8432_v58 = vadd.f32 %v15944_v27, %v8399_v10 }
 0xa81   : > { %v8646_v1 = vpop.f32.mrf.mxu3 }
 0xa82   : > { %v8903_v0 = vpack.c.bf16 %v8876_v28, %v8875_v15  ;;  %v8711_v43 = vpack.c.bf16 %v8646_v1, %v8646_v1  ;;  %v8528_v9 = vmax.f32 %v8432_v58, 0.0 }
 0xa83   : > { %v8326_v38 = vpop.f32.mrf.mxu2 }
 0xa84   : > { %v8363_v41 = vpack.c.bf16 %v8326_v38, %v8326_v38  ;;  %9007 = vmatmul.bf16.gmra.mxu0 %v8903_v0  ;;  %v8748_v23 = vunpack.c.l.bf16 %v8711_v43 }
 0xa86   : > { %v8400_v7 = vunpack.c.l.bf16 %v8363_v41  ;;  %v8781_v26 = vadd.f32 %v16009_v61, %v8748_v23 }
 0xa88   : > { %v8433_v4 = vadd.f32 %v15944_v27, %v8400_v7  ;;  %v8877_v63 = vmax.f32 %v8781_v26, 0.0 }
 0xa89   : > { %v8648_v60 = vpop.f32.mrf.mxu3 }
 0xa8a   : > { %v8529_v24 = vmax.f32 %v8433_v4, 0.0  ;;  %v8712_v25 = vpack.c.bf16 %v8648_v60, %v8648_v60 }
 0xa8b   : > { %v8329_v49 = vpop.f32.mrf.mxu2 }
 0xa8c   : > { %v8749_v37 = vunpack.c.l.bf16 %v8712_v25  ;;  %v8546_v57 = vpack.c.bf16 %v8529_v24, %v8528_v9  ;;  %v8364_v42 = vpack.c.bf16 %v8329_v49, %v8329_v49  ;;  %v16054_v24 = vpop.f32.mrf.mxu0 }
 0xa8e   : > { %v8782_v53 = vadd.f32 %v16009_v61, %v8749_v37  ;;  %8690 = vmatmul.bf16.gmra.mxu3 %v8546_v57  ;;  %v8401_v28 = vunpack.c.l.bf16 %v8364_v42 }
 0xa90   : > { %v8878_v62 = vmax.f32 %v8782_v53, 0.0  ;;  %v8434_v43 = vadd.f32 %v15944_v27, %v8401_v28 }
 0xa91   : > { %v8651_v15 = vpop.f32.mrf.mxu3 }
 0xa92   : > { %v8904_v1 = vpack.c.bf16 %v8878_v62, %v8877_v63  ;;  %v8713_v0 = vpack.c.bf16 %v8651_v15, %v8651_v15  ;;  %v8530_v4 = vmax.f32 %v8434_v43, 0.0 }
 0xa93   : > { %v8331_v10 = vpop.f32.mrf.mxu2 }
 0xa94   : > { %v8365_v38 = vpack.c.bf16 %v8331_v10, %v8331_v10  ;;  %9012 = vmatmul.bf16.gmra.mxu0 %v8904_v1  ;;  %v8750_v58 = vunpack.c.l.bf16 %v8713_v0 }
 0xa96   : > { %v8402_v41 = vunpack.c.l.bf16 %v8365_v38  ;;  %v8783_v25 = vadd.f32 %v16009_v61, %v8750_v58 }
 0xa98   : > { %v8435_v7 = vadd.f32 %v15944_v27, %v8402_v41  ;;  %v8879_v57 = vmax.f32 %v8783_v25, 0.0  ;;  %v16058_v27 = vpop.f32.mrf.mxu0 }
 0xa99   : > { %v8653_v23 = vpop.f32.mrf.mxu3 }
 0xa9a   : > { %v8531_v60 = vmax.f32 %v8435_v7, 0.0  ;;  %v8714_v9 = vpack.c.bf16 %v8653_v23, %v8653_v23 }
 0xa9c   : > { %v8751_v49 = vunpack.c.l.bf16 %v8714_v9  ;;  %v8547_v26 = vpack.c.bf16 %v8531_v60, %v8530_v4 }
 0xa9e   : > { %v8784_v37 = vadd.f32 %v16009_v61, %v8751_v49  ;;  %8695 = vmatmul.bf16.gmra.mxu3 %v8547_v26 }
 0xaa0   : > { %v8880_v53 = vmax.f32 %v8784_v37, 0.0  ;;  %v16062_v43 = vpop.f32.mrf.mxu0 }
 0xaa1   : > { %v8656_v42 = vpop.f32.mrf.mxu3 }
 0xaa2   : > { %v8905_v63 = vpack.c.bf16 %v8880_v53, %v8879_v57  ;;  %v8715_v62 = vpack.c.bf16 %v8656_v42, %v8656_v42 }
 0xaa4   : > { %9017 = vmatmul.bf16.gmra.mxu0 %v8905_v63  ;;  %v8752_v15 = vunpack.c.l.bf16 %v8715_v62  ;;  %v16072_v63 = vld [vmem:[%s16423_s24] ss:$0 sm:$0xff] }
 0xaa6   : > { %v8785_v10 = vadd.f32 %v16009_v61, %v8752_v15 }
 0xaa8   : > { %v8881_v41 = vmax.f32 %v8785_v10, 0.0  ;;  %v16064_v9 = vpop.f32.mrf.mxu0 }
 0xaa9   : > { %v8658_v28 = vpop.f32.mrf.mxu3 }
 0xaaa   : > { %v8716_v1 = vpack.c.bf16 %v8658_v28, %v8658_v28 }
 0xaac   : > { %v8753_v0 = vunpack.c.l.bf16 %v8716_v1 }
 0xaae   : > { %v8786_v38 = vadd.f32 %v16009_v61, %v8753_v0 }
 0xab0   : > { %v8882_v58 = vmax.f32 %v8786_v38, 0.0 }
 0xab1   : > { %v8661_v7 = vpop.f32.mrf.mxu3 }
 0xab2   : > { %v8906_v23 = vpack.c.bf16 %v8882_v58, %v8881_v41  ;;  %v8717_v4 = vpack.c.bf16 %v8661_v7, %v8661_v7 }
 0xab4   : > { %9022 = vmatmul.bf16.gmra.mxu0 %v8906_v23  ;;  %v8754_v60 = vunpack.c.l.bf16 %v8717_v4 }
 0xab6   : > { %v8787_v26 = vadd.f32 %v16009_v61, %v8754_v60 }
 0xab8   : > { %v8883_v53 = vmax.f32 %v8787_v26, 0.0 }
 0xab9   : > { %v8663_v25 = vpop.f32.mrf.mxu3 }
 0xaba   : > { %v8718_v49 = vpack.c.bf16 %v8663_v25, %v8663_v25 }
 0xabc   : > { %v8755_v37 = vunpack.c.l.bf16 %v8718_v49  ;;  %v16086_v49 = vpop.f32.mrf.mxu1 }
 0xabe   : > { %v8788_v57 = vadd.f32 %v16009_v61, %v8755_v37 }
 0xac0   : > { %v8884_v42 = vmax.f32 %v8788_v57, 0.0 }
 0xac1   : > { %v8666_v62 = vpop.f32.mrf.mxu3  ;;  %v8988_v15 = vpop.f32.mrf.mxu0 }
 0xac2   : > { %v8989_v28 = vadd.f32 %v8988_v15, %v15836_v3  ;;  %v8907_v1 = vpack.c.bf16 %v8884_v42, %v8883_v53  ;;  %v8719_v10 = vpack.c.bf16 %v8666_v62, %v8666_v62 }
 0xac4   : > { %v9072_v0 = vadd.f32 %v16072_v63, %v8989_v28  ;;  %9027 = vmatmul.bf16.gmra.mxu0 %v8907_v1  ;;  %v8756_v38 = vunpack.c.l.bf16 %v8719_v10 }
 0xac6   : > { %9105 = vst.msk [vmem:[%s16076_s29] sm:$0xff] %vm9104_vm0, %v9072_v0  ;;  %v8789_v3 = vadd.f32 %v16009_v61, %v8756_v38  ;;  %v16092_v0 = vpop.f32.mrf.mxu1 }
 0xac8   : > { %v8885_v26 = vmax.f32 %v8789_v3, 0.0 }
 0xac9   : > { %v8668_v41 = vpop.f32.mrf.mxu3  ;;  %v8990_v58 = vpop.f32.mrf.mxu0 }
 0xaca   : > { %v8720_v7 = vpack.c.bf16 %v8668_v41, %v8668_v41  ;;  %v8991_v23 = vadd.f32 %v8990_v58, %v15846_v45 }
 0xacc   : > { %v8757_v4 = vunpack.c.l.bf16 %v8720_v7  ;;  %v9073_v60 = vadd.f32 %v16072_v63, %v8991_v23 }
 0xace   : > { %v8790_v25 = vadd.f32 %v16009_v61, %v8757_v4  ;;  %9106 = vst.msk [vmem:[%s16076_s29 + $0x8] sm:$0xff] %vm9104_vm0, %v9073_v60 }
 0xad0   : > { %v8886_v37 = vmax.f32 %v8790_v25, 0.0 }
 0xad1   : > { %v8671_v57 = vpop.f32.mrf.mxu3  ;;  %v8993_v53 = vpop.f32.mrf.mxu0 }
 0xad2   : > { %v8994_v42 = vadd.f32 %v8993_v53, %v15854_v46  ;;  %v8908_v45 = vpack.c.bf16 %v8886_v37, %v8885_v26  ;;  %v8721_v62 = vpack.c.bf16 %v8671_v57, %v8671_v57  ;;  %v16101_v57 = vpop.f32.mrf.mxu1 }
 0xad4   : > { %v9074_v15 = vadd.f32 %v16072_v63, %v8994_v42  ;;  %9032 = vmatmul.bf16.gmra.mxu0 %v8908_v45  ;;  %v8758_v28 = vunpack.c.l.bf16 %v8721_v62 }
 0xad6   : > { %9107 = vst.msk [vmem:[%s16076_s29 + $0x10] sm:$0xff] %vm9104_vm0, %v9074_v15  ;;  %v8791_v58 = vadd.f32 %v16009_v61, %v8758_v28 }
 0xad8   : > { %v8887_v3 = vmax.f32 %v8791_v58, 0.0 }
 0xad9   : > { %v8673_v1 = vpop.f32.mrf.mxu3  ;;  %v8995_v10 = vpop.f32.mrf.mxu0 }
 0xada   : > { %v8722_v38 = vpack.c.bf16 %v8673_v1, %v8673_v1  ;;  %v8996_v41 = vadd.f32 %v8995_v10, %v15861_v32 }
 0xadc   : > { %v8759_v46 = vunpack.c.l.bf16 %v8722_v38  ;;  %v9075_v7 = vadd.f32 %v16072_v63, %v8996_v41  ;;  %v16109_v38 = vpop.f32.mrf.mxu1 }
 0xade   : > { %v8792_v23 = vadd.f32 %v16009_v61, %v8759_v46  ;;  %9108 = vst.msk [vmem:[%s16076_s29 + $0x18] sm:$0xff] %vm9104_vm0, %v9075_v7 }
 0xae0   : > { %v8888_v4 = vmax.f32 %v8792_v23, 0.0 }
 0xae1   : > { %v8676_v60 = vpop.f32.mrf.mxu3  ;;  %v8998_v25 = vpop.f32.mrf.mxu0 }
 0xae2   : > { %v8999_v26 = vadd.f32 %v8998_v25, %v15872_v16  ;;  %v8909_v37 = vpack.c.bf16 %v8888_v4, %v8887_v3  ;;  %v8723_v32 = vpack.c.bf16 %v8676_v60, %v8676_v60 }
 0xae4   : > { %v9076_v53 = vadd.f32 %v16072_v63, %v8999_v26  ;;  %9037 = vmatmul.bf16.gmra.mxu0 %v8909_v37  ;;  %v8760_v42 = vunpack.c.l.bf16 %v8723_v32  ;;  %v16118_v25 = vpop.f32.mrf.mxu1 }
 0xae6   : > { %9109 = vst.msk [vmem:[%s16076_s29 + $0x20] sm:$0xff] %vm9104_vm0, %v9076_v53  ;;  %v8793_v1 = vadd.f32 %v16009_v61, %v8760_v42 }
 0xae8   : > { %v8889_v58 = vmax.f32 %v8793_v1, 0.0 }
 0xae9   : > { %v8678_v45 = vpop.f32.mrf.mxu3  ;;  %v9000_v62 = vpop.f32.mrf.mxu0 }
 0xaea   : > { %v8724_v15 = vpack.c.bf16 %v8678_v45, %v8678_v45  ;;  %v9001_v28 = vadd.f32 %v9000_v62, %v15882_v21  ;;  %v16542_v45 = vld [vmem:[#allocation27_spill] sm:$0xff] }
 0xaeb   : > { %v7819_v62 = vadd.f32 %v15961_v20, %v16542_v45  ;;  %v16543_v20 = vld [vmem:[#allocation28_spill] sm:$0xff] }
 0xaec   : > { %v8761_v16 = vunpack.c.l.bf16 %v8724_v15  ;;  %v9077_v10 = vadd.f32 %v16072_v63, %v9001_v28 }
 0xaee   : > { %v8794_v41 = vadd.f32 %v16009_v61, %v8761_v16  ;;  %9110 = vst.msk [vmem:[%s16076_s29 + $0x28] sm:$0xff] %vm9104_vm0, %v9077_v10  ;;  %v7908_v16 = vadd.f32 %v16086_v49, %v7819_v62 }
 0xaf0   : > { %v8890_v46 = vmax.f32 %v8794_v41, 0.0 }
 0xaf1   : > { %v8681_v7 = vpop.f32.mrf.mxu3  ;;  %v9003_v23 = vpop.f32.mrf.mxu0 }
 0xaf2   : > { %v9004_v3 = vadd.f32 %v9003_v23, %v15890_v2  ;;  %v8910_v4 = vpack.c.bf16 %v8890_v46, %v8889_v58  ;;  %v8725_v21 = vpack.c.bf16 %v8681_v7, %v8681_v7 }
 0xaf4   : > { %v9078_v60 = vadd.f32 %v16072_v63, %v9004_v3  ;;  %9042 = vmatmul.bf16.gmra.mxu0 %v8910_v4  ;;  %v8762_v26 = vunpack.c.l.bf16 %v8725_v21  ;;  %v7821_v3 = vadd.f32 %v15966_v44, %v16543_v20 }
 0xaf6   : > { %9111 = vst.msk [vmem:[%s16076_s29 + $0x30] sm:$0xff] %vm9104_vm0, %v9078_v60  ;;  %v8795_v2 = vadd.f32 %v16009_v61, %v8762_v26  ;;  %v7910_v60 = vadd.f32 %v16092_v0, %v7821_v3 }
 0xaf8   : > { %v8891_v10 = vmax.f32 %v8795_v2, 0.0 }
 0xaf9   : > { %v8683_v37 = vpop.f32.mrf.mxu3  ;;  %v9005_v32 = vpop.f32.mrf.mxu0 }
 0xafa   : > { %v8726_v53 = vpack.c.bf16 %v8683_v37, %v8683_v37  ;;  %v9006_v42 = vadd.f32 %v9005_v32, %v15897_v59  ;;  %v7919_v59 = vpop.f32.mrf.mxu1 }
 0xafc   : > { %v8763_v15 = vunpack.c.l.bf16 %v8726_v53  ;;  %v9079_v28 = vadd.f32 %v16072_v63, %v9006_v42  ;;  %v16544_v42 = vld [vmem:[#allocation12_spill] sm:$0xff] }
 0xafd   : > { %v7824_v45 = vadd.f32 %v15969_v34, %v16544_v42  ;;  %v16545_v34 = vld [vmem:[#allocation13_spill] sm:$0xff] }
 0xafe   : > { %v8796_v1 = vadd.f32 %v16009_v61, %v8763_v15  ;;  %9112 = vst.msk [vmem:[%s16076_s29 + $0x38] sm:$0xff] %vm9104_vm0, %v9079_v28 }
 0xaff   : > { %v7913_v0 = vadd.f32 %v16101_v57, %v7824_v45 }
 0xb00   : > { %v8892_v41 = vmax.f32 %v8796_v1, 0.0 }
 0xb01   : > { %v8686_v58 = vpop.f32.mrf.mxu3  ;;  %v9008_v46 = vpop.f32.mrf.mxu0 }
 0xb02   : > { %v9009_v7 = vadd.f32 %v9008_v46, %v7908_v16  ;;  %v8911_v23 = vpack.c.bf16 %v8892_v41, %v8891_v10  ;;  %v8727_v4 = vpack.c.bf16 %v8686_v58, %v8686_v58  ;;  %v7922_v62 = vpop.f32.mrf.mxu1 }
 0xb04   : > { %v9080_v21 = vadd.f32 %v16072_v63, %v9009_v7  ;;  %9047 = vmatmul.bf16.gmra.mxu0 %v8911_v23  ;;  %v8764_v49 = vunpack.c.l.bf16 %v8727_v4  ;;  %v7826_v7 = vadd.f32 %v15976_v51, %v16545_v34 }
 0xb06   : > { %9113 = vst.msk [vmem:[%s16076_s29 + $0x40] sm:$0xff] %vm9104_vm0, %v9080_v21  ;;  %v8797_v44 = vadd.f32 %v16009_v61, %v8764_v49  ;;  %v7915_v4 = vadd.f32 %v16109_v38, %v7826_v7 }
 0xb08   : > { %v8893_v1 = vmax.f32 %v8797_v44, 0.0 }
 0xb09   : > { %v8688_v26 = vpop.f32.mrf.mxu3  ;;  %v9010_v37 = vpop.f32.mrf.mxu0 }
 0xb0a   : > { %v8728_v32 = vpack.c.bf16 %v8688_v26, %v8688_v26  ;;  %v9011_v53 = vadd.f32 %v9010_v37, %v7910_v60  ;;  %v7924_v3 = vpop.f32.mrf.mxu1  ;;  %v16546_v37 = vld [vmem:[#allocation14_spill] sm:$0xff] }
 0xb0c   : > { %v8765_v2 = vunpack.c.l.bf16 %v8728_v32  ;;  %v9081_v15 = vadd.f32 %v16072_v63, %v9011_v53  ;;  %v7829_v32 = vadd.f32 %v15981_v8, %v16546_v37  ;;  %v16547_v8 = vld [vmem:[#allocation15_spill] sm:$0xff] }
 0xb0e   : > { %v8798_v28 = vadd.f32 %v16009_v61, %v8765_v2  ;;  %9114 = vst.msk [vmem:[%s16076_s29 + $0x48] sm:$0xff] %vm9104_vm0, %v9081_v15  ;;  %v7918_v38 = vadd.f32 %v16118_v25, %v7829_v32 }
 0xb10   : > { %v8894_v16 = vmax.f32 %v8798_v28, 0.0 }
 0xb11   : > { %v8691_v10 = vpop.f32.mrf.mxu3  ;;  %v9013_v41 = vpop.f32.mrf.mxu0 }
 0xb12   : > { %v9014_v58 = vadd.f32 %v9013_v41, %v7913_v0  ;;  %v8912_v46 = vpack.c.bf16 %v8894_v16, %v8893_v1  ;;  %v8729_v23 = vpack.c.bf16 %v8691_v10, %v8691_v10  ;;  %v7927_v44 = vpop.f32.mrf.mxu1  ;;  %v7831_v10 = vadd.f32 %v15983_v30, %v16547_v8  ;;  %v16548_v8 = vld [vmem:[#allocation16_spill] sm:$0xff] }
 0xb14   : > { %v9082_v20 = vadd.f32 %v16072_v63, %v9014_v58  ;;  %9052 = vmatmul.bf16.gmra.mxu0 %v8912_v46  ;;  %v8766_v57 = vunpack.c.l.bf16 %v8729_v23  ;;  %v7920_v46 = vadd.f32 %v7919_v59, %v7831_v10  ;;  %v7844_v10 = vadd.f32 %v16007_v19, %v16548_v8 }
 0xb16   : > { %9115 = vst.msk [vmem:[%s16076_s29 + $0x50] sm:$0xff] %vm9104_vm0, %v9082_v20  ;;  %v8799_v51 = vadd.f32 %v16009_v61, %v8766_v57  ;;  %v7834_v57 = vadd.f32 %v15991_v56, %v15652_v6  ;;  %v7836_v6 = vadd.f32 %v15995_v5, %v15663_v48 }
 0xb18   : > { %v8895_v2 = vmax.f32 %v8799_v51, 0.0  ;;  %v7923_v59 = vadd.f32 %v7922_v62, %v7834_v57  ;;  %v7839_v62 = vadd.f32 %v15997_v47, %v15672_v39 }
 0xb19   : > { %v8693_v21 = vpop.f32.mrf.mxu3  ;;  %v9015_v60 = vpop.f32.mrf.mxu0 }
 0xb1a   : > { %v8730_v49 = vpack.c.bf16 %v8693_v21, %v8693_v21  ;;  %v9016_v26 = vadd.f32 %v9015_v60, %v7915_v4  ;;  %v7929_v4 = vpop.f32.mrf.mxu1  ;;  %v7928_v48 = vadd.f32 %v7927_v44, %v7839_v62 }
 0xb1c   : > { %v8767_v53 = vunpack.c.l.bf16 %v8730_v49  ;;  %v9083_v42 = vadd.f32 %v16072_v63, %v9016_v26 }
 0xb1e   : > { %v8800_v45 = vadd.f32 %v16009_v61, %v8767_v53  ;;  %9116 = vst.msk [vmem:[%s16076_s29 + $0x58] sm:$0xff] %vm9104_vm0, %v9083_v42 }
 0xb20   : > { %v8896_v15 = vmax.f32 %v8800_v45, 0.0 }
 0xb21   : > { %v8696_v28 = vpop.f32.mrf.mxu3  ;;  %v9018_v0 = vpop.f32.mrf.mxu0 }
 0xb22   : > { %v9019_v1 = vadd.f32 %v9018_v0, %v7918_v38  ;;  %v8913_v16 = vpack.c.bf16 %v8896_v15, %v8895_v2  ;;  %v8731_v41 = vpack.c.bf16 %v8696_v28, %v8696_v28  ;;  %v7932_v42 = vpop.f32.mrf.mxu1  ;;  %v7841_v0 = vadd.f32 %v16001_v18, %v15681_v50 }
 0xb24   : > { %v9084_v58 = vadd.f32 %v16072_v63, %v9019_v1  ;;  %9057 = vmatmul.bf16.gmra.mxu0 %v8913_v16  ;;  %v8768_v34 = vunpack.c.l.bf16 %v8731_v41  ;;  %v7930_v1 = vadd.f32 %v7929_v4, %v7841_v0  ;;  %v7933_v41 = vadd.f32 %v7932_v42, %v7844_v10 }
 0xb26   : > { %9117 = vst.msk [vmem:[%s16076_s29 + $0x60] sm:$0xff] %vm9104_vm0, %v9084_v58  ;;  %v8801_v30 = vadd.f32 %v16009_v61, %v8768_v34 }
 0xb28   : > { %v8897_v26 = vmax.f32 %v8801_v30, 0.0 }
 0xb29   : > { %v8698_v25 = vpop.f32.mrf.mxu3  ;;  %v9020_v7 = vpop.f32.mrf.mxu0 }
 0xb2a   : > { %v8732_v23 = vpack.c.bf16 %v8698_v25, %v8698_v25  ;;  %v9021_v20 = vadd.f32 %v9020_v7, %v7920_v46  ;;  %v7934_v15 = vpop.f32.mrf.mxu1  ;;  %v16549_v46 = vld [vmem:[#allocation17_spill] sm:$0xff] }
 0xb2b   : > { %v7846_v34 = vadd.f32 %v16014_v22, %v16549_v46  ;;  %v7851_v22 = vadd.f32 %v16022_v11, %v15723_v29 }
 0xb2c   : > { %v8769_v21 = vunpack.c.l.bf16 %v8732_v23  ;;  %v9085_v60 = vadd.f32 %v16072_v63, %v9021_v20  ;;  %v7849_v20 = vadd.f32 %v16018_v13, %v15714_v31 }
 0xb2d   : > { %v7935_v7 = vadd.f32 %v7934_v15, %v7846_v34  ;;  %v7869_v34 = vadd.f32 %v16054_v24, %v15795_v17  ;;  %v7874_v24 = vadd.f32 %v16062_v43, %v15815_v40 }
 0xb2e   : > { %v8802_v49 = vadd.f32 %v16009_v61, %v8769_v21  ;;  %9118 = vst.msk [vmem:[%s16076_s29 + $0x68] sm:$0xff] %vm9104_vm0, %v9085_v60  ;;  %v7925_v61 = vadd.f32 %v7924_v3, %v7836_v6 }
 0xb30   : > { %v8898_v37 = vmax.f32 %v8802_v49, 0.0 }
 0xb31   : > { %v9023_v32 = vpop.f32.mrf.mxu0 }
 0xb32   : > { %v9024_v51 = vadd.f32 %v9023_v32, %v7923_v59  ;;  %v8914_v53 = vpack.c.bf16 %v8898_v37, %v8897_v26  ;;  %v7937_v16 = vpop.f32.mrf.mxu1  ;;  %v16550_v37 = vld [vmem:[#allocation18_spill] sm:$0xff] }
 0xb33   : > { %v7938_v30 = vadd.f32 %v7937_v16, %v7849_v20  ;;  %v7854_v32 = vadd.f32 %v16028_v35, %v16550_v37  ;;  %v16554_v20 = vld [vmem:[#allocation22_spill] sm:$0xff] }
 0xb34   : > { %v9086_v56 = vadd.f32 %v16072_v63, %v9024_v51  ;;  %9062 = vmatmul.bf16.gmra.mxu0 %v8914_v53 }
 0xb36   : > { %9119 = vst.msk [vmem:[%s16076_s29 + $0x70] sm:$0xff] %vm9104_vm0, %v9086_v56  ;;  %v16551_v56 = vld [vmem:[#allocation19_spill] sm:$0xff] }
 0xb37   : > { %v7856_v42 = vadd.f32 %v16032_v52, %v16551_v56 }
 0xb39   : > { %v9025_v45 = vpop.f32.mrf.mxu0 }
 0xb3a   : > { %v9026_v38 = vadd.f32 %v9025_v45, %v7925_v61  ;;  %v7939_v18 = vpop.f32.mrf.mxu1 }
 0xb3b   : > { %v7940_v26 = vadd.f32 %v7939_v18, %v7851_v22 }
 0xb3c   : > { %v9087_v2 = vadd.f32 %v16072_v63, %v9026_v38 }
 0xb3e   : > { %9120 = vst.msk [vmem:[%s16076_s29 + $0x78] sm:$0xff] %vm9104_vm0, %v9087_v2  ;;  %v7859_v2 = vadd.f32 %v16036_v14, %v15756_v12  ;;  %v7864_v12 = vadd.f32 %v16045_v33, %v15777_v36 }
 0xb41   : > { %v9028_v5 = vpop.f32.mrf.mxu0 }
 0xb42   : > { %v9029_v28 = vadd.f32 %v9028_v5, %v7928_v48  ;;  %v7942_v57 = vpop.f32.mrf.mxu1 }
 0xb43   : > { %v7943_v53 = vadd.f32 %v7942_v57, %v7854_v32 }
 0xb44   : > { %v9088_v3 = vadd.f32 %v16072_v63, %v9029_v28  ;;  %v16552_v28 = vld [vmem:[#allocation20_spill] sm:$0xff] }
 0xb45   : > { %v7861_v0 = vadd.f32 %v16041_v55, %v16552_v28 }
 0xb46   : > { %9121 = vst.msk [vmem:[%s16076_s29 + $0x80] sm:$0xff] %vm9104_vm0, %v9088_v3 }
 0xb49   : > { %v9030_v39 = vpop.f32.mrf.mxu0 }
 0xb4a   : > { %v9031_v47 = vadd.f32 %v9030_v39, %v7930_v1  ;;  %v7944_v59 = vpop.f32.mrf.mxu1 }
 0xb4b   : > { %v7945_v45 = vadd.f32 %v7944_v59, %v7856_v42 }
 0xb4c   : > { %v9089_v44 = vadd.f32 %v16072_v63, %v9031_v47 }
 0xb4e   : > { %9122 = vst.msk [vmem:[%s16076_s29 + $0x88] sm:$0xff] %vm9104_vm0, %v9089_v44 }
 0xb51   : > { %v9033_v58 = vpop.f32.mrf.mxu0 }
 0xb52   : > { %v9034_v50 = vadd.f32 %v9033_v58, %v7933_v41  ;;  %v7947_v6 = vpop.f32.mrf.mxu1  ;;  %v16553_v41 = vld [vmem:[#allocation21_spill] sm:$0xff] }
 0xb53   : > { %v7948_v48 = vadd.f32 %v7947_v6, %v7859_v2  ;;  %v7866_v58 = vadd.f32 %v16050_v54, %v16553_v41 }
 0xb54   : > { %v9090_v25 = vadd.f32 %v16072_v63, %v9034_v50 }
 0xb56   : > { %9123 = vst.msk [vmem:[%s16076_s29 + $0x90] sm:$0xff] %vm9104_vm0, %v9090_v25 }
 0xb59   : > { %v9035_v23 = vpop.f32.mrf.mxu0 }
 0xb5a   : > { %v9036_v19 = vadd.f32 %v9035_v23, %v7935_v7  ;;  %v7949_v62 = vpop.f32.mrf.mxu1 }
 0xb5b   : > { %v7950_v16 = vadd.f32 %v7949_v62, %v7861_v0 }
 0xb5c   : > { %v9091_v4 = vadd.f32 %v16072_v63, %v9036_v19 }
 0xb5e   : > { %9124 = vst.msk [vmem:[%s16076_s29 + $0x98] sm:$0xff] %vm9104_vm0, %v9091_v4  ;;  %v7871_v4 = vadd.f32 %v16058_v27, %v16554_v20  ;;  %v16555_v27 = vld [vmem:[#allocation25_spill] sm:$0xff] }
 0xb61   : > { %v9038_v21 = vpop.f32.mrf.mxu0 }
 0xb62   : > { %v9039_v60 = vadd.f32 %v9038_v21, %v7938_v30  ;;  %v7952_v1 = vpop.f32.mrf.mxu1 }
 0xb63   : > { %v7953_v10 = vadd.f32 %v7952_v1, %v7864_v12 }
 0xb64   : > { %v9092_v49 = vadd.f32 %v16072_v63, %v9039_v60 }
 0xb66   : > { %9125 = vst.msk [vmem:[%s16076_s29 + $0xa0] sm:$0xff] %vm9104_vm0, %v9092_v49 }
 0xb69   : > { %v9040_v31 = vpop.f32.mrf.mxu0 }
 0xb6a   : > { %v9041_v13 = vadd.f32 %v9040_v31, %v7940_v26  ;;  %v7954_v8 = vpop.f32.mrf.mxu1  ;;  %v7876_v31 = vadd.f32 %v16064_v9, %v16555_v27 }
 0xb6b   : > { %v7955_v18 = vadd.f32 %v7954_v8, %v7866_v58 }
 0xb6c   : > { %v9093_v51 = vadd.f32 %v16072_v63, %v9041_v13 }
 0xb6e   : > { %9126 = vst.msk [vmem:[%s16076_s29 + $0xa8] sm:$0xff] %vm9104_vm0, %v9093_v51 }
 0xb71   : > { %v9043_v29 = vpop.f32.mrf.mxu0 }
 0xb72   : > { %v9044_v11 = vadd.f32 %v9043_v29, %v7943_v53  ;;  %v7957_v46 = vpop.f32.mrf.mxu1 }
 0xb73   : > { %v7958_v7 = vadd.f32 %v7957_v46, %v7869_v34 }
 0xb74   : > { %v9094_v61 = vadd.f32 %v16072_v63, %v9044_v11 }
 0xb76   : > { %9127 = vst.msk [vmem:[%s16076_s29 + $0xb0] sm:$0xff] %vm9104_vm0, %v9094_v61 }
 0xb79   : > { %v9045_v38 = vpop.f32.mrf.mxu0 }
 0xb7a   : > { %v9046_v35 = vadd.f32 %v9045_v38, %v7945_v45  ;;  %v7959_v19 = vpop.f32.mrf.mxu1 }
 0xb7b   : > { %v7960_v30 = vadd.f32 %v7959_v19, %v7871_v4 }
 0xb7c   : > { %v9095_v15 = vadd.f32 %v16072_v63, %v9046_v35 }
 0xb7e   : > { %9128 = vst.msk [vmem:[%s16076_s29 + $0xb8] sm:$0xff] %vm9104_vm0, %v9095_v15 }
 0xb81   : > { %v9048_v5 = vpop.f32.mrf.mxu0 }
 0xb82   : > { %v9049_v52 = vadd.f32 %v9048_v5, %v7948_v48  ;;  %v7962_v22 = vpop.f32.mrf.mxu1 }
 0xb83   : > { %v7963_v49 = vadd.f32 %v7962_v22, %v7874_v24 }
 0xb84   : > { %v9096_v3 = vadd.f32 %v16072_v63, %v9049_v52 }
 0xb86   : > { %9129 = vst.msk [vmem:[%s16076_s29 + $0xc0] sm:$0xff] %vm9104_vm0, %v9096_v3 }
 0xb89   : > { %v9050_v39 = vpop.f32.mrf.mxu0 }
 0xb8a   : > { %v9051_v47 = vadd.f32 %v9050_v39, %v7950_v16  ;;  %v7964_v37 = vpop.f32.mrf.mxu1 }
 0xb8b   : > { %v7965_v32 = vadd.f32 %v7964_v37, %v7876_v31 }
 0xb8c   : > { %v9097_v14 = vadd.f32 %v16072_v63, %v9051_v47 }
 0xb8e   : > { %9130 = vst.msk [vmem:[%s16076_s29 + $0xc8] sm:$0xff] %vm9104_vm0, %v9097_v14 }
 0xb91   : > { %v9053_v55 = vpop.f32.mrf.mxu0 }
 0xb92   : > { %v9054_v44 = vadd.f32 %v9053_v55, %v7953_v10 }
 0xb94   : > { %v9098_v50 = vadd.f32 %v16072_v63, %v9054_v44 }
 0xb96   : > { %9131 = vst.msk [vmem:[%s16076_s29 + $0xd0] sm:$0xff] %vm9104_vm0, %v9098_v50 }
 0xb99   : > { %v9055_v36 = vpop.f32.mrf.mxu0 }
 0xb9a   : > { %v9056_v33 = vadd.f32 %v9055_v36, %v7955_v18 }
 0xb9c   : > { %v9099_v25 = vadd.f32 %v16072_v63, %v9056_v33 }
 0xb9e   : > { %9132 = vst.msk [vmem:[%s16076_s29 + $0xd8] sm:$0xff] %vm9104_vm0, %v9099_v25 }
 0xba1   : > { %v9058_v23 = vpop.f32.mrf.mxu0 }
 0xba2   : > { %v9059_v54 = vadd.f32 %v9058_v23, %v7958_v7 }
 0xba4   : > { %v9100_v57 = vadd.f32 %v16072_v63, %v9059_v54 }
 0xba6   : > { %9133 = vst.msk [vmem:[%s16076_s29 + $0xe0] sm:$0xff] %vm9104_vm0, %v9100_v57 }
 0xba9   : > { %v9060_v21 = vpop.f32.mrf.mxu0 }
 0xbaa   : > { %v9061_v17 = vadd.f32 %v9060_v21, %v7960_v30 }
 0xbac   : > { %v9101_v60 = vadd.f32 %v16072_v63, %v9061_v17 }
 0xbae   : > { %9134 = vst.msk [vmem:[%s16076_s29 + $0xe8] sm:$0xff] %vm9104_vm0, %v9101_v60 }
 0xbb1   : > { %v9063_v59 = vpop.f32.mrf.mxu0 }
 0xbb2   : > { %v9064_v26 = vadd.f32 %v9063_v59, %v7963_v49 }
 0xbb4   : > { %v9102_v13 = vadd.f32 %v16072_v63, %v9064_v26 }
 0xbb6   : > { %9135 = vst.msk [vmem:[%s16076_s29 + $0xf0] sm:$0xff] %vm9104_vm0, %v9102_v13 }
 0xbb9   : > { %v9065_v51 = vpop.f32.mrf.mxu0 }
 0xbba   : > { %v9066_v53 = vadd.f32 %v9065_v51, %v7965_v32  ;;  %9143 = sbr.rel (!%p11452_p4) target bundleno = 3071 (0xbff), region = 124 }
 0xbbc   : > { %v9103_v40 = vadd.f32 %v16072_v63, %v9066_v53 }
 0xbbe   : > { %9136 = vst.msk [vmem:[%s16076_s29 + $0xf8] sm:$0xff] %vm9104_vm0, %v9103_v40 }
 0xbbf   : > { %s16567_s4 = smov (!%p9146_p8, %s9145_s4), 32 }
 0xbc0   : > { %s10734_s9 = sshll.u32 %s16567_s4, 3 }
 0xbc1   : > { %p10737_p9 = scmp.eq.s32.totalorder %s10734_s9, 0 }
 0xbc2   : > { %s16270_s7 = sshrl.u32 (!%p10737_p9), %s16567_s4, 5 }
 0xbc3   : > { %9154 = sbr.rel (%p10737_p9) target bundleno = 3071 (0xbff), region = 128  ;;  %p10738_p10 = scmp.le.s32.totalorder (!%p10737_p9), %s16270_s7, 0 }
 0xbc8   : > { %9433 = sbr.rel (%p10738_p10) target bundleno = 3054 (0xbee), region = 204  ;;  %s16558_s8 = smov (!%p10738_p10), %s16264_s2 }
 0xbc9   : > { %s16559_s27 = smov (!%p10738_p10), %s16076_s29  ;;  %s16279_s0 = smov (!%p10738_p10), 0  }
 0xbca   : > { %s16281_s3 = smov (!%p10738_p10), 0  }
 0xbcd LB: >> { %v9279_v43 = vld [vmem:[%s11271_s27] sm:$0xff]  ;;  %v9281_v9 = vld [vmem:[%s11271_s27 + $0x8] sm:$0xff]  ;;  %v9283_v63 = vld [vmem:[%s11271_s27 + $0x10] sm:$0xff]  ;;  %s9343_s25 = sadd.s32 1, %s11275_s0  ;;  %s9273_s3 = sadd.s32 1, %s11279_s3   ;;  %s11279_s3 = sphi %s16281_s3, %s9273_s3   ;;  %s11275_s0 = sphi %s16279_s0, %s16562_s0   ;;  %s11271_s27 = sphi %s16559_s27, %s16561_s27   ;;  %s11267_s8 = sphi %s16558_s8, %s16560_s8  }
 0xbce   : >> { %9280 = vst [vmem:[%s11267_s8] sm:$0xff] %v9279_v43  ;;  %v9285_v6 = vld [vmem:[%s11271_s27 + $0x18] sm:$0xff]  ;;  %p9344_p11 = scmp.ge.s32.totalorder %s9343_s25, %s16270_s7  ;;  %v9287_v29 = vld [vmem:[%s11271_s27 + $0x20] sm:$0xff]  ;;  %v9289_v11 = vld [vmem:[%s11271_s27 + $0x28] sm:$0xff]  ;;  %p9272_p12 = scmp.ge.s32.totalorder %s9273_s3, %s16270_s7 }
 0xbcf   : >> { %9282 = vst [vmem:[%s11267_s8 + $0x8] sm:$0xff] %v9281_v9  ;;  %v9291_v56 = vld [vmem:[%s11271_s27 + $0x30] sm:$0xff]  ;;  %v9293_v42 = vld [vmem:[%s11271_s27 + $0x38] sm:$0xff]  ;;  %v9295_v61 = vld [vmem:[%s11271_s27 + $0x40] sm:$0xff] }
 0xbd0   : >> { %9284 = vst [vmem:[%s11267_s8 + $0x10] sm:$0xff] %v9283_v63  ;;  %s16569_s25 = smov (%p9344_p11, %s9343_s25), 0  ;;  %v9297_v45 = vld [vmem:[%s11271_s27 + $0x48] sm:$0xff]  ;;  %v9299_v38 = vld [vmem:[%s11271_s27 + $0x50] sm:$0xff]  ;;  %v9301_v35 = vld [vmem:[%s11271_s27 + $0x58] sm:$0xff] }
 0xbd1   : >> { %9286 = vst [vmem:[%s11267_s8 + $0x18] sm:$0xff] %v9285_v6  ;;  %s10739_s30 = sshll.u32 %s16569_s25, 8  ;;  %v9303_v62 = vld [vmem:[%s11271_s27 + $0x60] sm:$0xff]  ;;  %v9305_v2 = vld [vmem:[%s11271_s27 + $0x68] sm:$0xff]  ;;  %v9307_v15 = vld [vmem:[%s11271_s27 + $0x70] sm:$0xff]  ;;  %s16562_s0 = smov %s16569_s25 }
 0xbd2   : >> { %9288 = vst [vmem:[%s11267_s8 + $0x20] sm:$0xff] %v9287_v29  ;;  %s16313_s6 = scalar_lea.vmem %s16076_s29, %s10739_s30 [#allocation2]   ;;  %s16316_s1 = scalar_lea.vmem %s16264_s2, %s10739_s30   ;;  %v9309_v48 = vld [vmem:[%s11271_s27 + $0x78] sm:$0xff]  ;;  %v9311_v5 = vld [vmem:[%s11271_s27 + $0x80] sm:$0xff]  ;;  %v9313_v52 = vld [vmem:[%s11271_s27 + $0x88] sm:$0xff] }
 0xbd3   : >> { %9290 = vst [vmem:[%s11267_s8 + $0x28] sm:$0xff] %v9289_v11  ;;  %v9315_v28 = vld [vmem:[%s11271_s27 + $0x90] sm:$0xff]  ;;  %v9317_v0 = vld [vmem:[%s11271_s27 + $0x98] sm:$0xff]  ;;  %v9319_v3 = vld [vmem:[%s11271_s27 + $0xa0] sm:$0xff] }
 0xbd4   : >> { %9292 = vst [vmem:[%s11267_s8 + $0x30] sm:$0xff] %v9291_v56  ;;  %v9321_v1 = vld [vmem:[%s11271_s27 + $0xa8] sm:$0xff]  ;;  %v9323_v16 = vld [vmem:[%s11271_s27 + $0xb0] sm:$0xff]  ;;  %v9325_v39 = vld [vmem:[%s11271_s27 + $0xb8] sm:$0xff] }
 0xbd5   : >> { %9294 = vst [vmem:[%s11267_s8 + $0x38] sm:$0xff] %v9293_v42  ;;  %v9327_v47 = vld [vmem:[%s11271_s27 + $0xc0] sm:$0xff]  ;;  %v9329_v12 = vld [vmem:[%s11271_s27 + $0xc8] sm:$0xff]  ;;  %v9331_v14 = vld [vmem:[%s11271_s27 + $0xd0] sm:$0xff] }
 0xbd6   : >> { %9296 = vst [vmem:[%s11267_s8 + $0x40] sm:$0xff] %v9295_v61  ;;  %v9333_v8 = vld [vmem:[%s11271_s27 + $0xd8] sm:$0xff]  ;;  %v9335_v10 = vld [vmem:[%s11271_s27 + $0xe0] sm:$0xff]  ;;  %v9337_v55 = vld [vmem:[%s11271_s27 + $0xe8] sm:$0xff] }
 0xbd7   : >> { %9298 = vst [vmem:[%s11267_s8 + $0x48] sm:$0xff] %v9297_v45  ;;  %v9339_v44 = vld [vmem:[%s11271_s27 + $0xf0] sm:$0xff]  ;;  %v9341_v41 = vld [vmem:[%s11271_s27 + $0xf8] sm:$0xff]  ;;  %s16561_s27 = smov %s16313_s6 }
 0xbd8   : >> { %9300 = vst [vmem:[%s11267_s8 + $0x50] sm:$0xff] %v9299_v38 }
 0xbd9   : >> { %9302 = vst [vmem:[%s11267_s8 + $0x58] sm:$0xff] %v9301_v35 }
 0xbda   : >> { %9304 = vst [vmem:[%s11267_s8 + $0x60] sm:$0xff] %v9303_v62 }
 0xbdb   : >> { %9306 = vst [vmem:[%s11267_s8 + $0x68] sm:$0xff] %v9305_v2 }
 0xbdc   : >> { %9308 = vst [vmem:[%s11267_s8 + $0x70] sm:$0xff] %v9307_v15 }
 0xbdd   : >> { %9310 = vst [vmem:[%s11267_s8 + $0x78] sm:$0xff] %v9309_v48 }
 0xbde   : >> { %9312 = vst [vmem:[%s11267_s8 + $0x80] sm:$0xff] %v9311_v5 }
 0xbdf   : >> { %9314 = vst [vmem:[%s11267_s8 + $0x88] sm:$0xff] %v9313_v52 }
 0xbe0   : >> { %9316 = vst [vmem:[%s11267_s8 + $0x90] sm:$0xff] %v9315_v28 }
 0xbe1   : >> { %9318 = vst [vmem:[%s11267_s8 + $0x98] sm:$0xff] %v9317_v0 }
 0xbe2   : >> { %9320 = vst [vmem:[%s11267_s8 + $0xa0] sm:$0xff] %v9319_v3 }
 0xbe3   : >> { %9322 = vst [vmem:[%s11267_s8 + $0xa8] sm:$0xff] %v9321_v1 }
 0xbe4   : >> { %9324 = vst [vmem:[%s11267_s8 + $0xb0] sm:$0xff] %v9323_v16 }
 0xbe5   : >> { %9326 = vst [vmem:[%s11267_s8 + $0xb8] sm:$0xff] %v9325_v39 }
 0xbe6   : >> { %9328 = vst [vmem:[%s11267_s8 + $0xc0] sm:$0xff] %v9327_v47 }
 0xbe7   : >> { %9330 = vst [vmem:[%s11267_s8 + $0xc8] sm:$0xff] %v9329_v12 }
 0xbe8   : >> { %9332 = vst [vmem:[%s11267_s8 + $0xd0] sm:$0xff] %v9331_v14 }
 0xbe9   : >> { %9334 = vst [vmem:[%s11267_s8 + $0xd8] sm:$0xff] %v9333_v8  ;;  %9275 = sbr.rel (!%p9272_p12) target bundleno = 3021 (0xbcd), region = 210 }
 0xbea   : >> { %9336 = vst [vmem:[%s11267_s8 + $0xe0] sm:$0xff] %v9335_v10 }
 0xbeb   : >> { %9338 = vst [vmem:[%s11267_s8 + $0xe8] sm:$0xff] %v9337_v55 }
 0xbec   : >> { %9340 = vst [vmem:[%s11267_s8 + $0xf0] sm:$0xff] %v9339_v44 }
 0xbed   : >> { %9342 = vst [vmem:[%s11267_s8 + $0xf8] sm:$0xff] %v9341_v41  ;;  %s16560_s8 = smov %s16316_s1 }
 0xbee PF: > { %s16381_s5 = sand.u32 31, %s16567_s4   ;;  %s11062_s9 = sshll.u32 %s16270_s7, 8 }
 0xbef   : > { %s9354_s30 = scalar_lea.vmem %s16076_s29, %s11062_s9 [#allocation2]   ;;  %s9356_s10 = scalar_lea.vmem %s16264_s2, %s11062_s9  }
 0xbf0   : > { %p10744_p13 = scmp.le.s32.totalorder %s16381_s5, 0 }
 0xbf1   : > { %s11281_s1 = smov (!%p10744_p13), %s9356_s10   ;;  %s11285_s6 = smov (!%p10744_p13), %s9354_s30  }
 0xbf2   : > { %9447 = sbr.rel (%p10744_p13) target bundleno = 3071 (0xbff), region = 215  ;;  %s11289_s11 = smov (!%p10744_p13), 0  }
 0xbf3   : > { %s11293_s25 = smov (!%p10744_p13), 0  }
 0xbf7 LB: >> { %v9366_v58 = vld [vmem:[%s11287_s6] sm:$0xff]  ;;  %s9368_s4 = sadd.s32 1, %s11291_s11  ;;  %s9360_s25 = sadd.s32 1, %s11295_s25   ;;  %s11295_s25 = sphi %s11293_s25, %s9360_s25   ;;  %s11291_s11 = sphi %s11289_s11, %s11290_s11   ;;  %s11287_s6 = sphi %s11285_s6, %s9373_s6   ;;  %s11283_s1 = sphi %s11281_s1, %s9374_s1  }
 0xbf8   : >> { %9367 = vst [vmem:[%s11283_s1] sm:$0xff] %v9366_v58  ;;  %p9369_p0 = scmp.ge.s32.totalorder %s9368_s4, %s16381_s5  ;;  %p9359_p1 = scmp.ge.s32.totalorder %s9360_s25, %s16381_s5 }
 0xbfa   : >> { %s16571_s4 = smov (%p9369_p0, %s9368_s4), 0  ;;  %9362 = sbr.rel (!%p9359_p1) target bundleno = 3063 (0xbf7), region = 221 }
 0xbfb   : >> { %s10745_s29 = sshll.u32 %s16571_s4, 3  ;;  %s11290_s11 = smov %s16571_s4  }
 0xbfc   : >> { %s9373_s6 = scalar_lea.vmem %s9354_s30, %s10745_s29 [#allocation2]   ;;  %s9374_s1 = scalar_lea.vmem %s9356_s10, %s10745_s29  }
 0xbff PF: > { %s16563_s6 = sld [smem:[#allocation5_spill]] }
 0xc00   : > { %s16564_s29 = sld [smem:[#allocation3_spill]] }
 0xc01   : > { %s16565_s2 = sld [smem:[#allocation6_spill]] }
 0xc05   : > { %p32_p2 = scmp.ge.s32.totalorder %s16563_s6, 6  }
 0xc07   :  { %34 = sbr.rel (!%p32_p2) target bundleno = 16 (0x10), region = 232 }

</bundles_post_ra>
